<compile_context>
chip_gen: v7x
topology: tpu7x:2x2x1
jax: 0.10.0
libtpu: 0.0.40
codegen_flags: <defaults>
</compile_context>

<pallas_src>
import numpy as np
import jax
import jax.numpy as jnp
from jax.experimental import pallas as pl
from jax.experimental.pallas import tpu as pltpu

# ---- AtomFlow hyper-parameters ------------------------------------------------
EMBED_DIM = 7
MAX_NODES = 9
NUM_BOND_CLASSES = 6
NUM_ATOM_CLASSES = 7
CONTEXT_SIZE = 8
HIDDEN_DIM = 64
BLOCK_LENGTH = 6
EDGES = MAX_NODES * (MAX_NODES + 1) // 2          # 45
SPATIAL = MAX_NODES * NUM_ATOM_CLASSES            # 63
CTX_COLS = EMBED_DIM * HIDDEN_DIM                 # 448  (w-major, channel-minor)
CTX_OUT_COLS = EMBED_DIM * CONTEXT_SIZE           # 56

_VMEM = pl.BlockSpec(memory_space=pltpu.MemorySpace.VMEM)


def _gelu_tanh(x):
    # tanh-form GELU: tanh runs on the EUP slot instead of a long VALU polynomial.
    c = 0.7978845608028654
    return 0.5 * x * (1.0 + jnp.tanh(c * (x + 0.044715 * x * x * x)))


# ---------------------------------------------------------------------------
# Kernel 1: ContextNet
#   Conv2d(1->64,(3,7),p=(1,3)) -> BN -> ReLU -> Conv2d(64->8,(3,7),p=(1,3)) -> BN -> ReLU
#   Layout: (B, 45 edges, (w, channel)) with channel minor; height taps via tiny
#   B-independent (45,45) shift selectors.
# ---------------------------------------------------------------------------
def _context_kernel(emb_ref, selh_ref, wm1_ref, b1_ref, g1_ref, be1_ref,
                    pool1_ref, bcast1_ref, wm2_ref, b2_ref, g2_ref, be2_ref,
                    pool2_ref, bcast2_ref, out_ref):
    B = emb_ref.shape[0]
    x = emb_ref[...]                                            # (B, 45, 7)

    def hshift(v, d):
        sel = jnp.broadcast_to(selh_ref[d], (B, EDGES, EDGES))
        return jnp.einsum('bpq,bqc->bpc', sel, v,
                          preferred_element_type=jnp.float32)

    def conv(v, w_ref, b_ref):
        acc = None
        for d in range(3):
            wd = jnp.broadcast_to(w_ref[d], (B,) + tuple(w_ref.shape[1:]))
            term = jnp.einsum('bpk,bkn->bpn', hshift(v, d), wd,
                              preferred_element_type=jnp.float32)
            acc = term if acc is None else acc + term
        return acc + b_ref[...]

    def bn_relu(h, pool_ref, bcast_ref, g_ref, be_ref):
        # training-mode BatchNorm2d; columns are (w, channel) pairs, channel minor.
        cm = jnp.mean(jnp.mean(h, axis=0), axis=0, keepdims=True)          # (1, W*C)
        cs = jnp.mean(jnp.mean(h * h, axis=0), axis=0, keepdims=True)
        mean_c = jnp.dot(cm, pool_ref[...], preferred_element_type=jnp.float32)
        var_c = jnp.dot(cs, pool_ref[...],
                        preferred_element_type=jnp.float32) - mean_c * mean_c
        scale = g_ref[...] * jax.lax.rsqrt(var_c + 1e-5)
        shift = be_ref[...] - mean_c * scale
        scale_t = jnp.dot(scale, bcast_ref[...], preferred_element_type=jnp.float32)
        shift_t = jnp.dot(shift, bcast_ref[...], preferred_element_type=jnp.float32)
        return jnp.maximum(h * scale_t + shift_t, 0.0)

    h1 = conv(x, wm1_ref, b1_ref)                               # (B, 45, 448)
    h1 = bn_relu(h1, pool1_ref, bcast1_ref, g1_ref, be1_ref)
    h2 = conv(h1, wm2_ref, b2_ref)                              # (B, 45, 56)
    out_ref[...] = bn_relu(h2, pool2_ref, bcast2_ref, g2_ref, be2_ref)


def context_net(emb, cp, consts):
    B = emb.shape[0]
    return pl.pallas_call(
        _context_kernel,
        out_shape=jax.ShapeDtypeStruct((B, EDGES, CTX_OUT_COLS), jnp.float32),
        in_specs=[_VMEM] * 14,
        out_specs=_VMEM,
    )(emb, consts["sel_h"], cp["wm1"], cp["b1"], cp["g1"], cp["be1"],
      consts["pool1"], consts["bcast1"], cp["wm2"], cp["b2"], cp["g2"], cp["be2"],
      consts["pool2"], consts["bcast2"])


# ---------------------------------------------------------------------------
# Kernel 2: all 6 coupling blocks, grid=(6,).
#   Per grid step: context-embedding MLP (fused), 3x3 conv (im2col via (63,63)
#   shift selectors + one K=81 matmul), BatchNorm, GELU, two 1x1 convs, masked
#   affine coupling.  z and the per-position log-det accumulate in the output refs
#   (constant block index -> VMEM-resident across the grid).
# ---------------------------------------------------------------------------
def _flow_kernel(ctx_ref, x0_ref, mask_ref, st_ref,
                 ew1_ref, eb1_ref, ew2_ref, eb2_ref,
                 wc1_ref, bc1_ref, g_ref, be_ref,
                 wc2_ref, bc2_ref, wc3_ref, bc3_ref,
                 z_ref, ldj_ref, xin_scr, xim_scr):
    blk = pl.program_id(0)
    B = x0_ref.shape[0]

    @pl.when(blk == 0)
    def _():
        z_ref[...] = x0_ref[...]
        ldj_ref[...] = jnp.zeros_like(ldj_ref)

    # ---- ConditionalARNet.embed (per-block weights, fused into the block loop) ----
    ctx = ctx_ref[...]                                          # (B*8, 315)
    hm = jnp.maximum(jnp.dot(ctx, ew1_ref[0],
                             preferred_element_type=jnp.float32) + eb1_ref[0], 0.0)
    cemb = jnp.maximum(jnp.dot(hm, ew2_ref[0],
                               preferred_element_type=jnp.float32) + eb2_ref[0], 0.0)

    # ---- assemble 9-channel AR-net input: channels on sublanes, spatial lane-dense ----
    z = z_ref[...]                                              # (B, 1, 63)
    m = mask_ref[0]                                             # (1, 63)
    xin_scr[:, 0:1, :] = z * m                                  # masked coupling channel
    for b in range(B):
        xin_scr[b, 1:, :] = cemb[CONTEXT_SIZE * b:CONTEXT_SIZE * (b + 1), :]
    x_in = xin_scr[...]                                         # (B, 9, 63)

    # ---- Conv2d(9->64, 3, padding=1): shifts via (63,63) selectors (padding folded
    #      in), taps fused into ONE K=81 matmul ----
    for k in range(9):
        st = jnp.broadcast_to(st_ref[k], (B, SPATIAL, SPATIAL))
        xim_scr[:, 9 * k:9 * (k + 1), :] = jnp.einsum(
            'bcq,bqp->bcp', x_in, st, preferred_element_type=jnp.float32)
    xim = xim_scr[...]                                          # (B, 81, 63)

    w1 = jnp.broadcast_to(wc1_ref[0], (B, HIDDEN_DIM, 81))
    h1 = jnp.einsum('bok,bkp->bop', w1, xim,
                    preferred_element_type=jnp.float32) + bc1_ref[0]   # (B, 64, 63)

    # training-mode BatchNorm2d (per channel over batch x spatial) + GELU
    mean = jnp.mean(jnp.mean(h1, axis=2, keepdims=True), axis=0, keepdims=True)
    d = h1 - mean
    var = jnp.mean(jnp.mean(d * d, axis=2, keepdims=True), axis=0, keepdims=True)
    h1 = d * jax.lax.rsqrt(var + 1e-5) * g_ref[0] + be_ref[0]
    h1 = _gelu_tanh(h1)

    # 1x1 convs
    w2 = jnp.broadcast_to(wc2_ref[0], (B, HIDDEN_DIM, HIDDEN_DIM))
    h2 = jnp.maximum(jnp.einsum('bij,bjp->bip', w2, h1,
                                preferred_element_type=jnp.float32) + bc2_ref[0], 0.0)
    w3 = jnp.broadcast_to(wc3_ref[0], (B, 2, HIDDEN_DIM))
    h3 = jnp.maximum(jnp.einsum('bij,bjp->bip', w3, h2,
                                preferred_element_type=jnp.float32) + bc3_ref[0], 0.0)
    t = h3[:, 0:1, :]                                           # (B, 1, 63) shift
    s = h3[:, 1:2, :]                                           # (B, 1, 63) log-scale

    # masked affine coupling + per-position log-det accumulation (lane-dense)
    # TODO(synk): ConditionalAdjacencyBlockFlow / create_mask sources not provided;
    # checkerboard mask + unclamped affine coupling assumed (same as previous version).
    inv = 1.0 - m
    z_ref[...] = m * z + inv * (z * jnp.exp(s) + t)
    ldj_ref[...] = ldj_ref[...] + inv * s


def flow_blocks(ctx_flat, x0, fp, consts):
    B = x0.shape[0]
    R8 = B * CONTEXT_SIZE

    def per_block(shape):
        return pl.BlockSpec((1,) + shape, lambda i: (i,) + (0,) * len(shape))

    def invariant(shape):
        return pl.BlockSpec(shape, lambda i: (0,) * len(shape))

    grid_spec = pltpu.PrefetchScalarGridSpec(
        num_scalar_prefetch=0,
        grid=(BLOCK_LENGTH,),
        in_specs=[
            invariant((R8, EDGES * EMBED_DIM)),            # ctx_flat
            invariant((B, 1, SPATIAL)),                    # x0
            per_block((1, SPATIAL)),                       # coupling masks
            invariant((9, SPATIAL, SPATIAL)),              # 3x3 shift selectors
            per_block((EDGES * EMBED_DIM, HIDDEN_DIM)),    # e_w1
            per_block((1, HIDDEN_DIM)),                    # e_b1
            per_block((HIDDEN_DIM, SPATIAL)),              # e_w2
            per_block((1, SPATIAL)),                       # e_b2
            per_block((HIDDEN_DIM, 81)),                   # conv1 weight (packed)
            per_block((HIDDEN_DIM, 1)),                    # conv1 bias
            per_block((HIDDEN_DIM, 1)),                    # bn gamma
            per_block((HIDDEN_DIM, 1)),                    # bn beta
            per_block((HIDDEN_DIM, HIDDEN_DIM)),           # 1x1 conv2 weight
            per_block((HIDDEN_DIM, 1)),                    # 1x1 conv2 bias
            per_block((2, HIDDEN_DIM)),                    # 1x1 conv3 weight
            per_block((2, 1)),                             # 1x1 conv3 bias
        ],
        out_specs=[
            pl.BlockSpec((B, 1, SPATIAL), lambda i: (0, 0, 0)),   # z (resident)
            pl.BlockSpec((B, 1, SPATIAL), lambda i: (0, 0, 0)),   # per-position log-det
        ],
        scratch_shapes=[pltpu.VMEM((B, 9, SPATIAL), jnp.float32),
                        pltpu.VMEM((B, 81, SPATIAL), jnp.float32)],
    )
    return pl.pallas_call(
        _flow_kernel,
        out_shape=(jax.ShapeDtypeStruct((B, 1, SPATIAL), jnp.float32),
                   jax.ShapeDtypeStruct((B, 1, SPATIAL), jnp.float32)),
        grid_spec=grid_spec,
        compiler_params=pltpu.CompilerParams(dimension_semantics=("arbitrary",)),
    )(ctx_flat, x0, consts["masks"], consts["sel_3x3"],
      fp["e_w1"], fp["e_b1"], fp["e_w2"], fp["e_b2"],
      fp["c1w"], fp["c1b"], fp["g"], fp["be"],
      fp["c2w"], fp["c2b"], fp["c3w"], fp["c3b"])


# ---------------------------------------------------------------------------
# Constants (all B-independent; built once, outside jit)
# ---------------------------------------------------------------------------
def build_constants():
    # ContextNet height-shift selectors over the 45-edge axis (kernel height 3, pad 1).
    sel_h = np.zeros((3, EDGES, EDGES), np.float32)
    for d in range(3):
        for e in range(EDGES):
            q = e + d - 1
            if 0 <= q < EDGES:
                sel_h[d, e, q] = 1.0

    # Per-channel pooling / broadcast matrices for BN in the (w, channel) column layout.
    pool1 = np.kron(np.ones((EMBED_DIM, 1), np.float32) / EMBED_DIM,
                    np.eye(HIDDEN_DIM, dtype=np.float32))            # (448, 64)
    bcast1 = np.kron(np.ones((1, EMBED_DIM), np.float32),
                     np.eye(HIDDEN_DIM, dtype=np.float32))           # (64, 448)
    pool2 = np.kron(np.ones((EMBED_DIM, 1), np.float32) / EMBED_DIM,
                    np.eye(CONTEXT_SIZE, dtype=np.float32))          # (56, 8)
    bcast2 = np.kron(np.ones((1, EMBED_DIM), np.float32),
                     np.eye(CONTEXT_SIZE, dtype=np.float32))         # (8, 56)

    # 3x3 conv shift selectors (right-multiplication form, zero padding folded in)
    # over the flattened (9, 7) node grid.
    sel3 = np.zeros((9, SPATIAL, SPATIAL), np.float32)
    for kh in range(3):
        for kw in range(3):
            k = kh * 3 + kw
            for hh in range(MAX_NODES):
                for ww in range(NUM_ATOM_CLASSES):
                    h_in, w_in = hh + kh - 1, ww + kw - 1
                    if 0 <= h_in < MAX_NODES and 0 <= w_in < NUM_ATOM_CLASSES:
                        sel3[k, h_in * NUM_ATOM_CLASSES + w_in,
                             hh * NUM_ATOM_CLASSES + ww] = 1.0

    # Alternating checkerboard coupling masks, spatial lane-dense.
    ii = np.arange(MAX_NODES)[:, None]
    jj = np.arange(NUM_ATOM_CLASSES)[None, :]
    base = ((ii + jj) % 2).astype(np.float32).reshape(1, SPATIAL)
    masks = np.stack([base if b % 2 == 0 else 1.0 - base for b in range(BLOCK_LENGTH)])

    return {"sel_h": jnp.asarray(sel_h),
            "pool1": jnp.asarray(pool1), "bcast1": jnp.asarray(bcast1),
            "pool2": jnp.asarray(pool2), "bcast2": jnp.asarray(bcast2),
            "sel_3x3": jnp.asarray(sel3), "masks": jnp.asarray(masks)}


# ---------------------------------------------------------------------------
# Parameters (PyTorch-shaped init, repacked to matmul form at init time)
# ---------------------------------------------------------------------------
def _init(key, shape, scale=0.05):
    return scale * jax.random.normal(key, shape, jnp.float32)


def init_params(key):
    ks = jax.random.split(key, 20)

    # --- ContextNet ---
    emb = _init(ks[0], (NUM_BOND_CLASSES, EMBED_DIM))                 # nn.Embedding(6, 7)
    w1 = np.asarray(_init(ks[1], (HIDDEN_DIM, 1, 3, EMBED_DIM)))      # Conv2d(1, 64, (3,7))
    b1 = np.asarray(_init(ks[2], (HIDDEN_DIM,)))
    w2 = np.asarray(_init(ks[3], (CONTEXT_SIZE, HIDDEN_DIM, 3, EMBED_DIM)))  # Conv2d(64, 8, (3,7))
    b2 = np.asarray(_init(ks[4], (CONTEXT_SIZE,)))

    # Pack the (3,7) conv kernels so that, per height tap d, the (w_in) / (w_in, c_in)
    # columns map to (w_out, c_out) columns in one matmul (channel minor).
    wm1 = np.zeros((3, EMBED_DIM, CTX_COLS), np.float32)
    wm2 = np.zeros((3, CTX_COLS, CTX_OUT_COLS), np.float32)
    for d in range(3):
        for wi in range(EMBED_DIM):
            for wo in range(EMBED_DIM):
                kw = wi - wo + EMBED_DIM // 2
                if 0 <= kw < EMBED_DIM:
                    wm1[d, wi, wo * HIDDEN_DIM:(wo + 1) * HIDDEN_DIM] = w1[:, 0, d, kw]
                    wm2[d, wi * HIDDEN_DIM:(wi + 1) * HIDDEN_DIM,
                        wo * CONTEXT_SIZE:(wo + 1) * CONTEXT_SIZE] = w2[:, :, d, kw].T

    ctx = {
        "emb": emb,
        "wm1": jnp.asarray(wm1),
        "b1": jnp.asarray(np.tile(b1, EMBED_DIM))[None, :],
        "g1": jnp.ones((1, HIDDEN_DIM), jnp.float32),
        "be1": jnp.zeros((1, HIDDEN_DIM), jnp.float32),
        "wm2": jnp.asarray(wm2),
        "b2": jnp.asarray(np.tile(b2, EMBED_DIM))[None, :],
        "g2": jnp.ones((1, CONTEXT_SIZE), jnp.float32),
        "be2": jnp.zeros((1, CONTEXT_SIZE), jnp.float32),
    }

    # --- flow blocks (ConditionalARNet per block) ---
    nb = BLOCK_LENGTH
    c1w_raw = np.asarray(_init(ks[5], (nb, HIDDEN_DIM, 1 + CONTEXT_SIZE, 3, 3)))
    # pack as (blk, c_out, (kh, kw, c_in)) to match the im2col row order (tap, channel)
    c1w = jnp.asarray(c1w_raw.transpose(0, 1, 3, 4, 2).reshape(nb, HIDDEN_DIM, 81))
    flow = {
        "e_w1": _init(ks[6], (nb, EDGES * EMBED_DIM, HIDDEN_DIM)),    # Linear(315, 64)
        "e_b1": _init(ks[7], (nb, 1, HIDDEN_DIM)),
        "e_w2": _init(ks[8], (nb, HIDDEN_DIM, SPATIAL)),              # Linear(64, 63)
        "e_b2": _init(ks[9], (nb, 1, SPATIAL)),
        "c1w": c1w,                                                   # Conv2d(9, 64, 3, p=1)
        "c1b": _init(ks[10], (nb, HIDDEN_DIM, 1)),
        "g": jnp.ones((nb, HIDDEN_DIM, 1), jnp.float32),
        "be": jnp.zeros((nb, HIDDEN_DIM, 1), jnp.float32),
        "c2w": _init(ks[11], (nb, HIDDEN_DIM, HIDDEN_DIM)),           # Conv2d(64, 64, 1)
        "c2b": _init(ks[12], (nb, HIDDEN_DIM, 1)),
        "c3w": _init(ks[13], (nb, 2, HIDDEN_DIM)),                    # Conv2d(64, 2, 1)
        "c3b": _init(ks[14], (nb, 2, 1)),
    }
    return {"ctx": ctx, "flow": flow}


# ---------------------------------------------------------------------------
# Forward
# ---------------------------------------------------------------------------
def atomflow_forward(x, tokens, params, consts):
    B = x.shape[0]
    cp, fp = params["ctx"], params["flow"]

    # nn.Embedding as a plain XLA gather.
    emb = cp["emb"][tokens]                                           # (B, 45, 7)

    # K1: ContextNet, fully fused.
    ctx_img = context_net(emb, cp, consts)                            # (B, 45, 56) (w, c)

    # Flatten(start_dim=2) layout expected by the AR-net context MLP (tiny XLA glue).
    ctx_flat = ctx_img.reshape(B, EDGES, EMBED_DIM, CONTEXT_SIZE)
    ctx_flat = ctx_flat.transpose(0, 3, 1, 2).reshape(B * CONTEXT_SIZE,
                                                      EDGES * EMBED_DIM)

    # TODO(synk): AtomSurjection source not provided; treated as identity, zero log-det.
    x0 = x.reshape(B, 1, SPATIAL)

    # K2: all 6 coupling blocks (context MLP + AR conv net + coupling) in one call.
    z, ldj_pos = flow_blocks(ctx_flat, x0, fp, consts)

    z = z.reshape(B, 1, MAX_NODES, NUM_ATOM_CLASSES)
    log_prob = jnp.sum(ldj_pos, axis=(1, 2))
    return z, log_prob


if __name__ == "__main__":
    key = jax.random.PRNGKey(0)
    kp, kx, kc = jax.random.split(key, 3)
    B = 2
    params = init_params(kp)
    consts = build_constants()

    # x: continuous atom-type tensor (B, 1, max_nodes=9, num_classes=7)
    x = jax.random.normal(kx, (B, 1, MAX_NODES, NUM_ATOM_CLASSES), jnp.float32)
    # context: bond-type tokens over the 45 upper-triangular edges, values in [0, 6)
    tokens = jax.random.randint(kc, (B, EDGES), 0, NUM_BOND_CLASSES, dtype=jnp.int32)

    fwd = jax.jit(atomflow_forward)
    z, log_prob = fwd(x, tokens, params, consts)
    jax.block_until_ready((z, log_prob))

    assert z.shape == (B, 1, MAX_NODES, NUM_ATOM_CLASSES)
    assert log_prob.shape == (B,)
    print("KERNEL_OK")
</pallas_src>

<mosaic_0001>
module attributes {stable_mosaic.version = 11 : i64} {
  func.func @_context_kernel(%arg0: memref<2x45x7xf32, #tpu.memory_space<vmem>>, %arg1: memref<3x45x45xf32, #tpu.memory_space<vmem>>, %arg2: memref<3x7x448xf32, #tpu.memory_space<vmem>>, %arg3: memref<1x448xf32, #tpu.memory_space<vmem>>, %arg4: memref<1x64xf32, #tpu.memory_space<vmem>>, %arg5: memref<1x64xf32, #tpu.memory_space<vmem>>, %arg6: memref<448x64xf32, #tpu.memory_space<vmem>>, %arg7: memref<64x448xf32, #tpu.memory_space<vmem>>, %arg8: memref<3x448x56xf32, #tpu.memory_space<vmem>>, %arg9: memref<1x56xf32, #tpu.memory_space<vmem>>, %arg10: memref<1x8xf32, #tpu.memory_space<vmem>>, %arg11: memref<1x8xf32, #tpu.memory_space<vmem>>, %arg12: memref<56x8xf32, #tpu.memory_space<vmem>>, %arg13: memref<8x56xf32, #tpu.memory_space<vmem>>, %arg14: memref<2x45x56xf32, #tpu.memory_space<vmem>>) attributes {dimension_semantics = [], scalar_prefetch = 0 : i64, scratch_operands = 0 : i64, tpu.core_type = #tpu.core_type<tc>} {
    %c0 = arith.constant 0 : index
    %c0_0 = arith.constant 0 : index
    %c0_1 = arith.constant 0 : index
    %0 = vector.load %arg0[%c0, %c0_0, %c0_1] : memref<2x45x7xf32, #tpu.memory_space<vmem>>, vector<2x45x7xf32>
    %c0_2 = arith.constant 0 : index
    %c0_3 = arith.constant 0 : index
    %c0_4 = arith.constant 0 : index
    %1 = vector.load %arg2[%c0_2, %c0_3, %c0_4] : memref<3x7x448xf32, #tpu.memory_space<vmem>>, vector<1x7x448xf32>
    %2 = vector.shape_cast %1 : vector<1x7x448xf32> to vector<7x448xf32>
    %3 = vector.shape_cast %2 : vector<7x448xf32> to vector<1x7x448xf32>
    %4 = vector.broadcast %3 : vector<1x7x448xf32> to vector<2x7x448xf32>
    %c0_5 = arith.constant 0 : index
    %c0_6 = arith.constant 0 : index
    %c0_7 = arith.constant 0 : index
    %5 = vector.load %arg1[%c0_5, %c0_6, %c0_7] : memref<3x45x45xf32, #tpu.memory_space<vmem>>, vector<1x45x45xf32>
    %6 = vector.shape_cast %5 : vector<1x45x45xf32> to vector<45x45xf32>
    %7 = vector.shape_cast %6 : vector<45x45xf32> to vector<1x45x45xf32>
    %8 = vector.broadcast %7 : vector<1x45x45xf32> to vector<2x45x45xf32>
    "tpu.trace_start"() <{level = 10 : i32, message = "bpq,bqc->bpc"}> : () -> ()
    %cst = arith.constant dense<0.000000e+00> : vector<2x45x7xf32>
    %9 = tpu.matmul %8, %0, %cst {dimension_numbers = #tpu.dot_dimension_numbers<[2], [1], [1], [2], [0, 0, 0, 1, 1, 2], [0], [0]>} : vector<2x45x45xf32>, vector<2x45x7xf32>, vector<2x45x7xf32> -> vector<2x45x7xf32>
    "tpu.trace_stop"() : () -> ()
    "tpu.trace_start"() <{level = 10 : i32, message = "bpk,bkn->bpn"}> : () -> ()
    %cst_8 = arith.constant dense<0.000000e+00> : vector<2x45x448xf32>
    %10 = tpu.matmul %9, %4, %cst_8 {dimension_numbers = #tpu.dot_dimension_numbers<[2], [1], [1], [2], [0, 0, 0, 1, 1, 2], [0], [0]>} : vector<2x45x7xf32>, vector<2x7x448xf32>, vector<2x45x448xf32> -> vector<2x45x448xf32>
    "tpu.trace_stop"() : () -> ()
    %c1 = arith.constant 1 : index
    %c0_9 = arith.constant 0 : index
    %c0_10 = arith.constant 0 : index
    %11 = vector.load %arg2[%c1, %c0_9, %c0_10] : memref<3x7x448xf32, #tpu.memory_space<vmem>>, vector<1x7x448xf32>
    %12 = vector.shape_cast %11 : vector<1x7x448xf32> to vector<7x448xf32>
    %13 = vector.shape_cast %12 : vector<7x448xf32> to vector<1x7x448xf32>
    %14 = vector.broadcast %13 : vector<1x7x448xf32> to vector<2x7x448xf32>
    %c1_11 = arith.constant 1 : index
    %c0_12 = arith.constant 0 : index
    %c0_13 = arith.constant 0 : index
    %15 = vector.load %arg1[%c1_11, %c0_12, %c0_13] : memref<3x45x45xf32, #tpu.memory_space<vmem>>, vector<1x45x45xf32>
    %16 = vector.shape_cast %15 : vector<1x45x45xf32> to vector<45x45xf32>
    %17 = vector.shape_cast %16 : vector<45x45xf32> to vector<1x45x45xf32>
    %18 = vector.broadcast %17 : vector<1x45x45xf32> to vector<2x45x45xf32>
    "tpu.trace_start"() <{level = 10 : i32, message = "bpq,bqc->bpc"}> : () -> ()
    %cst_14 = arith.constant dense<0.000000e+00> : vector<2x45x7xf32>
    %19 = tpu.matmul %18, %0, %cst_14 {dimension_numbers = #tpu.dot_dimension_numbers<[2], [1], [1], [2], [0, 0, 0, 1, 1, 2], [0], [0]>} : vector<2x45x45xf32>, vector<2x45x7xf32>, vector<2x45x7xf32> -> vector<2x45x7xf32>
    "tpu.trace_stop"() : () -> ()
    "tpu.trace_start"() <{level = 10 : i32, message = "bpk,bkn->bpn"}> : () -> ()
    %cst_15 = arith.constant dense<0.000000e+00> : vector<2x45x448xf32>
    %20 = tpu.matmul %19, %14, %cst_15 {dimension_numbers = #tpu.dot_dimension_numbers<[2], [1], [1], [2], [0, 0, 0, 1, 1, 2], [0], [0]>} : vector<2x45x7xf32>, vector<2x7x448xf32>, vector<2x45x448xf32> -> vector<2x45x448xf32>
    "tpu.trace_stop"() : () -> ()
    %21 = arith.addf %10, %20 : vector<2x45x448xf32>
    %c2 = arith.constant 2 : index
    %c0_16 = arith.constant 0 : index
    %c0_17 = arith.constant 0 : index
    %22 = vector.load %arg2[%c2, %c0_16, %c0_17] : memref<3x7x448xf32, #tpu.memory_space<vmem>>, vector<1x7x448xf32>
    %23 = vector.shape_cast %22 : vector<1x7x448xf32> to vector<7x448xf32>
    %24 = vector.shape_cast %23 : vector<7x448xf32> to vector<1x7x448xf32>
    %25 = vector.broadcast %24 : vector<1x7x448xf32> to vector<2x7x448xf32>
    %c2_18 = arith.constant 2 : index
    %c0_19 = arith.constant 0 : index
    %c0_20 = arith.constant 0 : index
    %26 = vector.load %arg1[%c2_18, %c0_19, %c0_20] : memref<3x45x45xf32, #tpu.memory_space<vmem>>, vector<1x45x45xf32>
    %27 = vector.shape_cast %26 : vector<1x45x45xf32> to vector<45x45xf32>
    %28 = vector.shape_cast %27 : vector<45x45xf32> to vector<1x45x45xf32>
    %29 = vector.broadcast %28 : vector<1x45x45xf32> to vector<2x45x45xf32>
    "tpu.trace_start"() <{level = 10 : i32, message = "bpq,bqc->bpc"}> : () -> ()
    %cst_21 = arith.constant dense<0.000000e+00> : vector<2x45x7xf32>
    %30 = tpu.matmul %29, %0, %cst_21 {dimension_numbers = #tpu.dot_dimension_numbers<[2], [1], [1], [2], [0, 0, 0, 1, 1, 2], [0], [0]>} : vector<2x45x45xf32>, vector<2x45x7xf32>, vector<2x45x7xf32> -> vector<2x45x7xf32>
    "tpu.trace_stop"() : () -> ()
    "tpu.trace_start"() <{level = 10 : i32, message = "bpk,bkn->bpn"}> : () -> ()
    %cst_22 = arith.constant dense<0.000000e+00> : vector<2x45x448xf32>
    %31 = tpu.matmul %30, %25, %cst_22 {dimension_numbers = #tpu.dot_dimension_numbers<[2], [1], [1], [2], [0, 0, 0, 1, 1, 2], [0], [0]>} : vector<2x45x7xf32>, vector<2x7x448xf32>, vector<2x45x448xf32> -> vector<2x45x448xf32>
    "tpu.trace_stop"() : () -> ()
    %32 = arith.addf %21, %31 : vector<2x45x448xf32>
    %c0_23 = arith.constant 0 : index
    %c0_24 = arith.constant 0 : index
    %33 = vector.load %arg3[%c0_23, %c0_24] : memref<1x448xf32, #tpu.memory_space<vmem>>, vector<1x448xf32>
    %34 = vector.shape_cast %33 : vector<1x448xf32> to vector<1x1x448xf32>
    %35 = vector.broadcast %34 : vector<1x1x448xf32> to vector<2x45x448xf32>
    %36 = arith.addf %32, %35 : vector<2x45x448xf32>
    %cst_25 = arith.constant dense<0.000000e+00> : vector<45x448xf32>
    %37 = vector.multi_reduction <add>, %36, %cst_25 [0] : vector<2x45x448xf32> to vector<45x448xf32>
    %cst_26 = arith.constant 2.000000e+00 : f32
    %38 = vector.broadcast %cst_26 : f32 to vector<45x448xf32>
    %39 = arith.divf %37, %38 : vector<45x448xf32>
    %cst_27 = arith.constant dense<0.000000e+00> : vector<448xf32>
    %40 = vector.multi_reduction <add>, %39, %cst_27 [0] : vector<45x448xf32> to vector<448xf32>
    %41 = vector.shape_cast %40 : vector<448xf32> to vector<1x448xf32>
    %cst_28 = arith.constant 4.500000e+01 : f32
    %42 = vector.broadcast %cst_28 : f32 to vector<1x448xf32>
    %43 = arith.divf %41, %42 : vector<1x448xf32>
    %44 = arith.mulf %36, %36 : vector<2x45x448xf32>
    %cst_29 = arith.constant dense<0.000000e+00> : vector<45x448xf32>
    %45 = vector.multi_reduction <add>, %44, %cst_29 [0] : vector<2x45x448xf32> to vector<45x448xf32>
    %cst_30 = arith.constant 2.000000e+00 : f32
    %46 = vector.broadcast %cst_30 : f32 to vector<45x448xf32>
    %47 = arith.divf %45, %46 : vector<45x448xf32>
    %cst_31 = arith.constant dense<0.000000e+00> : vector<448xf32>
    %48 = vector.multi_reduction <add>, %47, %cst_31 [0] : vector<45x448xf32> to vector<448xf32>
    %49 = vector.shape_cast %48 : vector<448xf32> to vector<1x448xf32>
    %cst_32 = arith.constant 4.500000e+01 : f32
    %50 = vector.broadcast %cst_32 : f32 to vector<1x448xf32>
    %51 = arith.divf %49, %50 : vector<1x448xf32>
    %c0_33 = arith.constant 0 : index
    %c0_34 = arith.constant 0 : index
    %52 = vector.load %arg6[%c0_33, %c0_34] : memref<448x64xf32, #tpu.memory_space<vmem>>, vector<448x64xf32>
    %cst_35 = arith.constant dense<0.000000e+00> : vector<1x64xf32>
    %53 = tpu.matmul %43, %52, %cst_35 {dimension_numbers = #tpu.dot_dimension_numbers<[1], [0], [0], [1], [0, 0, 1, 1], [], []>} : vector<1x448xf32>, vector<448x64xf32>, vector<1x64xf32> -> vector<1x64xf32>
    %c0_36 = arith.constant 0 : index
    %c0_37 = arith.constant 0 : index
    %54 = vector.load %arg6[%c0_36, %c0_37] : memref<448x64xf32, #tpu.memory_space<vmem>>, vector<448x64xf32>
    %cst_38 = arith.constant dense<0.000000e+00> : vector<1x64xf32>
    %55 = tpu.matmul %51, %54, %cst_38 {dimension_numbers = #tpu.dot_dimension_numbers<[1], [0], [0], [1], [0, 0, 1, 1], [], []>} : vector<1x448xf32>, vector<448x64xf32>, vector<1x64xf32> -> vector<1x64xf32>
    %56 = arith.mulf %53, %53 : vector<1x64xf32>
    %57 = arith.subf %55, %56 : vector<1x64xf32>
    %c0_39 = arith.constant 0 : index
    %c0_40 = arith.constant 0 : index
    %58 = vector.load %arg4[%c0_39, %c0_40] : memref<1x64xf32, #tpu.memory_space<vmem>>, vector<1x64xf32>
    %cst_41 = arith.constant 9.99999974E-6 : f32
    %59 = vector.broadcast %cst_41 : f32 to vector<1x64xf32>
    %60 = arith.addf %57, %59 : vector<1x64xf32>
    %61 = math.rsqrt %60 : vector<1x64xf32>
    %62 = arith.mulf %58, %61 : vector<1x64xf32>
    %c0_42 = arith.constant 0 : index
    %c0_43 = arith.constant 0 : index
    %63 = vector.load %arg5[%c0_42, %c0_43] : memref<1x64xf32, #tpu.memory_space<vmem>>, vector<1x64xf32>
    %64 = arith.mulf %53, %62 : vector<1x64xf32>
    %65 = arith.subf %63, %64 : vector<1x64xf32>
    %c0_44 = arith.constant 0 : index
    %c0_45 = arith.constant 0 : index
    %66 = vector.load %arg7[%c0_44, %c0_45] : memref<64x448xf32, #tpu.memory_space<vmem>>, vector<64x448xf32>
    %cst_46 = arith.constant dense<0.000000e+00> : vector<1x448xf32>
    %67 = tpu.matmul %62, %66, %cst_46 {dimension_numbers = #tpu.dot_dimension_numbers<[1], [0], [0], [1], [0, 0, 1, 1], [], []>} : vector<1x64xf32>, vector<64x448xf32>, vector<1x448xf32> -> vector<1x448xf32>
    %c0_47 = arith.constant 0 : index
    %c0_48 = arith.constant 0 : index
    %68 = vector.load %arg7[%c0_47, %c0_48] : memref<64x448xf32, #tpu.memory_space<vmem>>, vector<64x448xf32>
    %cst_49 = arith.constant dense<0.000000e+00> : vector<1x448xf32>
    %69 = tpu.matmul %65, %68, %cst_49 {dimension_numbers = #tpu.dot_dimension_numbers<[1], [0], [0], [1], [0, 0, 1, 1], [], []>} : vector<1x64xf32>, vector<64x448xf32>, vector<1x448xf32> -> vector<1x448xf32>
    %70 = vector.shape_cast %67 : vector<1x448xf32> to vector<1x1x448xf32>
    %71 = vector.broadcast %70 : vector<1x1x448xf32> to vector<2x45x448xf32>
    %72 = arith.mulf %36, %71 : vector<2x45x448xf32>
    %73 = vector.shape_cast %69 : vector<1x448xf32> to vector<1x1x448xf32>
    %74 = vector.broadcast %73 : vector<1x1x448xf32> to vector<2x45x448xf32>
    %75 = arith.addf %72, %74 : vector<2x45x448xf32>
    %cst_50 = arith.constant 0.000000e+00 : f32
    %76 = vector.broadcast %cst_50 : f32 to vector<2x45x448xf32>
    %77 = arith.maximumf %75, %76 : vector<2x45x448xf32>
    %c0_51 = arith.constant 0 : index
    %c0_52 = arith.constant 0 : index
    %c0_53 = arith.constant 0 : index
    %78 = vector.load %arg8[%c0_51, %c0_52, %c0_53] : memref<3x448x56xf32, #tpu.memory_space<vmem>>, vector<1x448x56xf32>
    %79 = vector.shape_cast %78 : vector<1x448x56xf32> to vector<448x56xf32>
    %80 = vector.shape_cast %79 : vector<448x56xf32> to vector<1x448x56xf32>
    %81 = vector.broadcast %80 : vector<1x448x56xf32> to vector<2x448x56xf32>
    %c0_54 = arith.constant 0 : index
    %c0_55 = arith.constant 0 : index
    %c0_56 = arith.constant 0 : index
    %82 = vector.load %arg1[%c0_54, %c0_55, %c0_56] : memref<3x45x45xf32, #tpu.memory_space<vmem>>, vector<1x45x45xf32>
    %83 = vector.shape_cast %82 : vector<1x45x45xf32> to vector<45x45xf32>
    %84 = vector.shape_cast %83 : vector<45x45xf32> to vector<1x45x45xf32>
    %85 = vector.broadcast %84 : vector<1x45x45xf32> to vector<2x45x45xf32>
    "tpu.trace_start"() <{level = 10 : i32, message = "bpq,bqc->bpc"}> : () -> ()
    %cst_57 = arith.constant dense<0.000000e+00> : vector<2x45x448xf32>
    %86 = tpu.matmul %85, %77, %cst_57 {dimension_numbers = #tpu.dot_dimension_numbers<[2], [1], [1], [2], [0, 0, 0, 1, 1, 2], [0], [0]>} : vector<2x45x45xf32>, vector<2x45x448xf32>, vector<2x45x448xf32> -> vector<2x45x448xf32>
    "tpu.trace_stop"() : () -> ()
    "tpu.trace_start"() <{level = 10 : i32, message = "bpk,bkn->bpn"}> : () -> ()
    %cst_58 = arith.constant dense<0.000000e+00> : vector<2x45x56xf32>
    %87 = tpu.matmul %86, %81, %cst_58 {dimension_numbers = #tpu.dot_dimension_numbers<[2], [1], [1], [2], [0, 0, 0, 1, 1, 2], [0], [0]>} : vector<2x45x448xf32>, vector<2x448x56xf32>, vector<2x45x56xf32> -> vector<2x45x56xf32>
    "tpu.trace_stop"() : () -> ()
    %c1_59 = arith.constant 1 : index
    %c0_60 = arith.constant 0 : index
    %c0_61 = arith.constant 0 : index
    %88 = vector.load %arg8[%c1_59, %c0_60, %c0_61] : memref<3x448x56xf32, #tpu.memory_space<vmem>>, vector<1x448x56xf32>
    %89 = vector.shape_cast %88 : vector<1x448x56xf32> to vector<448x56xf32>
    %90 = vector.shape_cast %89 : vector<448x56xf32> to vector<1x448x56xf32>
    %91 = vector.broadcast %90 : vector<1x448x56xf32> to vector<2x448x56xf32>
    %c1_62 = arith.constant 1 : index
    %c0_63 = arith.constant 0 : index
    %c0_64 = arith.constant 0 : index
    %92 = vector.load %arg1[%c1_62, %c0_63, %c0_64] : memref<3x45x45xf32, #tpu.memory_space<vmem>>, vector<1x45x45xf32>
    %93 = vector.shape_cast %92 : vector<1x45x45xf32> to vector<45x45xf32>
    %94 = vector.shape_cast %93 : vector<45x45xf32> to vector<1x45x45xf32>
    %95 = vector.broadcast %94 : vector<1x45x45xf32> to vector<2x45x45xf32>
    "tpu.trace_start"() <{level = 10 : i32, message = "bpq,bqc->bpc"}> : () -> ()
    %cst_65 = arith.constant dense<0.000000e+00> : vector<2x45x448xf32>
    %96 = tpu.matmul %95, %77, %cst_65 {dimension_numbers = #tpu.dot_dimension_numbers<[2], [1], [1], [2], [0, 0, 0, 1, 1, 2], [0], [0]>} : vector<2x45x45xf32>, vector<2x45x448xf32>, vector<2x45x448xf32> -> vector<2x45x448xf32>
    "tpu.trace_stop"() : () -> ()
    "tpu.trace_start"() <{level = 10 : i32, message = "bpk,bkn->bpn"}> : () -> ()
    %cst_66 = arith.constant dense<0.000000e+00> : vector<2x45x56xf32>
    %97 = tpu.matmul %96, %91, %cst_66 {dimension_numbers = #tpu.dot_dimension_numbers<[2], [1], [1], [2], [0, 0, 0, 1, 1, 2], [0], [0]>} : vector<2x45x448xf32>, vector<2x448x56xf32>, vector<2x45x56xf32> -> vector<2x45x56xf32>
    "tpu.trace_stop"() : () -> ()
    %98 = arith.addf %87, %97 : vector<2x45x56xf32>
    %c2_67 = arith.constant 2 : index
    %c0_68 = arith.constant 0 : index
    %c0_69 = arith.constant 0 : index
    %99 = vector.load %arg8[%c2_67, %c0_68, %c0_69] : memref<3x448x56xf32, #tpu.memory_space<vmem>>, vector<1x448x56xf32>
    %100 = vector.shape_cast %99 : vector<1x448x56xf32> to vector<448x56xf32>
    %101 = vector.shape_cast %100 : vector<448x56xf32> to vector<1x448x56xf32>
    %102 = vector.broadcast %101 : vector<1x448x56xf32> to vector<2x448x56xf32>
    %c2_70 = arith.constant 2 : index
    %c0_71 = arith.constant 0 : index
    %c0_72 = arith.constant 0 : index
    %103 = vector.load %arg1[%c2_70, %c0_71, %c0_72] : memref<3x45x45xf32, #tpu.memory_space<vmem>>, vector<1x45x45xf32>
    %104 = vector.shape_cast %103 : vector<1x45x45xf32> to vector<45x45xf32>
    %105 = vector.shape_cast %104 : vector<45x45xf32> to vector<1x45x45xf32>
    %106 = vector.broadcast %105 : vector<1x45x45xf32> to vector<2x45x45xf32>
    "tpu.trace_start"() <{level = 10 : i32, message = "bpq,bqc->bpc"}> : () -> ()
    %cst_73 = arith.constant dense<0.000000e+00> : vector<2x45x448xf32>
    %107 = tpu.matmul %106, %77, %cst_73 {dimension_numbers = #tpu.dot_dimension_numbers<[2], [1], [1], [2], [0, 0, 0, 1, 1, 2], [0], [0]>} : vector<2x45x45xf32>, vector<2x45x448xf32>, vector<2x45x448xf32> -> vector<2x45x448xf32>
    "tpu.trace_stop"() : () -> ()
    "tpu.trace_start"() <{level = 10 : i32, message = "bpk,bkn->bpn"}> : () -> ()
    %cst_74 = arith.constant dense<0.000000e+00> : vector<2x45x56xf32>
    %108 = tpu.matmul %107, %102, %cst_74 {dimension_numbers = #tpu.dot_dimension_numbers<[2], [1], [1], [2], [0, 0, 0, 1, 1, 2], [0], [0]>} : vector<2x45x448xf32>, vector<2x448x56xf32>, vector<2x45x56xf32> -> vector<2x45x56xf32>
    "tpu.trace_stop"() : () -> ()
    %109 = arith.addf %98, %108 : vector<2x45x56xf32>
    %c0_75 = arith.constant 0 : index
    %c0_76 = arith.constant 0 : index
    %110 = vector.load %arg9[%c0_75, %c0_76] : memref<1x56xf32, #tpu.memory_space<vmem>>, vector<1x56xf32>
    %111 = vector.shape_cast %110 : vector<1x56xf32> to vector<1x1x56xf32>
    %112 = vector.broadcast %111 : vector<1x1x56xf32> to vector<2x45x56xf32>
    %113 = arith.addf %109, %112 : vector<2x45x56xf32>
    %cst_77 = arith.constant dense<0.000000e+00> : vector<45x56xf32>
    %114 = vector.multi_reduction <add>, %113, %cst_77 [0] : vector<2x45x56xf32> to vector<45x56xf32>
    %cst_78 = arith.constant 2.000000e+00 : f32
    %115 = vector.broadcast %cst_78 : f32 to vector<45x56xf32>
    %116 = arith.divf %114, %115 : vector<45x56xf32>
    %cst_79 = arith.constant dense<0.000000e+00> : vector<56xf32>
    %117 = vector.multi_reduction <add>, %116, %cst_79 [0] : vector<45x56xf32> to vector<56xf32>
    %118 = vector.shape_cast %117 : vector<56xf32> to vector<1x56xf32>
    %cst_80 = arith.constant 4.500000e+01 : f32
    %119 = vector.broadcast %cst_80 : f32 to vector<1x56xf32>
    %120 = arith.divf %118, %119 : vector<1x56xf32>
    %121 = arith.mulf %113, %113 : vector<2x45x56xf32>
    %cst_81 = arith.constant dense<0.000000e+00> : vector<45x56xf32>
    %122 = vector.multi_reduction <add>, %121, %cst_81 [0] : vector<2x45x56xf32> to vector<45x56xf32>
    %cst_82 = arith.constant 2.000000e+00 : f32
    %123 = vector.broadcast %cst_82 : f32 to vector<45x56xf32>
    %124 = arith.divf %122, %123 : vector<45x56xf32>
    %cst_83 = arith.constant dense<0.000000e+00> : vector<56xf32>
    %125 = vector.multi_reduction <add>, %124, %cst_83 [0] : vector<45x56xf32> to vector<56xf32>
    %126 = vector.shape_cast %125 : vector<56xf32> to vector<1x56xf32>
    %cst_84 = arith.constant 4.500000e+01 : f32
    %127 = vector.broadcast %cst_84 : f32 to vector<1x56xf32>
    %128 = arith.divf %126, %127 : vector<1x56xf32>
    %c0_85 = arith.constant 0 : index
    %c0_86 = arith.constant 0 : index
    %129 = vector.load %arg12[%c0_85, %c0_86] : memref<56x8xf32, #tpu.memory_space<vmem>>, vector<56x8xf32>
    %cst_87 = arith.constant dense<0.000000e+00> : vector<1x8xf32>
    %130 = tpu.matmul %120, %129, %cst_87 {dimension_numbers = #tpu.dot_dimension_numbers<[1], [0], [0], [1], [0, 0, 1, 1], [], []>} : vector<1x56xf32>, vector<56x8xf32>, vector<1x8xf32> -> vector<1x8xf32>
    %c0_88 = arith.constant 0 : index
    %c0_89 = arith.constant 0 : index
    %131 = vector.load %arg12[%c0_88, %c0_89] : memref<56x8xf32, #tpu.memory_space<vmem>>, vector<56x8xf32>
    %cst_90 = arith.constant dense<0.000000e+00> : vector<1x8xf32>
    %132 = tpu.matmul %128, %131, %cst_90 {dimension_numbers = #tpu.dot_dimension_numbers<[1], [0], [0], [1], [0, 0, 1, 1], [], []>} : vector<1x56xf32>, vector<56x8xf32>, vector<1x8xf32> -> vector<1x8xf32>
    %133 = arith.mulf %130, %130 : vector<1x8xf32>
    %134 = arith.subf %132, %133 : vector<1x8xf32>
    %c0_91 = arith.constant 0 : index
    %c0_92 = arith.constant 0 : index
    %135 = vector.load %arg10[%c0_91, %c0_92] : memref<1x8xf32, #tpu.memory_space<vmem>>, vector<1x8xf32>
    %cst_93 = arith.constant 9.99999974E-6 : f32
    %136 = vector.broadcast %cst_93 : f32 to vector<1x8xf32>
    %137 = arith.addf %134, %136 : vector<1x8xf32>
    %138 = math.rsqrt %137 : vector<1x8xf32>
    %139 = arith.mulf %135, %138 : vector<1x8xf32>
    %c0_94 = arith.constant 0 : index
    %c0_95 = arith.constant 0 : index
    %140 = vector.load %arg11[%c0_94, %c0_95] : memref<1x8xf32, #tpu.memory_space<vmem>>, vector<1x8xf32>
    %141 = arith.mulf %130, %139 : vector<1x8xf32>
    %142 = arith.subf %140, %141 : vector<1x8xf32>
    %c0_96 = arith.constant 0 : index
    %c0_97 = arith.constant 0 : index
    %143 = vector.load %arg13[%c0_96, %c0_97] : memref<8x56xf32, #tpu.memory_space<vmem>>, vector<8x56xf32>
    %cst_98 = arith.constant dense<0.000000e+00> : vector<1x56xf32>
    %144 = tpu.matmul %139, %143, %cst_98 {dimension_numbers = #tpu.dot_dimension_numbers<[1], [0], [0], [1], [0, 0, 1, 1], [], []>} : vector<1x8xf32>, vector<8x56xf32>, vector<1x56xf32> -> vector<1x56xf32>
    %c0_99 = arith.constant 0 : index
    %c0_100 = arith.constant 0 : index
    %145 = vector.load %arg13[%c0_99, %c0_100] : memref<8x56xf32, #tpu.memory_space<vmem>>, vector<8x56xf32>
    %cst_101 = arith.constant dense<0.000000e+00> : vector<1x56xf32>
    %146 = tpu.matmul %142, %145, %cst_101 {dimension_numbers = #tpu.dot_dimension_numbers<[1], [0], [0], [1], [0, 0, 1, 1], [], []>} : vector<1x8xf32>, vector<8x56xf32>, vector<1x56xf32> -> vector<1x56xf32>
    %147 = vector.shape_cast %144 : vector<1x56xf32> to vector<1x1x56xf32>
    %148 = vector.broadcast %147 : vector<1x1x56xf32> to vector<2x45x56xf32>
    %149 = arith.mulf %113, %148 : vector<2x45x56xf32>
    %150 = vector.shape_cast %146 : vector<1x56xf32> to vector<1x1x56xf32>
    %151 = vector.broadcast %150 : vector<1x1x56xf32> to vector<2x45x56xf32>
    %152 = arith.addf %149, %151 : vector<2x45x56xf32>
    %cst_102 = arith.constant 0.000000e+00 : f32
    %153 = vector.broadcast %cst_102 : f32 to vector<2x45x56xf32>
    %154 = arith.maximumf %152, %153 : vector<2x45x56xf32>
    %c0_103 = arith.constant 0 : index
    %c0_104 = arith.constant 0 : index
    %c0_105 = arith.constant 0 : index
    %155 = vector.load %arg14[%c0_103, %c0_104, %c0_105] : memref<2x45x56xf32, #tpu.memory_space<vmem>>, vector<2x45x56xf32>
    tpu.vector_store %arg14[%c0_103, %c0_104, %c0_105], %154 {strides = array<i32>} : memref<2x45x56xf32, #tpu.memory_space<vmem>>, vector<2x45x56xf32>,
    return
  }
}

module attributes {stable_mosaic.version = 11 : i64} {
  func.func @_flow_kernel(%arg0: i32, %arg1: memref<16x315xf32, #tpu.memory_space<vmem>>, %arg2: memref<2x1x63xf32, #tpu.memory_space<vmem>>, %arg3: memref<1x1x63xf32, #tpu.memory_space<vmem>>, %arg4: memref<9x63x63xf32, #tpu.memory_space<vmem>>, %arg5: memref<1x315x64xf32, #tpu.memory_space<vmem>>, %arg6: memref<1x1x64xf32, #tpu.memory_space<vmem>>, %arg7: memref<1x64x63xf32, #tpu.memory_space<vmem>>, %arg8: memref<1x1x63xf32, #tpu.memory_space<vmem>>, %arg9: memref<1x64x81xf32, #tpu.memory_space<vmem>>, %arg10: memref<1x64x1xf32, #tpu.memory_space<vmem>>, %arg11: memref<1x64x1xf32, #tpu.memory_space<vmem>>, %arg12: memref<1x64x1xf32, #tpu.memory_space<vmem>>, %arg13: memref<1x64x64xf32, #tpu.memory_space<vmem>>, %arg14: memref<1x64x1xf32, #tpu.memory_space<vmem>>, %arg15: memref<1x2x64xf32, #tpu.memory_space<vmem>>, %arg16: memref<1x2x1xf32, #tpu.memory_space<vmem>>, %arg17: memref<2x1x63xf32, #tpu.memory_space<vmem>>, %arg18: memref<2x1x63xf32, #tpu.memory_space<vmem>>, %arg19: memref<2x9x63xf32, #tpu.memory_space<vmem>>, %arg20: memref<2x81x63xf32, #tpu.memory_space<vmem>>) attributes {dimension_semantics = [#tpu.dimension_semantics<arbitrary>], iteration_bounds = array<i64: 6>, scalar_prefetch = 0 : i64, scratch_operands = 2 : i64, tpu.core_type = #tpu.core_type<tc>, window_params = [{pipeline_mode = #tpu.pipeline_mode<synchronous>, transform_indices = @transform_0, window_bounds = array<i64: 16, 315>}, {pipeline_mode = #tpu.pipeline_mode<synchronous>, transform_indices = @transform_1, window_bounds = array<i64: 2, 1, 63>}, {transform_indices = @transform_2, window_bounds = array<i64: 1, 1, 63>}, {pipeline_mode = #tpu.pipeline_mode<synchronous>, transform_indices = @transform_3, window_bounds = array<i64: 9, 63, 63>}, {transform_indices = @transform_4, window_bounds = array<i64: 1, 315, 64>}, {transform_indices = @transform_5, window_bounds = array<i64: 1, 1, 64>}, {transform_indices = @transform_6, window_bounds = array<i64: 1, 64, 63>}, {transform_indices = @transform_7, window_bounds = array<i64: 1, 1, 63>}, {transform_indices = @transform_8, window_bounds = array<i64: 1, 64, 81>}, {transform_indices = @transform_9, window_bounds = array<i64: 1, 64, 1>}, {transform_indices = @transform_10, window_bounds = array<i64: 1, 64, 1>}, {transform_indices = @transform_11, window_bounds = array<i64: 1, 64, 1>}, {transform_indices = @transform_12, window_bounds = array<i64: 1, 64, 64>}, {transform_indices = @transform_13, window_bounds = array<i64: 1, 64, 1>}, {transform_indices = @transform_14, window_bounds = array<i64: 1, 2, 64>}, {transform_indices = @transform_15, window_bounds = array<i64: 1, 2, 1>}, {pipeline_mode = #tpu.pipeline_mode<synchronous>, transform_indices = @transform_16, window_bounds = array<i64: 2, 1, 63>}, {pipeline_mode = #tpu.pipeline_mode<synchronous>, transform_indices = @transform_17, window_bounds = array<i64: 2, 1, 63>}]} {
    %c0_i32 = arith.constant 0 : i32
    %0 = arith.cmpi eq, %arg0, %c0_i32 : i32
    %1 = arith.extui %0 : i1 to i32
    %c0_i32_0 = arith.constant 0 : i32
    %2 = arith.cmpi ne, %1, %c0_i32_0 : i32
    scf.if %2 {
      %c0_137 = arith.constant 0 : index
      %c0_138 = arith.constant 0 : index
      %c0_139 = arith.constant 0 : index
      %195 = vector.load %arg2[%c0_137, %c0_138, %c0_139] : memref<2x1x63xf32, #tpu.memory_space<vmem>>, vector<2x1x63xf32>
      %c0_140 = arith.constant 0 : index
      %c0_141 = arith.constant 0 : index
      %c0_142 = arith.constant 0 : index
      %196 = vector.load %arg17[%c0_140, %c0_141, %c0_142] : memref<2x1x63xf32, #tpu.memory_space<vmem>>, vector<2x1x63xf32>
      tpu.vector_store %arg17[%c0_140, %c0_141, %c0_142], %195 {strides = array<i32>} : memref<2x1x63xf32, #tpu.memory_space<vmem>>, vector<2x1x63xf32>,
      %cst_143 = arith.constant 0.000000e+00 : f32
      %197 = vector.broadcast %cst_143 : f32 to vector<2x1x63xf32>
      %c0_144 = arith.constant 0 : index
      %c0_145 = arith.constant 0 : index
      %c0_146 = arith.constant 0 : index
      %198 = vector.load %arg18[%c0_144, %c0_145, %c0_146] : memref<2x1x63xf32, #tpu.memory_space<vmem>>, vector<2x1x63xf32>
      tpu.vector_store %arg18[%c0_144, %c0_145, %c0_146], %197 {strides = array<i32>} : memref<2x1x63xf32, #tpu.memory_space<vmem>>, vector<2x1x63xf32>,
    } else {
    }
    %c0 = arith.constant 0 : index
    %c0_1 = arith.constant 0 : index
    %3 = vector.load %arg1[%c0, %c0_1] : memref<16x315xf32, #tpu.memory_space<vmem>>, vector<16x315xf32>
    %c0_2 = arith.constant 0 : index
    %c0_3 = arith.constant 0 : index
    %c0_4 = arith.constant 0 : index
    %4 = vector.load %arg5[%c0_2, %c0_3, %c0_4] : memref<1x315x64xf32, #tpu.memory_space<vmem>>, vector<1x315x64xf32>
    %5 = vector.shape_cast %4 : vector<1x315x64xf32> to vector<315x64xf32>
    %cst = arith.constant dense<0.000000e+00> : vector<16x64xf32>
    %6 = tpu.matmul %3, %5, %cst {dimension_numbers = #tpu.dot_dimension_numbers<[1], [0], [0], [1], [0, 0, 1, 1], [], []>} : vector<16x315xf32>, vector<315x64xf32>, vector<16x64xf32> -> vector<16x64xf32>
    %c0_5 = arith.constant 0 : index
    %c0_6 = arith.constant 0 : index
    %c0_7 = arith.constant 0 : index
    %7 = vector.load %arg6[%c0_5, %c0_6, %c0_7] : memref<1x1x64xf32, #tpu.memory_space<vmem>>, vector<1x1x64xf32>
    %8 = vector.shape_cast %7 : vector<1x1x64xf32> to vector<1x64xf32>
    %9 = vector.broadcast %8 : vector<1x64xf32> to vector<16x64xf32>
    %10 = arith.addf %6, %9 : vector<16x64xf32>
    %cst_8 = arith.constant 0.000000e+00 : f32
    %11 = vector.broadcast %cst_8 : f32 to vector<16x64xf32>
    %12 = arith.maximumf %10, %11 : vector<16x64xf32>
    %c0_9 = arith.constant 0 : index
    %c0_10 = arith.constant 0 : index
    %c0_11 = arith.constant 0 : index
    %13 = vector.load %arg7[%c0_9, %c0_10, %c0_11] : memref<1x64x63xf32, #tpu.memory_space<vmem>>, vector<1x64x63xf32>
    %14 = vector.shape_cast %13 : vector<1x64x63xf32> to vector<64x63xf32>
    %cst_12 = arith.constant dense<0.000000e+00> : vector<16x63xf32>
    %15 = tpu.matmul %12, %14, %cst_12 {dimension_numbers = #tpu.dot_dimension_numbers<[1], [0], [0], [1], [0, 0, 1, 1], [], []>} : vector<16x64xf32>, vector<64x63xf32>, vector<16x63xf32> -> vector<16x63xf32>
    %c0_13 = arith.constant 0 : index
    %c0_14 = arith.constant 0 : index
    %c0_15 = arith.constant 0 : index
    %16 = vector.load %arg8[%c0_13, %c0_14, %c0_15] : memref<1x1x63xf32, #tpu.memory_space<vmem>>, vector<1x1x63xf32>
    %17 = vector.shape_cast %16 : vector<1x1x63xf32> to vector<1x63xf32>
    %18 = vector.broadcast %17 : vector<1x63xf32> to vector<16x63xf32>
    %19 = arith.addf %15, %18 : vector<16x63xf32>
    %cst_16 = arith.constant 0.000000e+00 : f32
    %20 = vector.broadcast %cst_16 : f32 to vector<16x63xf32>
    %21 = arith.maximumf %19, %20 : vector<16x63xf32>
    %c0_17 = arith.constant 0 : index
    %c0_18 = arith.constant 0 : index
    %c0_19 = arith.constant 0 : index
    %22 = vector.load %arg17[%c0_17, %c0_18, %c0_19] : memref<2x1x63xf32, #tpu.memory_space<vmem>>, vector<2x1x63xf32>
    %c0_20 = arith.constant 0 : index
    %c0_21 = arith.constant 0 : index
    %c0_22 = arith.constant 0 : index
    %23 = vector.load %arg3[%c0_20, %c0_21, %c0_22] : memref<1x1x63xf32, #tpu.memory_space<vmem>>, vector<1x1x63xf32>
    %24 = vector.shape_cast %23 : vector<1x1x63xf32> to vector<1x63xf32>
    %25 = vector.shape_cast %24 : vector<1x63xf32> to vector<1x1x63xf32>
    %26 = vector.broadcast %25 : vector<1x1x63xf32> to vector<2x1x63xf32>
    %27 = arith.mulf %22, %26 : vector<2x1x63xf32>
    %c0_23 = arith.constant 0 : index
    %c0_24 = arith.constant 0 : index
    %c0_25 = arith.constant 0 : index
    %28 = vector.load %arg19[%c0_23, %c0_24, %c0_25] : memref<2x9x63xf32, #tpu.memory_space<vmem>>, vector<2x1x63xf32>
    tpu.vector_store %arg19[%c0_23, %c0_24, %c0_25], %27 {strides = array<i32>} : memref<2x9x63xf32, #tpu.memory_space<vmem>>, vector<2x1x63xf32>,
    %29 = vector.extract_strided_slice %21 {offsets = [0, 0], sizes = [8, 63], strides = [1, 1]} : vector<16x63xf32> to vector<8x63xf32>
    %c0_26 = arith.constant 0 : index
    %c1 = arith.constant 1 : index
    %c0_27 = arith.constant 0 : index
    %30 = vector.load %arg19[%c0_26, %c1, %c0_27] : memref<2x9x63xf32, #tpu.memory_space<vmem>>, vector<1x8x63xf32>
    %31 = vector.shape_cast %30 : vector<1x8x63xf32> to vector<8x63xf32>
    %32 = vector.shape_cast %29 : vector<8x63xf32> to vector<1x8x63xf32>
    tpu.vector_store %arg19[%c0_26, %c1, %c0_27], %32 {strides = array<i32>} : memref<2x9x63xf32, #tpu.memory_space<vmem>>, vector<1x8x63xf32>,
    %33 = vector.extract_strided_slice %21 {offsets = [8, 0], sizes = [8, 63], strides = [1, 1]} : vector<16x63xf32> to vector<8x63xf32>
    %c1_28 = arith.constant 1 : index
    %c1_29 = arith.constant 1 : index
    %c0_30 = arith.constant 0 : index
    %34 = vector.load %arg19[%c1_28, %c1_29, %c0_30] : memref<2x9x63xf32, #tpu.memory_space<vmem>>, vector<1x8x63xf32>
    %35 = vector.shape_cast %34 : vector<1x8x63xf32> to vector<8x63xf32>
    %36 = vector.shape_cast %33 : vector<8x63xf32> to vector<1x8x63xf32>
    tpu.vector_store %arg19[%c1_28, %c1_29, %c0_30], %36 {strides = array<i32>} : memref<2x9x63xf32, #tpu.memory_space<vmem>>, vector<1x8x63xf32>,
    %c0_31 = arith.constant 0 : index
    %c0_32 = arith.constant 0 : index
    %c0_33 = arith.constant 0 : index
    %37 = vector.load %arg19[%c0_31, %c0_32, %c0_33] : memref<2x9x63xf32, #tpu.memory_space<vmem>>, vector<2x9x63xf32>
    %c0_34 = arith.constant 0 : index
    %c0_35 = arith.constant 0 : index
    %c0_36 = arith.constant 0 : index
    %38 = vector.load %arg4[%c0_34, %c0_35, %c0_36] : memref<9x63x63xf32, #tpu.memory_space<vmem>>, vector<1x63x63xf32>
    %39 = vector.shape_cast %38 : vector<1x63x63xf32> to vector<63x63xf32>
    %40 = vector.shape_cast %39 : vector<63x63xf32> to vector<1x63x63xf32>
    %41 = vector.broadcast %40 : vector<1x63x63xf32> to vector<2x63x63xf32>
    "tpu.trace_start"() <{level = 10 : i32, message = "bcq,bqp->bcp"}> : () -> ()
    %cst_37 = arith.constant dense<0.000000e+00> : vector<2x9x63xf32>
    %42 = tpu.matmul %37, %41, %cst_37 {dimension_numbers = #tpu.dot_dimension_numbers<[2], [1], [1], [2], [0, 0, 0, 1, 1, 2], [0], [0]>} : vector<2x9x63xf32>, vector<2x63x63xf32>, vector<2x9x63xf32> -> vector<2x9x63xf32>
    "tpu.trace_stop"() : () -> ()
    %c0_38 = arith.constant 0 : index
    %c0_39 = arith.constant 0 : index
    %c0_40 = arith.constant 0 : index
    %43 = vector.load %arg20[%c0_38, %c0_39, %c0_40] : memref<2x81x63xf32, #tpu.memory_space<vmem>>, vector<2x9x63xf32>
    tpu.vector_store %arg20[%c0_38, %c0_39, %c0_40], %42 {strides = array<i32>} : memref<2x81x63xf32, #tpu.memory_space<vmem>>, vector<2x9x63xf32>,
    %c1_41 = arith.constant 1 : index
    %c0_42 = arith.constant 0 : index
    %c0_43 = arith.constant 0 : index
    %44 = vector.load %arg4[%c1_41, %c0_42, %c0_43] : memref<9x63x63xf32, #tpu.memory_space<vmem>>, vector<1x63x63xf32>
    %45 = vector.shape_cast %44 : vector<1x63x63xf32> to vector<63x63xf32>
    %46 = vector.shape_cast %45 : vector<63x63xf32> to vector<1x63x63xf32>
    %47 = vector.broadcast %46 : vector<1x63x63xf32> to vector<2x63x63xf32>
    "tpu.trace_start"() <{level = 10 : i32, message = "bcq,bqp->bcp"}> : () -> ()
    %cst_44 = arith.constant dense<0.000000e+00> : vector<2x9x63xf32>
    %48 = tpu.matmul %37, %47, %cst_44 {dimension_numbers = #tpu.dot_dimension_numbers<[2], [1], [1], [2], [0, 0, 0, 1, 1, 2], [0], [0]>} : vector<2x9x63xf32>, vector<2x63x63xf32>, vector<2x9x63xf32> -> vector<2x9x63xf32>
    "tpu.trace_stop"() : () -> ()
    %c0_45 = arith.constant 0 : index
    %c9 = arith.constant 9 : index
    %c0_46 = arith.constant 0 : index
    %49 = vector.load %arg20[%c0_45, %c9, %c0_46] : memref<2x81x63xf32, #tpu.memory_space<vmem>>, vector<2x9x63xf32>
    tpu.vector_store %arg20[%c0_45, %c9, %c0_46], %48 {strides = array<i32>} : memref<2x81x63xf32, #tpu.memory_space<vmem>>, vector<2x9x63xf32>,
    %c2 = arith.constant 2 : index
    %c0_47 = arith.constant 0 : index
    %c0_48 = arith.constant 0 : index
    %50 = vector.load %arg4[%c2, %c0_47, %c0_48] : memref<9x63x63xf32, #tpu.memory_space<vmem>>, vector<1x63x63xf32>
    %51 = vector.shape_cast %50 : vector<1x63x63xf32> to vector<63x63xf32>
    %52 = vector.shape_cast %51 : vector<63x63xf32> to vector<1x63x63xf32>
    %53 = vector.broadcast %52 : vector<1x63x63xf32> to vector<2x63x63xf32>
    "tpu.trace_start"() <{level = 10 : i32, message = "bcq,bqp->bcp"}> : () -> ()
    %cst_49 = arith.constant dense<0.000000e+00> : vector<2x9x63xf32>
    %54 = tpu.matmul %37, %53, %cst_49 {dimension_numbers = #tpu.dot_dimension_numbers<[2], [1], [1], [2], [0, 0, 0, 1, 1, 2], [0], [0]>} : vector<2x9x63xf32>, vector<2x63x63xf32>, vector<2x9x63xf32> -> vector<2x9x63xf32>
    "tpu.trace_stop"() : () -> ()
    %c0_50 = arith.constant 0 : index
    %c18 = arith.constant 18 : index
    %c0_51 = arith.constant 0 : index
    %55 = vector.load %arg20[%c0_50, %c18, %c0_51] : memref<2x81x63xf32, #tpu.memory_space<vmem>>, vector<2x9x63xf32>
    tpu.vector_store %arg20[%c0_50, %c18, %c0_51], %54 {strides = array<i32>} : memref<2x81x63xf32, #tpu.memory_space<vmem>>, vector<2x9x63xf32>,
    %c3 = arith.constant 3 : index
    %c0_52 = arith.constant 0 : index
    %c0_53 = arith.constant 0 : index
    %56 = vector.load %arg4[%c3, %c0_52, %c0_53] : memref<9x63x63xf32, #tpu.memory_space<vmem>>, vector<1x63x63xf32>
    %57 = vector.shape_cast %56 : vector<1x63x63xf32> to vector<63x63xf32>
    %58 = vector.shape_cast %57 : vector<63x63xf32> to vector<1x63x63xf32>
    %59 = vector.broadcast %58 : vector<1x63x63xf32> to vector<2x63x63xf32>
    "tpu.trace_start"() <{level = 10 : i32, message = "bcq,bqp->bcp"}> : () -> ()
    %cst_54 = arith.constant dense<0.000000e+00> : vector<2x9x63xf32>
    %60 = tpu.matmul %37, %59, %cst_54 {dimension_numbers = #tpu.dot_dimension_numbers<[2], [1], [1], [2], [0, 0, 0, 1, 1, 2], [0], [0]>} : vector<2x9x63xf32>, vector<2x63x63xf32>, vector<2x9x63xf32> -> vector<2x9x63xf32>
    "tpu.trace_stop"() : () -> ()
    %c0_55 = arith.constant 0 : index
    %c27 = arith.constant 27 : index
    %c0_56 = arith.constant 0 : index
    %61 = vector.load %arg20[%c0_55, %c27, %c0_56] : memref<2x81x63xf32, #tpu.memory_space<vmem>>, vector<2x9x63xf32>
    tpu.vector_store %arg20[%c0_55, %c27, %c0_56], %60 {strides = array<i32>} : memref<2x81x63xf32, #tpu.memory_space<vmem>>, vector<2x9x63xf32>,
    %c4 = arith.constant 4 : index
    %c0_57 = arith.constant 0 : index
    %c0_58 = arith.constant 0 : index
    %62 = vector.load %arg4[%c4, %c0_57, %c0_58] : memref<9x63x63xf32, #tpu.memory_space<vmem>>, vector<1x63x63xf32>
    %63 = vector.shape_cast %62 : vector<1x63x63xf32> to vector<63x63xf32>
    %64 = vector.shape_cast %63 : vector<63x63xf32> to vector<1x63x63xf32>
    %65 = vector.broadcast %64 : vector<1x63x63xf32> to vector<2x63x63xf32>
    "tpu.trace_start"() <{level = 10 : i32, message = "bcq,bqp->bcp"}> : () -> ()
    %cst_59 = arith.constant dense<0.000000e+00> : vector<2x9x63xf32>
    %66 = tpu.matmul %37, %65, %cst_59 {dimension_numbers = #tpu.dot_dimension_numbers<[2], [1], [1], [2], [0, 0, 0, 1, 1, 2], [0], [0]>} : vector<2x9x63xf32>, vector<2x63x63xf32>, vector<2x9x63xf32> -> vector<2x9x63xf32>
    "tpu.trace_stop"() : () -> ()
    %c0_60 = arith.constant 0 : index
    %c36 = arith.constant 36 : index
    %c0_61 = arith.constant 0 : index
    %67 = vector.load %arg20[%c0_60, %c36, %c0_61] : memref<2x81x63xf32, #tpu.memory_space<vmem>>, vector<2x9x63xf32>
    tpu.vector_store %arg20[%c0_60, %c36, %c0_61], %66 {strides = array<i32>} : memref<2x81x63xf32, #tpu.memory_space<vmem>>, vector<2x9x63xf32>,
    %c5 = arith.constant 5 : index
    %c0_62 = arith.constant 0 : index
    %c0_63 = arith.constant 0 : index
    %68 = vector.load %arg4[%c5, %c0_62, %c0_63] : memref<9x63x63xf32, #tpu.memory_space<vmem>>, vector<1x63x63xf32>
    %69 = vector.shape_cast %68 : vector<1x63x63xf32> to vector<63x63xf32>
    %70 = vector.shape_cast %69 : vector<63x63xf32> to vector<1x63x63xf32>
    %71 = vector.broadcast %70 : vector<1x63x63xf32> to vector<2x63x63xf32>
    "tpu.trace_start"() <{level = 10 : i32, message = "bcq,bqp->bcp"}> : () -> ()
    %cst_64 = arith.constant dense<0.000000e+00> : vector<2x9x63xf32>
    %72 = tpu.matmul %37, %71, %cst_64 {dimension_numbers = #tpu.dot_dimension_numbers<[2], [1], [1], [2], [0, 0, 0, 1, 1, 2], [0], [0]>} : vector<2x9x63xf32>, vector<2x63x63xf32>, vector<2x9x63xf32> -> vector<2x9x63xf32>
    "tpu.trace_stop"() : () -> ()
    %c0_65 = arith.constant 0 : index
    %c45 = arith.constant 45 : index
    %c0_66 = arith.constant 0 : index
    %73 = vector.load %arg20[%c0_65, %c45, %c0_66] : memref<2x81x63xf32, #tpu.memory_space<vmem>>, vector<2x9x63xf32>
    tpu.vector_store %arg20[%c0_65, %c45, %c0_66], %72 {strides = array<i32>} : memref<2x81x63xf32, #tpu.memory_space<vmem>>, vector<2x9x63xf32>,
    %c6 = arith.constant 6 : index
    %c0_67 = arith.constant 0 : index
    %c0_68 = arith.constant 0 : index
    %74 = vector.load %arg4[%c6, %c0_67, %c0_68] : memref<9x63x63xf32, #tpu.memory_space<vmem>>, vector<1x63x63xf32>
    %75 = vector.shape_cast %74 : vector<1x63x63xf32> to vector<63x63xf32>
    %76 = vector.shape_cast %75 : vector<63x63xf32> to vector<1x63x63xf32>
    %77 = vector.broadcast %76 : vector<1x63x63xf32> to vector<2x63x63xf32>
    "tpu.trace_start"() <{level = 10 : i32, message = "bcq,bqp->bcp"}> : () -> ()
    %cst_69 = arith.constant dense<0.000000e+00> : vector<2x9x63xf32>
    %78 = tpu.matmul %37, %77, %cst_69 {dimension_numbers = #tpu.dot_dimension_numbers<[2], [1], [1], [2], [0, 0, 0, 1, 1, 2], [0], [0]>} : vector<2x9x63xf32>, vector<2x63x63xf32>, vector<2x9x63xf32> -> vector<2x9x63xf32>
    "tpu.trace_stop"() : () -> ()
    %c0_70 = arith.constant 0 : index
    %c54 = arith.constant 54 : index
    %c0_71 = arith.constant 0 : index
    %79 = vector.load %arg20[%c0_70, %c54, %c0_71] : memref<2x81x63xf32, #tpu.memory_space<vmem>>, vector<2x9x63xf32>
    tpu.vector_store %arg20[%c0_70, %c54, %c0_71], %78 {strides = array<i32>} : memref<2x81x63xf32, #tpu.memory_space<vmem>>, vector<2x9x63xf32>,
    %c7 = arith.constant 7 : index
    %c0_72 = arith.constant 0 : index
    %c0_73 = arith.constant 0 : index
    %80 = vector.load %arg4[%c7, %c0_72, %c0_73] : memref<9x63x63xf32, #tpu.memory_space<vmem>>, vector<1x63x63xf32>
    %81 = vector.shape_cast %80 : vector<1x63x63xf32> to vector<63x63xf32>
    %82 = vector.shape_cast %81 : vector<63x63xf32> to vector<1x63x63xf32>
    %83 = vector.broadcast %82 : vector<1x63x63xf32> to vector<2x63x63xf32>
    "tpu.trace_start"() <{level = 10 : i32, message = "bcq,bqp->bcp"}> : () -> ()
    %cst_74 = arith.constant dense<0.000000e+00> : vector<2x9x63xf32>
    %84 = tpu.matmul %37, %83, %cst_74 {dimension_numbers = #tpu.dot_dimension_numbers<[2], [1], [1], [2], [0, 0, 0, 1, 1, 2], [0], [0]>} : vector<2x9x63xf32>, vector<2x63x63xf32>, vector<2x9x63xf32> -> vector<2x9x63xf32>
    "tpu.trace_stop"() : () -> ()
    %c0_75 = arith.constant 0 : index
    %c63 = arith.constant 63 : index
    %c0_76 = arith.constant 0 : index
    %85 = vector.load %arg20[%c0_75, %c63, %c0_76] : memref<2x81x63xf32, #tpu.memory_space<vmem>>, vector<2x9x63xf32>
    tpu.vector_store %arg20[%c0_75, %c63, %c0_76], %84 {strides = array<i32>} : memref<2x81x63xf32, #tpu.memory_space<vmem>>, vector<2x9x63xf32>,
    %c8 = arith.constant 8 : index
    %c0_77 = arith.constant 0 : index
    %c0_78 = arith.constant 0 : index
    %86 = vector.load %arg4[%c8, %c0_77, %c0_78] : memref<9x63x63xf32, #tpu.memory_space<vmem>>, vector<1x63x63xf32>
    %87 = vector.shape_cast %86 : vector<1x63x63xf32> to vector<63x63xf32>
    %88 = vector.shape_cast %87 : vector<63x63xf32> to vector<1x63x63xf32>
    %89 = vector.broadcast %88 : vector<1x63x63xf32> to vector<2x63x63xf32>
    "tpu.trace_start"() <{level = 10 : i32, message = "bcq,bqp->bcp"}> : () -> ()
    %cst_79 = arith.constant dense<0.000000e+00> : vector<2x9x63xf32>
    %90 = tpu.matmul %37, %89, %cst_79 {dimension_numbers = #tpu.dot_dimension_numbers<[2], [1], [1], [2], [0, 0, 0, 1, 1, 2], [0], [0]>} : vector<2x9x63xf32>, vector<2x63x63xf32>, vector<2x9x63xf32> -> vector<2x9x63xf32>
    "tpu.trace_stop"() : () -> ()
    %c0_80 = arith.constant 0 : index
    %c72 = arith.constant 72 : index
    %c0_81 = arith.constant 0 : index
    %91 = vector.load %arg20[%c0_80, %c72, %c0_81] : memref<2x81x63xf32, #tpu.memory_space<vmem>>, vector<2x9x63xf32>
    tpu.vector_store %arg20[%c0_80, %c72, %c0_81], %90 {strides = array<i32>} : memref<2x81x63xf32, #tpu.memory_space<vmem>>, vector<2x9x63xf32>,
    %c0_82 = arith.constant 0 : index
    %c0_83 = arith.constant 0 : index
    %c0_84 = arith.constant 0 : index
    %92 = vector.load %arg20[%c0_82, %c0_83, %c0_84] : memref<2x81x63xf32, #tpu.memory_space<vmem>>, vector<2x81x63xf32>
    %c0_85 = arith.constant 0 : index
    %c0_86 = arith.constant 0 : index
    %c0_87 = arith.constant 0 : index
    %93 = vector.load %arg9[%c0_85, %c0_86, %c0_87] : memref<1x64x81xf32, #tpu.memory_space<vmem>>, vector<1x64x81xf32>
    %94 = vector.shape_cast %93 : vector<1x64x81xf32> to vector<64x81xf32>
    %95 = vector.shape_cast %94 : vector<64x81xf32> to vector<1x64x81xf32>
    %96 = vector.broadcast %95 : vector<1x64x81xf32> to vector<2x64x81xf32>
    "tpu.trace_start"() <{level = 10 : i32, message = "bok,bkp->bop"}> : () -> ()
    %cst_88 = arith.constant dense<0.000000e+00> : vector<2x64x63xf32>
    %97 = tpu.matmul %96, %92, %cst_88 {dimension_numbers = #tpu.dot_dimension_numbers<[2], [1], [1], [2], [0, 0, 0, 1, 1, 2], [0], [0]>} : vector<2x64x81xf32>, vector<2x81x63xf32>, vector<2x64x63xf32> -> vector<2x64x63xf32>
    "tpu.trace_stop"() : () -> ()
    %c0_89 = arith.constant 0 : index
    %c0_90 = arith.constant 0 : index
    %c0_91 = arith.constant 0 : index
    %98 = vector.load %arg10[%c0_89, %c0_90, %c0_91] : memref<1x64x1xf32, #tpu.memory_space<vmem>>, vector<1x64x1xf32>
    %99 = vector.shape_cast %98 : vector<1x64x1xf32> to vector<64x1xf32>
    %100 = vector.shape_cast %99 : vector<64x1xf32> to vector<1x64x1xf32>
    %101 = vector.broadcast %100 : vector<1x64x1xf32> to vector<2x64x63xf32>
    %102 = arith.addf %97, %101 : vector<2x64x63xf32>
    %cst_92 = arith.constant dense<0.000000e+00> : vector<2x64xf32>
    %103 = vector.multi_reduction <add>, %102, %cst_92 [2] : vector<2x64x63xf32> to vector<2x64xf32>
    %104 = vector.shape_cast %103 : vector<2x64xf32> to vector<2x64x1xf32>
    %cst_93 = arith.constant 6.300000e+01 : f32
    %105 = vector.broadcast %cst_93 : f32 to vector<2x64x1xf32>
    %106 = arith.divf %104, %105 : vector<2x64x1xf32>
    %cst_94 = arith.constant dense<0.000000e+00> : vector<64x1xf32>
    %107 = vector.multi_reduction <add>, %106, %cst_94 [0] : vector<2x64x1xf32> to vector<64x1xf32>
    %108 = vector.shape_cast %107 : vector<64x1xf32> to vector<1x64x1xf32>
    %cst_95 = arith.constant 2.000000e+00 : f32
    %109 = vector.broadcast %cst_95 : f32 to vector<1x64x1xf32>
    %110 = arith.divf %108, %109 : vector<1x64x1xf32>
    %111 = vector.broadcast %110 : vector<1x64x1xf32> to vector<2x64x63xf32>
    %112 = arith.subf %102, %111 : vector<2x64x63xf32>
    %113 = arith.mulf %112, %112 : vector<2x64x63xf32>
    %cst_96 = arith.constant dense<0.000000e+00> : vector<2x64xf32>
    %114 = vector.multi_reduction <add>, %113, %cst_96 [2] : vector<2x64x63xf32> to vector<2x64xf32>
    %115 = vector.shape_cast %114 : vector<2x64xf32> to vector<2x64x1xf32>
    %cst_97 = arith.constant 6.300000e+01 : f32
    %116 = vector.broadcast %cst_97 : f32 to vector<2x64x1xf32>
    %117 = arith.divf %115, %116 : vector<2x64x1xf32>
    %cst_98 = arith.constant dense<0.000000e+00> : vector<64x1xf32>
    %118 = vector.multi_reduction <add>, %117, %cst_98 [0] : vector<2x64x1xf32> to vector<64x1xf32>
    %119 = vector.shape_cast %118 : vector<64x1xf32> to vector<1x64x1xf32>
    %cst_99 = arith.constant 2.000000e+00 : f32
    %120 = vector.broadcast %cst_99 : f32 to vector<1x64x1xf32>
    %121 = arith.divf %119, %120 : vector<1x64x1xf32>
    %cst_100 = arith.constant 9.99999974E-6 : f32
    %122 = vector.broadcast %cst_100 : f32 to vector<1x64x1xf32>
    %123 = arith.addf %121, %122 : vector<1x64x1xf32>
    %124 = math.rsqrt %123 : vector<1x64x1xf32>
    %125 = vector.broadcast %124 : vector<1x64x1xf32> to vector<2x64x63xf32>
    %126 = arith.mulf %112, %125 : vector<2x64x63xf32>
    %c0_101 = arith.constant 0 : index
    %c0_102 = arith.constant 0 : index
    %c0_103 = arith.constant 0 : index
    %127 = vector.load %arg11[%c0_101, %c0_102, %c0_103] : memref<1x64x1xf32, #tpu.memory_space<vmem>>, vector<1x64x1xf32>
    %128 = vector.shape_cast %127 : vector<1x64x1xf32> to vector<64x1xf32>
    %129 = vector.shape_cast %128 : vector<64x1xf32> to vector<1x64x1xf32>
    %130 = vector.broadcast %129 : vector<1x64x1xf32> to vector<2x64x63xf32>
    %131 = arith.mulf %126, %130 : vector<2x64x63xf32>
    %c0_104 = arith.constant 0 : index
    %c0_105 = arith.constant 0 : index
    %c0_106 = arith.constant 0 : index
    %132 = vector.load %arg12[%c0_104, %c0_105, %c0_106] : memref<1x64x1xf32, #tpu.memory_space<vmem>>, vector<1x64x1xf32>
    %133 = vector.shape_cast %132 : vector<1x64x1xf32> to vector<64x1xf32>
    %134 = vector.shape_cast %133 : vector<64x1xf32> to vector<1x64x1xf32>
    %135 = vector.broadcast %134 : vector<1x64x1xf32> to vector<2x64x63xf32>
    %136 = arith.addf %131, %135 : vector<2x64x63xf32>
    %cst_107 = arith.constant 5.000000e-01 : f32
    %137 = vector.broadcast %cst_107 : f32 to vector<2x64x63xf32>
    %138 = arith.mulf %137, %136 : vector<2x64x63xf32>
    %cst_108 = arith.constant 4.471500e-02 : f32
    %139 = vector.broadcast %cst_108 : f32 to vector<2x64x63xf32>
    %140 = arith.mulf %139, %136 : vector<2x64x63xf32>
    %141 = arith.mulf %140, %136 : vector<2x64x63xf32>
    %142 = arith.mulf %141, %136 : vector<2x64x63xf32>
    %143 = arith.addf %136, %142 : vector<2x64x63xf32>
    %cst_109 = arith.constant 0.797884583 : f32
    %144 = vector.broadcast %cst_109 : f32 to vector<2x64x63xf32>
    %145 = arith.mulf %144, %143 : vector<2x64x63xf32>
    %146 = math.tanh %145 : vector<2x64x63xf32>
    %cst_110 = arith.constant 1.000000e+00 : f32
    %147 = vector.broadcast %cst_110 : f32 to vector<2x64x63xf32>
    %148 = arith.addf %147, %146 : vector<2x64x63xf32>
    %149 = arith.mulf %138, %148 : vector<2x64x63xf32>
    %c0_111 = arith.constant 0 : index
    %c0_112 = arith.constant 0 : index
    %c0_113 = arith.constant 0 : index
    %150 = vector.load %arg13[%c0_111, %c0_112, %c0_113] : memref<1x64x64xf32, #tpu.memory_space<vmem>>, vector<1x64x64xf32>
    %151 = vector.shape_cast %150 : vector<1x64x64xf32> to vector<64x64xf32>
    %152 = vector.shape_cast %151 : vector<64x64xf32> to vector<1x64x64xf32>
    %153 = vector.broadcast %152 : vector<1x64x64xf32> to vector<2x64x64xf32>
    "tpu.trace_start"() <{level = 10 : i32, message = "bij,bjp->bip"}> : () -> ()
    %cst_114 = arith.constant dense<0.000000e+00> : vector<2x64x63xf32>
    %154 = tpu.matmul %153, %149, %cst_114 {dimension_numbers = #tpu.dot_dimension_numbers<[2], [1], [1], [2], [0, 0, 0, 1, 1, 2], [0], [0]>} : vector<2x64x64xf32>, vector<2x64x63xf32>, vector<2x64x63xf32> -> vector<2x64x63xf32>
    "tpu.trace_stop"() : () -> ()
    %c0_115 = arith.constant 0 : index
    %c0_116 = arith.constant 0 : index
    %c0_117 = arith.constant 0 : index
    %155 = vector.load %arg14[%c0_115, %c0_116, %c0_117] : memref<1x64x1xf32, #tpu.memory_space<vmem>>, vector<1x64x1xf32>
    %156 = vector.shape_cast %155 : vector<1x64x1xf32> to vector<64x1xf32>
    %157 = vector.shape_cast %156 : vector<64x1xf32> to vector<1x64x1xf32>
    %158 = vector.broadcast %157 : vector<1x64x1xf32> to vector<2x64x63xf32>
    %159 = arith.addf %154, %158 : vector<2x64x63xf32>
    %cst_118 = arith.constant 0.000000e+00 : f32
    %160 = vector.broadcast %cst_118 : f32 to vector<2x64x63xf32>
    %161 = arith.maximumf %159, %160 : vector<2x64x63xf32>
    %c0_119 = arith.constant 0 : index
    %c0_120 = arith.constant 0 : index
    %c0_121 = arith.constant 0 : index
    %162 = vector.load %arg15[%c0_119, %c0_120, %c0_121] : memref<1x2x64xf32, #tpu.memory_space<vmem>>, vector<1x2x64xf32>
    %163 = vector.shape_cast %162 : vector<1x2x64xf32> to vector<2x64xf32>
    %164 = vector.shape_cast %163 : vector<2x64xf32> to vector<1x2x64xf32>
    %165 = vector.broadcast %164 : vector<1x2x64xf32> to vector<2x2x64xf32>
    "tpu.trace_start"() <{level = 10 : i32, message = "bij,bjp->bip"}> : () -> ()
    %cst_122 = arith.constant dense<0.000000e+00> : vector<2x2x63xf32>
    %166 = tpu.matmul %165, %161, %cst_122 {dimension_numbers = #tpu.dot_dimension_numbers<[2], [1], [1], [2], [0, 0, 0, 1, 1, 2], [0], [0]>} : vector<2x2x64xf32>, vector<2x64x63xf32>, vector<2x2x63xf32> -> vector<2x2x63xf32>
    "tpu.trace_stop"() : () -> ()
    %c0_123 = arith.constant 0 : index
    %c0_124 = arith.constant 0 : index
    %c0_125 = arith.constant 0 : index
    %167 = vector.load %arg16[%c0_123, %c0_124, %c0_125] : memref<1x2x1xf32, #tpu.memory_space<vmem>>, vector<1x2x1xf32>
    %168 = vector.shape_cast %167 : vector<1x2x1xf32> to vector<2x1xf32>
    %169 = vector.shape_cast %168 : vector<2x1xf32> to vector<1x2x1xf32>
    %170 = vector.broadcast %169 : vector<1x2x1xf32> to vector<2x2x63xf32>
    %171 = arith.addf %166, %170 : vector<2x2x63xf32>
    %cst_126 = arith.constant 0.000000e+00 : f32
    %172 = vector.broadcast %cst_126 : f32 to vector<2x2x63xf32>
    %173 = arith.maximumf %171, %172 : vector<2x2x63xf32>
    %174 = vector.extract_strided_slice %173 {offsets = [0, 0, 0], sizes = [2, 1, 63], strides = [1, 1, 1]} : vector<2x2x63xf32> to vector<2x1x63xf32>
    %175 = vector.extract_strided_slice %173 {offsets = [0, 1, 0], sizes = [2, 1, 63], strides = [1, 1, 1]} : vector<2x2x63xf32> to vector<2x1x63xf32>
    %cst_127 = arith.constant 1.000000e+00 : f32
    %176 = vector.broadcast %cst_127 : f32 to vector<1x63xf32>
    %177 = arith.subf %176, %24 : vector<1x63xf32>
    %178 = vector.shape_cast %24 : vector<1x63xf32> to vector<1x1x63xf32>
    %179 = vector.broadcast %178 : vector<1x1x63xf32> to vector<2x1x63xf32>
    %180 = arith.mulf %179, %22 : vector<2x1x63xf32>
    %181 = math.exp %175 : vector<2x1x63xf32>
    %182 = arith.mulf %22, %181 : vector<2x1x63xf32>
    %183 = arith.addf %182, %174 : vector<2x1x63xf32>
    %184 = vector.shape_cast %177 : vector<1x63xf32> to vector<1x1x63xf32>
    %185 = vector.broadcast %184 : vector<1x1x63xf32> to vector<2x1x63xf32>
    %186 = arith.mulf %185, %183 : vector<2x1x63xf32>
    %187 = arith.addf %180, %186 : vector<2x1x63xf32>
    %c0_128 = arith.constant 0 : index
    %c0_129 = arith.constant 0 : index
    %c0_130 = arith.constant 0 : index
    %188 = vector.load %arg17[%c0_128, %c0_129, %c0_130] : memref<2x1x63xf32, #tpu.memory_space<vmem>>, vector<2x1x63xf32>
    tpu.vector_store %arg17[%c0_128, %c0_129, %c0_130], %187 {strides = array<i32>} : memref<2x1x63xf32, #tpu.memory_space<vmem>>, vector<2x1x63xf32>,
    %c0_131 = arith.constant 0 : index
    %c0_132 = arith.constant 0 : index
    %c0_133 = arith.constant 0 : index
    %189 = vector.load %arg18[%c0_131, %c0_132, %c0_133] : memref<2x1x63xf32, #tpu.memory_space<vmem>>, vector<2x1x63xf32>
    %190 = vector.shape_cast %177 : vector<1x63xf32> to vector<1x1x63xf32>
    %191 = vector.broadcast %190 : vector<1x1x63xf32> to vector<2x1x63xf32>
    %192 = arith.mulf %191, %175 : vector<2x1x63xf32>
    %193 = arith.addf %189, %192 : vector<2x1x63xf32>
    %c0_134 = arith.constant 0 : index
    %c0_135 = arith.constant 0 : index
    %c0_136 = arith.constant 0 : index
    %194 = vector.load %arg18[%c0_134, %c0_135, %c0_136] : memref<2x1x63xf32, #tpu.memory_space<vmem>>, vector<2x1x63xf32>
    tpu.vector_store %arg18[%c0_134, %c0_135, %c0_136], %193 {strides = array<i32>} : memref<2x1x63xf32, #tpu.memory_space<vmem>>, vector<2x1x63xf32>,
    return
  }
  func.func @transform_0(%arg0: i32) -> (i32, i32) {
    %c0_i32 = arith.constant 0 : i32
    %c0_i32_0 = arith.constant 0 : i32
    %c0_i32_1 = arith.constant 0 : i32
    return %c0_i32, %c0_i32_0 : i32, i32
  }
  func.func @transform_1(%arg0: i32) -> (i32, i32, i32) {
    %c0_i32 = arith.constant 0 : i32
    %c0_i32_0 = arith.constant 0 : i32
    %c0_i32_1 = arith.constant 0 : i32
    %c0_i32_2 = arith.constant 0 : i32
    return %c0_i32, %c0_i32_0, %c0_i32_1 : i32, i32, i32
  }
  func.func @transform_2(%arg0: i32) -> (i32, i32, i32) {
    %c0_i32 = arith.constant 0 : i32
    %c0_i32_0 = arith.constant 0 : i32
    %c0_i32_1 = arith.constant 0 : i32
    return %arg0, %c0_i32, %c0_i32_0 : i32, i32, i32
  }
  func.func @transform_3(%arg0: i32) -> (i32, i32, i32) {
    %c0_i32 = arith.constant 0 : i32
    %c0_i32_0 = arith.constant 0 : i32
    %c0_i32_1 = arith.constant 0 : i32
    %c0_i32_2 = arith.constant 0 : i32
    return %c0_i32, %c0_i32_0, %c0_i32_1 : i32, i32, i32
  }
  func.func @transform_4(%arg0: i32) -> (i32, i32, i32) {
    %c0_i32 = arith.constant 0 : i32
    %c0_i32_0 = arith.constant 0 : i32
    %c0_i32_1 = arith.constant 0 : i32
    return %arg0, %c0_i32, %c0_i32_0 : i32, i32, i32
  }
  func.func @transform_5(%arg0: i32) -> (i32, i32, i32) {
    %c0_i32 = arith.constant 0 : i32
    %c0_i32_0 = arith.constant 0 : i32
    %c0_i32_1 = arith.constant 0 : i32
    return %arg0, %c0_i32, %c0_i32_0 : i32, i32, i32
  }
  func.func @transform_6(%arg0: i32) -> (i32, i32, i32) {
    %c0_i32 = arith.constant 0 : i32
    %c0_i32_0 = arith.constant 0 : i32
    %c0_i32_1 = arith.constant 0 : i32
    return %arg0, %c0_i32, %c0_i32_0 : i32, i32, i32
  }
  func.func @transform_7(%arg0: i32) -> (i32, i32, i32) {
    %c0_i32 = arith.constant 0 : i32
    %c0_i32_0 = arith.constant 0 : i32
    %c0_i32_1 = arith.constant 0 : i32
    return %arg0, %c0_i32, %c0_i32_0 : i32, i32, i32
  }
  func.func @transform_8(%arg0: i32) -> (i32, i32, i32) {
    %c0_i32 = arith.constant 0 : i32
    %c0_i32_0 = arith.constant 0 : i32
    %c0_i32_1 = arith.constant 0 : i32
    return %arg0, %c0_i32, %c0_i32_0 : i32, i32, i32
  }
  func.func @transform_9(%arg0: i32) -> (i32, i32, i32) {
    %c0_i32 = arith.constant 0 : i32
    %c0_i32_0 = arith.constant 0 : i32
    %c0_i32_1 = arith.constant 0 : i32
    return %arg0, %c0_i32, %c0_i32_0 : i32, i32, i32
  }
  func.func @transform_10(%arg0: i32) -> (i32, i32, i32) {
    %c0_i32 = arith.constant 0 : i32
    %c0_i32_0 = arith.constant 0 : i32
    %c0_i32_1 = arith.constant 0 : i32
    return %arg0, %c0_i32, %c0_i32_0 : i32, i32, i32
  }
  func.func @transform_11(%arg0: i32) -> (i32, i32, i32) {
    %c0_i32 = arith.constant 0 : i32
    %c0_i32_0 = arith.constant 0 : i32
    %c0_i32_1 = arith.constant 0 : i32
    return %arg0, %c0_i32, %c0_i32_0 : i32, i32, i32
  }
  func.func @transform_12(%arg0: i32) -> (i32, i32, i32) {
    %c0_i32 = arith.constant 0 : i32
    %c0_i32_0 = arith.constant 0 : i32
    %c0_i32_1 = arith.constant 0 : i32
    return %arg0, %c0_i32, %c0_i32_0 : i32, i32, i32
  }
  func.func @transform_13(%arg0: i32) -> (i32, i32, i32) {
    %c0_i32 = arith.constant 0 : i32
    %c0_i32_0 = arith.constant 0 : i32
    %c0_i32_1 = arith.constant 0 : i32
    return %arg0, %c0_i32, %c0_i32_0 : i32, i32, i32
  }
  func.func @transform_14(%arg0: i32) -> (i32, i32, i32) {
    %c0_i32 = arith.constant 0 : i32
    %c0_i32_0 = arith.constant 0 : i32
    %c0_i32_1 = arith.constant 0 : i32
    return %arg0, %c0_i32, %c0_i32_0 : i32, i32, i32
  }
  func.func @transform_15(%arg0: i32) -> (i32, i32, i32) {
    %c0_i32 = arith.constant 0 : i32
    %c0_i32_0 = arith.constant 0 : i32
    %c0_i32_1 = arith.constant 0 : i32
    return %arg0, %c0_i32, %c0_i32_0 : i32, i32, i32
  }
  func.func @transform_16(%arg0: i32) -> (i32, i32, i32) {
    %c0_i32 = arith.constant 0 : i32
    %c0_i32_0 = arith.constant 0 : i32
    %c0_i32_1 = arith.constant 0 : i32
    %c0_i32_2 = arith.constant 0 : i32
    return %c0_i32, %c0_i32_0, %c0_i32_1 : i32, i32, i32
  }
  func.func @transform_17(%arg0: i32) -> (i32, i32, i32) {
    %c0_i32 = arith.constant 0 : i32
    %c0_i32_0 = arith.constant 0 : i32
    %c0_i32_1 = arith.constant 0 : i32
    %c0_i32_2 = arith.constant 0 : i32
    return %c0_i32, %c0_i32_0, %c0_i32_1 : i32, i32, i32
  }
}

</mosaic_0001>

<bundles_post_ra>
// kernel: atomflow_forward.3
= control target key start
LH: loop header
LB: loop body
LE: loop exit
PB: predicated region body
PF: predicated region fallthrough
CT: control target
= control target key end

     0   :  { %s5856_s24 = smov 0   ;;  %s6901_s0 = inlined_call_operand.vmem [shape: f32[16,315], index: 0, kind: input, shape index: {}]   ;;  %s6902_s1 = inlined_call_operand.vmem [shape: f32[2,1,63], index: 1, kind: input, shape index: {}]   ;;  %s6903_s2 = inlined_call_operand.vmem [shape: f32[6,1,63], index: 2, kind: input, shape index: {}]   ;;  %s6904_s3 = inlined_call_operand.vmem [shape: f32[9,63,63], index: 3, kind: input, shape index: {}]   ;;  %s6905_s4 = inlined_call_operand.vmem [shape: f32[6,315,64], index: 4, kind: input, shape index: {}]   ;;  %s6906_s5 = inlined_call_operand.vmem [shape: f32[6,1,64], index: 5, kind: input, shape index: {}]   ;;  %s6907_s6 = inlined_call_operand.vmem [shape: f32[6,64,63], index: 6, kind: input, shape index: {}]   ;;  %s6908_s7 = inlined_call_operand.vmem [shape: f32[6,1,63], index: 7, kind: input, shape index: {}]   ;;  %s6909_s8 = inlined_call_operand.vmem [shape: f32[6,64,81], index: 8, kind: input, shape index: {}]   ;;  %s6910_s9 = inlined_call_operand.vmem [shape: f32[6,64,1], index: 9, kind: input, shape index: {}]   ;;  %s6911_s10 = inlined_call_operand.vmem [shape: f32[6,64,1], index: 10, kind: input, shape index: {}]   ;;  %s6912_s11 = inlined_call_operand.vmem [shape: f32[6,64,1], index: 11, kind: input, shape index: {}]   ;;  %s6913_s12 = inlined_call_operand.vmem [shape: f32[6,64,64], index: 12, kind: input, shape index: {}]   ;;  %s6914_s13 = inlined_call_operand.vmem [shape: f32[6,64,1], index: 13, kind: input, shape index: {}]   ;;  %s6915_s14 = inlined_call_operand.vmem [shape: f32[6,2,64], index: 14, kind: input, shape index: {}]   ;;  %s6916_s15 = inlined_call_operand.vmem [shape: f32[6,2,1], index: 15, kind: input, shape index: {}]   ;;  %s6917_s16 = inlined_call_operand.vmem [shape: f32[2,1,63], index: 16, kind: output, shape index: {0}]   ;;  %s6918_s17 = inlined_call_operand.vmem [shape: f32[2,1,63], index: 17, kind: output, shape index: {1}]  }
   0x1   :  { %6926 = sst [smem:[#allocation6_spill]] %s6901_s0 }
   0x2   :  { %6927 = sst [smem:[#allocation7_spill]] %s6902_s1 }
   0x3   :  { %6928 = sst [smem:[#allocation8_spill]] %s6903_s2 }
   0x4   :  { %6929 = sst [smem:[#allocation9_spill]] %s6904_s3 }
   0x5   :  { %6930 = sst [smem:[#allocation10_spill]] %s6905_s4 }
   0x6   :  { %6931 = sst [smem:[#allocation11_spill]] %s6907_s6 }
   0x7   :  { %6932 = sst [smem:[#allocation12_spill]] %s6909_s8 }
   0x8   :  { %6933 = sst [smem:[#allocation13_spill]] %s6910_s9 }
   0x9   :  { %6934 = sst [smem:[#allocation14_spill]] %s6911_s10 }
   0xa   :  { %6935 = sst [smem:[#allocation15_spill]] %s6912_s11 }
   0xb   :  { %6936 = sst [smem:[#allocation16_spill]] %s6918_s17 }
   0xc LB: > { %6937 = sst [smem:[#allocation4_spill]] %s5757_s24  ;;  %s4132_s25 = sadd.s32 4294967295, %s5757_s24   ;;  %s5757_s24 = sphi %s5856_s24, %s28_s24  }
   0xd   : > { %p4135_p0 = scmp.ge.s32.totalorder %s5757_s24, 1  ;;  %p592_p1 = scmp.lt.s32.totalorder %s5757_s24, 7 }
   0xf   : > { %p593_p2 = pnand %p4135_p0, %p592_p1 }
  0x11   : > { %596 = sbr.rel (%p593_p2) target bundleno = 2012 (0x7dc), region = 84 }
  0x18   : > { %p691_p3 = scmp.lt.s32.totalorder %s4132_s25, 5  ;;  %s6938_s2 = sld [smem:[#allocation8_spill]] }
  0x19   : > { %s6940_s4 = sld [smem:[#allocation10_spill]]  ;;  %s6941_s6 = sld [smem:[#allocation11_spill]] }
  0x1a   : > { %s5864_s26 = scalar_select %p691_p3, %s4132_s25, 5 }
  0x1b   : > { %s6942_s8 = sld [smem:[#allocation12_spill]]  ;;  %s6943_s9 = sld [smem:[#allocation13_spill]] }
  0x1c   : > { %s5678_s0 = smul.u32 320, %s5864_s26  ;;  %s4317_s1 = sshll.u32 %s5864_s26, 6 }
  0x1d   : > { %s6944_s10 = sld [smem:[#allocation14_spill]]  ;;  %s6945_s11 = sld [smem:[#allocation15_spill]] }
  0x1e   : > { %s5870_s29 = scalar_lea.vmem %s6938_s2, %s5864_s26  ;;  %s5915_s17 = scalar_lea.vmem %s6913_s12, %s4317_s1 }
  0x1f   : > { %6939 = sst [smem:[#allocation5_spill]] %s5870_s29  ;;  %s5881_s22 = scalar_lea.vmem %s6940_s4, %s5678_s0 }
  0x20   : > { %s5886_s28 = scalar_lea.vmem %s6941_s6, %s4317_s1  ;;  %s5920_s19 = scalar_lea.vmem %s6914_s13, %s4317_s1 }
  0x21   : > { %s5895_s30 = scalar_lea.vmem %s6942_s8, %s4317_s1  ;;  %s5900_s20 = scalar_lea.vmem %s6943_s9, %s4317_s1 }
  0x22   : > { %s4151_s18 = sshll.u32 %s5864_s26, 1  ;;  %p4153_p4 = scmp.ne.s32.totalorder %s4132_s25, 0 }
  0x23   : > { %s5905_s23 = scalar_lea.vmem %s6944_s10, %s4317_s1  ;;  %s5910_s3 = scalar_lea.vmem %s6945_s11, %s4317_s1  ;;  %vm754_vm0 = vcmask (!%p4153_p4), 507904   ;;  %v5759_v2 = vmov (!%p4153_p4), 0.0  }
  0x24   : > { %s5926_s21 = scalar_lea.vmem %s6915_s14, %s4151_s18  ;;  %s5931_s27 = scalar_lea.vmem %s6916_s15, %s4151_s18 }
  0x25   : > { %751 = sbr.rel (%p4153_p4) target bundleno = 46 (0x2e), region = 88  ;;  %s6946_s10 = sld [smem:[#allocation7_spill]] (!%p4153_p4) }
  0x26   : > { %s6947_s18 = sld [smem:[#allocation16_spill]] (!%p4153_p4) }
  0x2b   : > { %v752_v0 = vld [vmem:[%s6946_s10] sm:$0x1] (!%p4153_p4)  ;;  %v753_v1 = vld [vmem:[%s6946_s10 + $0x1] sm:$0x1] (!%p4153_p4) }
  0x2c   : > { %755 = vst.msk [vmem:[%s6917_s16] sm:$0x1] %vm754_vm0, %v752_v0  ;;  %756 = vst.msk [vmem:[%s6917_s16 + $0x1] sm:$0x1] %vm754_vm0, %v753_v1 }
  0x2d   : > { %757 = vst.msk [vmem:[%s6947_s18] sm:$0x1] %vm754_vm0, %v5759_v2  ;;  %758 = vst.msk [vmem:[%s6947_s18 + $0x1] sm:$0x1] %vm754_vm0, %v5759_v2 }
  0x2e PF: > { %v781_v3 = vld [vmem:[%s5881_s22 + $0x80] sm:$0xff]  ;;  %v782_v4 = vld [vmem:[%s5881_s22 + $0x88] sm:$0xff]  ;;  %v783_v8 = vld [vmem:[%s5881_s22 + $0x90] sm:$0xff]  ;;  %s6948_s6 = sld [smem:[#allocation6_spill]]  ;;  %vm812_vm1 = vcmask 482304   ;;  %vm819_vm2 = vcmask 1042432   ;;  %s6952_s9 = scalar_lea.vmem %s6906_s5, %s5864_s26 }
  0x2f   : > { %v765_v5 = vld [vmem:[%s5881_s22] sm:$0xff]  ;;  %v5192_v6 = vpack.c.bf16 %v782_v4, %v781_v3  ;;  %v766_v7 = vld [vmem:[%s5881_s22 + $0x8] sm:$0xff]  ;;  %v784_v9 = vld [vmem:[%s5881_s22 + $0x98] sm:$0xff]  ;;  %vm5760_vm3 = vmmov 1   ;;  %s6951_s1 = sld [smem:[#allocation9_spill]]  ;;  %vm990_vm5 = vcmask 523264   ;;  %s6956_s18 = scalar_lea.vmem %s6908_s7, %s5864_s26 }
  0x30   : > { %v5194_v10 = vpack.c.bf16 %v766_v7, %v765_v5  ;;  %v5196_v11 = vpack.c.bf16 %v784_v9, %v783_v8  ;;  %v767_v12 = vld [vmem:[%s5881_s22 + $0x10] sm:$0xff]  ;;  %v768_v13 = vld [vmem:[%s5881_s22 + $0x18] sm:$0xff]  ;;  %v785_v14 = vld [vmem:[%s5881_s22 + $0xa0] sm:$0xff]  ;;  %s6953_s25 = sld [smem:[#allocation5_spill]]  ;;  %vm1104_vm6 = vcmask 1046528   ;;  %vm1079_vm7 = vcmask 507904  }
  0x31   : > { %5193 = vmatprep.subr.bf16.mxu0 %v5192_v6  ;;  %v786_v15 = vld [vmem:[%s5881_s22 + $0xa8] sm:$0xff]  ;;  %v5198_v16 = vpack.c.bf16 %v768_v13, %v767_v12  ;;  %v769_v18 = vld [vmem:[%s5881_s22 + $0x20] sm:$0xff]  ;;  %v787_v20 = vld [vmem:[%s5881_s22 + $0xb0] sm:$0xff]  ;;  %vm1082_vm9 = vcmask 515072   ;;  %vm2674_vm10 = vcmask 662528   ;;  %vm2699_vm11 = vcmask 1040384  }
  0x32   : > { %5195 = vmatpush3.bf16.msra.mxu0 %v5194_v10  ;;  %v5200_v17 = vpack.c.bf16 %v786_v15, %v785_v14  ;;  %v770_v19 = vld [vmem:[%s5881_s22 + $0x28] sm:$0xff]  ;;  %v788_v21 = vld [vmem:[%s5881_s22 + $0xb8] sm:$0xff]  ;;  %v797_v22 = vld [vmem:[%s5881_s22 + $0x100] sm:$0xff]  ;;  %vm5763_vm12 = vmmov 0  }
  0x33   : > { %5197 = vmatprep.subr.bf16.mxu0 %v5196_v11  ;;  %v798_v23 = vld [vmem:[%s5881_s22 + $0x108] sm:$0xff]  ;;  %v5202_v24 = vpack.c.bf16 %v770_v19, %v769_v18  ;;  %v771_v25 = vld [vmem:[%s5881_s22 + $0x30] sm:$0xff]  ;;  %v5204_v27 = vpack.c.bf16 %v788_v21, %v787_v20  ;;  %v772_v28 = vld [vmem:[%s5881_s22 + $0x38] sm:$0xff] }
  0x34   : > { %v5224_v26 = vpack.c.bf16 %v798_v23, %v797_v22  ;;  %v799_v29 = vld [vmem:[%s5881_s22 + $0x110] sm:$0xff]  ;;  %v800_v30 = vld [vmem:[%s5881_s22 + $0x118] sm:$0xff]  ;;  %v789_v31 = vld [vmem:[%s5881_s22 + $0xc0] sm:$0xff]  ;;  %v5206_v36 = vpack.c.bf16 %v772_v28, %v771_v25 }
  0x35   : > { %v790_v32 = vld [vmem:[%s5881_s22 + $0xc8] sm:$0xff]  ;;  %v5228_v33 = vpack.c.bf16 %v800_v30, %v799_v29  ;;  %v801_v34 = vld [vmem:[%s5881_s22 + $0x120] sm:$0xff]  ;;  %v803_v42 = vld [vmem:[%s5881_s22 + $0x130] sm:$0xff] }
  0x36   : > { %5199 = vmatpush3.bf16.msra.mxu0 %v5198_v16  ;;  %5225 = vmatprep.subr.bf16.mxu1 %v5224_v26  ;;  %v802_v35 = vld [vmem:[%s5881_s22 + $0x128] sm:$0xff]  ;;  %v773_v37 = vld [vmem:[%s5881_s22 + $0x40] sm:$0xff]  ;;  %v5208_v40 = vpack.c.bf16 %v790_v32, %v789_v31  ;;  %v804_v43 = vld [vmem:[%s5881_s22 + $0x138] sm:$0x7] }
  0x37   : > { %5201 = vmatprep.subr.bf16.mxu0 %v5200_v17  ;;  %5227 = vmatpush3.bf16.msra.mxu1 %v5224_v26  ;;  %v5232_v38 = vpack.c.bf16 %v802_v35, %v801_v34  ;;  %v760_v39 = vld [vmem:[%s6948_s6 + $0x8] sm:$0xff]  ;;  %v791_v44 = vld [vmem:[%s5881_s22 + $0xd0] sm:$0xff]  ;;  %v792_v45 = vld [vmem:[%s5881_s22 + $0xd8] sm:$0xff]  ;;  %v5236_v50 = vpack.c.bf16 %v804_v43, %v803_v42 }
  0x38   : > { %5229 = vmatprep.subr.bf16.mxu1 %v5228_v33  ;;  %v774_v41 = vld [vmem:[%s5881_s22 + $0x48] sm:$0xff]  ;;  %887 = vmatprep.mubr.f32.mxu0 %v760_v39  ;;  %v761_v46 = vld [vmem:[%s6948_s6 + $0x10] sm:$0xff]  ;;  %v776_v49 = vld [vmem:[%s5881_s22 + $0x58] sm:$0xff]  ;;  %v5212_v51 = vpack.c.bf16 %v792_v45, %v791_v44 }
  0x39   : > { %4666 = vmatprep.mubr.msk.f32.mxu1 %vm812_vm1, %v761_v46  ;;  %v5210_v47 = vpack.c.bf16 %v774_v41, %v773_v37  ;;  %v775_v48 = vld [vmem:[%s5881_s22 + $0x50] sm:$0xff]  ;;  %vm5991_vm4 = vmpackc.low %vm819_vm2, %vm5760_vm3  ;;  %v975_v53 = vld [vmem:[%s5886_s28] sm:$0xff] }
  0x3a   : > { %5203 = vmatpush3.bf16.msra.mxu0 %v5202_v24  ;;  %v976_v54 = vld [vmem:[%s5886_s28 + $0x8] sm:$0xff]  ;;  %v793_v55 = vld [vmem:[%s5881_s22 + $0xe0] sm:$0xff]  ;;  %v5214_v57 = vpack.c.bf16 %v776_v49, %v775_v48  ;;  %v795_v62 = vld [vmem:[%s5881_s22 + $0xf0] sm:$0xff] }
  0x3b   : > { %5205 = vmatprep.subr.bf16.mxu0 %v5204_v27  ;;  %5231 = vmatpush3.bf16.msra.mxu1 %v5228_v33  ;;  %v794_v56 = vld [vmem:[%s5881_s22 + $0xe8] sm:$0xff]  ;;  %v5242_v58 = vpack.c.bf16 %v976_v54, %v975_v53  ;;  %v777_v60 = vld [vmem:[%s5881_s22 + $0x60] sm:$0xff]  ;;  %v796_v63 = vld [vmem:[%s5881_s22 + $0xf8] sm:$0xff] }
  0x3c   : > { %5233 = vmatprep.subr.bf16.mxu1 %v5232_v38  ;;  %v5216_v59 = vpack.c.bf16 %v794_v56, %v793_v55  ;;  %v778_v61 = vld [vmem:[%s5881_s22 + $0x68] sm:$0xff]  ;;  %v5220_v2 = vpack.c.bf16 %v796_v63, %v795_v62  ;;  %v779_v3 = vld [vmem:[%s5881_s22 + $0x70] sm:$0xff]  ;;  %v780_v4 = vld [vmem:[%s5881_s22 + $0x78] sm:$0xff] }
  0x3d   : > { %v764_v0 = vld [vmem:[%s6948_s6 + $0x28] sm:$0xff]  ;;  %v5218_v1 = vpack.c.bf16 %v778_v61, %v777_v60  ;;  %v5222_v5 = vpack.c.bf16 %v780_v4, %v779_v3  ;;  %v759_v6 = vld [vmem:[%s6948_s6] sm:$0xff]  ;;  %v762_v8 = vld [vmem:[%s6948_s6 + $0x18] sm:$0xff] }
  0x3e   : > { %5207 = vmatpush3.bf16.msra.mxu0 %v5206_v36  ;;  %v763_v7 = vld [vmem:[%s6948_s6 + $0x20] sm:$0xff]  ;;  %v977_v9 = vld [vmem:[%s5886_s28 + $0x10] sm:$0xff]  ;;  %v978_v10 = vld [vmem:[%s5886_s28 + $0x18] sm:$0xff] }
  0x3f   : > { %5209 = vmatprep.subr.bf16.mxu0 %v5208_v40  ;;  %5235 = vmatpush3.bf16.msra.mxu1 %v5232_v38  ;;  %v5246_v11 = vpack.c.bf16 %v978_v10, %v977_v9  ;;  %v979_v12 = vld [vmem:[%s5886_s28 + $0x20] sm:$0xff]  ;;  %v980_v13 = vld [vmem:[%s5886_s28 + $0x28] sm:$0xff]  ;;  %v981_v15 = vld [vmem:[%s5886_s28 + $0x30] sm:$0xff] }
  0x40   : > { %5238 = vmatprep.subr.msk.bf16.mxu1 %vm5991_vm4, %v5236_v50  ;;  %v5250_v14 = vpack.c.bf16 %v980_v13, %v979_v12  ;;  %v982_v16 = vld [vmem:[%s5886_s28 + $0x38] sm:$0xff]  ;;  %v1090_v18 = vld [vmem:[%s6951_s1] sm:$0xff]  ;;  %v1091_v19 = vld [vmem:[%s6951_s1 + $0x8] sm:$0xff] }
  0x41   : > { %v5254_v17 = vpack.c.bf16 %v982_v16, %v981_v15  ;;  %v5258_v20 = vpack.c.bf16 %v1091_v19, %v1090_v18  ;;  %v4154_v25 = vld [vmem:[%s6952_s9] ss:$0 sm:$0xff]  ;;  %v1092_v36 = vld [vmem:[%s6951_s1 + $0x10] sm:$0xff]  ;;  %v1093_v37 = vld [vmem:[%s6951_s1 + $0x18] sm:$0xff] }
  0x42   : > { %5211 = vmatpush3.bf16.msra.mxu0 %v5210_v47  ;;  %v5262_v38 = vpack.c.bf16 %v1093_v37, %v1092_v36  ;;  %v1094_v39 = vld [vmem:[%s6951_s1 + $0x20] sm:$0xff]  ;;  %v1095_v40 = vld [vmem:[%s6951_s1 + $0x28] sm:$0xff]  ;;  %vm6065_vm8 = vmpackc.low %vm1104_vm6, %vm5760_vm3 }
  0x43   : > { %5213 = vmatprep.subr.bf16.mxu0 %v5212_v51  ;;  %5241 = vmatpush3.bf16.msk.msra.mxu1 %vm5991_vm4, %v5236_v50  ;;  %v1075_v41 = vld [vmem:[%s6917_s16 + $0x1] sm:$0x1]  ;;  %v5266_v42 = vpack.c.bf16 %v1095_v40, %v1094_v39  ;;  %v1076_v43 = vld [vmem:[%s6953_s25] sm:$0x1]  ;;  %v1096_v48 = vld [vmem:[%s6951_s1 + $0x30] sm:$0xff] }
  0x44   : > { %5243 = vmatprep.subr.bf16.mxu1 %v5242_v58  ;;  %v1074_v44 = vld [vmem:[%s6917_s16] sm:$0x1]  ;;  %v6060_v45 = vmul.f32 %v1076_v43, %v1075_v41  ;;  %v1097_v49 = vld [vmem:[%s6951_s1 + $0x38] sm:$0x7f]  ;;  %v4168_v52 = vld [vmem:[%s6951_s1 + $0x48] sm:$0xff] }
  0x45   : > { %v6062_v46 = vmul.f32 %v1076_v43, %v1074_v44  ;;  %v5270_v50 = vpack.c.bf16 %v1097_v49, %v1096_v48  ;;  %v4167_v51 = vld [vmem:[%s6951_s1 + $0x40] sm:$0xff]  ;;  %v4169_v61 = vld [vmem:[%s6951_s1 + $0x50] sm:$0xff]  ;;  %v4170_v62 = vld [vmem:[%s6951_s1 + $0x58] sm:$0xff] }
  0x46   : > { %5215 = vmatpush3.bf16.msra.mxu0 %v5214_v57  ;;  %4667 = vmatmul.mubr.msk.f32.vlgmr.msra.gmra.mrb[0].mxu1 %vm812_vm1, %v764_v0  ;;  %1081 = vst.msk [vmem:[#allocation2 + $0x10] sm:$0x1] %vm1079_vm7, %v6060_v45  ;;  %v5294_v53 = vpack.c.bf16 %v4168_v52, %v4167_v51  ;;  %v4158_v54 = vld [vmem:[%s6956_s18] ss:$0 sm:$0xff]  ;;  %v5298_v4 = vpack.c.bf16 %v4170_v62, %v4169_v61  ;;  %v4183_v13 = vld [vmem:[%s6951_s1 + $0x90] sm:$0xff]  ;;  %v4214_v41 = vld [vmem:[%s6951_s1 + $0x128] sm:$0xff] }
  0x47   : > { %5217 = vmatprep.subr.bf16.mxu0 %v5216_v59  ;;  %5245 = vmatpush3.bf16.msra.mxu1 %v5242_v58  ;;  %1080 = vst.msk [vmem:[#allocation2] sm:$0x1] %vm1079_vm7, %v6062_v46  ;;  %v4181_v10 = vld [vmem:[%s6951_s1 + $0x80] sm:$0xff]  ;;  %v4187_v19 = vld [vmem:[%s6951_s1 + $0xb0] sm:$0xff]  ;;  %v4216_v44 = vld [vmem:[%s6951_s1 + $0x138] sm:$0x7f] }
  0x48   : > { %5247 = vmatprep.subr.bf16.mxu1 %v5246_v11  ;;  %v4185_v16 = vld [vmem:[%s6951_s1 + $0xa0] sm:$0xff]  ;;  %v4211_v37 = vld [vmem:[%s6951_s1 + $0x110] sm:$0xff]  ;;  %v4238_v62 = vld [vmem:[%s6951_s1 + $0x188] sm:$0xff] }
  0x49   : > { %v4213_v40 = vld [vmem:[%s6951_s1 + $0x120] sm:$0xff]  ;;  %v4215_v43 = vld [vmem:[%s6951_s1 + $0x130] sm:$0xff] }
  0x4a   : > { %5219 = vmatpush3.bf16.msra.mxu0 %v5218_v1  ;;  %v4171_v1 = vld [vmem:[%s6951_s1 + $0x60] sm:$0xff]  ;;  %v5414_v48 = vpack.c.bf16 %v4216_v44, %v4215_v43  ;;  %v4225_v52 = vld [vmem:[%s6951_s1 + $0x150] sm:$0xff] }
  0x4b   : > { %5221 = vmatprep.subr.bf16.mxu0 %v5220_v2  ;;  %5249 = vmatpush3.bf16.msra.mxu1 %v5246_v11  ;;  %v4182_v11 = vld [vmem:[%s6951_s1 + $0x88] sm:$0xff]  ;;  %v4223_v49 = vld [vmem:[%s6951_s1 + $0x140] sm:$0xff] }
  0x4c   : > { %5251 = vmatprep.subr.bf16.mxu1 %v5250_v14  ;;  %v5330_v12 = vpack.c.bf16 %v4182_v11, %v4181_v10  ;;  %v4237_v61 = vld [vmem:[%s6951_s1 + $0x180] sm:$0xff]  ;;  %v4243_v10 = vld [vmem:[%s6951_s1 + $0x1b0] sm:$0xff]  ;;  %v4244_v11 = vld [vmem:[%s6951_s1 + $0x1b8] sm:$0x7f] }
  0x4e   : > { %5223 = vmatpush3.bf16.msra.mxu0 %v5222_v5  ;;  %v4172_v5 = vld [vmem:[%s6951_s1 + $0x68] sm:$0xff] }
  0x4f   : > { %5253 = vmatpush3.bf16.msra.mxu1 %v5250_v14  ;;  %5259 = vmatprep.subr.bf16.mxu0 %v5258_v20  ;;  %v4184_v14 = vld [vmem:[%s6951_s1 + $0x98] sm:$0xff] }
  0x50   : > { %5255 = vmatprep.subr.bf16.mxu1 %v5254_v17  ;;  %v5334_v15 = vpack.c.bf16 %v4184_v14, %v4183_v13  ;;  %v4251_v13 = vld [vmem:[%s6951_s1 + $0x1c0] sm:$0xff]  ;;  %v4252_v14 = vld [vmem:[%s6951_s1 + $0x1c8] sm:$0xff] }
  0x51   : > { %888 = vmatmul.mubr.f32.vlgmr.msra.gmra.mrb[0].mxu0 %v759_v6  ;;  %v5302_v6 = vpack.c.bf16 %v4172_v5, %v4171_v1  ;;  %v5474_v1 = vpack.c.bf16 %v4238_v62, %v4237_v61  ;;  %v4240_v5 = vld [vmem:[%s6951_s1 + $0x198] sm:$0xff]  ;;  %v2632_v62 = vld [vmem:[%s5900_s20 + $0x30] sm:$0xff] }
  0x52   : > { %892 = vmatprep.mubr.f32.mxu0 %v763_v7  ;;  %5261 = vmatpush3.bf16.msra.mxu0 %v5258_v20  ;;  %v4173_v7 = vld [vmem:[%s6951_s1 + $0x70] sm:$0xff]  ;;  %v2633_v61 = vld [vmem:[%s5900_s20 + $0x38] sm:$0xff] }
  0x53   : > { %5257 = vmatpush3.bf16.msra.mxu1 %v5254_v17  ;;  %5263 = vmatprep.subr.bf16.mxu0 %v5262_v38  ;;  %v4186_v17 = vld [vmem:[%s6951_s1 + $0xa8] sm:$0xff] }
  0x54   : > { %5277 = vmatprep.subr.bf16.mxu1 %v5258_v20  ;;  %v5338_v18 = vpack.c.bf16 %v4186_v17, %v4185_v16  ;;  %v4253_v16 = vld [vmem:[%s6951_s1 + $0x1d0] sm:$0xff]  ;;  %v4254_v17 = vld [vmem:[%s6951_s1 + $0x1d8] sm:$0xff] }
  0x55   : > { %893 = vmatmul.mubr.f32.gmra.mrb[2].mxu0 %v762_v8  ;;  %v4174_v8 = vld [vmem:[%s6951_s1 + $0x78] sm:$0x7f] }
  0x56   : > { %5265 = vmatpush3.bf16.msra.mxu0 %v5262_v38  ;;  %v5306_v9 = vpack.c.bf16 %v4174_v8, %v4173_v7  ;;  %v4241_v7 = vld [vmem:[%s6951_s1 + $0x1a0] sm:$0xff]  ;;  %v4242_v8 = vld [vmem:[%s6951_s1 + $0x1a8] sm:$0xff] }
  0x57   : > { %5267 = vmatprep.subr.bf16.mxu0 %v5266_v42 }
  0x5a   : > { %5269 = vmatpush3.bf16.msra.mxu0 %v5266_v42 }
  0x5b   : > { %5272 = vmatprep.subr.msk.bf16.mxu0 %vm6065_vm8, %v5270_v50 }
  0x5e   : > { %5275 = vmatpush3.bf16.msk.msra.mxu0 %vm6065_vm8, %v5270_v50 }
  0x5f   : > { %5295 = vmatprep.subr.bf16.mxu0 %v5294_v53 }
 0x119   : > { %v4668_v21 = vpop.f32.mrb[0].mxu1 }
 0x11a   : > { %v964_v22 = vpop.f32.mrb[1].mxu1 }
 0x124   : > { %v4356_v23 = vpop.f32.mrb[0].mxu0 }
 0x125   : > { %v4357_v24 = vpop.f32.mrb[1].mxu0 }
 0x126   : > { %v4358_v26 = vadd.f32 %v4357_v24, %v4356_v23  ;;  %v4196_v23 = vld [vmem:[%s6951_s1 + $0xc8] sm:$0xff] }
 0x128   : > { %v4359_v27 = vpop.f32.mrb[2].mxu0  ;;  %v890_v28 = vadd.f32 %v4358_v26, %v4154_v25  ;;  %v4198_v26 = vld [vmem:[%s6951_s1 + $0xd8] sm:$0xff] }
 0x129   : > { %v4360_v29 = vpop.f32.mrb[3].mxu0 }
 0x12a   : > { %v4361_v30 = vadd.f32 %v4360_v29, %v4359_v27  ;;  %v965_v31 = vadd.f32 %v964_v22, %v890_v28  ;;  %v4195_v22 = vld [vmem:[%s6951_s1 + $0xc0] sm:$0xff]  ;;  %v4200_v29 = vld [vmem:[%s6951_s1 + $0xe8] sm:$0xff] }
 0x12b   : > { %v5366_v24 = vpack.c.bf16 %v4196_v23, %v4195_v22  ;;  %v4199_v28 = vld [vmem:[%s6951_s1 + $0xe0] sm:$0xff]  ;;  %v4257_v22 = vld [vmem:[%s6951_s1 + $0x1f0] sm:$0xff]  ;;  %v4258_v23 = vld [vmem:[%s6951_s1 + $0x1f8] sm:$0x7f] }
 0x12c   : > { %v895_v32 = vadd.f32 %v4361_v30, %v4154_v25  ;;  %v973_v33 = vmax.f32 %v965_v31, 0.0  ;;  %v4197_v25 = vld [vmem:[%s6951_s1 + $0xd0] sm:$0xff]  ;;  %v5374_v30 = vpack.c.bf16 %v4200_v29, %v4199_v28  ;;  %v4268_v29 = vld [vmem:[%s6951_s1 + $0x218] sm:$0xff] }
 0x12d   : > { %v5370_v27 = vpack.c.bf16 %v4198_v26, %v4197_v25  ;;  %v4201_v31 = vld [vmem:[%s6951_s1 + $0xf0] sm:$0xff]  ;;  %v4265_v25 = vld [vmem:[%s6951_s1 + $0x200] sm:$0xff]  ;;  %v4266_v26 = vld [vmem:[%s6951_s1 + $0x208] sm:$0xff] }
 0x12e   : > { %v970_v34 = vadd.f32 %v4668_v21, %v895_v32  ;;  %4685 = vmatprep.mubr.msk.f32.mxu1 %vm990_vm5, %v973_v33  ;;  %v4202_v32 = vld [vmem:[%s6951_s1 + $0xf8] sm:$0x7f]  ;;  %v4267_v28 = vld [vmem:[%s6951_s1 + $0x210] sm:$0xff] }
 0x12f   : > { %v5378_v33 = vpack.c.bf16 %v4202_v32, %v4201_v31  ;;  %v4269_v31 = vld [vmem:[%s6951_s1 + $0x220] sm:$0xff]  ;;  %v4270_v32 = vld [vmem:[%s6951_s1 + $0x228] sm:$0xff] }
 0x130   : > { %v974_v35 = vmax.f32 %v970_v34, 0.0  ;;  %v4209_v34 = vld [vmem:[%s6951_s1 + $0x100] sm:$0xff] }
 0x132   : > { %4686 = vmatmul.mubr.msk.f32.vlgmr.msra.gmra.mrb[2].mxu1 %vm990_vm5, %v974_v35  ;;  %v4210_v35 = vld [vmem:[%s6951_s1 + $0x108] sm:$0xff] }
 0x133   : > { %5279 = vmatpush3.bf16.msra.mxu1 %v5258_v20  ;;  %v4188_v20 = vld [vmem:[%s6951_s1 + $0xb8] sm:$0x7f]  ;;  %v5402_v36 = vpack.c.bf16 %v4210_v35, %v4209_v34  ;;  %v4271_v34 = vld [vmem:[%s6951_s1 + $0x230] sm:$0xff] }
 0x134   : > { %5281 = vmatprep.subr.bf16.mxu1 %v5262_v38  ;;  %v5342_v21 = vpack.c.bf16 %v4188_v20, %v4187_v19  ;;  %v4255_v19 = vld [vmem:[%s6951_s1 + $0x1e0] sm:$0xff]  ;;  %v4256_v20 = vld [vmem:[%s6951_s1 + $0x1e8] sm:$0xff]  ;;  %v4272_v35 = vld [vmem:[%s6951_s1 + $0x238] sm:$0x7f] }
 0x137   : > { %5283 = vmatpush3.bf16.msra.mxu1 %v5262_v38  ;;  %v4212_v38 = vld [vmem:[%s6951_s1 + $0x118] sm:$0xff] }
 0x138   : > { %5285 = vmatprep.subr.bf16.mxu1 %v5266_v42  ;;  %v5406_v39 = vpack.c.bf16 %v4212_v38, %v4211_v37 }
 0x13b   : > { %5287 = vmatpush3.bf16.msra.mxu1 %v5266_v42  ;;  %v5410_v42 = vpack.c.bf16 %v4214_v41, %v4213_v40  ;;  %v2618_v40 = vld [vmem:[%s5895_s30] sm:$0xff] }
 0x13c   : > { %5290 = vmatprep.subr.msk.bf16.mxu1 %vm6065_vm8, %v5270_v50 }
 0x13f   : > { %5293 = vmatpush3.bf16.msk.msra.mxu1 %vm6065_vm8, %v5270_v50  ;;  %v4224_v50 = vld [vmem:[%s6951_s1 + $0x148] sm:$0xff] }
 0x140   : > { %5313 = vmatprep.subr.bf16.mxu1 %v5294_v53  ;;  %v5438_v51 = vpack.c.bf16 %v4224_v50, %v4223_v49  ;;  %v2628_v50 = vld [vmem:[%s5900_s20 + $0x10] sm:$0xff] }
 0x205   : > { %v4687_v55 = vpop.f32.mrb[2].mxu1 }
 0x206   : > { %v1069_v56 = vadd.f32 %v4687_v55, %v4158_v54  ;;  %v1063_v57 = vpop.f32.mrb[3].mxu1  ;;  %v4227_v55 = vld [vmem:[%s6951_s1 + $0x160] sm:$0xff] }
 0x207   : > { %v1064_v58 = vadd.f32 %v4158_v54, %v1063_v57 }
 0x208   : > { %v1073_v59 = vmax.f32 %v1069_v56, 0.0  ;;  %v4228_v56 = vld [vmem:[%s6951_s1 + $0x168] sm:$0xff] }
 0x209   : > { %v1072_v60 = vmax.f32 %v1064_v58, 0.0  ;;  %v5446_v57 = vpack.c.bf16 %v4228_v56, %v4227_v55  ;;  %v4229_v58 = vld [vmem:[%s6951_s1 + $0x170] sm:$0xff] }
 0x20a   : > { %1085 = vst.msk [vmem:[#allocation2 + $0x11] sm:$0xff] %vm1082_vm9, %v1073_v59  ;;  %v4230_v59 = vld [vmem:[%s6951_s1 + $0x178] sm:$0x7f] }
 0x20b   : > { %1083 = vst.msk [vmem:[#allocation2 + $0x1] sm:$0xff] %vm1082_vm9, %v1072_v60  ;;  %v5450_v60 = vpack.c.bf16 %v4230_v59, %v4229_v58  ;;  %v2627_v58 = vld [vmem:[%s5900_s20 + $0x8] sm:$0xff] }
 0x20c   : > { %v2631_v59 = vld [vmem:[%s5900_s20 + $0x28] sm:$0xff] }
 0x211   : > { %v6106_v63 = vld [vmem:[#allocation2 + $0x10] sm:$0xff]  ;;  %v6108_v0 = vld [vmem:[#allocation2 + $0x18] sm:$0x1] }
 0x212   : > { %4723 = vmatprep.mubr.msk.f32.mxu1 %vm1082_vm9, %v6106_v63  ;;  %v6115_v2 = vld [vmem:[#allocation2] sm:$0xff]  ;;  %v6117_v3 = vld [vmem:[#allocation2 + $0x8] sm:$0x1] }
 0x213   : > { %4704 = vmatprep.mubr.msk.f32.mxu0 %vm1082_vm9, %v6115_v2  ;;  %4724 = vmatmul.mubr.msk.f32.vlgmr.msra.gmra.mrb[4].mxu1 %vm1082_vm9, %v6108_v0 }
 0x214   : > { %5315 = vmatpush3.bf16.msra.mxu1 %v5294_v53  ;;  %4705 = vmatmul.mubr.msk.f32.vlgmr.msra.gmra.mrb[4].mxu0 %vm1082_vm9, %v6117_v3 }
 0x215   : > { %5297 = vmatpush3.bf16.msra.mxu0 %v5294_v53  ;;  %4761 = vmatprep.mubr.msk.f32.mxu1 %vm1082_vm9, %v6106_v63  ;;  %v4226_v53 = vld [vmem:[%s6951_s1 + $0x158] sm:$0xff] }
 0x216   : > { %4742 = vmatprep.mubr.msk.f32.mxu0 %vm1082_vm9, %v6115_v2  ;;  %5317 = vmatprep.subr.bf16.mxu1 %v5298_v4  ;;  %v5442_v54 = vpack.c.bf16 %v4226_v53, %v4225_v52  ;;  %v5761_v53 = vmov 0  }
 0x217   : > { %5299 = vmatprep.subr.bf16.mxu0 %v5298_v4  ;;  %5695 = vset.pattern.permute.xlu1 %v5761_v53 }
 0x218   : > { %5319 = vmatpush3.bf16.msra.mxu1 %v5298_v4  ;;  %5694 = vset.pattern.permute.xlu0 %v5761_v53 }
 0x219   : > { %5301 = vmatpush3.bf16.msra.mxu0 %v5298_v4  ;;  %5321 = vmatprep.subr.bf16.mxu1 %v5302_v6  ;;  %v4239_v4 = vld [vmem:[%s6951_s1 + $0x190] sm:$0xff] }
 0x21a   : > { %5303 = vmatprep.subr.bf16.mxu0 %v5302_v6  ;;  %2646 = vperm.xlu1 %5695, %v2628_v50  }
 0x21c   : > { %5323 = vmatpush3.bf16.msra.mxu1 %v5302_v6 }
 0x21d   : > { %5305 = vmatpush3.bf16.msra.mxu0 %v5302_v6  ;;  %5326 = vmatprep.subr.msk.bf16.mxu1 %vm6065_vm8, %v5306_v9  ;;  %v5478_v6 = vpack.c.bf16 %v4240_v5, %v4239_v4  ;;  %v3143_v4 = vld [vmem:[%s5905_s23 + $0x8] sm:$0xff] }
 0x21e   : > { %5308 = vmatprep.subr.msk.bf16.mxu0 %vm6065_vm8, %v5306_v9 }
 0x220   : > { %5329 = vmatpush3.bf16.msk.msra.mxu1 %vm6065_vm8, %v5306_v9 }
 0x221   : > { %5311 = vmatpush3.bf16.msk.msra.mxu0 %vm6065_vm8, %v5306_v9  ;;  %5349 = vmatprep.subr.bf16.mxu1 %v5330_v12  ;;  %v5482_v9 = vpack.c.bf16 %v4242_v8, %v4241_v7 }
 0x222   : > { %5331 = vmatprep.subr.bf16.mxu0 %v5330_v12 }
 0x223   : > { %4762 = vmatmul.mubr.msk.f32.vlgmr.msra.gmra.mrb[6].mxu1 %vm1082_vm9, %v6108_v0 }
 0x224   : > { %4743 = vmatmul.mubr.msk.f32.vlgmr.msra.gmra.mrb[6].mxu0 %vm1082_vm9, %v6117_v3  ;;  %5351 = vmatpush3.bf16.msra.mxu1 %v5330_v12 }
 0x225   : > { %4799 = vmatprep.mubr.msk.f32.mxu1 %vm1082_vm9, %v6106_v63  ;;  %5333 = vmatpush3.bf16.msra.mxu0 %v5330_v12  ;;  %v5486_v12 = vpack.c.bf16 %v4244_v11, %v4243_v10  ;;  %v3144_v10 = vld [vmem:[%s5905_s23 + $0x10] sm:$0xff]  ;;  %v3207_v11 = vld [vmem:[%s5910_s3 + $0x8] sm:$0xff] }
 0x226   : > { %4780 = vmatprep.mubr.msk.f32.mxu0 %vm1082_vm9, %v6115_v2  ;;  %5353 = vmatprep.subr.bf16.mxu1 %v5334_v15 }
 0x227   : > { %5335 = vmatprep.subr.bf16.mxu0 %v5334_v15 }
 0x228   : > { %5355 = vmatpush3.bf16.msra.mxu1 %v5334_v15 }
 0x229   : > { %5337 = vmatpush3.bf16.msra.mxu0 %v5334_v15  ;;  %5357 = vmatprep.subr.bf16.mxu1 %v5338_v18  ;;  %v5510_v15 = vpack.c.bf16 %v4252_v14, %v4251_v13 }
 0x22a   : > { %5339 = vmatprep.subr.bf16.mxu0 %v5338_v18 }
 0x22c   : > { %5359 = vmatpush3.bf16.msra.mxu1 %v5338_v18 }
 0x22d   : > { %5341 = vmatpush3.bf16.msra.mxu0 %v5338_v18  ;;  %5362 = vmatprep.subr.msk.bf16.mxu1 %vm6065_vm8, %v5342_v21  ;;  %v5514_v18 = vpack.c.bf16 %v4254_v17, %v4253_v16 }
 0x22e   : > { %5344 = vmatprep.subr.msk.bf16.mxu0 %vm6065_vm8, %v5342_v21 }
 0x230   : > { %5365 = vmatpush3.bf16.msk.msra.mxu1 %vm6065_vm8, %v5342_v21 }
 0x231   : > { %5347 = vmatpush3.bf16.msk.msra.mxu0 %vm6065_vm8, %v5342_v21  ;;  %5385 = vmatprep.subr.bf16.mxu1 %v5366_v24  ;;  %v5518_v21 = vpack.c.bf16 %v4256_v20, %v4255_v19  ;;  %v3145_v19 = vld [vmem:[%s5905_s23 + $0x18] sm:$0xff]  ;;  %v3146_v20 = vld [vmem:[%s5905_s23 + $0x20] sm:$0xff] }
 0x232   : > { %5367 = vmatprep.subr.bf16.mxu0 %v5366_v24 }
 0x233   : > { %4800 = vmatmul.mubr.msk.f32.vlgmr.msra.gmra.mrb[8].mxu1 %vm1082_vm9, %v6108_v0 }
 0x234   : > { %4781 = vmatmul.mubr.msk.f32.vlgmr.msra.gmra.mrb[8].mxu0 %vm1082_vm9, %v6117_v3  ;;  %5387 = vmatpush3.bf16.msra.mxu1 %v5366_v24 }
 0x235   : > { %4837 = vmatprep.mubr.msk.f32.mxu1 %vm1082_vm9, %v6106_v63  ;;  %5369 = vmatpush3.bf16.msra.mxu0 %v5366_v24  ;;  %v5522_v24 = vpack.c.bf16 %v4258_v23, %v4257_v22 }
 0x236   : > { %4818 = vmatprep.mubr.msk.f32.mxu0 %vm1082_vm9, %v6115_v2  ;;  %5389 = vmatprep.subr.bf16.mxu1 %v5370_v27 }
 0x237   : > { %5371 = vmatprep.subr.bf16.mxu0 %v5370_v27 }
 0x238   : > { %5391 = vmatpush3.bf16.msra.mxu1 %v5370_v27 }
 0x239   : > { %5373 = vmatpush3.bf16.msra.mxu0 %v5370_v27  ;;  %5393 = vmatprep.subr.bf16.mxu1 %v5374_v30  ;;  %v5546_v27 = vpack.c.bf16 %v4266_v26, %v4265_v25  ;;  %v3147_v26 = vld [vmem:[%s5905_s23 + $0x28] sm:$0xff] }
 0x23a   : > { %5375 = vmatprep.subr.bf16.mxu0 %v5374_v30 }
 0x23c   : > { %5395 = vmatpush3.bf16.msra.mxu1 %v5374_v30 }
 0x23d   : > { %5377 = vmatpush3.bf16.msra.mxu0 %v5374_v30  ;;  %5398 = vmatprep.subr.msk.bf16.mxu1 %vm6065_vm8, %v5378_v33  ;;  %v5550_v30 = vpack.c.bf16 %v4268_v29, %v4267_v28 }
 0x23e   : > { %5380 = vmatprep.subr.msk.bf16.mxu0 %vm6065_vm8, %v5378_v33 }
 0x240   : > { %5401 = vmatpush3.bf16.msk.msra.mxu1 %vm6065_vm8, %v5378_v33 }
 0x241   : > { %5383 = vmatpush3.bf16.msk.msra.mxu0 %vm6065_vm8, %v5378_v33  ;;  %5421 = vmatprep.subr.bf16.mxu1 %v5402_v36  ;;  %v5554_v33 = vpack.c.bf16 %v4270_v32, %v4269_v31 }
 0x242   : > { %5403 = vmatprep.subr.bf16.mxu0 %v5402_v36 }
 0x243   : > { %4838 = vmatmul.mubr.msk.f32.vlgmr.msra.gmra.mrb[10].mxu1 %vm1082_vm9, %v6108_v0 }
 0x244   : > { %4819 = vmatmul.mubr.msk.f32.vlgmr.msra.gmra.mrb[10].mxu0 %vm1082_vm9, %v6117_v3  ;;  %5423 = vmatpush3.bf16.msra.mxu1 %v5402_v36 }
 0x245   : > { %4875 = vmatprep.mubr.msk.f32.mxu1 %vm1082_vm9, %v6106_v63  ;;  %5405 = vmatpush3.bf16.msra.mxu0 %v5402_v36  ;;  %v5558_v36 = vpack.c.bf16 %v4272_v35, %v4271_v34 }
 0x246   : > { %4856 = vmatprep.mubr.msk.f32.mxu0 %vm1082_vm9, %v6115_v2  ;;  %5425 = vmatprep.subr.bf16.mxu1 %v5406_v39 }
 0x247   : > { %5407 = vmatprep.subr.bf16.mxu0 %v5406_v39 }
 0x248   : > { %5427 = vmatpush3.bf16.msra.mxu1 %v5406_v39 }
 0x249   : > { %5409 = vmatpush3.bf16.msra.mxu0 %v5406_v39  ;;  %5429 = vmatprep.subr.bf16.mxu1 %v5410_v42 }
 0x24a   : > { %5411 = vmatprep.subr.bf16.mxu0 %v5410_v42 }
 0x24c   : > { %5431 = vmatpush3.bf16.msra.mxu1 %v5410_v42 }
 0x24d   : > { %5413 = vmatpush3.bf16.msra.mxu0 %v5410_v42  ;;  %5434 = vmatprep.subr.msk.bf16.mxu1 %vm6065_vm8, %v5414_v48 }
 0x24e   : > { %5416 = vmatprep.subr.msk.bf16.mxu0 %vm6065_vm8, %v5414_v48 }
 0x250   : > { %5437 = vmatpush3.bf16.msk.msra.mxu1 %vm6065_vm8, %v5414_v48 }
 0x251   : > { %5419 = vmatpush3.bf16.msk.msra.mxu0 %vm6065_vm8, %v5414_v48  ;;  %5457 = vmatprep.subr.bf16.mxu1 %v5438_v51 }
 0x252   : > { %5439 = vmatprep.subr.bf16.mxu0 %v5438_v51 }
 0x253   : > { %4876 = vmatmul.mubr.msk.f32.vlgmr.msra.gmra.mrb[12].mxu1 %vm1082_vm9, %v6108_v0 }
 0x254   : > { %4857 = vmatmul.mubr.msk.f32.vlgmr.msra.gmra.mrb[12].mxu0 %vm1082_vm9, %v6117_v3  ;;  %5459 = vmatpush3.bf16.msra.mxu1 %v5438_v51 }
 0x255   : > { %4913 = vmatprep.mubr.msk.f32.mxu1 %vm1082_vm9, %v6106_v63  ;;  %5441 = vmatpush3.bf16.msra.mxu0 %v5438_v51  ;;  %v2626_v51 = vld [vmem:[%s5900_s20] sm:$0xff] }
 0x256   : > { %4894 = vmatprep.mubr.msk.f32.mxu0 %vm1082_vm9, %v6115_v2  ;;  %5461 = vmatprep.subr.bf16.mxu1 %v5442_v54 }
 0x257   : > { %5443 = vmatprep.subr.bf16.mxu0 %v5442_v54  ;;  %2636 = vperm.xlu0 %5694, %v2626_v51  }
 0x258   : > { %5463 = vmatpush3.bf16.msra.mxu1 %v5442_v54 }
 0x259   : > { %5445 = vmatpush3.bf16.msra.mxu0 %v5442_v54  ;;  %5465 = vmatprep.subr.bf16.mxu1 %v5446_v57 }
 0x25a   : > { %5447 = vmatprep.subr.bf16.mxu0 %v5446_v57 }
 0x25b   : > { %2641 = vperm.xlu0 %5694, %v2627_v58  }
 0x25c   : > { %5467 = vmatpush3.bf16.msra.mxu1 %v5446_v57 }
 0x25d   : > { %5449 = vmatpush3.bf16.msra.mxu0 %v5446_v57  ;;  %5470 = vmatprep.subr.msk.bf16.mxu1 %vm6065_vm8, %v5450_v60  ;;  %v2629_v57 = vld [vmem:[%s5900_s20 + $0x18] sm:$0xff] }
 0x25e   : > { %5452 = vmatprep.subr.msk.bf16.mxu0 %vm6065_vm8, %v5450_v60  ;;  %2651 = vperm.xlu1 %5695, %v2629_v57  }
 0x260   : > { %5473 = vmatpush3.bf16.msk.msra.mxu1 %vm6065_vm8, %v5450_v60 }
 0x261   : > { %5455 = vmatpush3.bf16.msk.msra.mxu0 %vm6065_vm8, %v5450_v60  ;;  %5493 = vmatprep.subr.bf16.mxu1 %v5474_v1  ;;  %v2630_v60 = vld [vmem:[%s5900_s20 + $0x20] sm:$0xff] }
 0x262   : > { %5475 = vmatprep.subr.bf16.mxu0 %v5474_v1  ;;  %2661 = vperm.xlu1 %5695, %v2631_v59  }
 0x263   : > { %4914 = vmatmul.mubr.msk.f32.vlgmr.msra.gmra.mrb[14].mxu1 %vm1082_vm9, %v6108_v0  ;;  %2656 = vperm.xlu0 %5694, %v2630_v60  }
 0x264   : > { %4895 = vmatmul.mubr.msk.f32.vlgmr.msra.gmra.mrb[14].mxu0 %vm1082_vm9, %v6117_v3  ;;  %5495 = vmatpush3.bf16.msra.mxu1 %v5474_v1 }
 0x265   : > { %4951 = vmatprep.mubr.msk.f32.mxu1 %vm1082_vm9, %v6106_v63  ;;  %5477 = vmatpush3.bf16.msra.mxu0 %v5474_v1  ;;  %v3142_v1 = vld [vmem:[%s5905_s23] sm:$0xff] }
 0x266   : > { %4932 = vmatprep.mubr.msk.f32.mxu0 %vm1082_vm9, %v6115_v2  ;;  %5497 = vmatprep.subr.bf16.mxu1 %v5478_v6 }
 0x267   : > { %5479 = vmatprep.subr.bf16.mxu0 %v5478_v6  ;;  %2671 = vperm.xlu1 %5695, %v2633_v61   ;;  %v2619_v61 = vld [vmem:[%s5895_s30 + $0x8] sm:$0xff] }
 0x268   : > { %5499 = vmatpush3.bf16.msra.mxu1 %v5478_v6  ;;  %2666 = vperm.xlu0 %5694, %v2632_v62   ;;  %v2620_v62 = vld [vmem:[%s5895_s30 + $0x10] sm:$0xff] }
 0x269   : > { %5481 = vmatpush3.bf16.msra.mxu0 %v5478_v6  ;;  %5501 = vmatprep.subr.bf16.mxu1 %v5482_v9 }
 0x26a   : > { %5483 = vmatprep.subr.bf16.mxu0 %v5482_v9 }
 0x26b   : > { %3152 = vperm.xlu1 %5695, %v3142_v1   ;;  %v2621_v1 = vld [vmem:[%s5895_s30 + $0x18] sm:$0xff] }
 0x26c   : > { %5503 = vmatpush3.bf16.msra.mxu1 %v5482_v9  ;;  %3157 = vperm.xlu0 %5694, %v3143_v4   ;;  %v2622_v4 = vld [vmem:[%s5895_s30 + $0x20] sm:$0xff] }
 0x26d   : > { %5485 = vmatpush3.bf16.msra.mxu0 %v5482_v9  ;;  %5506 = vmatprep.subr.msk.bf16.mxu1 %vm6065_vm8, %v5486_v12  ;;  %v3206_v9 = vld [vmem:[%s5910_s3] sm:$0xff] }
 0x26e   : > { %5488 = vmatprep.subr.msk.bf16.mxu0 %vm6065_vm8, %v5486_v12 }
 0x26f   : > { %3216 = vperm.xlu1 %5695, %v3206_v9  }
 0x270   : > { %5509 = vmatpush3.bf16.msk.msra.mxu1 %vm6065_vm8, %v5486_v12  ;;  %3162 = vperm.xlu0 %5694, %v3144_v10  }
 0x271   : > { %5491 = vmatpush3.bf16.msk.msra.mxu0 %vm6065_vm8, %v5486_v12  ;;  %5529 = vmatprep.subr.bf16.mxu1 %v5510_v15  ;;  %v3208_v12 = vld [vmem:[%s5910_s3 + $0x10] sm:$0xff] }
 0x272   : > { %5511 = vmatprep.subr.bf16.mxu0 %v5510_v15 }
 0x273   : > { %4952 = vmatmul.mubr.msk.f32.vlgmr.msra.gmra.mrb[16].mxu1 %vm1082_vm9, %v6108_v0  ;;  %3221 = vperm.xlu1 %5695, %v3207_v11  }
 0x274   : > { %4933 = vmatmul.mubr.msk.f32.vlgmr.msra.gmra.mrb[16].mxu0 %vm1082_vm9, %v6117_v3  ;;  %5531 = vmatpush3.bf16.msra.mxu1 %v5510_v15 }
 0x275   : > { %4989 = vmatprep.mubr.msk.f32.mxu1 %vm1082_vm9, %v6106_v63  ;;  %5513 = vmatpush3.bf16.msra.mxu0 %v5510_v15 }
 0x276   : > { %4970 = vmatprep.mubr.msk.f32.mxu0 %vm1082_vm9, %v6115_v2  ;;  %5533 = vmatprep.subr.bf16.mxu1 %v5514_v18 }
 0x277   : > { %5515 = vmatprep.subr.bf16.mxu0 %v5514_v18  ;;  %3226 = vperm.xlu0 %5694, %v3208_v12  }
 0x278   : > { %5535 = vmatpush3.bf16.msra.mxu1 %v5514_v18  ;;  %3167 = vperm.xlu1 %5695, %v3145_v19  }
 0x279   : > { %5517 = vmatpush3.bf16.msra.mxu0 %v5514_v18  ;;  %5537 = vmatprep.subr.bf16.mxu1 %v5518_v21 }
 0x27a   : > { %5519 = vmatprep.subr.bf16.mxu0 %v5518_v21 }
 0x27b   : > { %3172 = vperm.xlu0 %5694, %v3146_v20  }
 0x27c   : > { %5539 = vmatpush3.bf16.msra.mxu1 %v5518_v21 }
 0x27d   : > { %5521 = vmatpush3.bf16.msra.mxu0 %v5518_v21  ;;  %5542 = vmatprep.subr.msk.bf16.mxu1 %vm6065_vm8, %v5522_v24  ;;  %v3209_v21 = vld [vmem:[%s5910_s3 + $0x18] sm:$0xff] }
 0x27e   : > { %5524 = vmatprep.subr.msk.bf16.mxu0 %vm6065_vm8, %v5522_v24  ;;  %3231 = vperm.xlu1 %5695, %v3209_v21  }
 0x280   : > { %5545 = vmatpush3.bf16.msk.msra.mxu1 %vm6065_vm8, %v5522_v24 }
 0x281   : > { %5527 = vmatpush3.bf16.msk.msra.mxu0 %vm6065_vm8, %v5522_v24  ;;  %5565 = vmatprep.subr.bf16.mxu1 %v5546_v27 }
 0x282   : > { %5547 = vmatprep.subr.bf16.mxu0 %v5546_v27  ;;  %3177 = vperm.xlu1 %5695, %v3147_v26  }
 0x283   : > { %4990 = vmatmul.mubr.msk.f32.vlgmr.msra.gmra.mrb[18].mxu1 %vm1082_vm9, %v6108_v0 }
 0x284   : > { %4971 = vmatmul.mubr.msk.f32.vlgmr.msra.gmra.mrb[18].mxu0 %vm1082_vm9, %v6117_v3  ;;  %5567 = vmatpush3.bf16.msra.mxu1 %v5546_v27 }
 0x285   : > { %5027 = vmatprep.mubr.msk.f32.mxu1 %vm1082_vm9, %v6106_v63  ;;  %5549 = vmatpush3.bf16.msra.mxu0 %v5546_v27 }
 0x286   : > { %5008 = vmatprep.mubr.msk.f32.mxu0 %vm1082_vm9, %v6115_v2  ;;  %5569 = vmatprep.subr.bf16.mxu1 %v5550_v30 }
 0x287   : > { %5551 = vmatprep.subr.bf16.mxu0 %v5550_v30 }
 0x288   : > { %5571 = vmatpush3.bf16.msra.mxu1 %v5550_v30 }
 0x289   : > { %5553 = vmatpush3.bf16.msra.mxu0 %v5550_v30  ;;  %5573 = vmatprep.subr.bf16.mxu1 %v5554_v33 }
 0x28a   : > { %5555 = vmatprep.subr.bf16.mxu0 %v5554_v33 }
 0x28c   : > { %5575 = vmatpush3.bf16.msra.mxu1 %v5554_v33 }
 0x28d   : > { %5557 = vmatpush3.bf16.msra.mxu0 %v5554_v33  ;;  %5578 = vmatprep.subr.msk.bf16.mxu1 %vm6065_vm8, %v5558_v36 }
 0x28e   : > { %5560 = vmatprep.subr.msk.bf16.mxu0 %vm6065_vm8, %v5558_v36 }
 0x290   : > { %5581 = vmatpush3.bf16.msk.msra.mxu1 %vm6065_vm8, %v5558_v36 }
 0x291   : > { %5563 = vmatpush3.bf16.msk.msra.mxu0 %vm6065_vm8, %v5558_v36 }
 0x293   : > { %5028 = vmatmul.mubr.msk.f32.vlgmr.msra.gmra.mrb[20].mxu1 %vm1082_vm9, %v6108_v0 }
 0x294   : > { %5009 = vmatmul.mubr.msk.f32.vlgmr.msra.gmra.mrb[20].mxu0 %vm1082_vm9, %v6117_v3  ;;  %5086 = vmatprep.mubr.msk.f32.mxu1 %vm2674_vm10, %v2618_v40 }
 0x295   : > { %5052 = vmatprep.mubr.msk.f32.mxu0 %vm2674_vm10, %v2618_v40 }
 0x2e6   : > { %v4725_v63 = vpop.f32.mrb[4].mxu1 }
 0x2e7   : > { %1267 = vst.msk [vmem:[#allocation3 + $0x60] sm:$0x1] %vm1079_vm7, %v4725_v63  ;;  %v4706_v2 = vpop.f32.mrb[4].mxu0  ;;  %v1255_v37 = vpop.f32.mrb[5].mxu1 }
 0x2e8   : > { %1265 = vst.msk [vmem:[#allocation3 + $0x8] sm:$0x1] %vm1079_vm7, %v4706_v2  ;;  %v1174_v38 = vpop.f32.mrb[5].mxu0 }
 0x2e9   : > { %1266 = vst.msk [vmem:[#allocation3 + $0x58] sm:$0xff] %vm1082_vm9, %v1255_v37  ;;  %1264 = vst.msk [vmem:[#allocation3] sm:$0xff] %vm1082_vm9, %v1174_v38 }
 0x2f0   : > { %v2607_v41 = vld [vmem:[#allocation3 + $0x58] sm:$0xff]  ;;  %v2596_v44 = vld [vmem:[#allocation3] sm:$0xff] }
 0x2f6   : > { %v4763_v47 = vpop.f32.mrb[6].mxu1 }
 0x2f7   : > { %1433 = vst.msk [vmem:[#allocation3 + $0x69] sm:$0x1] %vm1079_vm7, %v4763_v47  ;;  %v4744_v39 = vpop.f32.mrb[6].mxu0  ;;  %v1421_v0 = vpop.f32.mrb[7].mxu1 }
 0x2f8   : > { %1431 = vst.msk [vmem:[#allocation3 + $0x11] sm:$0x1] %vm1079_vm7, %v4744_v39  ;;  %v1346_v3 = vpop.f32.mrb[7].mxu0 }
 0x2f9   : > { %1432 = vst.msk [vmem:[#allocation3 + $0x61] sm:$0xff] %vm1082_vm9, %v1421_v0  ;;  %1430 = vst.msk [vmem:[#allocation3 + $0x9] sm:$0xff] %vm1082_vm9, %v1346_v3 }
 0x300   : > { %v2608_v42 = vld [vmem:[#allocation3 + $0x60] sm:$0xff]  ;;  %v2597_v48 = vld [vmem:[#allocation3 + $0x8] sm:$0xff] }
 0x301   : > { %v5602_v43 = vpack.c.bf16 %v2608_v42, %v2607_v41  ;;  %v5582_v49 = vpack.c.bf16 %v2597_v48, %v2596_v44 }
 0x303   : > { %5603 = vmatprep.subr.bf16.mxu1 %v5602_v43  ;;  %5583 = vmatprep.subr.bf16.mxu0 %v5582_v49 }
 0x304   : > { %5605 = vmatpush3.bf16.msra.mxu1 %v5602_v43  ;;  %5585 = vmatpush3.bf16.msra.mxu0 %v5582_v49 }
 0x306   : > { %v4801_v52 = vpop.f32.mrb[8].mxu1 }
 0x307   : > { %1599 = vst.msk [vmem:[#allocation3 + $0x72] sm:$0x1] %vm1079_vm7, %v4801_v52  ;;  %v4782_v54 = vpop.f32.mrb[8].mxu0  ;;  %v1587_v55 = vpop.f32.mrb[9].mxu1 }
 0x308   : > { %1597 = vst.msk [vmem:[#allocation3 + $0x1a] sm:$0x1] %vm1079_vm7, %v4782_v54  ;;  %v1512_v56 = vpop.f32.mrb[9].mxu0 }
 0x309   : > { %1598 = vst.msk [vmem:[#allocation3 + $0x6a] sm:$0xff] %vm1082_vm9, %v1587_v55  ;;  %1596 = vst.msk [vmem:[#allocation3 + $0x12] sm:$0xff] %vm1082_vm9, %v1512_v56 }
 0x310   : > { %v2609_v13 = vld [vmem:[#allocation3 + $0x68] sm:$0xff]  ;;  %v2598_v16 = vld [vmem:[#allocation3 + $0x10] sm:$0xff] }
 0x316   : > { %v4839_v5 = vpop.f32.mrb[10].mxu1 }
 0x317   : > { %1765 = vst.msk [vmem:[#allocation3 + $0x7b] sm:$0x1] %vm1079_vm7, %v4839_v5  ;;  %v4820_v6 = vpop.f32.mrb[10].mxu0  ;;  %v1753_v7 = vpop.f32.mrb[11].mxu1  ;;  %v2623_v5 = vld [vmem:[%s5895_s30 + $0x28] sm:$0xff] }
 0x318   : > { %1763 = vst.msk [vmem:[#allocation3 + $0x23] sm:$0x1] %vm1079_vm7, %v4820_v6  ;;  %v1678_v8 = vpop.f32.mrb[11].mxu0  ;;  %v2624_v6 = vld [vmem:[%s5895_s30 + $0x30] sm:$0xff] }
 0x319   : > { %1764 = vst.msk [vmem:[#allocation3 + $0x73] sm:$0xff] %vm1082_vm9, %v1753_v7  ;;  %1762 = vst.msk [vmem:[#allocation3 + $0x1b] sm:$0xff] %vm1082_vm9, %v1678_v8  ;;  %v2625_v7 = vld [vmem:[%s5895_s30 + $0x38] sm:$0xff]  ;;  %v2637_v8 = vpop.permute.xlu0 %2636 }
 0x31d   : > { %v2642_v9 = vpop.permute.xlu0 %2641 }
 0x320   : > { %v2610_v14 = vld [vmem:[#allocation3 + $0x70] sm:$0xff]  ;;  %v2599_v17 = vld [vmem:[#allocation3 + $0x18] sm:$0xff] }
 0x321   : > { %v5606_v15 = vpack.c.bf16 %v2610_v14, %v2609_v13  ;;  %v5586_v18 = vpack.c.bf16 %v2599_v17, %v2598_v16 }
 0x323   : > { %5607 = vmatprep.subr.bf16.mxu1 %v5606_v15  ;;  %5587 = vmatprep.subr.bf16.mxu0 %v5586_v18 }
 0x324   : > { %5609 = vmatpush3.bf16.msra.mxu1 %v5606_v15  ;;  %5589 = vmatpush3.bf16.msra.mxu0 %v5586_v18  ;;  %v2647_v18 = vpop.permute.xlu1 %2646 }
 0x326   : > { %v4877_v22 = vpop.f32.mrb[12].mxu1 }
 0x327   : > { %1931 = vst.msk [vmem:[#allocation3 + $0x84] sm:$0x1] %vm1079_vm7, %v4877_v22  ;;  %v4858_v23 = vpop.f32.mrb[12].mxu0  ;;  %v1919_v24 = vpop.f32.mrb[13].mxu1 }
 0x328   : > { %1929 = vst.msk [vmem:[#allocation3 + $0x2c] sm:$0x1] %vm1079_vm7, %v4858_v23  ;;  %v1844_v25 = vpop.f32.mrb[13].mxu0 }
 0x329   : > { %1930 = vst.msk [vmem:[#allocation3 + $0x7c] sm:$0xff] %vm1082_vm9, %v1919_v24  ;;  %1928 = vst.msk [vmem:[#allocation3 + $0x24] sm:$0xff] %vm1082_vm9, %v1844_v25 }
 0x330   : > { %v2611_v31 = vld [vmem:[#allocation3 + $0x78] sm:$0xff]  ;;  %v2600_v34 = vld [vmem:[#allocation3 + $0x20] sm:$0xff] }
 0x336   : > { %v4915_v27 = vpop.f32.mrb[14].mxu1 }
 0x337   : > { %2097 = vst.msk [vmem:[#allocation3 + $0x8d] sm:$0x1] %vm1079_vm7, %v4915_v27  ;;  %v4896_v28 = vpop.f32.mrb[14].mxu0  ;;  %v2085_v29 = vpop.f32.mrb[15].mxu1 }
 0x338   : > { %2095 = vst.msk [vmem:[#allocation3 + $0x35] sm:$0x1] %vm1079_vm7, %v4896_v28  ;;  %v2010_v30 = vpop.f32.mrb[15].mxu0 }
 0x339   : > { %2096 = vst.msk [vmem:[#allocation3 + $0x85] sm:$0xff] %vm1082_vm9, %v2085_v29  ;;  %2094 = vst.msk [vmem:[#allocation3 + $0x2d] sm:$0xff] %vm1082_vm9, %v2010_v30 }
 0x340   : > { %v2612_v32 = vld [vmem:[#allocation3 + $0x80] sm:$0xff]  ;;  %v2601_v35 = vld [vmem:[#allocation3 + $0x28] sm:$0xff] }
 0x341   : > { %v5610_v33 = vpack.c.bf16 %v2612_v32, %v2611_v31  ;;  %v5590_v36 = vpack.c.bf16 %v2601_v35, %v2600_v34  ;;  %v2652_v32 = vpop.permute.xlu1 %2651  ;;  %v2657_v34 = vpop.permute.xlu0 %2656 }
 0x343   : > { %5611 = vmatprep.subr.bf16.mxu1 %v5610_v33  ;;  %5591 = vmatprep.subr.bf16.mxu0 %v5590_v36 }
 0x344   : > { %5613 = vmatpush3.bf16.msra.mxu1 %v5610_v33  ;;  %5593 = vmatpush3.bf16.msra.mxu0 %v5590_v36 }
 0x346   : > { %v4953_v63 = vpop.f32.mrb[16].mxu1 }
 0x347   : > { %2263 = vst.msk [vmem:[#allocation3 + $0x96] sm:$0x1] %vm1079_vm7, %v4953_v63  ;;  %v4934_v2 = vpop.f32.mrb[16].mxu0  ;;  %v2251_v37 = vpop.f32.mrb[17].mxu1 }
 0x348   : > { %2261 = vst.msk [vmem:[#allocation3 + $0x3e] sm:$0x1] %vm1079_vm7, %v4934_v2  ;;  %v2176_v38 = vpop.f32.mrb[17].mxu0 }
 0x349   : > { %2262 = vst.msk [vmem:[#allocation3 + $0x8e] sm:$0xff] %vm1082_vm9, %v2251_v37  ;;  %2260 = vst.msk [vmem:[#allocation3 + $0x36] sm:$0xff] %vm1082_vm9, %v2176_v38 }
 0x350   : > { %v2613_v3 = vld [vmem:[#allocation3 + $0x88] sm:$0xff]  ;;  %v2602_v43 = vld [vmem:[#allocation3 + $0x30] sm:$0xff] }
 0x356   : > { %v4991_v47 = vpop.f32.mrb[18].mxu1 }
 0x357   : > { %2429 = vst.msk [vmem:[#allocation3 + $0x9f] sm:$0x1] %vm1079_vm7, %v4991_v47  ;;  %v4972_v39 = vpop.f32.mrb[18].mxu0  ;;  %v2417_v0 = vpop.f32.mrb[19].mxu1 }
 0x358   : > { %2427 = vst.msk [vmem:[#allocation3 + $0x47] sm:$0x1] %vm1079_vm7, %v4972_v39  ;;  %v2342_v40 = vpop.f32.mrb[19].mxu0 }
 0x359   : > { %2428 = vst.msk [vmem:[#allocation3 + $0x97] sm:$0xff] %vm1082_vm9, %v2417_v0  ;;  %2426 = vst.msk [vmem:[#allocation3 + $0x3f] sm:$0xff] %vm1082_vm9, %v2342_v40 }
 0x360   : > { %v2614_v41 = vld [vmem:[#allocation3 + $0x90] sm:$0xff]  ;;  %v2603_v44 = vld [vmem:[#allocation3 + $0x38] sm:$0xff]  ;;  %v2604_v56 = vld [vmem:[#allocation3 + $0x40] sm:$0xff] }
 0x361   : > { %v5614_v42 = vpack.c.bf16 %v2614_v41, %v2613_v3  ;;  %v5594_v48 = vpack.c.bf16 %v2603_v44, %v2602_v43  ;;  %v2615_v53 = vld [vmem:[#allocation3 + $0x98] sm:$0xff] }
 0x363   : > { %5615 = vmatprep.subr.bf16.mxu1 %v5614_v42  ;;  %5595 = vmatprep.subr.bf16.mxu0 %v5594_v48 }
 0x364   : > { %5617 = vmatpush3.bf16.msra.mxu1 %v5614_v42  ;;  %5597 = vmatpush3.bf16.msra.mxu0 %v5594_v48  ;;  %v2662_v42 = vpop.permute.xlu1 %2661 }
 0x366   : > { %v5029_v49 = vpop.f32.mrb[20].mxu1 }
 0x367   : > { %2595 = vst.msk [vmem:[#allocation3 + $0xa8] sm:$0x1] %vm1079_vm7, %v5029_v49  ;;  %v5010_v50 = vpop.f32.mrb[20].mxu0  ;;  %v2583_v51 = vpop.f32.mrb[21].mxu1 }
 0x368   : > { %2593 = vst.msk [vmem:[#allocation3 + $0x50] sm:$0x1] %vm1079_vm7, %v5010_v50  ;;  %v2508_v52 = vpop.f32.mrb[21].mxu0 }
 0x369   : > { %2594 = vst.msk [vmem:[#allocation3 + $0xa0] sm:$0xff] %vm1082_vm9, %v2583_v51  ;;  %2592 = vst.msk [vmem:[#allocation3 + $0x48] sm:$0xff] %vm1082_vm9, %v2508_v52  ;;  %v2672_v51 = vpop.permute.xlu1 %2671 }
 0x36e   : > { %v2617_v59 = vld [vmem:[#allocation3 + $0xa8] sm:$0x1] }
 0x36f   : > { %v2606_v60 = vld [vmem:[#allocation3 + $0x50] sm:$0x1] }
 0x370   : > { %v2616_v54 = vld [vmem:[#allocation3 + $0xa0] sm:$0xff]  ;;  %v2605_v57 = vld [vmem:[#allocation3 + $0x48] sm:$0xff] }
 0x371   : > { %v5618_v55 = vpack.c.bf16 %v2616_v54, %v2615_v53  ;;  %v5598_v58 = vpack.c.bf16 %v2605_v57, %v2604_v56  ;;  %v3211_v57 = vld [vmem:[%s5910_s3 + $0x28] sm:$0xff] }
 0x373   : > { %5619 = vmatprep.subr.bf16.mxu1 %v5618_v55  ;;  %5599 = vmatprep.subr.bf16.mxu0 %v5598_v58 }
 0x374   : > { %5621 = vmatpush3.bf16.msra.mxu1 %v5618_v55  ;;  %5601 = vmatpush3.bf16.msra.mxu0 %v5598_v58  ;;  %v3210_v58 = vld [vmem:[%s5910_s3 + $0x20] sm:$0xff] }
 0x375   : > { %5084 = vmatprep.subr.msk.mxu1 %vm2699_vm11, %v2617_v59  ;;  %5050 = vmatprep.subr.msk.mxu0 %vm2699_vm11, %v2606_v60 }
 0x378   : > { %5085 = vmatpush3.msk.msra.mxu1 %vm2699_vm11, %v2617_v59  ;;  %5051 = vmatpush3.msk.msra.mxu0 %vm2699_vm11, %v2606_v60  ;;  %v3148_v59 = vld [vmem:[%s5905_s23 + $0x30] sm:$0xff]  ;;  %v2667_v60 = vpop.permute.xlu0 %2666 }
 0x379   : > { %5087 = vmatmul.mubr.msk.f32.vlgmr.msra.gmra.mrb[22].mxu1 %vm2674_vm10, %v2619_v61  ;;  %5053 = vmatmul.mubr.msk.f32.vlgmr.msra.gmra.mrb[22].mxu0 %vm2674_vm10, %v2619_v61 }
 0x37a   : > { %5089 = vmatprep.mubr.msk.f32.mxu1 %vm2674_vm10, %v2620_v62  ;;  %5055 = vmatprep.mubr.msk.f32.mxu0 %vm2674_vm10, %v2620_v62 }
 0x37d   : > { %5090 = vmatmul.mubr.msk.f32.gmra.mrb[24].mxu1 %vm2674_vm10, %v2621_v1  ;;  %5056 = vmatmul.mubr.msk.f32.gmra.mrb[24].mxu0 %vm2674_vm10, %v2621_v1 }
 0x37e   : > { %5092 = vmatprep.mubr.msk.f32.mxu1 %vm2674_vm10, %v2622_v4  ;;  %5058 = vmatprep.mubr.msk.f32.mxu0 %vm2674_vm10, %v2622_v4 }
 0x381   : > { %5093 = vmatmul.mubr.msk.f32.gmra.mrb[26].mxu1 %vm2674_vm10, %v2623_v5  ;;  %5059 = vmatmul.mubr.msk.f32.gmra.mrb[26].mxu0 %vm2674_vm10, %v2623_v5  ;;  %v3149_v5 = vld [vmem:[%s5905_s23 + $0x38] sm:$0xff]  ;;  %s6957_s23 = sld [smem:[#allocation16_spill]] }
 0x382   : > { %5095 = vmatprep.mubr.msk.f32.mxu1 %vm2674_vm10, %v2624_v6  ;;  %5061 = vmatprep.mubr.msk.f32.mxu0 %vm2674_vm10, %v2624_v6  ;;  %v6576_v6 = vpop.permute.xlu1 %3152 }
 0x385   : > { %5096 = vmatmul.mubr.msk.f32.gmra.mrb[28].mxu1 %vm2674_vm10, %v2625_v7  ;;  %5062 = vmatmul.mubr.msk.f32.gmra.mrb[28].mxu0 %vm2674_vm10, %v2625_v7 }
 0x386   : > { %v6578_v7 = vpop.permute.xlu1 %3216 }
 0x44c   : > { %v5088_v10 = vpop.f32.mrb[22].mxu1  ;;  %v5054_v12 = vpop.f32.mrb[22].mxu0 }
 0x44d   : > { %v6508_v11 = vadd.f32 %v5088_v10, %v2642_v9  ;;  %v2877_v13 = vpop.f32.mrb[23].mxu1  ;;  %v6510_v14 = vadd.f32 %v5054_v12, %v2642_v9  ;;  %v2769_v15 = vpop.f32.mrb[23].mxu0 }
 0x44e   : > { %v6512_v16 = vadd.f32 %v2877_v13, %v2637_v8  ;;  %v6520_v25 = vadd.f32 %v2769_v15, %v2637_v8  ;;  %v6580_v8 = vpop.permute.xlu0 %3157  ;;  %v6582_v9 = vpop.permute.xlu1 %3221 }
 0x44f   : > { %v2943_v17 = vsel %vm1082_vm9, %v6508_v11, 0.0  ;;  %v2919_v20 = vsel %vm1082_vm9, %v6510_v14, 0.0 }
 0x450   : > { %2944 = vadd.xlane.f32.xlu0 %v2943_v17  ;;  %v5091_v19 = vpop.f32.mrb[24].mxu1  ;;  %2920 = vadd.xlane.f32.xlu1 %v2919_v20  ;;  %v5057_v22 = vpop.f32.mrb[24].mxu0  ;;  %v2940_v26 = vsel %vm1082_vm9, %v6512_v16, 0.0  ;;  %v2916_v36 = vsel %vm1082_vm9, %v6520_v25, 0.0 }
 0x451   : > { %v2887_v21 = vpop.f32.mrb[25].mxu1  ;;  %v2779_v24 = vpop.f32.mrb[25].mxu0  ;;  %v6528_v35 = vadd.f32 %v5091_v19, %v2652_v32  ;;  %v6536_v0 = vadd.f32 %v5057_v22, %v2652_v32 }
 0x452   : > { %v6518_v23 = vadd.f32 %v2887_v21, %v2647_v18  ;;  %v6524_v27 = vadd.f32 %v2779_v24, %v2647_v18  ;;  %v6584_v10 = vpop.permute.xlu0 %3162  ;;  %v6586_v12 = vpop.permute.xlu1 %3167 }
 0x453   : > { %v2949_v40 = vsel %vm1082_vm9, %v6528_v35, 0.0  ;;  %v2925_v44 = vsel %vm1082_vm9, %v6536_v0, 0.0 }
 0x454   : > { %v5094_v28 = vpop.f32.mrb[26].mxu1  ;;  %2941 = vadd.xlane.f32.xlu0 %v2940_v26  ;;  %v2946_v29 = vsel %vm1082_vm9, %v6518_v23, 0.0  ;;  %v5060_v31 = vpop.f32.mrb[26].mxu0  ;;  %v2922_v37 = vsel %vm1082_vm9, %v6524_v27, 0.0 }
 0x455   : > { %v2897_v30 = vpop.f32.mrb[27].mxu1  ;;  %2947 = vadd.xlane.f32.xlu1 %v2946_v29  ;;  %v2789_v33 = vpop.f32.mrb[27].mxu0  ;;  %v6544_v43 = vadd.f32 %v5094_v28, %v2662_v42  ;;  %v6550_v49 = vadd.f32 %v5060_v31, %v2662_v42 }
 0x456   : > { %v6532_v63 = vadd.f32 %v2897_v30, %v2657_v34  ;;  %v6540_v3 = vadd.f32 %v2789_v33, %v2657_v34  ;;  %v6588_v13 = vpop.permute.xlu0 %3226  ;;  %v6590_v15 = vpop.permute.xlu1 %3231 }
 0x457   : > { %v2955_v50 = vsel %vm1082_vm9, %v6544_v43, 0.0  ;;  %v2931_v53 = vsel %vm1082_vm9, %v6550_v49, 0.0 }
 0x458   : > { %v5097_v2 = vpop.f32.mrb[28].mxu1  ;;  %2917 = vadd.xlane.f32.xlu0 %v2916_v36  ;;  %v5063_v38 = vpop.f32.mrb[28].mxu0  ;;  %v2952_v41 = vsel %vm1082_vm9, %v6532_v63, 0.0  ;;  %v2928_v48 = vsel %vm1082_vm9, %v6540_v3, 0.0 }
 0x459   : > { %v2907_v47 = vpop.f32.mrb[29].mxu1  ;;  %2923 = vadd.xlane.f32.xlu1 %v2922_v37  ;;  %v2799_v39 = vpop.f32.mrb[29].mxu0  ;;  %v6554_v52 = vadd.f32 %v5097_v2, %v2672_v51  ;;  %v6558_v54 = vadd.f32 %v5063_v38, %v2672_v51 }
 0x45a   : > { %v6567_v61 = vadd.f32 %v2907_v47, %v2667_v60  ;;  %v6569_v62 = vadd.f32 %v2799_v39, %v2667_v60  ;;  %v6592_v17 = vpop.permute.xlu0 %3172  ;;  %v6594_v18 = vpop.permute.xlu1 %3177 }
 0x45b   : > { %v2961_v55 = vsel %vm1082_vm9, %v6554_v52, 0.0  ;;  %v2937_v56 = vsel %vm1082_vm9, %v6558_v54, 0.0 }
 0x45c   : > { %2950 = vadd.xlane.f32.xlu0 %v2949_v40  ;;  %v2958_v1 = vsel %vm1082_vm9, %v6567_v61, 0.0  ;;  %v2934_v4 = vsel %vm1082_vm9, %v6569_v62, 0.0 }
 0x45d   : > { %2953 = vadd.xlane.f32.xlu1 %v2952_v41 }
 0x460   : > { %2926 = vadd.xlane.f32.xlu0 %v2925_v44 }
 0x461   : > { %2929 = vadd.xlane.f32.xlu1 %v2928_v48 }
 0x464   : > { %2956 = vadd.xlane.f32.xlu0 %v2955_v50 }
 0x468   : > { %2932 = vadd.xlane.f32.xlu0 %v2931_v53 }
 0x46c   : > { %2962 = vadd.xlane.f32.xlu0 %v2961_v55 }
 0x470   : > { %2938 = vadd.xlane.f32.xlu0 %v2937_v56 }
 0x472   : > { %3241 = vperm.xlu1 %5695, %v3211_v57  }
 0x486   : > { %3236 = vperm.xlu0 %5694, %v3210_v58  }
 0x48a   : > { %3182 = vperm.xlu0 %5694, %v3148_v59  }
 0x496   : > { %2959 = vadd.xlane.f32.xlu1 %v2958_v1 }
 0x49a   : > { %2935 = vadd.xlane.f32.xlu1 %v2934_v4 }
 0x4ab   : > { %3187 = vperm.xlu1 %5695, %v3149_v5  }
 0x4dd   : > { %v2945_v19 = vpop.xlane.xlu0 %2944  ;;  %v2921_v21 = vpop.xlane.xlu1 %2920 }
 0x4de   : > { %v2974_v20 = vmul.f32 0.015873017, %v2945_v19  ;;  %v2966_v22 = vmul.f32 0.015873017, %v2921_v21 }
 0x4e0   : > { %v2982_v24 = vadd.f32 %v2974_v20, %v2966_v22 }
 0x4e1   : > { %v2942_v26 = vpop.xlane.xlu0 %2941 }
 0x4e2   : > { %v2948_v28 = vpop.xlane.xlu1 %2947  ;;  %v2991_v29 = vmul.f32 0.5, %v2982_v24  ;;  %v2973_v33 = vmul.f32 0.015873017, %v2942_v26 }
 0x4e3   : > { %v2975_v2 = vmul.f32 0.015873017, %v2948_v28 }
 0x4e4   : > { %v6597_v31 = vsub.f32 %v6510_v14, %v2991_v29  ;;  %v6600_v32 = vsub.f32 %v6508_v11, %v2991_v29 }
 0x4e5   : > { %v2918_v30 = vpop.xlane.xlu0 %2917 }
 0x4e6   : > { %v2965_v34 = vmul.f32 0.015873017, %v2918_v30  ;;  %v2924_v36 = vpop.xlane.xlu1 %2923  ;;  %v3015_v38 = vmul.f32 %v6597_v31, %v6597_v31  ;;  %v3023_v14 = vmul.f32 %v6600_v32, %v6600_v32 }
 0x4e7   : > { %v2967_v37 = vmul.f32 0.015873017, %v2924_v36 }
 0x4e8   : > { %v2981_v47 = vadd.f32 %v2973_v33, %v2965_v34  ;;  %v3033_v41 = vsel %vm1082_vm9, %v3015_v38, 0.0  ;;  %v3057_v53 = vsel %vm1082_vm9, %v3023_v14, 0.0 }
 0x4e9   : > { %v2983_v39 = vadd.f32 %v2975_v2, %v2967_v37  ;;  %v2951_v40 = vpop.xlane.xlu0 %2950  ;;  %3034 = vadd.xlane.f32.xlu0 %v3033_v41 }
 0x4ea   : > { %v2990_v42 = vmul.f32 0.5, %v2981_v47  ;;  %v2954_v44 = vpop.xlane.xlu1 %2953  ;;  %v2976_v55 = vmul.f32 0.015873017, %v2951_v40 }
 0x4eb   : > { %v2992_v11 = vmul.f32 0.5, %v2983_v39  ;;  %v2977_v59 = vmul.f32 0.015873017, %v2954_v44 }
 0x4ec   : > { %v6608_v48 = vsub.f32 %v6520_v25, %v2990_v42  ;;  %v6611_v50 = vsub.f32 %v6512_v16, %v2990_v42 }
 0x4ed   : > { %v2927_v51 = vpop.xlane.xlu0 %2926  ;;  %3058 = vadd.xlane.f32.xlu0 %v3057_v53  ;;  %v6617_v1 = vsub.f32 %v6524_v27, %v2992_v11  ;;  %v6625_v22 = vsub.f32 %v6518_v23, %v2992_v11 }
 0x4ee   : > { %v2968_v56 = vmul.f32 0.015873017, %v2927_v51  ;;  %v2930_v57 = vpop.xlane.xlu1 %2929  ;;  %v3014_v58 = vmul.f32 %v6608_v48, %v6608_v48  ;;  %v3022_v16 = vmul.f32 %v6611_v50, %v6611_v50 }
 0x4ef   : > { %v2969_v60 = vmul.f32 0.015873017, %v2930_v57  ;;  %v3016_v21 = vmul.f32 %v6617_v1, %v6617_v1  ;;  %v3024_v23 = vmul.f32 %v6625_v22, %v6625_v22 }
 0x4f0   : > { %v2984_v25 = vadd.f32 %v2976_v55, %v2968_v56  ;;  %v3030_v4 = vsel %vm1082_vm9, %v3014_v58, 0.0  ;;  %v3054_v27 = vsel %vm1082_vm9, %v3022_v16, 0.0 }
 0x4f1   : > { %v2985_v5 = vadd.f32 %v2977_v59, %v2969_v60  ;;  %3031 = vadd.xlane.f32.xlu1 %v3030_v4  ;;  %v2957_v19 = vpop.xlane.xlu0 %2956  ;;  %v3036_v36 = vsel %vm1082_vm9, %v3016_v21, 0.0  ;;  %v3060_v39 = vsel %vm1082_vm9, %v3024_v23, 0.0  ;;  %v3422_v21 = vld [vmem:[%s5920_s19] sm:$0xff] }
 0x4f2   : > { %v2993_v20 = vmul.f32 0.5, %v2984_v25  ;;  %v2978_v30 = vmul.f32 0.015873017, %v2957_v19 }
 0x4f3   : > { %v2994_v24 = vmul.f32 0.5, %v2985_v5 }
 0x4f4   : > { %v6629_v26 = vsub.f32 %v6536_v0, %v2993_v20  ;;  %v6632_v28 = vsub.f32 %v6528_v35, %v2993_v20 }
 0x4f5   : > { %3055 = vadd.xlane.f32.xlu1 %v3054_v27  ;;  %v2933_v29 = vpop.xlane.xlu0 %2932  ;;  %v6643_v35 = vsub.f32 %v6540_v3, %v2994_v24  ;;  %v6647_v40 = vsub.f32 %v6532_v63, %v2994_v24 }
 0x4f6   : > { %v2970_v33 = vmul.f32 0.015873017, %v2933_v29  ;;  %v3017_v34 = vmul.f32 %v6629_v26, %v6629_v26  ;;  %v3025_v0 = vmul.f32 %v6632_v28, %v6632_v28 }
 0x4f7   : > { %v3018_v14 = vmul.f32 %v6643_v35, %v6643_v35  ;;  %v3026_v53 = vmul.f32 %v6647_v40, %v6647_v40 }
 0x4f8   : > { %v2986_v2 = vadd.f32 %v2978_v30, %v2970_v33  ;;  %v3039_v37 = vsel %vm1082_vm9, %v3017_v34, 0.0  ;;  %v3063_v41 = vsel %vm1082_vm9, %v3025_v0, 0.0  ;;  %v3424_v30 = vld [vmem:[%s5920_s19 + $0x10] sm:$0xff] }
 0x4f9   : > { %3037 = vadd.xlane.f32.xlu1 %v3036_v36  ;;  %3040 = vadd.xlane.f32.xlu0 %v3039_v37  ;;  %v2963_v38 = vpop.xlane.xlu0 %2962  ;;  %v3042_v56 = vsel %vm1082_vm9, %v3018_v14, 0.0  ;;  %v3066_v58 = vsel %vm1082_vm9, %v3026_v53, 0.0  ;;  %v3426_v36 = vld [vmem:[%s5920_s19 + $0x20] sm:$0xff]  ;;  %v3428_v0 = vld [vmem:[%s5920_s19 + $0x30] sm:$0xff]  ;;  %v3425_v14 = vld [vmem:[%s5920_s19 + $0x18] sm:$0xff] }
 0x4fa   : > { %v2995_v47 = vmul.f32 0.5, %v2986_v2  ;;  %v2980_v11 = vmul.f32 0.015873017, %v2963_v38 }
 0x4fc   : > { %v6653_v42 = vsub.f32 %v6550_v49, %v2995_v47  ;;  %v6656_v3 = vsub.f32 %v6544_v43, %v2995_v47 }
 0x4fd   : > { %3061 = vadd.xlane.f32.xlu1 %v3060_v39  ;;  %3064 = vadd.xlane.f32.xlu0 %v3063_v41  ;;  %v2939_v44 = vpop.xlane.xlu0 %2938  ;;  %v3423_v41 = vld [vmem:[%s5920_s19 + $0x8] sm:$0xff] }
 0x4fe   : > { %v2972_v51 = vmul.f32 0.015873017, %v2939_v44  ;;  %v3019_v63 = vmul.f32 %v6653_v42, %v6653_v42  ;;  %v3027_v43 = vmul.f32 %v6656_v3, %v6656_v3  ;;  %v3427_v44 = vld [vmem:[%s5920_s19 + $0x28] sm:$0xff] }
 0x500   : > { %v2988_v55 = vadd.f32 %v2980_v11, %v2972_v51  ;;  %v3045_v49 = vsel %vm1082_vm9, %v3019_v63, 0.0  ;;  %v3069_v59 = vsel %vm1082_vm9, %v3027_v43, 0.0  ;;  %v3429_v11 = vld [vmem:[%s5920_s19 + $0x38] sm:$0xff] }
 0x501   : > { %3043 = vadd.xlane.f32.xlu1 %v3042_v56  ;;  %3046 = vadd.xlane.f32.xlu0 %v3045_v49  ;;  %v3414_v49 = vld [vmem:[%s5915_s17] sm:$0xff] }
 0x502   : > { %v2997_v57 = vmul.f32 0.5, %v2988_v55  ;;  %5114 = vmatprep.mubr.msk.f32.mxu0 %vm990_vm5, %v3414_v49  ;;  %5142 = vmatprep.mubr.msk.f32.mxu1 %vm990_vm5, %v3414_v49 }
 0x504   : > { %v6669_v60 = vsub.f32 %v6558_v54, %v2997_v57  ;;  %v6672_v25 = vsub.f32 %v6554_v52, %v2997_v57  ;;  %v6680_v54 = vpop.permute.xlu1 %3241  ;;  %v3212_v52 = vld [vmem:[%s5910_s3 + $0x30] sm:$0xff] }
 0x505   : > { %3067 = vadd.xlane.f32.xlu1 %v3066_v58  ;;  %3070 = vadd.xlane.f32.xlu0 %v3069_v59  ;;  %v6705_v51 = vpop.permute.xlu0 %3236 }
 0x506   : > { %v3021_v4 = vmul.f32 %v6669_v60, %v6669_v60  ;;  %v3029_v5 = vmul.f32 %v6672_v25, %v6672_v25 }
 0x508   : > { %v3051_v16 = vsel %vm1082_vm9, %v3021_v4, 0.0  ;;  %v3075_v19 = vsel %vm1082_vm9, %v3029_v5, 0.0 }
 0x509   : > { %3052 = vadd.xlane.f32.xlu0 %v3051_v16  ;;  %v6707_v63 = vpop.permute.xlu0 %3182 }
 0x50d   : > { %3076 = vadd.xlane.f32.xlu0 %v3075_v19 }
 0x523   : > { %v2960_v20 = vpop.xlane.xlu1 %2959  ;;  %3246 = vperm.xlu0 %5694, %v3212_v52  }
 0x524   : > { %v2979_v27 = vmul.f32 0.015873017, %v2960_v20 }
 0x527   : > { %v2936_v24 = vpop.xlane.xlu1 %2935  ;;  %3432 = vperm.xlu0 %5694, %v3422_v21  }
 0x528   : > { %v2971_v29 = vmul.f32 0.015873017, %v2936_v24 }
 0x52a   : > { %v2987_v33 = vadd.f32 %v2979_v27, %v2971_v29 }
 0x52b   : > { %3442 = vperm.xlu0 %5694, %v3424_v30   ;;  %v6709_v55 = vpop.permute.xlu1 %3187 }
 0x52c   : > { %v2996_v34 = vmul.f32 0.5, %v2987_v33 }
 0x52e   : > { %v6687_v23 = vsub.f32 %v6569_v62, %v2996_v34  ;;  %v6690_v2 = vsub.f32 %v6567_v61, %v2996_v34  ;;  %v3721_v62 = vld [vmem:[%s5931_s27] sm:$0x3]  ;;  %v3213_v61 = vld [vmem:[%s5910_s3 + $0x38] sm:$0xff] }
 0x52f   : > { %3452 = vperm.xlu0 %5694, %v3426_v36  }
 0x530   : > { %v3020_v37 = vmul.f32 %v6687_v23, %v6687_v23  ;;  %v3028_v47 = vmul.f32 %v6690_v2, %v6690_v2 }
 0x532   : > { %v3048_v38 = vsel %vm1082_vm9, %v3020_v37, 0.0  ;;  %v3072_v39 = vsel %vm1082_vm9, %v3028_v47, 0.0 }
 0x533   : > { %3049 = vadd.xlane.f32.xlu1 %v3048_v38  ;;  %3462 = vperm.xlu0 %5694, %v3428_v0  }
 0x537   : > { %3073 = vadd.xlane.f32.xlu1 %v3072_v39  ;;  %3724 = vperm.xlu0 %5694, %v3721_v62  }
 0x548   : > { %3251 = vperm.xlu1 %5695, %v3213_v61  }
 0x54c   : > { %3437 = vperm.xlu1 %5695, %v3423_v41  }
 0x550   : > { %3447 = vperm.xlu1 %5695, %v3425_v14  }
 0x554   : > { %3457 = vperm.xlu1 %5695, %v3427_v44  }
 0x558   : > { %3467 = vperm.xlu1 %5695, %v3429_v11  }
 0x576   : > { %v3035_v53 = vpop.xlane.xlu0 %3034 }
 0x577   : > { %v3079_v43 = vmul.f32 0.015873017, %v3035_v53 }
 0x57a   : > { %v3059_v56 = vpop.xlane.xlu0 %3058 }
 0x57b   : > { %v3087_v57 = vmul.f32 0.015873017, %v3059_v56 }
 0x57d   : > { %v3095_v58 = vadd.f32 %v3087_v57, %v3079_v43 }
 0x57e   : > { %v3032_v59 = vpop.xlane.xlu1 %3031 }
 0x57f   : > { %v3103_v4 = vmul.f32 0.5, %v3095_v58  ;;  %v3078_v19 = vmul.f32 0.015873017, %v3032_v59 }
 0x581   : > { %v3111_v16 = vadd.f32 1e-05, %v3103_v4 }
 0x582   : > { %v3056_v5 = vpop.xlane.xlu1 %3055 }
 0x583   : > { %v3086_v52 = vmul.f32 0.015873017, %v3056_v5  ;;  %5696 = vrsqrt.f32 %v3111_v16 }
 0x585   : > { %v3094_v20 = vadd.f32 %v3086_v52, %v3078_v19 }
 0x586   : > { %v3038_v21 = vpop.xlane.xlu1 %3037  ;;  %v3041_v24 = vpop.xlane.xlu0 %3040 }
 0x587   : > { %v3102_v27 = vmul.f32 0.5, %v3094_v20  ;;  %v3080_v30 = vmul.f32 0.015873017, %v3038_v21  ;;  %v3081_v36 = vmul.f32 0.015873017, %v3041_v24 }
 0x589   : > { %v3110_v29 = vadd.f32 1e-05, %v3102_v27 }
 0x58a   : > { %v3062_v33 = vpop.xlane.xlu1 %3061  ;;  %v3065_v34 = vpop.xlane.xlu0 %3064 }
 0x58b   : > { %5698 = vrsqrt.f32 %v3110_v29  ;;  %v3088_v37 = vmul.f32 0.015873017, %v3062_v33  ;;  %v3089_v0 = vmul.f32 0.015873017, %v3065_v34 }
 0x58d   : > { %v3096_v38 = vadd.f32 %v3088_v37, %v3080_v30  ;;  %v3097_v47 = vadd.f32 %v3089_v0, %v3081_v36  ;;  %v5697_v62 = vpop.eup %5696 }
 0x58e   : > { %v3044_v39 = vpop.xlane.xlu1 %3043  ;;  %v3047_v61 = vpop.xlane.xlu0 %3046  ;;  %v3127_v41 = vmul.f32 %v5697_v62, %v6597_v31  ;;  %v3135_v14 = vmul.f32 %v5697_v62, %v6600_v32 }
 0x58f   : > { %v3104_v44 = vmul.f32 0.5, %v3096_v38  ;;  %v3105_v11 = vmul.f32 0.5, %v3097_v47  ;;  %v3082_v57 = vmul.f32 0.015873017, %v3044_v39  ;;  %v3083_v32 = vmul.f32 0.015873017, %v3047_v61 }
 0x590   : > { %v3191_v53 = vmul.f32 %v6580_v8, %v3127_v41  ;;  %v3199_v56 = vmul.f32 %v6580_v8, %v3135_v14 }
 0x591   : > { %v3112_v49 = vadd.f32 1e-05, %v3104_v44  ;;  %v3113_v43 = vadd.f32 1e-05, %v3105_v11 }
 0x592   : > { %v3068_v58 = vpop.xlane.xlu1 %3067  ;;  %v3071_v59 = vpop.xlane.xlu0 %3070  ;;  %v3255_v4 = vadd.f32 %v6582_v9, %v3191_v53  ;;  %v6720_v16 = vadd.f32 %v6582_v9, %v3199_v56 }
 0x593   : > { %5700 = vrsqrt.f32 %v3112_v49  ;;  %v3090_v31 = vmul.f32 0.015873017, %v3068_v58  ;;  %v3091_v5 = vmul.f32 0.015873017, %v3071_v59 }
 0x594   : > { %5702 = vrsqrt.f32 %v3113_v43  ;;  %v3287_v20 = vmul.f32 0.044715, %v3255_v4  ;;  %v3295_v29 = vmul.f32 0.044715, %v6720_v16 }
 0x595   : > { %v5699_v19 = vpop.eup %5698  ;;  %v3098_v52 = vadd.f32 %v3090_v31, %v3082_v57  ;;  %v3099_v24 = vadd.f32 %v3091_v5, %v3083_v32 }
 0x596   : > { %v3126_v8 = vmul.f32 %v5699_v19, %v6608_v48  ;;  %v3134_v21 = vmul.f32 %v5699_v19, %v6611_v50  ;;  %v3053_v27 = vpop.xlane.xlu0 %3052  ;;  %v3303_v33 = vmul.f32 %v3287_v20, %v3255_v4  ;;  %v3311_v37 = vmul.f32 %v3295_v29, %v6720_v16 }
 0x597   : > { %v3106_v30 = vmul.f32 0.5, %v3098_v52  ;;  %v3107_v36 = vmul.f32 0.5, %v3099_v24  ;;  %v3085_v58 = vmul.f32 0.015873017, %v3053_v27 }
 0x598   : > { %v3190_v9 = vmul.f32 %v6576_v6, %v3126_v8  ;;  %v3198_v34 = vmul.f32 %v6576_v6, %v3134_v21  ;;  %v3319_v38 = vmul.f32 %v3303_v33, %v3255_v4  ;;  %v3327_v39 = vmul.f32 %v3311_v37, %v6720_v16 }
 0x599   : > { %v3114_v0 = vadd.f32 1e-05, %v3106_v30  ;;  %v3115_v50 = vadd.f32 1e-05, %v3107_v36 }
 0x59a   : > { %v6729_v47 = vadd.f32 %v6578_v7, %v3190_v9  ;;  %v6732_v48 = vadd.f32 %v6578_v7, %v3198_v34  ;;  %v3077_v62 = vpop.xlane.xlu0 %3076  ;;  %v3335_v61 = vadd.f32 %v3319_v38, %v3255_v4  ;;  %v3343_v53 = vadd.f32 %v3327_v39, %v6720_v16 }
 0x59b   : > { %5704 = vrsqrt.f32 %v3114_v0  ;;  %v3093_v14 = vmul.f32 0.015873017, %v3077_v62 }
 0x59c   : > { %5706 = vrsqrt.f32 %v3115_v50  ;;  %v3286_v6 = vmul.f32 0.044715, %v6729_v47  ;;  %v3351_v44 = vmul.f32 0.7978846, %v3335_v61  ;;  %v3294_v11 = vmul.f32 0.044715, %v6732_v48 }
 0x59d   : > { %v5701_v41 = vpop.eup %5700  ;;  %v3101_v52 = vadd.f32 %v3093_v14, %v3085_v58  ;;  %v3279_v14 = vmul.f32 0.5, %v6720_v16 }
 0x59e   : > { %v5703_v56 = vpop.eup %5702  ;;  %v3128_v7 = vmul.f32 %v5701_v41, %v6617_v1  ;;  %v3136_v49 = vmul.f32 %v5701_v41, %v6625_v22  ;;  %v3302_v43 = vmul.f32 %v3286_v6, %v6729_v47  ;;  %5708 = vtanh.f32 %v3351_v44 }
 0x59f   : > { %v3129_v57 = vmul.f32 %v5703_v56, %v6629_v26  ;;  %v3137_v31 = vmul.f32 %v5703_v56, %v6632_v28  ;;  %v3310_v5 = vmul.f32 %v3294_v11, %v6732_v48  ;;  %v3359_v22 = vmul.f32 0.7978846, %v3343_v53 }
 0x5a0   : > { %v3192_v59 = vmul.f32 %v6584_v10, %v3128_v7  ;;  %v3318_v32 = vmul.f32 %v3302_v43, %v6729_v47  ;;  %v3200_v19 = vmul.f32 %v6584_v10, %v3136_v49  ;;  %v3271_v28 = vmul.f32 0.5, %v3255_v4 }
 0x5a1   : > { %v3193_v1 = vmul.f32 %v6586_v12, %v3129_v57  ;;  %v3326_v8 = vmul.f32 %v3310_v5, %v6732_v48  ;;  %v3201_v24 = vmul.f32 %v6586_v12, %v3137_v31  ;;  %5710 = vtanh.f32 %v3359_v22 }
 0x5a2   : > { %v6749_v20 = vadd.f32 %v6588_v13, %v3192_v59  ;;  %v3334_v26 = vadd.f32 %v3318_v32, %v6729_v47  ;;  %v6759_v30 = vadd.f32 %v6588_v13, %v3200_v19  ;;  %v3109_v33 = vmul.f32 0.5, %v3101_v52 }
 0x5a3   : > { %v6754_v21 = vadd.f32 %v6590_v15, %v3193_v1  ;;  %v3342_v10 = vadd.f32 %v3326_v8, %v6732_v48  ;;  %v6770_v62 = vadd.f32 %v6590_v15, %v3201_v24  ;;  %v3270_v56 = vmul.f32 0.5, %v6729_v47 }
 0x5a4   : > { %v3350_v27 = vmul.f32 0.7978846, %v3334_v26  ;;  %v3288_v9 = vmul.f32 0.044715, %v6749_v20  ;;  %v3278_v7 = vmul.f32 0.5, %v6732_v48 }
 0x5a5   : > { %v5705_v29 = vpop.eup %5704  ;;  %v3289_v34 = vmul.f32 0.044715, %v6754_v21  ;;  %v3358_v12 = vmul.f32 0.7978846, %v3342_v10  ;;  %v3297_v49 = vmul.f32 0.044715, %v6770_v62 }
 0x5a6   : > { %v5707_v36 = vpop.eup %5706  ;;  %v3130_v37 = vmul.f32 %v5705_v29, %v6643_v35  ;;  %v3138_v4 = vmul.f32 %v5705_v29, %v6647_v40  ;;  %5712 = vtanh.f32 %v3350_v27  ;;  %v3304_v50 = vmul.f32 %v3288_v9, %v6749_v20 }
 0x5a7   : > { %v3131_v0 = vmul.f32 %v5707_v36, %v6653_v42  ;;  %v3139_v38 = vmul.f32 %v5707_v36, %v6656_v3  ;;  %v3305_v13 = vmul.f32 %v3289_v34, %v6754_v21  ;;  %5714 = vtanh.f32 %v3358_v12 }
 0x5a8   : > { %v3194_v39 = vmul.f32 %v6592_v17, %v3130_v37  ;;  %v3202_v61 = vmul.f32 %v6592_v17, %v3138_v4  ;;  %v5709_v35 = vpop.eup %5708  ;;  %v3320_v42 = vmul.f32 %v3304_v50, %v6749_v20  ;;  %v3296_v17 = vmul.f32 0.044715, %v6759_v30 }
 0x5a9   : > { %v3195_v40 = vmul.f32 %v6594_v18, %v3131_v0  ;;  %v3203_v6 = vmul.f32 %v6594_v18, %v3139_v38  ;;  %v3321_v3 = vmul.f32 %v3305_v13, %v6754_v21  ;;  %v3383_v11 = vadd.f32 1.0, %v5709_v35 }
 0x5aa   : > { %v6779_v41 = vadd.f32 %v6705_v51, %v3194_v39  ;;  %v6782_v15 = vadd.f32 %v6705_v51, %v3202_v61  ;;  %v3336_v18 = vadd.f32 %v3320_v42, %v6749_v20  ;;  %v3312_v51 = vmul.f32 %v3296_v17, %v6759_v30 }
 0x5ab   : > { %v6787_v44 = vadd.f32 %v6680_v54, %v3195_v40  ;;  %v3337_v53 = vadd.f32 %v3321_v3, %v6754_v21  ;;  %v6796_v16 = vadd.f32 %v6680_v54, %v3203_v6  ;;  %v3117_v43 = vadd.f32 1e-05, %v3109_v33  ;;  %v5711_v59 = vpop.eup %5710 }
 0x5ac   : > { %v3352_v57 = vmul.f32 0.7978846, %v3336_v18  ;;  %v3313_v31 = vmul.f32 %v3297_v49, %v6770_v62  ;;  %v3328_v32 = vmul.f32 %v3312_v51, %v6759_v30  ;;  %v3290_v5 = vmul.f32 0.044715, %v6779_v41 }
 0x5ad   : > { %v3353_v58 = vmul.f32 0.7978846, %v3337_v53  ;;  %v3291_v47 = vmul.f32 0.044715, %v6787_v44  ;;  %v3399_v48 = vmul.f32 %v3383_v11, %v3271_v28  ;;  %v3391_v19 = vadd.f32 1.0, %v5711_v59 }
 0x5ae   : > { %5716 = vtanh.f32 %v3352_v57  ;;  %v3298_v1 = vmul.f32 0.044715, %v6782_v15  ;;  %v3329_v54 = vmul.f32 %v3313_v31, %v6770_v62  ;;  %v3344_v22 = vadd.f32 %v3328_v32, %v6759_v30 }
 0x5af   : > { %5718 = vtanh.f32 %v3353_v58  ;;  %v3306_v26 = vmul.f32 %v3290_v5, %v6779_v41  ;;  %v3407_v24 = vmul.f32 %v3391_v19, %v3279_v14  ;;  %v3307_v27 = vmul.f32 %v3291_v47, %v6787_v44 }
 0x5b0   : > { %v5713_v52 = vpop.eup %5712  ;;  %v3299_v10 = vmul.f32 0.044715, %v6796_v16  ;;  %v3345_v28 = vadd.f32 %v3329_v54, %v6770_v62  ;;  %v3360_v33 = vmul.f32 0.7978846, %v3344_v22  ;;  %v3314_v34 = vmul.f32 %v3298_v1, %v6782_v15 }
 0x5b1   : > { %v3382_v8 = vadd.f32 1.0, %v5713_v52  ;;  %v5715_v29 = vpop.eup %5714  ;;  %v3322_v9 = vmul.f32 %v3306_v26, %v6779_v41  ;;  %v3323_v4 = vmul.f32 %v3307_v27, %v6787_v44  ;;  %v3273_v49 = vmul.f32 0.5, %v6754_v21 }
 0x5b2   : > { %v3390_v37 = vadd.f32 1.0, %v5715_v29  ;;  %v3315_v12 = vmul.f32 %v3299_v10, %v6796_v16  ;;  %v3361_v0 = vmul.f32 0.7978846, %v3345_v28  ;;  %5720 = vtanh.f32 %v3360_v33 }
 0x5b3   : > { %v3398_v36 = vmul.f32 %v3382_v8, %v3270_v56  ;;  %v3338_v38 = vadd.f32 %v3322_v9, %v6779_v41  ;;  %v3330_v50 = vmul.f32 %v3314_v34, %v6782_v15  ;;  %v3339_v61 = vadd.f32 %v3323_v4, %v6787_v44 }
 0x5b4   : > { %v3406_v39 = vmul.f32 %v3390_v37, %v3278_v7  ;;  %v3331_v35 = vmul.f32 %v3315_v12, %v6796_v16  ;;  %5722 = vtanh.f32 %v3361_v0  ;;  %v3272_v56 = vmul.f32 0.5, %v6749_v20 }
 0x5b5   : > { %v5622_v13 = vpack.c.bf16 %v3399_v48, %v3398_v36  ;;  %v3354_v40 = vmul.f32 0.7978846, %v3338_v38  ;;  %v3346_v6 = vadd.f32 %v3330_v50, %v6782_v15  ;;  %5724 = vrsqrt.f32 %v3117_v43 }
 0x5b6   : > { %v5638_v42 = vpack.c.bf16 %v3407_v24, %v3406_v39  ;;  %v3355_v3 = vmul.f32 0.7978846, %v3339_v61  ;;  %v3347_v14 = vadd.f32 %v3331_v35, %v6796_v16  ;;  %v3280_v31 = vmul.f32 0.5, %v6759_v30 }
 0x5b7   : > { %5623 = vmatprep.subr.bf16.mxu0 %v5622_v13  ;;  %5726 = vtanh.f32 %v3354_v40  ;;  %v3362_v17 = vmul.f32 0.7978846, %v3346_v6  ;;  %v3281_v19 = vmul.f32 0.5, %v6770_v62  ;;  %v3274_v22 = vmul.f32 0.5, %v6779_v41 }
 0x5b8   : > { %5625 = vmatpush3.bf16.msra.mxu0 %v5622_v13  ;;  %v5717_v11 = vpop.eup %5716  ;;  %5639 = vmatprep.subr.bf16.mxu1 %v5638_v42  ;;  %5728 = vtanh.f32 %v3355_v3  ;;  %v3363_v18 = vmul.f32 0.7978846, %v3347_v14  ;;  %v3275_v30 = vmul.f32 0.5, %v6787_v44  ;;  %v3282_v29 = vmul.f32 0.5, %v6782_v15 }
 0x5b9   : > { %v5719_v53 = vpop.eup %5718  ;;  %5641 = vmatpush3.bf16.msra.mxu1 %v5638_v42  ;;  %v3384_v7 = vadd.f32 1.0, %v5717_v11  ;;  %5730 = vtanh.f32 %v3362_v17  ;;  %v3283_v37 = vmul.f32 0.5, %v6796_v16 }
 0x5ba   : > { %v3385_v51 = vadd.f32 1.0, %v5719_v53  ;;  %5732 = vtanh.f32 %v3363_v18 }
 0x5bb   : > { %v3400_v43 = vmul.f32 %v3384_v7, %v3272_v56  ;;  %v3247_v7 = vpop.permute.xlu0 %3246 }
 0x5bc   : > { %v3401_v57 = vmul.f32 %v3385_v51, %v3273_v49  ;;  %v5721_v58 = vpop.eup %5720 }
 0x5bd   : > { %v3392_v32 = vadd.f32 1.0, %v5721_v58 }
 0x5be   : > { %v5626_v59 = vpack.c.bf16 %v3401_v57, %v3400_v43  ;;  %v5723_v5 = vpop.eup %5722 }
 0x5bf   : > { %v5725_v48 = vpop.eup %5724  ;;  %v3393_v20 = vadd.f32 1.0, %v5723_v5  ;;  %v3408_v1 = vmul.f32 %v3392_v32, %v3280_v31 }
 0x5c0   : > { %v3050_v47 = vpop.xlane.xlu1 %3049  ;;  %5627 = vmatprep.subr.bf16.mxu0 %v5626_v59  ;;  %v3133_v41 = vmul.f32 %v5725_v48, %v6669_v60  ;;  %v3141_v38 = vmul.f32 %v5725_v48, %v6672_v25 }
 0x5c1   : > { %v5727_v52 = vpop.eup %5726  ;;  %5629 = vmatpush3.bf16.msra.mxu0 %v5626_v59  ;;  %v3409_v54 = vmul.f32 %v3393_v20, %v3281_v19  ;;  %v3084_v24 = vmul.f32 0.015873017, %v3050_v47 }
 0x5c2   : > { %v5729_v21 = vpop.eup %5728  ;;  %v3386_v26 = vadd.f32 1.0, %v5727_v52  ;;  %v3197_v61 = vmul.f32 %v6709_v55, %v3133_v41  ;;  %v3205_v16 = vmul.f32 %v6709_v55, %v3141_v38  ;;  %v3417_v41 = vld [vmem:[%s5915_s17 + $0x18] sm:$0xff]  ;;  %v3420_v38 = vld [vmem:[%s5915_s17 + $0x30] sm:$0xff] }
 0x5c3   : > { %v5731_v8 = vpop.eup %5730  ;;  %v3387_v10 = vadd.f32 1.0, %v5729_v21  ;;  %v5642_v33 = vpack.c.bf16 %v3409_v54, %v3408_v1 }
 0x5c4   : > { %v3074_v27 = vpop.xlane.xlu1 %3073  ;;  %v5733_v28 = vpop.eup %5732  ;;  %v3402_v9 = vmul.f32 %v3386_v26, %v3274_v22  ;;  %v3394_v34 = vadd.f32 1.0, %v5731_v8 }
 0x5c5   : > { %v3092_v62 = vmul.f32 0.015873017, %v3074_v27  ;;  %v3403_v36 = vmul.f32 %v3387_v10, %v3275_v30  ;;  %v3395_v4 = vadd.f32 1.0, %v5733_v28  ;;  %5643 = vmatprep.subr.bf16.mxu1 %v5642_v33 }
 0x5c6   : > { %v3410_v0 = vmul.f32 %v3394_v34, %v3282_v29  ;;  %5645 = vmatpush3.bf16.msra.mxu1 %v5642_v33 }
 0x5c7   : > { %v3100_v12 = vadd.f32 %v3092_v62, %v3084_v24  ;;  %v5630_v44 = vpack.c.bf16 %v3403_v36, %v3402_v9  ;;  %v3411_v50 = vmul.f32 %v3395_v4, %v3283_v37  ;;  %v3415_v37 = vld [vmem:[%s5915_s17 + $0x8] sm:$0xff]  ;;  %v3416_v4 = vld [vmem:[%s5915_s17 + $0x10] sm:$0xff] }
 0x5c8   : > { %v3252_v13 = vpop.permute.xlu1 %3251 }
 0x5c9   : > { %v3108_v15 = vmul.f32 0.5, %v3100_v12  ;;  %5631 = vmatprep.subr.bf16.mxu0 %v5630_v44  ;;  %v5646_v39 = vpack.c.bf16 %v3411_v50, %v3410_v0  ;;  %v3261_v60 = vadd.f32 %v3252_v13, %v3197_v61  ;;  %v3269_v40 = vadd.f32 %v3252_v13, %v3205_v16  ;;  %v3418_v12 = vld [vmem:[%s5915_s17 + $0x20] sm:$0xff]  ;;  %v3419_v0 = vld [vmem:[%s5915_s17 + $0x28] sm:$0xff]  ;;  %v3433_v13 = vpop.permute.xlu0 %3432 }
 0x5ca   : > { %5633 = vmatpush3.bf16.msra.mxu0 %v5630_v44  ;;  %v3421_v44 = vld [vmem:[%s5915_s17 + $0x38] sm:$0xff]  ;;  %v5762_v50 = vmov 0.0|0.0  }
 0x5cb   : > { %v3116_v35 = vadd.f32 1e-05, %v3108_v15  ;;  %5647 = vmatprep.subr.bf16.mxu1 %v5646_v39  ;;  %v3293_v6 = vmul.f32 0.044715, %v3261_v60  ;;  %v3301_v25 = vmul.f32 0.044715, %v3269_v40 }
 0x5cc   : > { %5649 = vmatpush3.bf16.msra.mxu1 %v5646_v39  ;;  %v3277_v24 = vmul.f32 0.5, %v3261_v60  ;;  %v3285_v10 = vmul.f32 0.5, %v3269_v40  ;;  %v5764_v15 = vmov 0.0   ;;  %v3438_v39 = vpop.permute.xlu1 %3437 }
 0x5cd   : > { %5734 = vrsqrt.f32 %v3116_v35  ;;  %v3309_v42 = vmul.f32 %v3293_v6, %v3261_v60  ;;  %v3317_v3 = vmul.f32 %v3301_v25, %v3269_v40  ;;  %v3443_v61 = vpop.permute.xlu0 %3442 }
 0x5cf   : > { %v3325_v18 = vmul.f32 %v3309_v42, %v3261_v60  ;;  %v3333_v53 = vmul.f32 %v3317_v3, %v3269_v40 }
 0x5d0   : > { %v3448_v35 = vpop.permute.xlu1 %3447 }
 0x5d1   : > { %v3341_v43 = vadd.f32 %v3325_v18, %v3261_v60  ;;  %v3349_v57 = vadd.f32 %v3333_v53, %v3269_v40 }
 0x5d3   : > { %v3357_v32 = vmul.f32 0.7978846, %v3341_v43  ;;  %v3365_v47 = vmul.f32 0.7978846, %v3349_v57 }
 0x5d4   : > { %v3458_v43 = vpop.permute.xlu1 %3457 }
 0x5d5   : > { %5736 = vtanh.f32 %v3357_v32 }
 0x5d6   : > { %5738 = vtanh.f32 %v3365_v47 }
 0x5d7   : > { %v5735_v14 = vpop.eup %5734 }
 0x5d8   : > { %v3132_v17 = vmul.f32 %v5735_v14, %v6687_v23  ;;  %v3140_v11 = vmul.f32 %v5735_v14, %v6690_v2 }
 0x5da   : > { %v3196_v56 = vmul.f32 %v6707_v63, %v3132_v17  ;;  %v3204_v55 = vmul.f32 %v6707_v63, %v3140_v11  ;;  %v3453_v11 = vpop.permute.xlu0 %3452 }
 0x5dc   : > { %v3260_v49 = vadd.f32 %v3247_v7, %v3196_v56  ;;  %v3268_v51 = vadd.f32 %v3247_v7, %v3204_v55 }
 0x5de   : > { %v3292_v58 = vmul.f32 0.044715, %v3260_v49  ;;  %v3300_v59 = vmul.f32 0.044715, %v3268_v51  ;;  %v3276_v8 = vmul.f32 0.5, %v3260_v49  ;;  %v3284_v30 = vmul.f32 0.5, %v3268_v51 }
 0x5df   : > { %v5737_v63 = vpop.eup %5736 }
 0x5e0   : > { %v3308_v31 = vmul.f32 %v3292_v58, %v3260_v49  ;;  %v3316_v5 = vmul.f32 %v3300_v59, %v3268_v51  ;;  %v5739_v52 = vpop.eup %5738  ;;  %v3389_v21 = vadd.f32 1.0, %v5737_v63 }
 0x5e1   : > { %v3397_v22 = vadd.f32 1.0, %v5739_v52 }
 0x5e2   : > { %v3324_v23 = vmul.f32 %v3308_v31, %v3260_v49  ;;  %v3332_v48 = vmul.f32 %v3316_v5, %v3268_v51  ;;  %v3405_v33 = vmul.f32 %v3389_v21, %v3277_v24 }
 0x5e3   : > { %v3413_v9 = vmul.f32 %v3397_v22, %v3285_v10 }
 0x5e4   : > { %v3340_v2 = vadd.f32 %v3324_v23, %v3260_v49  ;;  %v3348_v19 = vadd.f32 %v3332_v48, %v3268_v51 }
 0x5e6   : > { %v3356_v20 = vmul.f32 0.7978846, %v3340_v2  ;;  %v3364_v1 = vmul.f32 0.7978846, %v3348_v19 }
 0x5e8   : > { %5740 = vtanh.f32 %v3356_v20 }
 0x5e9   : > { %5742 = vtanh.f32 %v3364_v1 }
 0x5f2   : > { %v5741_v54 = vpop.eup %5740 }
 0x5f3   : > { %v5743_v26 = vpop.eup %5742  ;;  %v3388_v27 = vadd.f32 1.0, %v5741_v54 }
 0x5f4   : > { %v3396_v29 = vadd.f32 1.0, %v5743_v26  ;;  %v3463_v26 = vpop.permute.xlu0 %3462 }
 0x5f5   : > { %v3404_v28 = vmul.f32 %v3388_v27, %v3276_v8 }
 0x5f6   : > { %v3412_v62 = vmul.f32 %v3396_v29, %v3284_v30  ;;  %v3468_v30 = vpop.permute.xlu1 %3467 }
 0x5f7   : > { %v5634_v34 = vpack.c.bf16 %v3405_v33, %v3404_v28 }
 0x5f8   : > { %v5650_v36 = vpack.c.bf16 %v3413_v9, %v3412_v62 }
 0x5f9   : > { %5635 = vmatprep.subr.bf16.mxu0 %v5634_v34 }
 0x5fa   : > { %5651 = vmatprep.subr.bf16.mxu1 %v5650_v36  ;;  %5637 = vmatpush3.bf16.msra.mxu0 %v5634_v34 }
 0x5fb   : > { %5653 = vmatpush3.bf16.msra.mxu1 %v5650_v36  ;;  %5654 = vmatprep.subr.bf16.mxu0 %v5762_v50 }
 0x5fc   : > { %5666 = vmatprep.subr.bf16.mxu1 %v5762_v50 }
 0x5fd   : > { %5115 = vmatmul.mubr.msk.f32.vlgmr.msra.gmra.mrb[30].mxu0 %vm990_vm5, %v3415_v37 }
 0x5fe   : > { %5143 = vmatmul.mubr.msk.f32.vlgmr.msra.gmra.mrb[30].mxu1 %vm990_vm5, %v3415_v37  ;;  %5117 = vmatprep.mubr.msk.f32.mxu0 %vm990_vm5, %v3416_v4 }
 0x5ff   : > { %5145 = vmatprep.mubr.msk.f32.mxu1 %vm990_vm5, %v3416_v4 }
 0x601   : > { %5118 = vmatmul.mubr.msk.f32.gmra.mrb[32].mxu0 %vm990_vm5, %v3417_v41 }
 0x602   : > { %5146 = vmatmul.mubr.msk.f32.gmra.mrb[32].mxu1 %vm990_vm5, %v3417_v41  ;;  %5120 = vmatprep.mubr.msk.f32.mxu0 %vm990_vm5, %v3418_v12 }
 0x603   : > { %5148 = vmatprep.mubr.msk.f32.mxu1 %vm990_vm5, %v3418_v12 }
 0x605   : > { %5121 = vmatmul.mubr.msk.f32.gmra.mrb[34].mxu0 %vm990_vm5, %v3419_v0 }
 0x606   : > { %5149 = vmatmul.mubr.msk.f32.gmra.mrb[34].mxu1 %vm990_vm5, %v3419_v0  ;;  %5123 = vmatprep.mubr.msk.f32.mxu0 %vm990_vm5, %v3420_v38 }
 0x607   : > { %5151 = vmatprep.mubr.msk.f32.mxu1 %vm990_vm5, %v3420_v38 }
 0x609   : > { %5124 = vmatmul.mubr.msk.f32.gmra.mrb[36].mxu0 %vm990_vm5, %v3421_v44 }
 0x60a   : > { %5152 = vmatmul.mubr.msk.f32.gmra.mrb[36].mxu1 %vm990_vm5, %v3421_v44  ;;  %5170 = vmatprep.mubr.msk.f32.mxu0 %vm5763_vm12, %v5764_v15 }
 0x60b   : > { %5189 = vmatprep.mubr.msk.f32.mxu1 %vm5763_vm12, %v5764_v15 }
 0x6d0   : > { %v5116_v16 = vpop.f32.mrb[30].mxu0 }
 0x6d1   : > { %v3566_v60 = vadd.f32 %v5116_v16, %v3438_v39  ;;  %v5144_v40 = vpop.f32.mrb[30].mxu1  ;;  %v3560_v6 = vpop.f32.mrb[31].mxu0  ;;  %v5765_v16 = vmov 1966171168  }
 0x6d2   : > { %v3671_v25 = vadd.f32 %v5144_v40, %v3438_v39  ;;  %v3561_v42 = vadd.f32 %v3560_v6, %v3433_v13  ;;  %v3665_v3 = vpop.f32.mrb[31].mxu1  ;;  %v3882_v40 = vlaneseq }
 0x6d3   : > { %v3705_v14 = vmax.f32 %v3566_v60, 0.0  ;;  %v3666_v17 = vadd.f32 %v3665_v3, %v3433_v13  ;;  %v3880_v60 = vunpack.c.l.s4 %v5765_v16 }
 0x6d4   : > { %v3713_v18 = vmax.f32 %v3671_v25, 0.0  ;;  %v3704_v53 = vmax.f32 %v3561_v42, 0.0  ;;  %v5119_v56 = vpop.f32.mrb[32].mxu0  ;;  %v3883_v25 = vshrl.u32 %v3882_v40, 7  ;;  %v3725_v42 = vpop.permute.xlu0 %3724 }
 0x6d5   : > { %v3712_v55 = vmax.f32 %v3666_v17, 0.0  ;;  %v3576_v7 = vadd.f32 %v5119_v56, %v3448_v35  ;;  %v5147_v49 = vpop.f32.mrb[32].mxu1  ;;  %v3570_v51 = vpop.f32.mrb[33].mxu0  ;;  %v3881_v6 = vunpack.c.0.s8 %v3880_v60 }
 0x6d6   : > { %v5655_v57 = vpack.c.bf16 %v3705_v14, %v3704_v53  ;;  %v3681_v58 = vadd.f32 %v5147_v49, %v3448_v35  ;;  %v3571_v59 = vadd.f32 %v3570_v51, %v3443_v61  ;;  %v3675_v31 = vpop.f32.mrb[33].mxu1  ;;  %v3720_v35 = vld [vmem:[%s5926_s21] sm:$0x3] }
 0x6d7   : > { %v5667_v32 = vpack.c.bf16 %v3713_v18, %v3712_v55  ;;  %v3707_v5 = vmax.f32 %v3576_v7, 0.0  ;;  %v3676_v47 = vadd.f32 %v3675_v31, %v3443_v61  ;;  %v3884_v17 = vsub.s32 %v3881_v6, %v3883_v25 }
 0x6d8   : > { %v3715_v23 = vmax.f32 %v3681_v58, 0.0  ;;  %v3706_v48 = vmax.f32 %v3571_v59, 0.0  ;;  %v5122_v2 = vpop.f32.mrb[34].mxu0  ;;  %5656 = vmatpush3.bf16.msra.mxu0 %v5655_v57  ;;  %v5748_v57 = vld [vmem:[%s6953_s25] sm:$0x1] }
 0x6d9   : > { %v3714_v19 = vmax.f32 %v3676_v47, 0.0  ;;  %v3586_v20 = vadd.f32 %v5122_v2, %v3458_v43  ;;  %v5150_v1 = vpop.f32.mrb[34].mxu1  ;;  %5668 = vmatpush3.bf16.msra.mxu1 %v5667_v32  ;;  %v3580_v63 = vpop.f32.mrb[35].mxu0  ;;  %5657 = vmatprep.subr.bf16.mxu0 %v5762_v50  ;;  %v3872_v58 = vsub.f32 1.0, %v5748_v57 }
 0x6da   : > { %v5658_v52 = vpack.c.bf16 %v3707_v5, %v3706_v48  ;;  %v3691_v21 = vadd.f32 %v5150_v1, %v3458_v43  ;;  %v3581_v54 = vadd.f32 %v3580_v63, %v3453_v11  ;;  %v3685_v22 = vpop.f32.mrb[35].mxu1  ;;  %5669 = vmatprep.subr.bf16.mxu1 %v5762_v50  ;;  %v3921_v5 = vld [vmem:[%s6957_s23] sm:$0x1]  ;;  %v3922_v48 = vld [vmem:[%s6957_s23 + $0x1] sm:$0x1] }
 0x6db   : > { %v5670_v8 = vpack.c.bf16 %v3715_v23, %v3714_v19  ;;  %v3709_v24 = vmax.f32 %v3586_v20, 0.0  ;;  %v3686_v27 = vadd.f32 %v3685_v22, %v3453_v11 }
 0x6dc   : > { %v3717_v10 = vmax.f32 %v3691_v21, 0.0  ;;  %v3708_v29 = vmax.f32 %v3581_v54, 0.0  ;;  %v5125_v28 = vpop.f32.mrb[36].mxu0  ;;  %5659 = vmatpush3.bf16.msra.mxu0 %v5658_v52 }
 0x6dd   : > { %v3716_v33 = vmax.f32 %v3686_v27, 0.0  ;;  %v3596_v62 = vadd.f32 %v5125_v28, %v3468_v30  ;;  %v5153_v9 = vpop.f32.mrb[36].mxu1  ;;  %5671 = vmatpush3.bf16.msra.mxu1 %v5670_v8  ;;  %v3590_v34 = vpop.f32.mrb[37].mxu0  ;;  %5660 = vmatprep.subr.bf16.mxu0 %v5762_v50 }
 0x6de   : > { %v5661_v36 = vpack.c.bf16 %v3709_v24, %v3708_v29  ;;  %v3701_v37 = vadd.f32 %v5153_v9, %v3468_v30  ;;  %v3591_v4 = vadd.f32 %v3590_v34, %v3463_v26  ;;  %v3695_v41 = vpop.f32.mrb[37].mxu1  ;;  %5672 = vmatprep.subr.bf16.mxu1 %v5762_v50  ;;  %v5749_v24 = vld [vmem:[%s6917_s16] sm:$0x1]  ;;  %v5750_v30 = vld [vmem:[%s6917_s16 + $0x1] sm:$0x1] }
 0x6df   : > { %v5673_v12 = vpack.c.bf16 %v3717_v10, %v3716_v33  ;;  %v3711_v0 = vmax.f32 %v3596_v62, 0.0  ;;  %v3696_v38 = vadd.f32 %v3695_v41, %v3463_v26 }
 0x6e0   : > { %v3719_v44 = vmax.f32 %v3701_v37, 0.0  ;;  %v3710_v15 = vmax.f32 %v3591_v4, 0.0  ;;  %5662 = vmatpush3.bf16.msra.mxu0 %v5661_v36 }
 0x6e1   : > { %v3718_v13 = vmax.f32 %v3696_v38, 0.0  ;;  %5674 = vmatpush3.bf16.msra.mxu1 %v5673_v12  ;;  %5663 = vmatprep.subr.bf16.mxu0 %v5762_v50 }
 0x6e2   : > { %v5664_v39 = vpack.c.bf16 %v3711_v0, %v3710_v15  ;;  %5675 = vmatprep.subr.bf16.mxu1 %v5762_v50 }
 0x6e3   : > { %v5676_v61 = vpack.c.bf16 %v3719_v44, %v3718_v13 }
 0x6e4   : > { %5665 = vmatpush3.bf16.msra.mxu0 %v5664_v39 }
 0x6e5   : > { %5677 = vmatpush3.bf16.msra.mxu1 %v5676_v61 }
 0x6e7   : > { %5171 = vmatmul.mubr.msk.f32.vlgmr.msra.gmra.mrb[38].mxu0 %vm990_vm5, %v3720_v35 }
 0x6e8   : > { %5190 = vmatmul.mubr.msk.f32.vlgmr.msra.gmra.mrb[38].mxu1 %vm990_vm5, %v3720_v35 }
 0x7ba   : > { %v3796_v3 = vpop.f32.mrb[38].mxu0 }
 0x7bb   : > { %v3797_v14 = vadd.f32 %v3796_v3, %v3725_v42  ;;  %v3866_v11 = vpop.f32.mrb[38].mxu1  ;;  %v5172_v50 = vpop.f32.mrb[39].mxu0 }
 0x7bc   : > { %v3867_v18 = vadd.f32 %v3866_v11, %v3725_v42  ;;  %v5191_v53 = vpop.f32.mrb[39].mxu1 }
 0x7bd   : > { %v3870_v56 = vmax.f32 %v3797_v14, 0.0 }
 0x7be   : > { %v3871_v55 = vmax.f32 %v3867_v18, 0.0 }
 0x7bf   : > { %v3873_v7 = vmul.f32 1.442695, %v3870_v56  ;;  %v3931_v49 = vrot.slane %v3870_v56, %v3884_v17 }
 0x7c0   : > { %v3875_v51 = vmul.f32 1.442695, %v3871_v55  ;;  %v3946_v43 = vrot.slane %v3871_v55, %v3884_v17 }
 0x7c1   : > { %5744 = vpow2.f32 %v3873_v7  ;;  %v3932_v59 = vcombine.high %v3931_v49, %v3931_v49 }
 0x7c2   : > { %5746 = vpow2.f32 %v3875_v51  ;;  %v3947_v31 = vcombine.high %v3946_v43, %v3946_v43 }
 0x7c3   : > { %v3939_v32 = vrot.slane %v3932_v59, %v3884_v17 }
 0x7c4   : > { %v3954_v47 = vrot.slane %v3947_v31, %v3884_v17 }
 0x7c5   : > { %v3957_v23 = vmul.f32 %v3939_v32, %v3872_v58 }
 0x7c6   : > { %v3958_v2 = vmul.f32 %v3954_v47, %v3872_v58 }
 0x7c7   : > { %v3959_v19 = vadd.f32 %v3957_v23, %v3921_v5 }
 0x7c8   : > { %v3960_v20 = vadd.f32 %v3958_v2, %v3922_v48 }
 0x7c9   : > { %3961 = vst.msk [vmem:[%s6957_s23] sm:$0x1] %vm1079_vm7, %v3959_v19 }
 0x7ca   : > { %3962 = vst.msk [vmem:[%s6957_s23 + $0x1] sm:$0x1] %vm1079_vm7, %v3960_v20 }
 0x7cb   : > { %v5745_v1 = vpop.eup %5744 }
 0x7cc   : > { %v5747_v63 = vpop.eup %5746  ;;  %v3885_v52 = vrot.slane %v5745_v1, %v3884_v17 }
 0x7cd   : > { %v3900_v21 = vrot.slane %v5747_v63, %v3884_v17 }
 0x7ce   : > { %v3886_v54 = vcombine.high %v3885_v52, %v3885_v52 }
 0x7cf   : > { %v3901_v22 = vcombine.high %v3900_v21, %v3900_v21 }
 0x7d0   : > { %v3893_v26 = vrot.slane %v3886_v54, %v3884_v17 }
 0x7d1   : > { %v3908_v8 = vrot.slane %v3901_v22, %v3884_v17 }
 0x7d2   : > { %v3911_v27 = vmul.f32 %v5749_v24, %v3893_v26 }
 0x7d3   : > { %v3912_v10 = vmul.f32 %v5750_v30, %v3908_v8 }
 0x7d4   : > { %v3913_v29 = vadd.f32 %v3911_v27, %v3870_v56 }
 0x7d5   : > { %v3914_v28 = vadd.f32 %v3912_v10, %v3871_v55 }
 0x7d6   : > { %v3915_v33 = vmul.f32 %v3913_v29, %v3872_v58 }
 0x7d7   : > { %v3916_v62 = vmul.f32 %v3914_v28, %v3872_v58 }
 0x7d8   : > { %v3917_v9 = vadd.f32 %v3915_v33, %v6062_v46 }
 0x7d9   : > { %v3918_v34 = vadd.f32 %v3916_v62, %v6060_v45 }
 0x7da   : > { %3919 = vst.msk [vmem:[%s6917_s16] sm:$0x1] %vm1079_vm7, %v3917_v9 }
 0x7db   : > { %3920 = vst.msk [vmem:[%s6917_s16 + $0x1] sm:$0x1] %vm1079_vm7, %v3918_v34 }
 0x7dc PF: > { %s6958_s4 = sld [smem:[#allocation4_spill]] }
 0x7e2   : > { %s28_s24 = sadd.s32 1, %s6958_s4  }
 0x7e3   : > { %p25_p5 = scmp.ge.s32.totalorder %s28_s24, 8  }
 0x7e5   :  { %27 = sbr.rel (!%p25_p5) target bundleno = 12 (0xc), region = 167 }

// kernel: atomflow_forward.2
= control target key start
LH: loop header
LB: loop body
LE: loop exit
PB: predicated region body
PF: predicated region fallthrough
CT: control target
= control target key end

     0   :  { %vm88_vm0 = vcmask 1044480   ;;  %vm69_vm1 = vcmask 367616   ;;  %vm8612_vm2 = vmmov 1   ;;  %v12201_v11 = vmov 0  ;;  %s12098_s0 = inlined_call_operand.vmem [shape: f32[2,45,7], index: 0, kind: input, shape index: {}]   ;;  %s12099_s1 = inlined_call_operand.vmem [shape: f32[3,45,45], index: 1, kind: input, shape index: {}]   ;;  %s12100_s2 = inlined_call_operand.vmem [shape: f32[3,7,448], index: 2, kind: input, shape index: {}]   ;;  %s12101_s6 = inlined_call_operand.vmem [shape: f32[448,64], index: 6, kind: input, shape index: {}]   ;;  %s12102_s3 = inlined_call_operand.vmem [shape: f32[1,448], index: 3, kind: input, shape index: {}]   ;;  %s12103_s7 = inlined_call_operand.vmem [shape: f32[64,448], index: 7, kind: input, shape index: {}]   ;;  %s12104_s4 = inlined_call_operand.vmem [shape: f32[1,64], index: 4, kind: input, shape index: {}]   ;;  %s12105_s5 = inlined_call_operand.vmem [shape: f32[1,64], index: 5, kind: input, shape index: {}]   ;;  %s12106_s8 = inlined_call_operand.vmem [shape: f32[3,448,56], index: 8, kind: input, shape index: {}]   ;;  %s12107_s12 = inlined_call_operand.vmem [shape: f32[56,8], index: 12, kind: input, shape index: {}]   ;;  %s12108_s9 = inlined_call_operand.vmem [shape: f32[1,56], index: 9, kind: input, shape index: {}]   ;;  %s12109_s13 = inlined_call_operand.vmem [shape: f32[8,56], index: 13, kind: input, shape index: {}]   ;;  %s12110_s10 = inlined_call_operand.vmem [shape: f32[1,8], index: 10, kind: input, shape index: {}]   ;;  %s12111_s11 = inlined_call_operand.vmem [shape: f32[1,8], index: 11, kind: input, shape index: {}]   ;;  %s12112_s14 = inlined_call_operand.vmem [shape: f32[2,45,56], index: 14, kind: output, shape index: {}]  }
   0x1   :  { %v47_v0 = vld [vmem:[%s12098_s0] sm:$0xff]  ;;  %v48_v1 = vld [vmem:[%s12098_s0 + $0x8] sm:$0xff]  ;;  %v49_v2 = vld [vmem:[%s12098_s0 + $0x10] sm:$0xff]  ;;  %vm524_vm4 = vcmask 1046528   ;;  %v12113_v35 = vmov 0.0   ;;  %vm505_vm5 = vcmask 56320  }
   0x2   :  { %v8700_v3 = vpack.c.bf16 %v48_v1, %v47_v0  ;;  %v50_v4 = vld [vmem:[%s12098_s0 + $0x18] sm:$0xff]  ;;  %v51_v6 = vld [vmem:[%s12098_s0 + $0x20] sm:$0xff]  ;;  %v52_v7 = vld [vmem:[%s12098_s0 + $0x28] sm:$0x1f]  ;;  %vm2204_vm6 = vcmask 523264   ;;  %vm2241_vm7 = vcmask 520192  }
   0x3   :  { %v8705_v5 = vpack.c.bf16 %v50_v4, %v49_v2  ;;  %v63_v8 = vld [vmem:[%s12099_s1] sm:$0xff]  ;;  %v8721_v9 = vld [vmem:[%s12099_s1 + $0x30] sm:$0xff]  ;;  %v8727_v10 = vpack.c.bf16 %v52_v7, %v51_v6  ;;  %vm8730_vm3 = vmpackc.low %vm88_vm0, %vm8612_vm2  ;;  %vm8615_vm8 = vmmov 0   ;;  %vm6105_vm9 = vcmask 457728  }
   0x4   :  { %7631 = vmatprep.subr.bf16.mxu1 %v8700_v3  ;;  %7659 = vmatprep.subr.bf16.mxu0 %v8700_v3  ;;  %v12202_v11 = vsel %vm8730_vm3, 4294967295, %v12201_v11  ;;  %v53_v12 = vld [vmem:[%s12098_s0 + $0x30] sm:$0xff]  ;;  %v54_v13 = vld [vmem:[%s12098_s0 + $0x38] sm:$0xff]  ;;  %v55_v15 = vld [vmem:[%s12098_s0 + $0x40] sm:$0xff]  ;;  %vm6121_vm10 = vcmask 454656   ;;  %vm6366_vm11 = vcmask 64512  }
   0x5   :  { %7633 = vmatpush3.bf16.msra.mxu1 %v8700_v3  ;;  %7661 = vmatpush3.bf16.msra.mxu0 %v8700_v3  ;;  %12203 = vst [vmem:[#allocation2_spill] sm:$0xff] %v12202_v11  ;;  %v8751_v14 = vpack.c.bf16 %v54_v13, %v53_v12  ;;  %v56_v16 = vld [vmem:[%s12098_s0 + $0x48] sm:$0xff]  ;;  %v6592_v19 = vld [vmem:[%s12099_s1 + $0x38] sm:$0xff]  ;;  %v65_v20 = vld [vmem:[%s12099_s1 + $0x10] sm:$0xff] }
   0x6   :  { %7635 = vmatprep.subr.bf16.mxu1 %v8705_v5  ;;  %7663 = vmatprep.subr.bf16.mxu0 %v8705_v5  ;;  %v6588_v17 = vld [vmem:[%s12100_s2 + $0x28] sm:$0x7f]  ;;  %v8778_v21 = vpack.c.bf16 %v56_v16, %v55_v15  ;;  %v6593_v22 = vld [vmem:[%s12099_s1 + $0x40] sm:$0xff]  ;;  %v57_v23 = vld [vmem:[%s12098_s0 + $0x50] sm:$0xff] }
   0x7   :  { %7472 = vmatprep.mubr.msk.f32.mxu1 %vm69_vm1, %v63_v8  ;;  %7514 = vmatprep.mubr.msk.f32.mxu0 %vm69_vm1, %v8721_v9  ;;  %v64_v18 = vld [vmem:[%s12099_s1 + $0x8] sm:$0xff]  ;;  %v58_v24 = vld [vmem:[%s12098_s0 + $0x58] sm:$0x1f]  ;;  %v6587_v25 = vld [vmem:[%s12100_s2 + $0x20] sm:$0x7f] }
   0x8   :  { %v66_v26 = vld [vmem:[%s12099_s1 + $0x18] sm:$0xff]  ;;  %v6594_v27 = vld [vmem:[%s12099_s1 + $0x48] sm:$0xff]  ;;  %v67_v28 = vld [vmem:[%s12099_s1 + $0x20] sm:$0xff]  ;;  %v8808_v29 = vpack.c.bf16 %v58_v24, %v57_v23 }
   0x9   :  { %7637 = vmatpush3.bf16.msra.mxu1 %v8705_v5  ;;  %7665 = vmatpush3.bf16.msra.mxu0 %v8705_v5  ;;  %v6595_v30 = vld [vmem:[%s12099_s1 + $0x50] sm:$0xff]  ;;  %v68_v31 = vld [vmem:[%s12099_s1 + $0x28] sm:$0x1f]  ;;  %v6596_v32 = vld [vmem:[%s12099_s1 + $0x58] sm:$0x1f] }
   0xa   :  { %7640 = vmatprep.subr.msk.bf16.mxu1 %vm8730_vm3, %v8727_v10  ;;  %7668 = vmatprep.subr.msk.bf16.mxu0 %vm8730_vm3, %v8727_v10  ;;  %v6590_v33 = vld [vmem:[%s12100_s2 + $0x38] sm:$0x7f]  ;;  %v6589_v34 = vld [vmem:[%s12100_s2 + $0x30] sm:$0x7f]  ;;  %v60_v40 = vld [vmem:[%s12100_s2 + $0x8] sm:$0x7f] }
   0xb   :  { %v62_v41 = vld [vmem:[%s12100_s2 + $0x18] sm:$0x7f]  ;;  %v59_v57 = vld [vmem:[%s12100_s2] sm:$0x7f]  ;;  %v61_v59 = vld [vmem:[%s12100_s2 + $0x10] sm:$0x7f] }
   0xc   :  { %v6678_v0 = vld [vmem:[%s12100_s2 + $0x58] sm:$0x7f]  ;;  %v6679_v1 = vld [vmem:[%s12099_s1 + $0x60] sm:$0xff]  ;;  %v6680_v2 = vld [vmem:[%s12099_s1 + $0x68] sm:$0xff] }
   0xd   :  { %7643 = vmatpush3.bf16.msk.msra.mxu1 %vm8730_vm3, %v8727_v10  ;;  %7671 = vmatpush3.bf16.msk.msra.mxu0 %vm8730_vm3, %v8727_v10  ;;  %v6677_v4 = vld [vmem:[%s12100_s2 + $0x50] sm:$0x7f]  ;;  %v6683_v6 = vld [vmem:[%s12099_s1 + $0x80] sm:$0xff]  ;;  %v6684_v7 = vld [vmem:[%s12099_s1 + $0x88] sm:$0x1f] }
   0xe   :  { %7645 = vmatprep.subr.bf16.mxu1 %v8751_v14  ;;  %6611 = vmatprep.subr.msk.mxu0 %vm524_vm4, %v6588_v17  ;;  %v2531_v23 = vld [vmem:[%s12101_s6 + $0x100] sm:$0xff]  ;;  %v2532_v24 = vld [vmem:[%s12101_s6 + $0x108] sm:$0xff] }
  0x10   :  { %7473 = vmatmul.mubr.msk.f32.vlgmr.msra.gmra.mrb[0].mxu1 %vm69_vm1, %v64_v18  ;;  %7515 = vmatmul.mubr.msk.f32.vlgmr.msra.gmra.mrb[0].mxu0 %vm69_vm1, %v6592_v19 }
  0x11   :  { %7647 = vmatpush3.bf16.msra.mxu1 %v8751_v14  ;;  %7475 = vmatprep.mubr.msk.f32.mxu1 %vm69_vm1, %v65_v20 }
  0x12   :  { %7649 = vmatprep.subr.bf16.mxu1 %v8778_v21  ;;  %7517 = vmatprep.mubr.msk.f32.mxu0 %vm69_vm1, %v6593_v22 }
  0x13   :  { %6612 = vmatpush1.msk.msra.mxu0 %vm524_vm4, %v6587_v25 }
  0x14   :  { %7476 = vmatmul.mubr.msk.f32.gmra.mrb[2].mxu1 %vm69_vm1, %v66_v26  ;;  %7518 = vmatmul.mubr.msk.f32.gmra.mrb[2].mxu0 %vm69_vm1, %v6594_v27 }
  0x15   :  { %7651 = vmatpush3.bf16.msra.mxu1 %v8778_v21  ;;  %7478 = vmatprep.mubr.msk.f32.mxu1 %vm69_vm1, %v67_v28 }
  0x16   :  { %7654 = vmatprep.subr.msk.bf16.mxu1 %vm8730_vm3, %v8808_v29  ;;  %7520 = vmatprep.mubr.msk.f32.mxu0 %vm69_vm1, %v6595_v30 }
  0x17   :  { %6627 = vmatprep.subr.msk.mxu0 %vm524_vm4, %v6588_v17 }
  0x18   :  { %7479 = vmatmul.mubr.msk.f32.gmra.mrb[4].mxu1 %vm69_vm1, %v68_v31  ;;  %7521 = vmatmul.mubr.msk.f32.gmra.mrb[4].mxu0 %vm69_vm1, %v6596_v32 }
  0x19   :  { %7657 = vmatpush3.bf16.msk.msra.mxu1 %vm8730_vm3, %v8808_v29  ;;  %7493 = vmatprep.mubr.msk.f32.mxu1 %vm69_vm1, %v63_v8  ;;  %v6676_v8 = vld [vmem:[%s12100_s2 + $0x48] sm:$0x7f] }
  0x1a   :  { %7673 = vmatprep.subr.bf16.mxu1 %v8751_v14  ;;  %601 = vmatprep.mubr.f32.mxu0 %v12113_v35 }
  0x1c   :  { %7494 = vmatmul.mubr.msk.f32.vlgmr.msra.gmra.mrb[6].mxu1 %vm69_vm1, %v64_v18 }
  0x1d   :  { %7675 = vmatpush3.bf16.msra.mxu1 %v8751_v14  ;;  %7496 = vmatprep.mubr.msk.f32.mxu1 %vm69_vm1, %v65_v20 }
  0x1e   :  { %7677 = vmatprep.subr.bf16.mxu1 %v8778_v21 }
  0x20   :  { %7497 = vmatmul.mubr.msk.f32.gmra.mrb[8].mxu1 %vm69_vm1, %v66_v26  ;;  %v12115_v26 = vmov 0.0|0.0  }
  0x21   :  { %7679 = vmatpush3.bf16.msra.mxu1 %v8778_v21  ;;  %7499 = vmatprep.mubr.msk.f32.mxu1 %vm69_vm1, %v67_v28  ;;  %v2534_v28 = vld [vmem:[%s12101_s6 + $0x118] sm:$0xff] }
  0x22   :  { %7682 = vmatprep.subr.msk.bf16.mxu1 %vm8730_vm3, %v8808_v29 }
  0x24   :  { %7500 = vmatmul.mubr.msk.f32.gmra.mrb[10].mxu1 %vm69_vm1, %v68_v31  ;;  %v2536_v31 = vld [vmem:[%s12101_s6 + $0x128] sm:$0xff] }
  0x25   :  { %7685 = vmatpush3.bf16.msk.msra.mxu1 %vm8730_vm3, %v8808_v29  ;;  %7535 = vmatprep.mubr.msk.f32.mxu1 %vm69_vm1, %v8721_v9  ;;  %v6675_v9 = vld [vmem:[%s12100_s2 + $0x40] sm:$0x7f] }
  0x26   :  { %6619 = vmatprep.subr.msk.mxu1 %vm524_vm4, %v6590_v33 }
  0x28   :  { %7536 = vmatmul.mubr.msk.f32.vlgmr.msra.gmra.mrb[12].mxu1 %vm69_vm1, %v6592_v19 }
  0x29   :  { %7538 = vmatprep.mubr.msk.f32.mxu1 %vm69_vm1, %v6593_v22  ;;  %6620 = vmatpush1.msk.msra.mxu1 %vm524_vm4, %v6589_v34 }
  0x2a   :  { %6635 = vmatprep.subr.msk.mxu1 %vm524_vm4, %v6590_v33  ;;  %v2537_v33 = vld [vmem:[%s12101_s6 + $0x130] sm:$0xff] }
  0x2c   :  { %7539 = vmatmul.mubr.msk.f32.gmra.mrb[14].mxu1 %vm69_vm1, %v6594_v27  ;;  %v2533_v27 = vld [vmem:[%s12101_s6 + $0x110] sm:$0xff] }
  0x2d   :  { %7541 = vmatprep.mubr.msk.f32.mxu1 %vm69_vm1, %v6595_v30  ;;  %v2535_v30 = vld [vmem:[%s12101_s6 + $0x120] sm:$0xff] }
  0x30   :  { %7542 = vmatmul.mubr.msk.f32.gmra.mrb[16].mxu1 %vm69_vm1, %v6596_v32  ;;  %v9177_v32 = vpack.c.bf16 %v2536_v31, %v2535_v30  ;;  %v2527_v31 = vld [vmem:[%s12101_s6 + $0xe0] sm:$0xff] }
  0x31   :  { %702 = vmatprep.mubr.f32.mxu1 %v12113_v35 }
  0x32   :  { %12206 = vst [vmem:[#allocation5_spill] sm:$0xff] %v9177_v32 }
  0xe3   :  { %v8868_v36 = vpop.f32.mrb[0].mxu1  ;;  %v7516_v37 = vpop.f32.mrb[0].mxu0 }
  0xe4   :  { %v8870_v38 = vpop.f32.mrb[1].mxu1  ;;  %v381_v39 = vpop.f32.mrb[1].mxu0 }
  0xe5   :  { %6613 = vmatmul.mubr.msk.f32.vlgmr.msra.gmra.mrb[6].mxu0 %vm505_vm5, %v381_v39  ;;  %6621 = vmatmul.mubr.msk.f32.vlgmr.msra.gmra.mrb[18].mxu1 %vm505_vm5, %v381_v39 }
  0xe6   :  { %6628 = vmatpush1.msk.msra.mxu0 %vm524_vm4, %v6587_v25  ;;  %607 = vmatprep.mubr.f32.mxu0 %v12113_v35  ;;  %v9156_v25 = vpack.c.bf16 %v2532_v24, %v2531_v23  ;;  %v2510_v23 = vld [vmem:[%s12101_s6 + $0x58] sm:$0xff]  ;;  %v2549_v24 = vld [vmem:[%s12101_s6 + $0x190] sm:$0xff] }
  0xe7   :  { %v8882_v42 = vpop.f32.mrb[2].mxu1  ;;  %708 = vmatprep.mubr.f32.mxu1 %v12113_v35  ;;  %v7519_v43 = vpop.f32.mrb[2].mxu0  ;;  %6636 = vmatpush1.msk.msra.mxu1 %vm524_vm4, %v6589_v34  ;;  %v2538_v34 = vld [vmem:[%s12101_s6 + $0x138] sm:$0xff] }
  0xe8   :  { %v8886_v44 = vpop.f32.mrb[3].mxu1  ;;  %v391_v45 = vpop.f32.mrb[3].mxu0  ;;  %6643 = vmatprep.subr.msk.mxu0 %vm524_vm4, %v60_v40  ;;  %6651 = vmatprep.subr.msk.mxu1 %vm524_vm4, %v62_v41  ;;  %12204 = vst [vmem:[#allocation3_spill] sm:$0xff] %v9156_v25 }
  0xe9   :  { %6614 = vmatmul.mubr.msk.f32.gmra.mrb[8].mxu0 %vm505_vm5, %v7516_v37  ;;  %6622 = vmatmul.mubr.msk.f32.gmra.mrb[20].mxu1 %vm505_vm5, %v7516_v37  ;;  %v2515_v37 = vld [vmem:[%s12101_s6 + $0x80] sm:$0xff] }
  0xea   :  { %613 = vmatprep.mubr.f32.mxu0 %v12113_v35  ;;  %714 = vmatprep.mubr.f32.mxu1 %v12113_v35 }
  0xeb   :  { %v8894_v46 = vpop.f32.mrb[4].mxu1  ;;  %v7522_v47 = vpop.f32.mrb[4].mxu0 }
  0xec   :  { %v8896_v48 = vpop.f32.mrb[5].mxu1  ;;  %v401_v49 = vpop.f32.mrb[5].mxu0 }
  0xed   :  { %6615 = vmatmul.mubr.msk.f32.gmra.mrb[10].mxu0 %vm505_vm5, %v391_v45  ;;  %6623 = vmatmul.mubr.msk.f32.gmra.mrb[22].mxu1 %vm505_vm5, %v391_v45 }
  0xee   :  { %619 = vmatprep.mubr.f32.mxu0 %v12113_v35  ;;  %720 = vmatprep.mubr.f32.mxu1 %v12113_v35 }
  0xef   :  { %v8902_v50 = vpop.f32.mrb[6].mxu1 }
  0xf0   :  { %v8904_v51 = vpop.f32.mrb[7].mxu1 }
  0xf1   :  { %6616 = vmatmul.mubr.msk.f32.gmra.mrb[12].mxu0 %vm505_vm5, %v7519_v43  ;;  %6624 = vmatmul.mubr.msk.f32.gmra.mrb[24].mxu1 %vm505_vm5, %v7519_v43 }
  0xf2   :  { %625 = vmatprep.mubr.f32.mxu0 %v12113_v35  ;;  %726 = vmatprep.mubr.f32.mxu1 %v12113_v35 }
  0xf3   :  { %v8910_v52 = vpop.f32.mrb[8].mxu1 }
  0xf4   :  { %v8912_v53 = vpop.f32.mrb[9].mxu1 }
  0xf5   :  { %6617 = vmatmul.mubr.msk.f32.gmra.mrb[14].mxu0 %vm505_vm5, %v401_v49  ;;  %6625 = vmatmul.mubr.msk.f32.gmra.mrb[26].mxu1 %vm505_vm5, %v401_v49  ;;  %v2501_v49 = vld [vmem:[%s12101_s6 + $0x10] sm:$0xff] }
  0xf6   :  { %631 = vmatprep.mubr.f32.mxu0 %v12113_v35  ;;  %732 = vmatprep.mubr.f32.mxu1 %v12113_v35 }
  0xf7   :  { %v8918_v54 = vpop.f32.mrb[10].mxu1 }
  0xf8   :  { %v8920_v55 = vpop.f32.mrb[11].mxu1 }
  0xf9   :  { %6618 = vmatmul.mubr.msk.f32.gmra.mrb[16].mxu0 %vm505_vm5, %v7522_v47  ;;  %6626 = vmatmul.mubr.msk.f32.gmra.mrb[28].mxu1 %vm505_vm5, %v7522_v47  ;;  %v2518_v47 = vld [vmem:[%s12101_s6 + $0x98] sm:$0xff] }
  0xfa   :  { %821 = vmatprep.mubr.f32.mxu0 %v12113_v35  ;;  %922 = vmatprep.mubr.f32.mxu1 %v12113_v35 }
  0xfb   :  { %v7537_v56 = vpop.f32.mrb[12].mxu1 }
  0xfc   :  { %v476_v58 = vpop.f32.mrb[13].mxu1 }
  0xfd   :  { %6629 = vmatmul.mubr.msk.f32.vlgmr.msra.gmra.mrb[18].mxu0 %vm505_vm5, %v476_v58  ;;  %6637 = vmatmul.mubr.msk.f32.vlgmr.msra.gmra.mrb[30].mxu1 %vm505_vm5, %v476_v58  ;;  %v2503_v58 = vld [vmem:[%s12101_s6 + $0x20] sm:$0xff] }
  0xfe   :  { %6644 = vmatpush1.msk.msra.mxu0 %vm524_vm4, %v59_v57  ;;  %827 = vmatprep.mubr.f32.mxu0 %v12113_v35 }
  0xff   :  { %928 = vmatprep.mubr.f32.mxu1 %v12113_v35  ;;  %v7540_v60 = vpop.f32.mrb[14].mxu1  ;;  %6652 = vmatpush1.msk.msra.mxu1 %vm524_vm4, %v61_v59 }
 0x100   :  { %v486_v61 = vpop.f32.mrb[15].mxu1  ;;  %6659 = vmatprep.subr.msk.mxu0 %vm524_vm4, %v60_v40  ;;  %6667 = vmatprep.subr.msk.mxu1 %vm524_vm4, %v62_v41  ;;  %v2499_v40 = vld [vmem:[%s12101_s6] sm:$0xff]  ;;  %v2500_v41 = vld [vmem:[%s12101_s6 + $0x8] sm:$0xff] }
 0x101   :  { %6630 = vmatmul.mubr.msk.f32.gmra.mrb[20].mxu0 %vm505_vm5, %v7537_v56  ;;  %6638 = vmatmul.mubr.msk.f32.gmra.mrb[32].mxu1 %vm505_vm5, %v7537_v56  ;;  %v9208_v43 = vpack.c.bf16 %v2500_v41, %v2499_v40  ;;  %v2520_v56 = vld [vmem:[%s12101_s6 + $0xa8] sm:$0xff]  ;;  %v2551_v40 = vld [vmem:[%s12101_s6 + $0x1a0] sm:$0xff] }
 0x102   :  { %833 = vmatprep.mubr.f32.mxu0 %v12113_v35  ;;  %934 = vmatprep.mubr.f32.mxu1 %v12113_v35  ;;  %v2552_v41 = vld [vmem:[%s12101_s6 + $0x1a8] sm:$0xff] }
 0x103   :  { %v7543_v62 = vpop.f32.mrb[16].mxu1  ;;  %12208 = vst [vmem:[#allocation7_spill] sm:$0xff] %v9208_v43 }
 0x104   :  { %v496_v63 = vpop.f32.mrb[17].mxu1 }
 0x105   :  { %6631 = vmatmul.mubr.msk.f32.gmra.mrb[22].mxu0 %vm505_vm5, %v486_v61  ;;  %6639 = vmatmul.mubr.msk.f32.gmra.mrb[34].mxu1 %vm505_vm5, %v486_v61 }
 0x106   :  { %839 = vmatprep.mubr.f32.mxu0 %v12113_v35  ;;  %940 = vmatprep.mubr.f32.mxu1 %v12113_v35 }
 0x109   :  { %6632 = vmatmul.mubr.msk.f32.gmra.mrb[24].mxu0 %vm505_vm5, %v7540_v60  ;;  %6640 = vmatmul.mubr.msk.f32.gmra.mrb[36].mxu1 %vm505_vm5, %v7540_v60  ;;  %v2543_v60 = vld [vmem:[%s12101_s6 + $0x160] sm:$0xff] }
 0x10a   :  { %845 = vmatprep.mubr.f32.mxu0 %v12113_v35  ;;  %946 = vmatprep.mubr.f32.mxu1 %v12113_v35 }
 0x10d   :  { %6633 = vmatmul.mubr.msk.f32.gmra.mrb[26].mxu0 %vm505_vm5, %v496_v63  ;;  %6641 = vmatmul.mubr.msk.f32.gmra.mrb[38].mxu1 %vm505_vm5, %v496_v63 }
 0x10e   :  { %851 = vmatprep.mubr.f32.mxu0 %v12113_v35  ;;  %952 = vmatprep.mubr.f32.mxu1 %v12113_v35 }
 0x111   :  { %6634 = vmatmul.mubr.msk.f32.gmra.mrb[28].mxu0 %vm505_vm5, %v7543_v62  ;;  %6642 = vmatmul.mubr.msk.f32.gmra.mrb[40].mxu1 %vm505_vm5, %v7543_v62  ;;  %v2544_v62 = vld [vmem:[%s12101_s6 + $0x168] sm:$0xff] }
 0x112   :  { %1053 = vmatprep.mubr.f32.mxu0 %v12113_v35  ;;  %1154 = vmatprep.mubr.f32.mxu1 %v12113_v35  ;;  %v9270_v63 = vpack.c.bf16 %v2544_v62, %v2543_v60 }
 0x114   :  { %12215 = vst [vmem:[#allocation14_spill] sm:$0xff] %v9270_v63 }
 0x115   :  { %6645 = vmatmul.mubr.msk.f32.vlgmr.msra.gmra.mrb[6].mxu0 %vm505_vm5, %v8870_v38  ;;  %6653 = vmatmul.mubr.msk.f32.vlgmr.msra.gmra.mrb[18].mxu1 %vm505_vm5, %v8870_v38  ;;  %v2516_v38 = vld [vmem:[%s12101_s6 + $0x88] sm:$0xff] }
 0x116   :  { %6660 = vmatpush1.msk.msra.mxu0 %vm524_vm4, %v59_v57  ;;  %1059 = vmatprep.mubr.f32.mxu0 %v12113_v35  ;;  %v9197_v39 = vpack.c.bf16 %v2516_v38, %v2515_v37  ;;  %v2512_v38 = vld [vmem:[%s12101_s6 + $0x68] sm:$0xff] }
 0x117   :  { %1160 = vmatprep.mubr.f32.mxu1 %v12113_v35  ;;  %6668 = vmatpush1.msk.msra.mxu1 %vm524_vm4, %v61_v59  ;;  %v2504_v59 = vld [vmem:[%s12101_s6 + $0x28] sm:$0xff] }
 0x118   :  { %7687 = vmatprep.subr.bf16.mxu0 %v8700_v3  ;;  %7701 = vmatprep.subr.bf16.mxu1 %v8751_v14  ;;  %v9264_v61 = vpack.c.bf16 %v2504_v59, %v2503_v58 }
 0x119   :  { %6646 = vmatmul.mubr.msk.f32.gmra.mrb[8].mxu0 %vm505_vm5, %v8868_v36  ;;  %6654 = vmatmul.mubr.msk.f32.gmra.mrb[20].mxu1 %vm505_vm5, %v8868_v36  ;;  %v9187_v36 = vpack.c.bf16 %v2538_v34, %v2537_v33  ;;  %v2528_v33 = vld [vmem:[%s12101_s6 + $0xe8] sm:$0xff]  ;;  %v2511_v34 = vld [vmem:[%s12101_s6 + $0x60] sm:$0xff] }
 0x11a   :  { %1065 = vmatprep.mubr.f32.mxu0 %v12113_v35  ;;  %1166 = vmatprep.mubr.f32.mxu1 %v12113_v35  ;;  %12214 = vst [vmem:[#allocation13_spill] sm:$0xff] %v9264_v61  ;;  %v9366_v37 = vpack.c.bf16 %v2528_v33, %v2527_v31 }
 0x11b   :  { %12207 = vst [vmem:[#allocation6_spill] sm:$0xff] %v9187_v36 }
 0x11c   :  { %12225 = vst [vmem:[#allocation24_spill] sm:$0xff] %v9366_v37 }
 0x11d   :  { %6647 = vmatmul.mubr.msk.f32.gmra.mrb[10].mxu0 %vm505_vm5, %v8886_v44  ;;  %6655 = vmatmul.mubr.msk.f32.gmra.mrb[22].mxu1 %vm505_vm5, %v8886_v44  ;;  %v2540_v44 = vld [vmem:[%s12101_s6 + $0x148] sm:$0xff] }
 0x11e   :  { %1071 = vmatprep.mubr.f32.mxu0 %v12113_v35  ;;  %1172 = vmatprep.mubr.f32.mxu1 %v12113_v35 }
 0x121   :  { %6648 = vmatmul.mubr.msk.f32.gmra.mrb[12].mxu0 %vm505_vm5, %v8882_v42  ;;  %6656 = vmatmul.mubr.msk.f32.gmra.mrb[24].mxu1 %vm505_vm5, %v8882_v42  ;;  %v2539_v42 = vld [vmem:[%s12101_s6 + $0x140] sm:$0xff] }
 0x122   :  { %1077 = vmatprep.mubr.f32.mxu0 %v12113_v35  ;;  %1178 = vmatprep.mubr.f32.mxu1 %v12113_v35  ;;  %v9214_v45 = vpack.c.bf16 %v2540_v44, %v2539_v42  ;;  %v9378_v42 = vpack.c.bf16 %v2512_v38, %v2511_v34  ;;  %v9380_v44 = vpack.c.bf16 %v2552_v41, %v2551_v40 }
 0x124   :  { %12209 = vst [vmem:[#allocation8_spill] sm:$0xff] %v9214_v45  ;;  %12226 = vst [vmem:[#allocation25_spill] sm:$0xff] %v9378_v42 }
 0x125   :  { %6649 = vmatmul.mubr.msk.f32.gmra.mrb[14].mxu0 %vm505_vm5, %v8896_v48  ;;  %6657 = vmatmul.mubr.msk.f32.gmra.mrb[26].mxu1 %vm505_vm5, %v8896_v48  ;;  %12227 = vst [vmem:[#allocation26_spill] sm:$0xff] %v9380_v44 }
 0x126   :  { %1083 = vmatprep.mubr.f32.mxu0 %v12113_v35  ;;  %1184 = vmatprep.mubr.f32.mxu1 %v12113_v35 }
 0x129   :  { %6650 = vmatmul.mubr.msk.f32.gmra.mrb[16].mxu0 %vm505_vm5, %v8894_v46  ;;  %6658 = vmatmul.mubr.msk.f32.gmra.mrb[28].mxu1 %vm505_vm5, %v8894_v46  ;;  %v2517_v46 = vld [vmem:[%s12101_s6 + $0x90] sm:$0xff] }
 0x12a   :  { %1273 = vmatprep.mubr.f32.mxu0 %v12113_v35  ;;  %1374 = vmatprep.mubr.f32.mxu1 %v12113_v35  ;;  %v9225_v48 = vpack.c.bf16 %v2518_v47, %v2517_v46  ;;  %v2529_v46 = vld [vmem:[%s12101_s6 + $0xf0] sm:$0xff]  ;;  %v2530_v47 = vld [vmem:[%s12101_s6 + $0xf8] sm:$0xff] }
 0x12c   :  { %12210 = vst [vmem:[#allocation9_spill] sm:$0xff] %v9225_v48 }
 0x12d   :  { %6661 = vmatmul.mubr.msk.f32.vlgmr.msra.gmra.mrb[18].mxu0 %vm505_vm5, %v8904_v51  ;;  %6669 = vmatmul.mubr.msk.f32.vlgmr.msra.gmra.mrb[30].mxu1 %vm505_vm5, %v8904_v51  ;;  %v2541_v51 = vld [vmem:[%s12101_s6 + $0x150] sm:$0xff] }
 0x12e   :  { %7689 = vmatpush3.bf16.msra.mxu0 %v8700_v3  ;;  %1279 = vmatprep.mubr.f32.mxu0 %v12113_v35  ;;  %v6681_v3 = vld [vmem:[%s12099_s1 + $0x70] sm:$0xff] }
 0x12f   :  { %1380 = vmatprep.mubr.f32.mxu1 %v12113_v35  ;;  %7691 = vmatprep.subr.bf16.mxu0 %v8705_v5 }
 0x130   :  { %7703 = vmatpush3.bf16.msra.mxu1 %v8751_v14 }
 0x131   :  { %6662 = vmatmul.mubr.msk.f32.gmra.mrb[20].mxu0 %vm505_vm5, %v8902_v50  ;;  %6670 = vmatmul.mubr.msk.f32.gmra.mrb[32].mxu1 %vm505_vm5, %v8902_v50  ;;  %v2502_v50 = vld [vmem:[%s12101_s6 + $0x18] sm:$0xff] }
 0x132   :  { %1285 = vmatprep.mubr.f32.mxu0 %v12113_v35  ;;  %1386 = vmatprep.mubr.f32.mxu1 %v12113_v35 }
 0x133   :  { %7693 = vmatpush3.bf16.msra.mxu0 %v8705_v5  ;;  %7705 = vmatprep.subr.bf16.mxu1 %v8778_v21  ;;  %v6682_v5 = vld [vmem:[%s12099_s1 + $0x78] sm:$0xff] }
 0x134   :  { %7696 = vmatprep.subr.msk.bf16.mxu0 %vm8730_vm3, %v8727_v10  ;;  %7707 = vmatpush3.bf16.msra.mxu1 %v8778_v21 }
 0x135   :  { %6663 = vmatmul.mubr.msk.f32.gmra.mrb[22].mxu0 %vm505_vm5, %v8912_v53  ;;  %6671 = vmatmul.mubr.msk.f32.gmra.mrb[34].mxu1 %vm505_vm5, %v8912_v53  ;;  %v2542_v53 = vld [vmem:[%s12101_s6 + $0x158] sm:$0xff] }
 0x136   :  { %1291 = vmatprep.mubr.f32.mxu0 %v12113_v35  ;;  %1392 = vmatprep.mubr.f32.mxu1 %v12113_v35 }
 0x137   :  { %7699 = vmatpush3.bf16.msk.msra.mxu0 %vm8730_vm3, %v8727_v10  ;;  %7710 = vmatprep.subr.msk.bf16.mxu1 %vm8730_vm3, %v8808_v29 }
 0x138   :  { %7713 = vmatpush3.bf16.msk.msra.mxu1 %vm8730_vm3, %v8808_v29  ;;  %6699 = vmatprep.subr.msk.mxu0 %vm524_vm4, %v6676_v8  ;;  %v9167_v29 = vpack.c.bf16 %v2534_v28, %v2533_v27  ;;  %v2550_v28 = vld [vmem:[%s12101_s6 + $0x198] sm:$0xff] }
 0x139   :  { %6664 = vmatmul.mubr.msk.f32.gmra.mrb[24].mxu0 %vm505_vm5, %v8910_v52  ;;  %6672 = vmatmul.mubr.msk.f32.gmra.mrb[36].mxu1 %vm505_vm5, %v8910_v52  ;;  %v9236_v52 = vpack.c.bf16 %v2502_v50, %v2501_v49  ;;  %v9354_v30 = vpack.c.bf16 %v2550_v28, %v2549_v24  ;;  %v2513_v49 = vld [vmem:[%s12101_s6 + $0x70] sm:$0xff]  ;;  %v9393_v50 = vpack.c.bf16 %v2530_v47, %v2529_v46 }
 0x13a   :  { %1297 = vmatprep.mubr.f32.mxu0 %v12113_v35  ;;  %1398 = vmatprep.mubr.f32.mxu1 %v12113_v35  ;;  %12205 = vst [vmem:[#allocation4_spill] sm:$0xff] %v9167_v29 }
 0x13b   :  { %6707 = vmatprep.subr.msk.mxu1 %vm524_vm4, %v6678_v0  ;;  %12211 = vst [vmem:[#allocation10_spill] sm:$0xff] %v9236_v52  ;;  %12224 = vst [vmem:[#allocation23_spill] sm:$0xff] %v9354_v30 }
 0x13c   :  { %12228 = vst [vmem:[#allocation27_spill] sm:$0xff] %v9393_v50 }
 0x13d   :  { %6665 = vmatmul.mubr.msk.f32.gmra.mrb[26].mxu0 %vm505_vm5, %v8920_v55  ;;  %6673 = vmatmul.mubr.msk.f32.gmra.mrb[38].mxu1 %vm505_vm5, %v8920_v55  ;;  %v2519_v55 = vld [vmem:[%s12101_s6 + $0xa0] sm:$0xff] }
 0x13e   :  { %1303 = vmatprep.mubr.f32.mxu0 %v12113_v35  ;;  %1404 = vmatprep.mubr.f32.mxu1 %v12113_v35  ;;  %v9253_v57 = vpack.c.bf16 %v2520_v56, %v2519_v55  ;;  %v2554_v55 = vld [vmem:[%s12101_s6 + $0x1b8] sm:$0xff] }
 0x140   :  { %12213 = vst [vmem:[#allocation12_spill] sm:$0xff] %v9253_v57 }
 0x141   :  { %6666 = vmatmul.mubr.msk.f32.gmra.mrb[28].mxu0 %vm505_vm5, %v8918_v54  ;;  %6674 = vmatmul.mubr.msk.f32.gmra.mrb[40].mxu1 %vm505_vm5, %v8918_v54  ;;  %v9242_v54 = vpack.c.bf16 %v2542_v53, %v2541_v51  ;;  %v2514_v51 = vld [vmem:[%s12101_s6 + $0x78] sm:$0xff]  ;;  %v2553_v53 = vld [vmem:[%s12101_s6 + $0x1b0] sm:$0xff] }
 0x142   :  { %7556 = vmatprep.mubr.msk.f32.mxu0 %vm69_vm1, %v6679_v1  ;;  %7577 = vmatprep.mubr.msk.f32.mxu1 %vm69_vm1, %v6679_v1  ;;  %v2522_v1 = vld [vmem:[%s12101_s6 + $0xb8] sm:$0xff]  ;;  %v9405_v56 = vpack.c.bf16 %v2514_v51, %v2513_v49  ;;  %v9409_v58 = vpack.c.bf16 %v2554_v55, %v2553_v53 }
 0x143   :  { %12212 = vst [vmem:[#allocation11_spill] sm:$0xff] %v9242_v54 }
 0x144   :  { %12229 = vst [vmem:[#allocation28_spill] sm:$0xff] %v9405_v56  ;;  %12230 = vst [vmem:[#allocation29_spill] sm:$0xff] %v9409_v58 }
 0x145   :  { %7557 = vmatmul.mubr.msk.f32.vlgmr.msra.gmra.mrb[30].mxu0 %vm69_vm1, %v6680_v2  ;;  %7578 = vmatmul.mubr.msk.f32.vlgmr.msra.gmra.mrb[42].mxu1 %vm69_vm1, %v6680_v2 }
 0x146   :  { %7559 = vmatprep.mubr.msk.f32.mxu0 %vm69_vm1, %v6681_v3  ;;  %7580 = vmatprep.mubr.msk.f32.mxu1 %vm69_vm1, %v6681_v3  ;;  %v2505_v3 = vld [vmem:[%s12101_s6 + $0x30] sm:$0xff] }
 0x147   :  { %6708 = vmatpush1.msk.msra.mxu1 %vm524_vm4, %v6677_v4  ;;  %6700 = vmatpush1.msk.msra.mxu0 %vm524_vm4, %v6675_v9 }
 0x148   :  { %6723 = vmatprep.subr.msk.mxu1 %vm524_vm4, %v6678_v0  ;;  %6715 = vmatprep.subr.msk.mxu0 %vm524_vm4, %v6676_v8  ;;  %v2521_v0 = vld [vmem:[%s12101_s6 + $0xb0] sm:$0xff] }
 0x149   :  { %7560 = vmatmul.mubr.msk.f32.gmra.mrb[32].mxu0 %vm69_vm1, %v6682_v5  ;;  %7581 = vmatmul.mubr.msk.f32.gmra.mrb[44].mxu1 %vm69_vm1, %v6682_v5  ;;  %v9280_v2 = vpack.c.bf16 %v2522_v1, %v2521_v0  ;;  %v2545_v5 = vld [vmem:[%s12101_s6 + $0x170] sm:$0xff]  ;;  %v2133_v1 = vlaneseq }
 0x14a   :  { %7562 = vmatprep.mubr.msk.f32.mxu0 %vm69_vm1, %v6683_v6  ;;  %7583 = vmatprep.mubr.msk.f32.mxu1 %vm69_vm1, %v6683_v6 }
 0x14b   :  { %12216 = vst [vmem:[#allocation15_spill] sm:$0xff] %v9280_v2 }
 0x14d   :  { %7563 = vmatmul.mubr.msk.f32.gmra.mrb[34].mxu0 %vm69_vm1, %v6684_v7  ;;  %7584 = vmatmul.mubr.msk.f32.gmra.mrb[46].mxu1 %vm69_vm1, %v6684_v7  ;;  %v2546_v7 = vld [vmem:[%s12101_s6 + $0x178] sm:$0xff] }
 0x14e   :  { %1725 = vmatprep.mubr.f32.mxu0 %v12113_v35  ;;  %1826 = vmatprep.mubr.f32.mxu1 %v12113_v35  ;;  %v9298_v8 = vpack.c.bf16 %v2546_v7, %v2545_v5 }
 0x150   :  { %12218 = vst [vmem:[#allocation17_spill] sm:$0xff] %v9298_v8 }
 0x218   :  { %v7558_v10 = vpop.f32.mrb[30].mxu0  ;;  %v7579_v12 = vpop.f32.mrb[42].mxu1 }
 0x219   :  { %v1507_v13 = vpop.f32.mrb[31].mxu0  ;;  %v1602_v14 = vpop.f32.mrb[43].mxu1 }
 0x21a   :  { %6701 = vmatmul.mubr.msk.f32.vlgmr.msra.gmra.mrb[6].mxu0 %vm505_vm5, %v1507_v13  ;;  %6709 = vmatmul.mubr.msk.f32.vlgmr.msra.gmra.mrb[18].mxu1 %vm505_vm5, %v1507_v13  ;;  %v2507_v13 = vld [vmem:[%s12101_s6 + $0x40] sm:$0xff] }
 0x21b   :  { %6724 = vmatpush1.msk.msra.mxu1 %vm524_vm4, %v6677_v4  ;;  %1731 = vmatprep.mubr.f32.mxu0 %v12113_v35  ;;  %v2506_v4 = vld [vmem:[%s12101_s6 + $0x38] sm:$0xff] }
 0x21c   :  { %1832 = vmatprep.mubr.f32.mxu1 %v12113_v35  ;;  %v7561_v15 = vpop.f32.mrb[32].mxu0  ;;  %6716 = vmatpush1.msk.msra.mxu0 %vm524_vm4, %v6675_v9  ;;  %v7582_v16 = vpop.f32.mrb[44].mxu1  ;;  %v9292_v6 = vpack.c.bf16 %v2506_v4, %v2505_v3  ;;  %v2523_v9 = vld [vmem:[%s12101_s6 + $0xc0] sm:$0xff] }
 0x21d   :  { %v1517_v17 = vpop.f32.mrb[33].mxu0  ;;  %v1612_v18 = vpop.f32.mrb[45].mxu1  ;;  %7746 = vmatprep.subr.bf16.mxu1 %v12115_v26  ;;  %7715 = vmatprep.subr.bf16.mxu0 %v9197_v39 }
 0x21e   :  { %6702 = vmatmul.mubr.msk.f32.gmra.mrb[8].mxu0 %vm505_vm5, %v7558_v10  ;;  %6710 = vmatmul.mubr.msk.f32.gmra.mrb[20].mxu1 %vm505_vm5, %v7558_v10  ;;  %12217 = vst [vmem:[#allocation16_spill] sm:$0xff] %v9292_v6  ;;  %v2524_v10 = vld [vmem:[%s12101_s6 + $0xc8] sm:$0xff] }
 0x21f   :  { %1737 = vmatprep.mubr.f32.mxu0 %v12113_v35  ;;  %1838 = vmatprep.mubr.f32.mxu1 %v12113_v35 }
 0x220   :  { %v7564_v19 = vpop.f32.mrb[34].mxu0  ;;  %v7585_v20 = vpop.f32.mrb[46].mxu1 }
 0x221   :  { %v1527_v21 = vpop.f32.mrb[35].mxu0  ;;  %v1622_v22 = vpop.f32.mrb[47].mxu1 }
 0x222   :  { %6703 = vmatmul.mubr.msk.f32.gmra.mrb[10].mxu0 %vm505_vm5, %v1517_v17  ;;  %6711 = vmatmul.mubr.msk.f32.gmra.mrb[22].mxu1 %vm505_vm5, %v1517_v17  ;;  %v2548_v17 = vld [vmem:[%s12101_s6 + $0x188] sm:$0xff] }
 0x223   :  { %1743 = vmatprep.mubr.f32.mxu0 %v12113_v35  ;;  %1844 = vmatprep.mubr.f32.mxu1 %v12113_v35 }
 0x226   :  { %6704 = vmatmul.mubr.msk.f32.gmra.mrb[12].mxu0 %vm505_vm5, %v7561_v15  ;;  %6712 = vmatmul.mubr.msk.f32.gmra.mrb[24].mxu1 %vm505_vm5, %v7561_v15  ;;  %v2547_v15 = vld [vmem:[%s12101_s6 + $0x180] sm:$0xff] }
 0x227   :  { %1749 = vmatprep.mubr.f32.mxu0 %v12113_v35  ;;  %1850 = vmatprep.mubr.f32.mxu1 %v12113_v35 }
 0x22a   :  { %6705 = vmatmul.mubr.msk.f32.gmra.mrb[14].mxu0 %vm505_vm5, %v1527_v21  ;;  %6713 = vmatmul.mubr.msk.f32.gmra.mrb[26].mxu1 %vm505_vm5, %v1527_v21 }
 0x22b   :  { %1755 = vmatprep.mubr.f32.mxu0 %v12113_v35  ;;  %1856 = vmatprep.mubr.f32.mxu1 %v12113_v35 }
 0x22e   :  { %6706 = vmatmul.mubr.msk.f32.gmra.mrb[16].mxu0 %vm505_vm5, %v7564_v19  ;;  %6714 = vmatmul.mubr.msk.f32.gmra.mrb[28].mxu1 %vm505_vm5, %v7564_v19  ;;  %v2525_v19 = vld [vmem:[%s12101_s6 + $0xd0] sm:$0xff] }
 0x22f   :  { %1945 = vmatprep.mubr.f32.mxu0 %v12113_v35  ;;  %2046 = vmatprep.mubr.f32.mxu1 %v12113_v35 }
 0x232   :  { %6717 = vmatmul.mubr.msk.f32.vlgmr.msra.gmra.mrb[18].mxu0 %vm505_vm5, %v1602_v14  ;;  %6725 = vmatmul.mubr.msk.f32.vlgmr.msra.gmra.mrb[30].mxu1 %vm505_vm5, %v1602_v14  ;;  %v2508_v14 = vld [vmem:[%s12101_s6 + $0x48] sm:$0xff] }
 0x233   :  { %1951 = vmatprep.mubr.f32.mxu0 %v12113_v35  ;;  %2052 = vmatprep.mubr.f32.mxu1 %v12113_v35 }
 0x234   :  { %7748 = vmatpush1.bf16.msra.mxu1 %v9156_v25  ;;  %7717 = vmatpush3.bf16.msra.mxu0 %v9208_v43 }
 0x235   :  { %7749 = vmatprep.subr.bf16.mxu1 %v12115_v26  ;;  %7719 = vmatprep.subr.bf16.mxu0 %v9225_v48 }
 0x236   :  { %6718 = vmatmul.mubr.msk.f32.gmra.mrb[20].mxu0 %vm505_vm5, %v7579_v12  ;;  %6726 = vmatmul.mubr.msk.f32.gmra.mrb[32].mxu1 %vm505_vm5, %v7579_v12  ;;  %v9308_v12 = vpack.c.bf16 %v2524_v10, %v2523_v9  ;;  %v2134_v9 = vshrl.u32 %v2133_v1, 7 }
 0x237   :  { %1957 = vmatprep.mubr.f32.mxu0 %v12113_v35  ;;  %2058 = vmatprep.mubr.f32.mxu1 %v12113_v35 }
 0x238   :  { %7751 = vmatpush1.bf16.msra.mxu1 %v9167_v29  ;;  %7721 = vmatpush3.bf16.msra.mxu0 %v9236_v52  ;;  %12219 = vst [vmem:[#allocation18_spill] sm:$0xff] %v9308_v12  ;;  %v2139_v28 = vsub.s32 1, %v2134_v9  ;;  %v2143_v40 = vsub.s32 2, %v2134_v9 }
 0x239   :  { %7752 = vmatprep.subr.bf16.mxu1 %v12115_v26  ;;  %7723 = vmatprep.subr.bf16.mxu0 %v9253_v57 }
 0x23a   :  { %6719 = vmatmul.mubr.msk.f32.gmra.mrb[22].mxu0 %vm505_vm5, %v1612_v18  ;;  %6727 = vmatmul.mubr.msk.f32.gmra.mrb[34].mxu1 %vm505_vm5, %v1612_v18  ;;  %v9326_v18 = vpack.c.bf16 %v2548_v17, %v2547_v15  ;;  %v2147_v17 = vsub.s32 3, %v2134_v9 }
 0x23b   :  { %1963 = vmatprep.mubr.f32.mxu0 %v12113_v35  ;;  %2064 = vmatprep.mubr.f32.mxu1 %v12113_v35 }
 0x23c   :  { %7754 = vmatpush1.bf16.msra.mxu1 %v9177_v32  ;;  %7725 = vmatpush3.bf16.msra.mxu0 %v9264_v61  ;;  %12221 = vst [vmem:[#allocation20_spill] sm:$0xff] %v9326_v18 }
 0x23d   :  { %7755 = vmatprep.subr.bf16.mxu1 %v12115_v26  ;;  %7727 = vmatprep.subr.bf16.mxu0 %v9280_v2 }
 0x23e   :  { %6720 = vmatmul.mubr.msk.f32.gmra.mrb[24].mxu0 %vm505_vm5, %v7582_v16  ;;  %6728 = vmatmul.mubr.msk.f32.gmra.mrb[36].mxu1 %vm505_vm5, %v7582_v16  ;;  %v9320_v16 = vpack.c.bf16 %v2508_v14, %v2507_v13 }
 0x23f   :  { %1969 = vmatprep.mubr.f32.mxu0 %v12113_v35  ;;  %2070 = vmatprep.mubr.f32.mxu1 %v12113_v35 }
 0x240   :  { %7757 = vmatpush1.bf16.msra.mxu1 %v9187_v36  ;;  %7729 = vmatpush3.bf16.msra.mxu0 %v9292_v6  ;;  %12220 = vst [vmem:[#allocation19_spill] sm:$0xff] %v9320_v16 }
 0x241   :  { %7758 = vmatprep.subr.bf16.mxu1 %v12115_v26  ;;  %7731 = vmatprep.subr.bf16.mxu0 %v9308_v12 }
 0x242   :  { %6721 = vmatmul.mubr.msk.f32.gmra.mrb[26].mxu0 %vm505_vm5, %v1622_v22  ;;  %6729 = vmatmul.mubr.msk.f32.gmra.mrb[38].mxu1 %vm505_vm5, %v1622_v22  ;;  %v2509_v22 = vld [vmem:[%s12101_s6 + $0x50] sm:$0xff] }
 0x243   :  { %1975 = vmatprep.mubr.f32.mxu0 %v12113_v35  ;;  %2076 = vmatprep.mubr.f32.mxu1 %v12113_v35  ;;  %v9348_v27 = vpack.c.bf16 %v2510_v23, %v2509_v22  ;;  %v9419_v22 = vsub.s32 0, %v2134_v9 }
 0x244   :  { %7760 = vmatpush1.bf16.msra.mxu1 %v9214_v45  ;;  %7733 = vmatpush3.bf16.msra.mxu0 %v9320_v16 }
 0x245   :  { %7761 = vmatprep.subr.bf16.mxu1 %v12115_v26  ;;  %12223 = vst [vmem:[#allocation22_spill] sm:$0xff] %v9348_v27  ;;  %12231 = vst [vmem:[#allocation30_spill] sm:$0xff] %v9419_v22 }
 0x246   :  { %6722 = vmatmul.mubr.msk.f32.gmra.mrb[28].mxu0 %vm505_vm5, %v7585_v20  ;;  %6730 = vmatmul.mubr.msk.f32.gmra.mrb[40].mxu1 %vm505_vm5, %v7585_v20  ;;  %v2526_v20 = vld [vmem:[%s12101_s6 + $0xd8] sm:$0xff] }
 0x247   :  { %v9336_v21 = vpack.c.bf16 %v2526_v20, %v2525_v19 }
 0x248   :  { %7763 = vmatpush1.bf16.msra.mxu1 %v9242_v54 }
 0x249   :  { %7764 = vmatprep.subr.bf16.mxu1 %v12115_v26  ;;  %12222 = vst [vmem:[#allocation21_spill] sm:$0xff] %v9336_v21  ;;  %7735 = vmatprep.subr.bf16.mxu0 %v9336_v21 }
 0x24a   :  { %7737 = vmatpush3.bf16.msra.mxu0 %v9348_v27 }
 0x24b   :  { %7739 = vmatprep.subr.bf16.mxu0 %v9366_v37 }
 0x24c   :  { %7766 = vmatpush1.bf16.msra.mxu1 %v9270_v63 }
 0x24d   :  { %7767 = vmatprep.subr.bf16.mxu1 %v12115_v26 }
 0x24e   :  { %7741 = vmatpush3.bf16.msra.mxu0 %v9378_v42 }
 0x24f   :  { %7743 = vmatprep.subr.bf16.mxu0 %v9393_v50 }
 0x250   :  { %7769 = vmatpush1.bf16.msra.mxu1 %v9298_v8 }
 0x251   :  { %7770 = vmatprep.subr.bf16.mxu1 %v12115_v26 }
 0x252   :  { %7745 = vmatpush3.bf16.msra.mxu0 %v9405_v56 }
 0x253   :  { %7783 = vmatprep.subr.bf16.mxu0 %v9197_v39  ;;  %v2131_v39 = vld [vmem:[%s12102_s3] sm:$0xf] }
 0x254   :  { %7772 = vmatpush1.bf16.msra.mxu1 %v9326_v18  ;;  %v9421_v31 = vrot.slane %v2131_v39, %v2147_v17  ;;  %v9426_v38 = vrot.slane %v2131_v39, %v9419_v22  ;;  %v9428_v47 = vrot.slane %v2131_v39, %v2139_v28  ;;  %v9436_v1 = vrot.slane %v2131_v39, %v2143_v40 }
 0x255   :  { %7773 = vmatprep.subr.bf16.mxu1 %v12115_v26 }
 0x258   :  { %7775 = vmatpush1.bf16.msra.mxu1 %v9354_v30 }
 0x259   :  { %7776 = vmatprep.subr.bf16.mxu1 %v12115_v26 }
 0x25c   :  { %7778 = vmatpush1.bf16.msra.mxu1 %v9380_v44 }
 0x25d   :  { %7779 = vmatprep.subr.bf16.mxu1 %v12115_v26 }
 0x260   :  { %7781 = vmatpush1.bf16.msra.mxu1 %v9409_v58 }
 0x261   :  { %7814 = vmatprep.subr.bf16.mxu1 %v12115_v26 }
 0x2ed   :  { %v1727_v59 = vpop.f32.mrb[6].mxu0  ;;  %v1828_v60 = vpop.f32.mrb[18].mxu1 }
 0x2ee   :  { %v1729_v62 = vpop.f32.mrb[7].mxu0  ;;  %v1830_v0 = vpop.f32.mrb[19].mxu1  ;;  %v9434_v55 = vadd.f32 %v9426_v38, %v1727_v59  ;;  %v9457_v11 = vadd.f32 %v9436_v1, %v1828_v60 }
 0x2ef   :  { %v9431_v49 = vadd.f32 %v9421_v31, %v1830_v0  ;;  %v9442_v9 = vadd.f32 %v9428_v47, %v1729_v62 }
 0x2f0   :  { %12233 = vst [vmem:[#allocation32_spill] sm:$0xff] %v9434_v55  ;;  %12238 = vst [vmem:[#allocation37_spill] sm:$0xff] %v9457_v11 }
 0x2f1   :  { %v1733_v3 = vpop.f32.mrb[8].mxu0  ;;  %v1834_v4 = vpop.f32.mrb[20].mxu1  ;;  %12232 = vst [vmem:[#allocation31_spill] sm:$0xff] %v9431_v49  ;;  %12235 = vst [vmem:[#allocation34_spill] sm:$0xff] %v9442_v9  ;;  %v2331_v28 = vmul.f32 %v9431_v49, %v9431_v49 }
 0x2f2   :  { %v1735_v5 = vpop.f32.mrb[9].mxu0  ;;  %v1836_v7 = vpop.f32.mrb[21].mxu1  ;;  %v9447_v0 = vadd.f32 %v9426_v38, %v1733_v3 }
 0x2f3   :  { %v9439_v17 = vadd.f32 %v9421_v31, %v1836_v7  ;;  %v9454_v7 = vmul.f32 %v9434_v55, %v9434_v55  ;;  %v9460_v62 = vadd.f32 %v9428_v47, %v1735_v5  ;;  %v9479_v5 = vsel %vm2204_vm6, %v9431_v49, 0.0 }
 0x2f4   :  { %12236 = vst [vmem:[#allocation35_spill] sm:$0xff] %v9447_v0  ;;  %v9482_v18 = vsel %vm2204_vm6, %v2331_v28, 0.0  ;;  %v9486_v8 = vmul.f32 %v9447_v0, %v9447_v0 }
 0x2f5   :  { %v1739_v10 = vpop.f32.mrb[10].mxu0  ;;  %v1840_v13 = vpop.f32.mrb[22].mxu1  ;;  %12234 = vst [vmem:[#allocation33_spill] sm:$0xff] %v9439_v17  ;;  %12239 = vst [vmem:[#allocation38_spill] sm:$0xff] %v9460_v62  ;;  %v2335_v3 = vmul.f32 %v9439_v17, %v9439_v17  ;;  %v9512_v63 = vsel %vm2204_vm6, %v9439_v17, 0.0 }
 0x2f6   :  { %v1741_v14 = vpop.f32.mrb[11].mxu0  ;;  %v1842_v15 = vpop.f32.mrb[23].mxu1  ;;  %v9469_v44 = vadd.f32 %v9426_v38, %v1739_v10  ;;  %v9489_v10 = vadd.f32 %v9436_v1, %v1834_v4  ;;  %v9508_v4 = vmul.f32 %v9460_v62, %v9460_v62 }
 0x2f7   :  { %v9450_v59 = vadd.f32 %v9421_v31, %v1842_v15  ;;  %v9466_v15 = vmul.f32 %v9442_v9, %v9442_v9  ;;  %v9472_v30 = vadd.f32 %v9428_v47, %v1741_v14 }
 0x2f8   :  { %12240 = vst [vmem:[#allocation39_spill] sm:$0xff] %v9469_v44  ;;  %12242 = vst [vmem:[#allocation41_spill] sm:$0xff] %v9489_v10  ;;  %v9522_v37 = vmul.f32 %v9469_v44, %v9469_v44 }
 0x2f9   :  { %v1745_v19 = vpop.f32.mrb[12].mxu0  ;;  %v1846_v20 = vpop.f32.mrb[24].mxu1  ;;  %12237 = vst [vmem:[#allocation36_spill] sm:$0xff] %v9450_v59  ;;  %v2339_v14 = vmul.f32 %v9450_v59, %v9450_v59  ;;  %v9526_v54 = vmul.f32 %v9472_v30, %v9472_v30 }
 0x2fa   :  { %v1747_v23 = vpop.f32.mrb[13].mxu0  ;;  %v1848_v24 = vpop.f32.mrb[25].mxu1  ;;  %12244 = vst [vmem:[#allocation43_spill] sm:$0xff] %v9522_v37  ;;  %v9538_v27 = vadd.f32 %v9436_v1, %v1846_v20 }
 0x2fb   :  { %v9475_v60 = vadd.f32 %v9421_v31, %v1848_v24  ;;  %v9494_v24 = vadd.f32 %v9426_v38, %v1745_v19  ;;  %v9497_v56 = vadd.f32 %v9428_v47, %v1747_v23  ;;  %v9515_v19 = vsel %vm2204_vm6, %v2335_v3, 0.0 }
 0x2fc   :  { %v9518_v23 = vadd.f32 %v9436_v1, %v1840_v13  ;;  %v9535_v13 = vsel %vm2204_vm6, %v9450_v59, 0.0  ;;  %v9547_v16 = vsel %vm2204_vm6, %v2339_v14, 0.0 }
 0x2fd   :  { %v1751_v33 = vpop.f32.mrb[14].mxu0  ;;  %v9423_v34 = vpop.f32.mrb[26].mxu1  ;;  %12241 = vst [vmem:[#allocation40_spill] sm:$0xff] %v9475_v60  ;;  %v2343_v17 = vmul.f32 %v9475_v60, %v9475_v60  ;;  %v9555_v59 = vmul.f32 %v9497_v56, %v9497_v56 }
 0x2fe   :  { %v1753_v41 = vpop.f32.mrb[15].mxu0  ;;  %v1854_v46 = vpop.f32.mrb[27].mxu1  ;;  %v9531_v3 = vadd.f32 %v9426_v38, %v1751_v33  ;;  %v9551_v33 = vmul.f32 %v9494_v24, %v9494_v24  ;;  %v9569_v14 = vadd.f32 %v9436_v1, %v9423_v34 }
 0x2ff   :  { %v9500_v49 = vadd.f32 %v9421_v31, %v1854_v46  ;;  %v9541_v21 = vadd.f32 %v9428_v47, %v1753_v41  ;;  %v9580_v61 = vsel %vm2204_vm6, %v2343_v17, 0.0 }
 0x300   :  { %12246 = vst [vmem:[#allocation45_spill] sm:$0xff] %v9551_v33  ;;  %12249 = vst [vmem:[#allocation48_spill] sm:$0xff] %v9580_v61 }
 0x301   :  { %v1757_v51 = vpop.f32.mrb[16].mxu0  ;;  %v1858_v53 = vpop.f32.mrb[28].mxu1  ;;  %12243 = vst [vmem:[#allocation42_spill] sm:$0xff] %v9500_v49  ;;  %v2347_v20 = vmul.f32 %v9500_v49, %v9500_v49 }
 0x302   :  { %v1759_v35 = vpop.f32.mrb[17].mxu0  ;;  %v1860_v26 = vpop.f32.mrb[29].mxu1  ;;  %v9572_v36 = vadd.f32 %v9426_v38, %v1757_v51  ;;  %v9575_v6 = vadd.f32 %v9436_v1, %v1858_v53  ;;  %v9594_v51 = vmul.f32 %v9541_v21, %v9541_v21 }
 0x303   :  { %v9587_v57 = vadd.f32 %v9428_v47, %v1759_v35  ;;  %v9590_v34 = vadd.f32 %v9421_v31, %v1860_v26  ;;  %v9606_v35 = vsel %vm2204_vm6, %v9500_v49, 0.0  ;;  %v9609_v26 = vsel %vm2204_vm6, %v2347_v20, 0.0 }
 0x304   :  { %12247 = vst [vmem:[#allocation46_spill] sm:$0xff] %v9572_v36  ;;  %12248 = vst [vmem:[#allocation47_spill] sm:$0xff] %v9575_v6  ;;  %v9623_v25 = vsel %vm88_vm0, %v9572_v36, 0.0  ;;  %v2348_v49 = vmul.f32 %v9572_v36, %v9572_v36  ;;  %v9629_v20 = vsel %vm88_vm0, %v9575_v6, 0.0 }
 0x305   :  { %v1947_v39 = vpop.f32.mrb[18].mxu0  ;;  %v2048_v40 = vpop.f32.mrb[30].mxu1  ;;  %12251 = vst [vmem:[#allocation50_spill] sm:$0xff] %v9587_v57  ;;  %12252 = vst [vmem:[#allocation51_spill] sm:$0xff] %v9590_v34  ;;  %v2349_v33 = vmul.f32 %v9587_v57, %v9587_v57  ;;  %v2351_v36 = vmul.f32 %v9590_v34, %v9590_v34 }
 0x306   :  { %v1949_v22 = vpop.f32.mrb[19].mxu0  ;;  %v2050_v58 = vpop.f32.mrb[31].mxu1  ;;  %12253 = vst [vmem:[#allocation52_spill] sm:$0xff] %v9594_v51  ;;  %v9597_v53 = vadd.f32 %v9426_v38, %v1947_v39  ;;  %v9600_v17 = vadd.f32 %v9436_v1, %v2048_v40  ;;  %12256 = vst [vmem:[#allocation55_spill] sm:$0xff] %v9606_v35 }
 0x307   :  { %v9544_v45 = vadd.f32 %v9421_v31, %v2050_v58  ;;  %v9565_v58 = vsel %vm2204_vm6, %v9475_v60, 0.0  ;;  %v9584_v60 = vmul.f32 %v9531_v3, %v9531_v3  ;;  %12257 = vst [vmem:[#allocation56_spill] sm:$0xff] %v9609_v26  ;;  %v9612_v52 = vadd.f32 %v9428_v47, %v1949_v22  ;;  %12260 = vst [vmem:[#allocation59_spill] sm:$0xff] %v9623_v25 }
 0x308   :  { %12254 = vst [vmem:[#allocation53_spill] sm:$0xff] %v9597_v53  ;;  %12255 = vst [vmem:[#allocation54_spill] sm:$0xff] %v9600_v17  ;;  %v2352_v37 = vmul.f32 %v9597_v53, %v9597_v53  ;;  %v2203_v26 = vadd.f32 %v9600_v17, %v9457_v11  ;;  %v9669_v11 = vsel %vm88_vm0, %v2348_v49, 0.0  ;;  %v9689_v49 = vsel %vm2241_vm7, %v2351_v36, 0.0 }
 0x309   :  { %v9502_v28 = vpop.f32.mrb[20].mxu0  ;;  %v9504_v50 = vpop.f32.mrb[32].mxu1  ;;  %12245 = vst [vmem:[#allocation44_spill] sm:$0xff] %v9544_v45  ;;  %12250 = vst [vmem:[#allocation49_spill] sm:$0xff] %v9584_v60  ;;  %v2355_v29 = vmul.f32 %v9544_v45, %v9544_v45  ;;  %v2206_v22 = vsel %vm2204_vm6, %v9544_v45, 0.0  ;;  %v9639_v60 = vsel %vm88_vm0, %v9587_v57, 0.0  ;;  %v2201_v45 = vadd.f32 %v9597_v53, %v9434_v55 }
 0x30a   :  { %v1955_v46 = vpop.f32.mrb[21].mxu0  ;;  %v2056_v42 = vpop.f32.mrb[33].mxu1  ;;  %12258 = vst [vmem:[#allocation57_spill] sm:$0xff] %v9612_v52  ;;  %12261 = vst [vmem:[#allocation60_spill] sm:$0xff] %v9629_v20  ;;  %v9657_v57 = vsel %vm2241_vm7, %v9590_v34, 0.0  ;;  %v2353_v51 = vmul.f32 %v9612_v52, %v9612_v52  ;;  %v9675_v34 = vadd.f32 %v9426_v38, %v9502_v28 }
 0x30b   :  { %v9615_v48 = vadd.f32 %v9421_v31, %v2056_v42  ;;  %12262 = vst [vmem:[#allocation61_spill] sm:$0xff] %v9639_v60  ;;  %v9646_v6 = vadd.f32 %v9428_v47, %v1955_v46  ;;  %v2380_v60 = vsel %vm2204_vm6, %v2355_v29, 0.0  ;;  %12264 = vst [vmem:[#allocation63_spill] sm:$0xff] %v9657_v57  ;;  %v2207_v46 = vadd.f32 %v2206_v22, %v9479_v5 }
 0x30c   :  { %12265 = vst [vmem:[#allocation64_spill] sm:$0xff] %v9669_v11  ;;  %v2202_v29 = vadd.f32 %v9612_v52, %v9442_v9  ;;  %12266 = vst [vmem:[#allocation65_spill] sm:$0xff] %v9675_v34  ;;  %v9679_v5 = vadd.f32 %v9436_v1, %v9504_v50  ;;  %v9686_v57 = vsel %vm88_vm0, %v2349_v33, 0.0  ;;  %v2381_v52 = vadd.f32 %v2380_v60, %v9482_v18 }
 0x30d   :  { %v9559_v12 = vpop.f32.mrb[22].mxu0  ;;  %v9561_v41 = vpop.f32.mrb[34].mxu1  ;;  %12259 = vst [vmem:[#allocation58_spill] sm:$0xff] %v9615_v48  ;;  %12263 = vst [vmem:[#allocation62_spill] sm:$0xff] %v9646_v6  ;;  %v2359_v55 = vmul.f32 %v9615_v48, %v9615_v48  ;;  %v2357_v28 = vmul.f32 %v9646_v6, %v9646_v6  ;;  %v2246_v9 = vmul.f32 0.5, %v2201_v45  ;;  %v2376_v11 = vadd.f32 %v2352_v37, %v9454_v7 }
 0x30e   :  { %v9577_v2 = vpop.f32.mrb[23].mxu0  ;;  %v2062_v32 = vpop.f32.mrb[35].mxu1  ;;  %12267 = vst [vmem:[#allocation66_spill] sm:$0xff] %v9689_v49  ;;  %v2248_v50 = vmul.f32 0.5, %v2203_v26  ;;  %v2212_v25 = vsel %vm2204_vm6, %v9615_v48, 0.0  ;;  %v2377_v61 = vadd.f32 %v2353_v51, %v9466_v15  ;;  %v2249_v35 = vmul.f32 0.5, %v2207_v46 }
 0x30f   :  { %v2386_v33 = vsel %vm2204_vm6, %v2359_v55, 0.0  ;;  %v9700_v36 = vadd.f32 %v9421_v31, %v2062_v32  ;;  %v2247_v60 = vmul.f32 0.5, %v2202_v29  ;;  %v2208_v45 = vadd.f32 %v9675_v34, %v9447_v0 }
 0x310   :  { %v2210_v37 = vadd.f32 %v9679_v5, %v9489_v10  ;;  %v9712_v7 = vadd.f32 %v9426_v38, %v9559_v12  ;;  %v2421_v32 = vmul.f32 0.5, %v2381_v52  ;;  %v2209_v51 = vadd.f32 %v9646_v6, %v9460_v62 }
 0x311   :  { %v9617_v39 = vpop.f32.mrb[24].mxu0  ;;  %v9619_v40 = vpop.f32.mrb[36].mxu1  ;;  %12268 = vst [vmem:[#allocation67_spill] sm:$0xff] %v9700_v36  ;;  %v2383_v26 = vadd.f32 %v2357_v28, %v9508_v4  ;;  %v2213_v46 = vadd.f32 %v2212_v25, %v9512_v63  ;;  %v2387_v29 = vadd.f32 %v2386_v33, %v9515_v19  ;;  %v9725_v48 = vadd.f32 %v9436_v1, %v9561_v41 }
 0x312   :  { %v9633_v42 = vpop.f32.mrb[25].mxu0  ;;  %v9635_v43 = vpop.f32.mrb[37].mxu1  ;;  %v9729_v12 = vadd.f32 %v9428_v47, %v9577_v2  ;;  %v2363_v52 = vmul.f32 %v9700_v36, %v9700_v36  ;;  %v9733_v0 = vmul.f32 0.5, %v2376_v11  ;;  %v2419_v6 = vmul.f32 0.5, %v2377_v61 }
 0x313   :  { %v2306_v4 = vsel %vm2204_vm6, %v2249_v35, 0.0  ;;  %v2356_v25 = vmul.f32 %v9675_v34, %v9675_v34  ;;  %v2250_v63 = vmul.f32 0.5, %v2208_v45  ;;  %v2252_v19 = vmul.f32 0.5, %v2210_v37 }
 0x314   :  { %v2214_v41 = vadd.f32 %v9712_v7, %v9469_v44  ;;  %v2218_v2 = vsel %vm2204_vm6, %v9700_v36, 0.0  ;;  %v2478_v28 = vsel %vm2204_vm6, %v2421_v32, 0.0  ;;  %v2251_v33 = vmul.f32 0.5, %v2209_v51 }
 0x315   :  { %v9664_v20 = vpop.f32.mrb[26].mxu0  ;;  %v9666_v53 = vpop.f32.mrb[38].mxu1  ;;  %v2253_v62 = vmul.f32 0.5, %v2213_v46  ;;  %v2392_v11 = vsel %vm2204_vm6, %v2363_v52, 0.0  ;;  %v2423_v61 = vmul.f32 0.5, %v2383_v26  ;;  %v2425_v10 = vmul.f32 0.5, %v2387_v29 }
 0x316   :  { %v9681_v22 = vpop.f32.mrb[27].mxu0  ;;  %v9683_v17 = vpop.f32.mrb[39].mxu1  ;;  %v2216_v35 = vadd.f32 %v9725_v48, %v9518_v23  ;;  %v2361_v45 = vmul.f32 %v9729_v12, %v9729_v12  ;;  %v9749_v37 = vadd.f32 %v2356_v25, %v9486_v8  ;;  %v2219_v34 = vadd.f32 %v2218_v2, %v9535_v13 }
 0x317   :  { %v9754_v32 = vadd.f32 %v9426_v38, %v9617_v39  ;;  %v9758_v51 = vadd.f32 %v9428_v47, %v9633_v42  ;;  %v2270_v26 = vadd.f32 %v2250_v63, %v2246_v9  ;;  %v2294_v46 = vadd.f32 %v2252_v19, %v2248_v50 }
 0x318   :  { %v2254_v29 = vmul.f32 0.5, %v2214_v41  ;;  %v2393_v52 = vadd.f32 %v2392_v11, %v9547_v16  ;;  %v2282_v36 = vadd.f32 %v2251_v33, %v2247_v60  ;;  %v2307_v44 = vsel %vm2204_vm6, %v2253_v62, 0.0 }
 0x319   :  { %v9702_v49 = vpop.f32.mrb[28].mxu0  ;;  %v9704_v18 = vpop.f32.mrb[40].mxu1  ;;  %v2215_v8 = vadd.f32 %v9729_v12, %v9472_v30  ;;  %v9766_v13 = vadd.f32 %v9436_v1, %v9619_v40  ;;  %v2454_v39 = vadd.f32 %v2423_v61, %v2419_v6  ;;  %v2479_v25 = vsel %vm2204_vm6, %v2425_v10, 0.0 }
 0x31a   :  { %v9714_v15 = vpop.f32.mrb[29].mxu0  ;;  %v9716_v55 = vpop.f32.mrb[41].mxu1  ;;  %v2256_v42 = vmul.f32 0.5, %v2216_v35  ;;  %v2389_v9 = vadd.f32 %v2361_v45, %v9526_v54  ;;  %v2257_v50 = vmul.f32 0.5, %v2219_v34  ;;  %v2220_v16 = vadd.f32 %v9754_v32, %v9494_v24 }
 0x31b   :  { %v2365_v62 = vmul.f32 %v9758_v51, %v9758_v51  ;;  %v9776_v60 = vadd.f32 %v9421_v31, %v9635_v43  ;;  %v2308_v63 = vadd.f32 %v2307_v44, %v2306_v4  ;;  %v2271_v40 = vadd.f32 %v2270_v26, %v2254_v29 }
 0x31c   :  { %v9780_v6 = vmul.f32 %v9712_v7, %v9712_v7  ;;  %v2429_v10 = vmul.f32 0.5, %v2393_v52  ;;  %v2480_v19 = vadd.f32 %v2479_v25, %v2478_v28  ;;  %v2255_v54 = vmul.f32 0.5, %v2215_v8 }
 0x31d   :  { %v2222_v34 = vadd.f32 %v9766_v13, %v9538_v27  ;;  %v9786_v41 = vadd.f32 %v9426_v38, %v9664_v20  ;;  %v2295_v2 = vadd.f32 %v2294_v46, %v2256_v42  ;;  %v2427_v33 = vmul.f32 0.5, %v2389_v9 }
 0x31e   :  { %v2221_v43 = vadd.f32 %v9758_v51, %v9497_v56  ;;  %v2224_v44 = vsel %vm2204_vm6, %v9776_v60, 0.0  ;;  %v2309_v4 = vsel %vm2204_vm6, %v2257_v50, 0.0  ;;  %v2258_v11 = vmul.f32 0.5, %v2220_v16 }
 0x31f   :  { %v2395_v28 = vadd.f32 %v2365_v62, %v9555_v59  ;;  %v9796_v61 = vadd.f32 %v9436_v1, %v9666_v53  ;;  %v2481_v20 = vsel %vm2204_vm6, %v2429_v10, 0.0  ;;  %v2367_v35 = vmul.f32 %v9776_v60, %v9776_v60 }
 0x320   :  { %v9803_v45 = vadd.f32 %v9428_v47, %v9681_v22  ;;  %v9807_v26 = vadd.f32 %v9421_v31, %v9683_v17  ;;  %v2283_v46 = vadd.f32 %v2282_v36, %v2255_v54  ;;  %v2260_v29 = vmul.f32 0.5, %v2222_v34 }
 0x321   :  { %v2225_v59 = vadd.f32 %v2224_v44, %v9565_v58  ;;  %v2226_v53 = vadd.f32 %v9786_v41, %v9531_v3  ;;  %v2455_v52 = vadd.f32 %v2454_v39, %v2427_v33  ;;  %v2310_v8 = vadd.f32 %v2309_v4, %v2308_v63  ;;  %v12270_v4 = vld [vmem:[#allocation48_spill] sm:$0xff] }
 0x322   :  { %v9814_v25 = vmul.f32 %v9754_v32, %v9754_v32  ;;  %v2259_v42 = vmul.f32 0.5, %v2221_v43  ;;  %v9816_v22 = vadd.f32 %v2481_v20, %v2480_v19  ;;  %v2272_v9 = vadd.f32 %v2271_v40, %v2258_v11  ;;  %v12269_v19 = vld [vmem:[#allocation55_spill] sm:$0xff] }
 0x323   :  { %v2431_v50 = vmul.f32 0.5, %v2395_v28  ;;  %v2228_v17 = vadd.f32 %v9796_v61, %v9569_v14  ;;  %v2398_v36 = vsel %vm2204_vm6, %v2367_v35, 0.0  ;;  %v2227_v58 = vadd.f32 %v9803_v45, %v9541_v21 }
 0x324   :  { %v2230_v39 = vsel %vm2204_vm6, %v9807_v26, 0.0  ;;  %v2371_v16 = vmul.f32 %v9807_v26, %v9807_v26  ;;  %v2296_v62 = vadd.f32 %v2295_v2, %v2260_v29  ;;  %v2261_v63 = vmul.f32 0.5, %v2225_v59 }
 0x325   :  { %v2262_v10 = vmul.f32 0.5, %v2226_v53  ;;  %v2369_v40 = vmul.f32 %v9803_v45, %v9803_v45  ;;  %v2231_v54 = vadd.f32 %v2230_v39, %v12269_v19  ;;  %v9832_v34 = vadd.f32 %v9426_v38, %v9702_v49  ;;  %v12273_v53 = vld [vmem:[#allocation52_spill] sm:$0xff] }
 0x326   :  { %v9836_v33 = vadd.f32 %v9436_v1, %v9704_v18  ;;  %v9840_v43 = vadd.f32 %v9428_v47, %v9714_v15  ;;  %v2284_v2 = vadd.f32 %v2283_v46, %v2259_v42  ;;  %v2456_v44 = vadd.f32 %v2455_v52, %v2431_v50  ;;  %v12271_v18 = vld [vmem:[#allocation59_spill] sm:$0xff]  ;;  %v12272_v47 = vld [vmem:[#allocation60_spill] sm:$0xff] }
 0x327   :  { %v2399_v11 = vadd.f32 %v2398_v36, %v12270_v4  ;;  %v2264_v28 = vmul.f32 0.5, %v2228_v17  ;;  %v2263_v20 = vmul.f32 0.5, %v2227_v58  ;;  %v2404_v35 = vsel %vm2204_vm6, %v2371_v16, 0.0  ;;  %v12274_v36 = vld [vmem:[#allocation56_spill] sm:$0xff]  ;;  %v12275_v4 = vld [vmem:[#allocation61_spill] sm:$0xff] }
 0x328   :  { %v2233_v38 = vsel %vm88_vm0, %v9832_v34, 0.0  ;;  %v2239_v49 = vsel %vm88_vm0, %v9836_v33, 0.0  ;;  %v2311_v1 = vsel %vm2204_vm6, %v2261_v63, 0.0  ;;  %v9853_v46 = vadd.f32 %v9421_v31, %v9716_v55 }
 0x329   :  { %v2234_v29 = vadd.f32 %v2233_v38, %v12271_v18  ;;  %v2240_v15 = vadd.f32 %v2239_v49, %v12272_v47  ;;  %v2273_v59 = vadd.f32 %v2272_v9, %v2262_v10  ;;  %v2401_v52 = vadd.f32 %v2369_v40, %v12273_v53 }
 0x32a   :  { %v2265_v42 = vmul.f32 0.5, %v2231_v54  ;;  %v2236_v50 = vsel %vm88_vm0, %v9840_v43, 0.0  ;;  %v2433_v17 = vmul.f32 0.5, %v2399_v11  ;;  %v2405_v58 = vadd.f32 %v2404_v35, %v12274_v36 }
 0x32b   :  { %v2266_v39 = vmul.f32 0.5, %v2234_v29  ;;  %v2268_v16 = vmul.f32 0.5, %v2240_v15  ;;  %v2312_v63 = vadd.f32 %v2311_v1, %v2310_v8  ;;  %v2297_v19 = vadd.f32 %v2296_v62, %v2264_v28  ;;  %v12276_v28 = vld [vmem:[#allocation63_spill] sm:$0xff] }
 0x32c   :  { %v2237_v38 = vadd.f32 %v2236_v50, %v12275_v4  ;;  %v2373_v31 = vmul.f32 %v9840_v43, %v9840_v43  ;;  %v2285_v55 = vadd.f32 %v2284_v2, %v2263_v20  ;;  %v2243_v40 = vsel %vm2241_vm7, %v9853_v46, 0.0 }
 0x32d   :  { %v2274_v9 = vsel %vm88_vm0, %v2266_v39, 0.0  ;;  %v2298_v10 = vsel %vm88_vm0, %v2268_v16, 0.0  ;;  %v2313_v54 = vsel %vm2204_vm6, %v2265_v42, 0.0  ;;  %v2437_v8 = vmul.f32 0.5, %v2405_v58 }
 0x32e   :  { %v2275_v11 = vadd.f32 %v2274_v9, %v2273_v59  ;;  %v2299_v35 = vadd.f32 %v2298_v10, %v2297_v19  ;;  %v2267_v49 = vmul.f32 0.5, %v2237_v38  ;;  %v2410_v62 = vsel %vm88_vm0, %v2373_v31, 0.0  ;;  %v12277_v9 = vld [vmem:[#allocation66_spill] sm:$0xff] }
 0x32f   :  { %v2244_v1 = vadd.f32 %v2243_v40, %v12276_v28  ;;  %v2375_v2 = vmul.f32 %v9853_v46, %v9853_v46  ;;  %v2483_v20 = vsel %vm2204_vm6, %v2433_v17, 0.0  ;;  %v2435_v18 = vmul.f32 0.5, %v2401_v52 }
 0x330   :  { %v2276_v29 = vrot.slane %v2275_v11, 4  ;;  %v2300_v47 = vrot.slane %v2299_v35, 4  ;;  %v2372_v15 = vmul.f32 %v9832_v34, %v9832_v34  ;;  %v2286_v59 = vsel %vm88_vm0, %v2267_v49, 0.0 }
 0x331   :  { %v2411_v53 = vadd.f32 %v2410_v62, %v9686_v57  ;;  %v2269_v42 = vmul.f32 0.5, %v2244_v1  ;;  %v2314_v50 = vadd.f32 %v2313_v54, %v2312_v63  ;;  %v2287_v39 = vadd.f32 %v2286_v59, %v2285_v55 }
 0x332   :  { %v2277_v36 = vadd.f32 %v2276_v29, %v2275_v11  ;;  %v2301_v58 = vadd.f32 %v2300_v47, %v2299_v35  ;;  %v2485_v16 = vsel %vm2204_vm6, %v2437_v8, 0.0  ;;  %v2416_v52 = vsel %vm2241_vm7, %v2375_v2, 0.0  ;;  %v12278_v2 = vld [vmem:[#allocation43_spill] sm:$0xff] }
 0x333   :  { %v2439_v19 = vmul.f32 0.5, %v2411_v53  ;;  %v2315_v17 = vsel %vm2241_vm7, %v2269_v42, 0.0  ;;  %v2417_v10 = vadd.f32 %v2416_v52, %v12277_v9  ;;  %v2484_v40 = vadd.f32 %v2483_v20, %v9816_v22  ;;  %v12279_v53 = vld [vmem:[#allocation45_spill] sm:$0xff] }
 0x334   :  { %v2278_v4 = vrot.slane %v2277_v36, 2  ;;  %v2302_v38 = vrot.slane %v2301_v58, 2  ;;  %v2316_v31 = vadd.f32 %v2315_v17, %v2314_v50  ;;  %v2457_v57 = vadd.f32 %v2456_v44, %v2435_v18  ;;  %v12280_v50 = vld [vmem:[#allocation64_spill] sm:$0xff] }
 0x335   :  { %v2458_v63 = vsel %vm88_vm0, %v2439_v19, 0.0  ;;  %v2288_v54 = vrot.slane %v2287_v39, 4  ;;  %v2407_v55 = vsel %vm88_vm0, %v2372_v15, 0.0  ;;  %v2441_v49 = vmul.f32 0.5, %v2417_v10 }
 0x336   :  { %v2279_v11 = vadd.f32 %v2278_v4, %v2277_v36  ;;  %v2317_v35 = vrot.slane %v2316_v31, 4  ;;  %v2486_v8 = vadd.f32 %v2485_v16, %v2484_v40  ;;  %v2303_v62 = vadd.f32 %v2302_v38, %v2301_v58  ;;  %v12281_v4 = vld [vmem:[#allocation49_spill] sm:$0xff] }
 0x337   :  { %v2289_v28 = vadd.f32 %v2288_v54, %v2287_v39  ;;  %v2459_v1 = vadd.f32 %v2458_v63, %v2457_v57  ;;  %v2388_v29 = vadd.f32 %v9780_v6, %v12278_v2  ;;  %v2368_v47 = vmul.f32 %v9786_v41, %v9786_v41 }
 0x338   :  { %v2318_v22 = vadd.f32 %v2317_v35, %v2316_v31  ;;  %v2487_v44 = vsel %vm2241_vm7, %v2441_v49, 0.0  ;;  %v2422_v20 = vmul.f32 0.5, %v9749_v37  ;;  %v2394_v42 = vadd.f32 %v9814_v25, %v12279_v53  ;;  %v12282_v53 = vld [vmem:[#allocation41_spill] sm:$0xff] }
 0x339   :  { %v2488_v18 = vadd.f32 %v2487_v44, %v2486_v8  ;;  %v2290_v59 = vrot.slane %v2289_v28, 2  ;;  %v2460_v15 = vrot.slane %v2459_v1, 4  ;;  %v2408_v36 = vadd.f32 %v2407_v55, %v12280_v50  ;;  %v12283_v50 = vld [vmem:[#allocation54_spill] sm:$0xff] }
 0x33a   :  { %v2319_v58 = vrot.slane %v2318_v22, 2  ;;  %v2280_v39 = vrot.slane %v2279_v11, 1  ;;  %v2304_v19 = vrot.slane %v2303_v62, 1  ;;  %v2426_v52 = vmul.f32 0.5, %v2388_v29 }
 0x33b   :  { %v2489_v16 = vrot.slane %v2488_v18, 4  ;;  %v2291_v6 = vadd.f32 %v2290_v59, %v2289_v28  ;;  %v2461_v17 = vadd.f32 %v2460_v15, %v2459_v1  ;;  %v2400_v38 = vadd.f32 %v2368_v47, %v12281_v4 }
 0x33c   :  { %v2320_v31 = vadd.f32 %v2319_v58, %v2318_v22  ;;  %v2442_v37 = vadd.f32 %v2422_v20, %v9733_v0  ;;  %v2430_v57 = vmul.f32 0.5, %v2394_v42  ;;  %v2438_v63 = vmul.f32 0.5, %v2408_v36 }
 0x33d   :  { %v2292_v9 = vrot.slane %v2291_v6, 1  ;;  %v2462_v10 = vrot.slane %v2461_v17, 2  ;;  %v2490_v40 = vadd.f32 %v2489_v16, %v2488_v18  ;;  %v2281_v54 = vadd.f32 %v2280_v39, %v2279_v11 }
 0x33e   :  { %v2321_v25 = vrot.slane %v2320_v31, 1  ;;  %v2305_v35 = vadd.f32 %v2304_v19, %v2303_v62  ;;  %v2443_v28 = vadd.f32 %v2442_v37, %v2426_v52  ;;  %v2434_v2 = vmul.f32 0.5, %v2400_v38  ;;  %v12285_v52 = vld [vmem:[#allocation37_spill] sm:$0xff]  ;;  %v12286_v37 = vld [vmem:[#allocation3_spill] sm:$0xff] }
 0x33f   :  { %v2293_v55 = vadd.f32 %v2292_v9, %v2291_v6  ;;  %v2463_v49 = vadd.f32 %v2462_v10, %v2461_v17  ;;  %v2491_v8 = vrot.slane %v2490_v40, 2  ;;  %v2358_v0 = vmul.f32 %v9679_v5, %v9679_v5  ;;  %v12284_v6 = vld [vmem:[#allocation7_spill] sm:$0xff]  ;;  %v12287_v9 = vld [vmem:[#allocation9_spill] sm:$0xff] }
 0x340   :  { %v2322_v1 = vadd.f32 %v2321_v25, %v2320_v31  ;;  %v2444_v22 = vadd.f32 %v2443_v28, %v2430_v57  ;;  %v2324_v18 = vmul.f32 0.022222223, %v2281_v54  ;;  %v2446_v59 = vsel %vm88_vm0, %v2438_v63, 0.0  ;;  %v12288_v10 = vld [vmem:[#allocation47_spill] sm:$0xff] }
 0x341   :  { %v2325_v29 = vmul.f32 0.022222223, %v2293_v55  ;;  %v2464_v44 = vrot.slane %v2463_v49, 1  ;;  %v2492_v47 = vadd.f32 %v2491_v8, %v2490_v40  ;;  %v2326_v11 = vmul.f32 0.022222223, %v2305_v35 }
 0x342   :  { %v2327_v20 = vmul.f32 0.022222223, %v2322_v1  ;;  %v2334_v42 = vmul.f32 %v12282_v53, %v12282_v53  ;;  %v2354_v36 = vmul.f32 %v12283_v50, %v12283_v50  ;;  %v2445_v58 = vadd.f32 %v2444_v22, %v2434_v2  ;;  %v12290_v2 = vld [vmem:[#allocation10_spill] sm:$0xff] }
 0x343   :  { %2622 = vmatprep.mubr.f32.mxu0 %v2325_v29  ;;  %v2465_v15 = vadd.f32 %v2464_v44, %v2463_v49  ;;  %v2493_v62 = vrot.slane %v2492_v47, 1  ;;  %v2362_v39 = vmul.f32 %v9725_v48, %v9725_v48  ;;  %v2374_v16 = vmul.f32 %v9836_v33, %v9836_v33  ;;  %v12291_v29 = vld [vmem:[#allocation4_spill] sm:$0xff] }
 0x344   :  { %6731 = vmatprep.mubr.msk.f32.mxu1 %vm2204_vm6, %v2327_v20  ;;  %2623 = vmatmul.mubr.f32.vlgmr.msra.gmra.mrb[36].mxu0 %v2324_v18  ;;  %v2330_v4 = vmul.f32 %v12285_v52, %v12285_v52  ;;  %v2338_v38 = vmul.f32 %v9518_v23, %v9518_v23  ;;  %v2447_v31 = vadd.f32 %v2446_v59, %v2445_v58  ;;  %v12289_v54 = vmov 0.0|0.0   ;;  %v12292_v44 = vld [vmem:[#allocation12_spill] sm:$0xff] }
 0x345   :  { %2693 = vmatmul.mubr.f32.vlgmr.msra.gmra.mrb[48].mxu1 %v2326_v11  ;;  %7785 = vmatpush3.bf16.msra.mxu0 %v12284_v6  ;;  %v2496_v19 = vmul.f32 0.022222223, %v2465_v15  ;;  %v2494_v17 = vadd.f32 %v2493_v62, %v2492_v47  ;;  %v2350_v40 = vmul.f32 %v12288_v10, %v12288_v10  ;;  %v2384_v57 = vadd.f32 %v2358_v0, %v2334_v42  ;;  %v12293_v62 = vld [vmem:[#allocation13_spill] sm:$0xff] }
 0x346   :  { %7816 = vmatpush1.bf16.msra.mxu1 %v12286_v37  ;;  %7787 = vmatprep.subr.bf16.mxu0 %v12287_v9  ;;  %v2366_v63 = vmul.f32 %v9766_v13, %v9766_v13  ;;  %v2342_v55 = vmul.f32 %v9538_v27, %v9538_v27  ;;  %v2378_v35 = vadd.f32 %v2354_v36, %v2330_v4  ;;  %v2413_v28 = vsel %vm88_vm0, %v2374_v16, 0.0  ;;  %v12294_v42 = vld [vmem:[#allocation5_spill] sm:$0xff]  ;;  %v12295_v36 = vld [vmem:[#allocation15_spill] sm:$0xff]  ;;  %v12296_v4 = vld [vmem:[#allocation16_spill] sm:$0xff] }
 0x347   :  { %2765 = vmatprep.mubr.f32.mxu0 %v2496_v19  ;;  %v2498_v25 = vmul.f32 0.022222223, %v2494_v17  ;;  %7817 = vmatprep.subr.bf16.mxu1 %v12289_v54  ;;  %v2390_v49 = vadd.f32 %v2362_v39, %v2338_v38  ;;  %v2370_v8 = vmul.f32 %v9796_v61, %v9796_v61  ;;  %v2448_v1 = vrot.slane %v2447_v31, 4  ;;  %v12297_v38 = vld [vmem:[#allocation6_spill] sm:$0xff] }
 0x348   :  { %v2346_v47 = vmul.f32 %v9569_v14, %v9569_v14  ;;  %v2412_v0 = vsel %vm88_vm0, %v2350_v40, 0.0  ;;  %v2424_v22 = vmul.f32 0.5, %v2384_v57  ;;  %v2396_v20 = vadd.f32 %v2366_v63, %v2342_v55  ;;  %v12298_v37 = vld [vmem:[#allocation18_spill] sm:$0xff]  ;;  %v12299_v63 = vld [vmem:[#allocation19_spill] sm:$0xff]  ;;  %v12301_v55 = vld [vmem:[#allocation21_spill] sm:$0xff] }
 0x349   :  { %6732 = vmatprep.mubr.msk.f32.mxu1 %vm2204_vm6, %v2498_v25  ;;  %7789 = vmatpush3.bf16.msra.mxu0 %v12290_v2  ;;  %v2414_v18 = vadd.f32 %v2413_v28, %v2412_v0  ;;  %v2420_v59 = vmul.f32 0.5, %v2378_v35  ;;  %v2428_v11 = vmul.f32 0.5, %v2390_v49  ;;  %v2449_v58 = vadd.f32 %v2448_v1, %v2447_v31  ;;  %v12300_v25 = vld [vmem:[#allocation8_spill] sm:$0xff]  ;;  %v12303_v28 = vld [vmem:[#allocation11_spill] sm:$0xff] }
 0x34a   :  { %7819 = vmatpush1.bf16.msra.mxu1 %v12291_v29  ;;  %7791 = vmatprep.subr.bf16.mxu0 %v12292_v44  ;;  %v2402_v15 = vadd.f32 %v2370_v8, %v2346_v47  ;;  %v2432_v16 = vmul.f32 0.5, %v2396_v20  ;;  %v12302_v8 = vld [vmem:[#allocation22_spill] sm:$0xff]  ;;  %v12304_v2 = vld [vmem:[#allocation24_spill] sm:$0xff]  ;;  %v12305_v44 = vld [vmem:[#allocation25_spill] sm:$0xff] }
 0x34b   :  { %7820 = vmatprep.subr.bf16.mxu1 %v12289_v54  ;;  %v2466_v39 = vadd.f32 %v2424_v22, %v2420_v59  ;;  %v2440_v6 = vmul.f32 0.5, %v2414_v18  ;;  %v2450_v9 = vrot.slane %v2449_v58, 2  ;;  %v12306_v47 = vld [vmem:[#allocation14_spill] sm:$0xff]  ;;  %v12307_v0 = vld [vmem:[#allocation27_spill] sm:$0xff]  ;;  %v12308_v18 = vld [vmem:[#allocation28_spill] sm:$0xff] }
 0x34c   :  { %v2436_v17 = vmul.f32 0.5, %v2402_v15  ;;  %v12309_v59 = vld [vmem:[#allocation17_spill] sm:$0xff] }
 0x34d   :  { %7793 = vmatpush3.bf16.msra.mxu0 %v12293_v62  ;;  %v2467_v19 = vadd.f32 %v2466_v39, %v2428_v11  ;;  %v2470_v57 = vsel %vm88_vm0, %v2440_v6, 0.0  ;;  %v2451_v35 = vadd.f32 %v2450_v9, %v2449_v58  ;;  %v12310_v62 = vmov 0.0   ;;  %v12312_v58 = vld [vmem:[#allocation23_spill] sm:$0xff]  ;;  %v2850_v9 = vld [vmem:[%s12103_s7] sm:$0xff] }
 0x34e   :  { %7822 = vmatpush1.bf16.msra.mxu1 %v12294_v42  ;;  %7795 = vmatprep.subr.bf16.mxu0 %v12295_v36  ;;  %v12311_v42 = vld [vmem:[#allocation20_spill] sm:$0xff] }
 0x34f   :  { %7823 = vmatprep.subr.bf16.mxu1 %v12289_v54  ;;  %v2468_v40 = vadd.f32 %v2467_v19, %v2432_v16  ;;  %v2452_v1 = vrot.slane %v2451_v35, 1  ;;  %v12313_v16 = vld [vmem:[#allocation26_spill] sm:$0xff]  ;;  %v12314_v19 = vld [vmem:[#allocation29_spill] sm:$0xff] }
 0x351   :  { %7797 = vmatpush3.bf16.msra.mxu0 %v12296_v4  ;;  %v2469_v31 = vadd.f32 %v2468_v40, %v2436_v17  ;;  %v2453_v22 = vadd.f32 %v2452_v1, %v2451_v35  ;;  %v2851_v4 = vld [vmem:[%s12103_s7 + $0x8] sm:$0xff]  ;;  %v2854_v40 = vld [vmem:[%s12103_s7 + $0x20] sm:$0xff]  ;;  %v2856_v1 = vld [vmem:[%s12103_s7 + $0x30] sm:$0xff] }
 0x352   :  { %7825 = vmatpush1.bf16.msra.mxu1 %v12297_v38  ;;  %7799 = vmatprep.subr.bf16.mxu0 %v12298_v37  ;;  %v2855_v38 = vld [vmem:[%s12103_s7 + $0x28] sm:$0xff]  ;;  %v2862_v35 = vld [vmem:[%s12103_s7 + $0x60] sm:$0xff] }
 0x353   :  { %7826 = vmatprep.subr.bf16.mxu1 %v12289_v54  ;;  %v2471_v49 = vadd.f32 %v2470_v57, %v2469_v31  ;;  %v2495_v11 = vmul.f32 0.022222223, %v2453_v22  ;;  %v9970_v37 = vpack.c.bf16 %v2855_v38, %v2851_v4  ;;  %v9978_v57 = vpack.c.bf16 %v2854_v40, %v2850_v9  ;;  %v2859_v31 = vld [vmem:[%s12103_s7 + $0x48] sm:$0xff]  ;;  %v2866_v22 = vld [vmem:[%s12103_s7 + $0x80] sm:$0xff]  ;;  %v2869_v38 = vld [vmem:[%s12103_s7 + $0x98] sm:$0xff] }
 0x354   :  { %v2873_v9 = vld [vmem:[%s12103_s7 + $0xb8] sm:$0xff]  ;;  %v2868_v40 = vld [vmem:[%s12103_s7 + $0x90] sm:$0xff] }
 0x355   :  { %7801 = vmatpush3.bf16.msra.mxu0 %v12299_v63  ;;  %v2472_v29 = vrot.slane %v2471_v49, 4  ;;  %v2863_v63 = vld [vmem:[%s12103_s7 + $0x68] sm:$0xff] }
 0x356   :  { %7828 = vmatpush1.bf16.msra.mxu1 %v12300_v25  ;;  %7803 = vmatprep.subr.bf16.mxu0 %v12301_v55  ;;  %v9988_v25 = vpack.c.bf16 %v2863_v63, %v2859_v31  ;;  %v2858_v55 = vld [vmem:[%s12103_s7 + $0x40] sm:$0xff]  ;;  %v7874_v63 = vpack.c.bf16 %v2873_v9, %v2869_v38 }
 0x357   :  { %7829 = vmatprep.subr.bf16.mxu1 %v12289_v54  ;;  %v2473_v20 = vadd.f32 %v2472_v29, %v2471_v49  ;;  %v2853_v49 = vld [vmem:[%s12103_s7 + $0x18] sm:$0xff] }
 0x359   :  { %7805 = vmatpush3.bf16.msra.mxu0 %v12302_v8  ;;  %v2474_v15 = vrot.slane %v2473_v20, 2  ;;  %v9999_v8 = vpack.c.bf16 %v2862_v35, %v2858_v55  ;;  %v2872_v55 = vld [vmem:[%s12103_s7 + $0xb0] sm:$0xff] }
 0x35a   :  { %7831 = vmatpush1.bf16.msra.mxu1 %v12303_v28  ;;  %7807 = vmatprep.subr.bf16.mxu0 %v12304_v2  ;;  %v2857_v28 = vld [vmem:[%s12103_s7 + $0x38] sm:$0xff]  ;;  %v2852_v2 = vld [vmem:[%s12103_s7 + $0x10] sm:$0xff]  ;;  %v7876_v35 = vpack.c.bf16 %v2872_v55, %v2868_v40 }
 0x35b   :  { %7832 = vmatprep.subr.bf16.mxu1 %v12289_v54  ;;  %v2475_v36 = vadd.f32 %v2474_v15, %v2473_v20  ;;  %v7866_v29 = vpack.c.bf16 %v2857_v28, %v2853_v49  ;;  %v2877_v49 = vld [vmem:[%s12103_s7 + $0xd8] sm:$0xff] }
 0x35c   :  { %v2881_v28 = vld [vmem:[%s12103_s7 + $0xf8] sm:$0xff] }
 0x35d   :  { %7809 = vmatpush3.bf16.msra.mxu0 %v12305_v44  ;;  %v2476_v39 = vrot.slane %v2475_v36, 1  ;;  %v10011_v44 = vpack.c.bf16 %v2856_v1, %v2852_v2  ;;  %v7878_v2 = vpack.c.bf16 %v2881_v28, %v2877_v49  ;;  %v2876_v1 = vld [vmem:[%s12103_s7 + $0xd0] sm:$0xff]  ;;  %v2843_v49 = vld [vmem:[%s12104_s4] sm:$0x1] }
 0x35e   :  { %7834 = vmatpush1.bf16.msra.mxu1 %v12306_v47  ;;  %7811 = vmatprep.subr.bf16.mxu0 %v12307_v0  ;;  %v2867_v47 = vld [vmem:[%s12103_s7 + $0x88] sm:$0xff] }
 0x35f   :  { %7835 = vmatprep.subr.bf16.mxu1 %v12289_v54  ;;  %v2477_v6 = vadd.f32 %v2476_v39, %v2475_v36  ;;  %v2871_v0 = vld [vmem:[%s12103_s7 + $0xa8] sm:$0xff]  ;;  %v2860_v36 = vld [vmem:[%s12103_s7 + $0x50] sm:$0xff] }
 0x360   :  { %v10023_v20 = vpack.c.bf16 %v2871_v0, %v2867_v47  ;;  %v2875_v39 = vld [vmem:[%s12103_s7 + $0xc8] sm:$0xff]  ;;  %v2880_v47 = vld [vmem:[%s12103_s7 + $0xf0] sm:$0xff] }
 0x361   :  { %7813 = vmatpush3.bf16.msra.mxu0 %v12308_v18  ;;  %v2497_v17 = vmul.f32 0.022222223, %v2477_v6  ;;  %v2870_v18 = vld [vmem:[%s12103_s7 + $0xa0] sm:$0xff]  ;;  %v2879_v6 = vld [vmem:[%s12103_s7 + $0xe8] sm:$0xff]  ;;  %v7880_v0 = vpack.c.bf16 %v2880_v47, %v2876_v1 }
 0x362   :  { %7837 = vmatpush1.bf16.msra.mxu1 %v12309_v59  ;;  %7851 = vmatprep.subr.bf16.mxu0 %v9970_v37  ;;  %v2861_v59 = vld [vmem:[%s12103_s7 + $0x58] sm:$0xff]  ;;  %v10034_v15 = vpack.c.bf16 %v2870_v18, %v2866_v22  ;;  %v10056_v4 = vpack.c.bf16 %v2879_v6, %v2875_v39  ;;  %v2847_v47 = vld [vmem:[%s12105_s5] sm:$0x1] }
 0x363   :  { %7838 = vmatprep.subr.bf16.mxu1 %v12289_v54 }
 0x364   :  { %2766 = vmatmul.mubr.f32.vlgmr.msra.gmra.mrb[38].mxu0 %v2495_v11  ;;  %v2865_v11 = vld [vmem:[%s12103_s7 + $0x78] sm:$0xff] }
 0x365   :  { %2949 = vmatprep.mubr.f32.mxu0 %v12310_v62  ;;  %7853 = vmatpush1.bf16.msra.mxu0 %v9978_v57 }
 0x366   :  { %7840 = vmatpush1.bf16.msra.mxu1 %v12311_v42  ;;  %7855 = vmatprep.subr.bf16.mxu0 %v9988_v25  ;;  %v7870_v42 = vpack.c.bf16 %v2865_v11, %v2861_v59 }
 0x367   :  { %7841 = vmatprep.subr.bf16.mxu1 %v12289_v54 }
 0x369   :  { %7857 = vmatpush1.bf16.msra.mxu0 %v9999_v8 }
 0x36a   :  { %7843 = vmatpush1.bf16.msra.mxu1 %v12312_v58  ;;  %v2864_v58 = vld [vmem:[%s12103_s7 + $0x70] sm:$0xff]  ;;  %7859 = vmatprep.subr.bf16.mxu0 %v10023_v20 }
 0x36b   :  { %7844 = vmatprep.subr.bf16.mxu1 %v12289_v54 }
 0x36d   :  { %7861 = vmatpush1.bf16.msra.mxu0 %v10034_v15 }
 0x36e   :  { %7846 = vmatpush1.bf16.msra.mxu1 %v12313_v16  ;;  %v7872_v16 = vpack.c.bf16 %v2864_v58, %v2860_v36  ;;  %7863 = vmatprep.subr.bf16.mxu0 %v10056_v4 }
 0x36f   :  { %7847 = vmatprep.subr.bf16.mxu1 %v12289_v54 }
 0x372   :  { %7849 = vmatpush1.bf16.msra.mxu1 %v12314_v19  ;;  %v2874_v19 = vld [vmem:[%s12103_s7 + $0xc0] sm:$0xff] }
 0x373   :  { %7899 = vmatprep.subr.bf16.mxu1 %v7866_v29 }
 0x375   :  { %2836 = vmatmul.mubr.f32.vlgmr.msra.gmra.mrb[50].mxu1 %v2497_v17  ;;  %v2878_v17 = vld [vmem:[%s12103_s7 + $0xe0] sm:$0xff] }
 0x376   :  { %3165 = vmatprep.mubr.f32.mxu1 %v12310_v62  ;;  %7901 = vmatpush1.bf16.msra.mxu1 %v10011_v44  ;;  %v7864_v31 = vpack.c.bf16 %v2878_v17, %v2874_v19 }
 0x377   :  { %7903 = vmatprep.subr.bf16.mxu1 %v7870_v42 }
 0x378   :  { %7865 = vmatpush1.bf16.msra.mxu0 %v7864_v31 }
 0x379   :  { %7867 = vmatprep.subr.bf16.mxu0 %v7866_v29 }
 0x37a   :  { %7905 = vmatpush1.bf16.msra.mxu1 %v7872_v16 }
 0x37b   :  { %7907 = vmatprep.subr.bf16.mxu1 %v7874_v63 }
 0x37e   :  { %7909 = vmatpush1.bf16.msra.mxu1 %v7876_v35 }
 0x37f   :  { %7911 = vmatprep.subr.bf16.mxu1 %v7878_v2 }
 0x382   :  { %7913 = vmatpush1.bf16.msra.mxu1 %v7880_v0 }
 0x417   :  { %v7102_v29 = vpop.f32.mrb[36].mxu0 }
 0x418   :  { %v2694_v22 = vpop.f32.mrb[48].mxu1  ;;  %v7103_v18 = vpop.f32.mrb[37].mxu0 }
 0x419   :  { %v7104_v59 = vadd.f32 %v7103_v18, %v7102_v29  ;;  %v2696_v11 = vpop.f32.mrb[49].mxu1 }
 0x41b   :  { %v2695_v36 = vadd.f32 %v7104_v59, %v2694_v22  ;;  %v12320_v59 = vld [vmem:[#allocation38_spill] sm:$0xff] }
 0x41d   :  { %v2841_v38 = vmul.f32 %v2695_v36, %v2695_v36 }
 0x437   :  { %v7137_v58 = vpop.f32.mrb[38].mxu0 }
 0x438   :  { %v7138_v39 = vpop.f32.mrb[39].mxu0 }
 0x439   :  { %v7139_v6 = vadd.f32 %v7138_v39, %v7137_v58 }
 0x448   :  { %v2837_v19 = vpop.f32.mrb[50].mxu1 }
 0x449   :  { %v2838_v17 = vadd.f32 %v7139_v6, %v2837_v19  ;;  %v2839_v9 = vpop.f32.mrb[51].mxu1 }
 0x44b   :  { %v2842_v40 = vsub.f32 %v2838_v17, %v2841_v38 }
 0x44d   :  { %v2844_v55 = vadd.f32 1e-05, %v2842_v40 }
 0x44f   :  { %8608 = vrsqrt.f32 %v2844_v55  ;;  %v12324_v55 = vld [vmem:[#allocation62_spill] sm:$0xff] }
 0x459   :  { %v8609_v28 = vpop.eup %8608 }
 0x45a   :  { %v2846_v1 = vmul.f32 %v8609_v28, %v2843_v49  ;;  %v12325_v28 = vld [vmem:[#allocation53_spill] sm:$0xff] }
 0x45c   :  { %6733 = vmatmul.mubr.msk.f32.vlgmr.msra.gmra.mrb[40].mxu0 %vm2204_vm6, %v2846_v1  ;;  %v2848_v29 = vmul.f32 %v2846_v1, %v2695_v36 }
 0x45d   :  { %7869 = vmatpush1.bf16.msra.mxu0 %v10011_v44  ;;  %3020 = vmatprep.mubr.f32.mxu0 %v12310_v62 }
 0x45e   :  { %7871 = vmatprep.subr.bf16.mxu0 %v7870_v42  ;;  %v2849_v22 = vsub.f32 %v2847_v47, %v2848_v29  ;;  %v12326_v47 = vld [vmem:[#allocation65_spill] sm:$0xff] }
 0x460   :  { %6736 = vmatmul.mubr.msk.f32.vlgmr.msra.gmra.mrb[52].mxu1 %vm2204_vm6, %v2849_v22 }
 0x461   :  { %7873 = vmatpush1.bf16.msra.mxu0 %v7872_v16  ;;  %3605 = vmatprep.mubr.f32.mxu1 %v12310_v62  ;;  %v12315_v16 = vld [vmem:[#allocation30_spill] sm:$0xff] }
 0x462   :  { %7875 = vmatprep.subr.bf16.mxu0 %v7874_v63 }
 0x465   :  { %7877 = vmatpush1.bf16.msra.mxu0 %v7876_v35 }
 0x466   :  { %7879 = vmatprep.subr.bf16.mxu0 %v7878_v2 }
 0x469   :  { %7881 = vmatpush1.bf16.msra.mxu0 %v7880_v0  ;;  %v12319_v0 = vld [vmem:[#allocation34_spill] sm:$0xff] }
 0x46a   :  { %7883 = vmatprep.subr.bf16.mxu0 %v9970_v37 }
 0x46c   :  { %6734 = vmatmul.mubr.msk.f32.vlgmr.msra.gmra.mrb[42].mxu0 %vm2204_vm6, %v2846_v1 }
 0x46d   :  { %7885 = vmatpush1.bf16.msra.mxu0 %v9978_v57  ;;  %3094 = vmatprep.mubr.f32.mxu0 %v12310_v62 }
 0x46e   :  { %7887 = vmatprep.subr.bf16.mxu0 %v9988_v25 }
 0x471   :  { %7889 = vmatpush1.bf16.msra.mxu0 %v9999_v8  ;;  %v12316_v8 = vld [vmem:[#allocation32_spill] sm:$0xff] }
 0x472   :  { %7891 = vmatprep.subr.bf16.mxu0 %v10023_v20  ;;  %v12317_v20 = vld [vmem:[#allocation35_spill] sm:$0xff] }
 0x475   :  { %7893 = vmatpush1.bf16.msra.mxu0 %v10034_v15 }
 0x476   :  { %7895 = vmatprep.subr.bf16.mxu0 %v10056_v4  ;;  %v12318_v4 = vld [vmem:[#allocation39_spill] sm:$0xff] }
 0x479   :  { %7897 = vmatpush1.bf16.msra.mxu0 %v7864_v31 }
 0x47c   :  { %6735 = vmatmul.mubr.msk.f32.vlgmr.msra.gmra.mrb[44].mxu0 %vm2204_vm6, %v2849_v22 }
 0x47d   :  { %3504 = vmatprep.mubr.f32.mxu0 %v12310_v62 }
 0x52f   :  { %v2951_v37 = vpop.f32.mrb[40].mxu0 }
 0x530   :  { %v2953_v44 = vpop.f32.mrb[41].mxu0  ;;  %v3175_v63 = vrot.slane %v2951_v37, %v12315_v16 }
 0x531   :  { %v3179_v25 = vrot.slane %v2953_v44, %v12315_v16 }
 0x532   :  { %v10109_v35 = vmul.f32 %v3175_v63, %v12316_v8  ;;  %v10112_v15 = vmul.f32 %v3175_v63, %v12317_v20  ;;  %v10115_v31 = vmul.f32 %v3175_v63, %v12318_v4  ;;  %v10118_v2 = vmul.f32 %v3175_v63, %v9494_v24  ;;  %v12321_v24 = vld [vmem:[#allocation50_spill] sm:$0xff] }
 0x533   :  { %v3167_v57 = vpop.f32.mrb[52].mxu1  ;;  %v10121_v18 = vmul.f32 %v3179_v25, %v12319_v0  ;;  %v10124_v11 = vmul.f32 %v3179_v25, %v12320_v59  ;;  %v10127_v36 = vmul.f32 %v3179_v25, %v9472_v30  ;;  %v10130_v58 = vmul.f32 %v3179_v25, %v9497_v56  ;;  %v12322_v30 = vld [vmem:[#allocation46_spill] sm:$0xff]  ;;  %v12323_v56 = vld [vmem:[#allocation57_spill] sm:$0xff] }
 0x534   :  { %v3169_v42 = vpop.f32.mrb[53].mxu1  ;;  %v10133_v39 = vrot.slane %v3167_v57, %v12315_v16  ;;  %v10136_v6 = vmul.f32 %v3179_v25, %v9541_v21  ;;  %v10139_v19 = vmul.f32 %v3179_v25, %v12321_v24  ;;  %v10142_v17 = vmul.f32 %v3175_v63, %v9531_v3  ;;  %v12331_v24 = vld [vmem:[#allocation40_spill] sm:$0xff] }
 0x535   :  { %v10145_v38 = vrot.slane %v3169_v42, %v12315_v16  ;;  %v10148_v9 = vmul.f32 %v3175_v63, %v12322_v30  ;;  %v10151_v40 = vmul.f32 %v3179_v25, %v12323_v56  ;;  %v10154_v49 = vmul.f32 %v3179_v25, %v12324_v55 }
 0x536   :  { %v10157_v1 = vmul.f32 %v3175_v63, %v12325_v28  ;;  %v10160_v29 = vmul.f32 %v3175_v63, %v12326_v47  ;;  %v10163_v3 = vmul.f32 %v3179_v25, %v9729_v12  ;;  %v10166_v22 = vmul.f32 %v3179_v25, %v9758_v51 }
 0x537   :  { %v10172_v57 = vmul.f32 %v3175_v63, %v9712_v7  ;;  %v10175_v42 = vmul.f32 %v3175_v63, %v9754_v32  ;;  %v10178_v8 = vmul.f32 %v3179_v25, %v9803_v45  ;;  %v10184_v12 = vmul.f32 %v3179_v25, %v9840_v43  ;;  %v12328_v43 = vld [vmem:[#allocation31_spill] sm:$0xff] }
 0x538   :  { %v10187_v51 = vmul.f32 %v3175_v63, %v9786_v41  ;;  %v10190_v4 = vmul.f32 %v3175_v63, %v9832_v34  ;;  %v12329_v41 = vld [vmem:[#allocation33_spill] sm:$0xff]  ;;  %v12330_v34 = vld [vmem:[#allocation36_spill] sm:$0xff] }
 0x53a   :  { %12327 = vst [vmem:[#allocation55_spill] sm:$0xff] %v10190_v4 }
 0x53f   :  { %v3022_v21 = vpop.f32.mrb[42].mxu0 }
 0x540   :  { %v10169_v37 = vrot.slane %v3022_v21, %v12315_v16  ;;  %v3024_v44 = vpop.f32.mrb[43].mxu0 }
 0x541   :  { %v10181_v20 = vrot.slane %v3024_v44, %v12315_v16 }
 0x542   :  { %v3190_v7 = vmul.f32 %v10169_v37, %v12285_v52  ;;  %v3194_v32 = vmul.f32 %v10169_v37, %v12282_v53  ;;  %v3198_v45 = vmul.f32 %v10169_v37, %v9518_v23  ;;  %v3202_v0 = vmul.f32 %v10169_v37, %v9538_v27 }
 0x543   :  { %v3191_v25 = vmul.f32 %v10181_v20, %v12328_v43  ;;  %v3195_v59 = vmul.f32 %v10181_v20, %v12329_v41  ;;  %v3199_v63 = vmul.f32 %v10181_v20, %v12330_v34  ;;  %v3203_v52 = vmul.f32 %v10181_v20, %v12331_v24 }
 0x544   :  { %v3254_v53 = vadd.f32 %v10133_v39, %v3190_v7  ;;  %v3258_v30 = vadd.f32 %v10133_v39, %v3194_v32  ;;  %v3262_v23 = vadd.f32 %v10133_v39, %v3198_v45  ;;  %v3266_v27 = vadd.f32 %v10133_v39, %v3202_v0  ;;  %v12334_v0 = vld [vmem:[#allocation42_spill] sm:$0xff] }
 0x545   :  { %v3255_v56 = vadd.f32 %v10145_v38, %v3191_v25  ;;  %v3259_v55 = vadd.f32 %v10145_v38, %v3195_v59  ;;  %v3263_v21 = vadd.f32 %v10145_v38, %v3199_v63  ;;  %v3267_v28 = vadd.f32 %v10145_v38, %v3203_v52  ;;  %v12335_v59 = vld [vmem:[#allocation51_spill] sm:$0xff] }
 0x546   :  { %v3302_v47 = vmax.f32 %v3254_v53, 0.0  ;;  %v3306_v44 = vmax.f32 %v3258_v30, 0.0  ;;  %v3310_v43 = vmax.f32 %v3262_v23, 0.0  ;;  %v3314_v41 = vmax.f32 %v3266_v27, 0.0 }
 0x547   :  { %v3303_v34 = vmax.f32 %v3255_v56, 0.0  ;;  %v3307_v7 = vmax.f32 %v3259_v55, 0.0  ;;  %v3311_v24 = vmax.f32 %v3263_v21, 0.0  ;;  %v3315_v32 = vmax.f32 %v3267_v28, 0.0  ;;  %v12338_v56 = vld [vmem:[#allocation44_spill] sm:$0xff]  ;;  %v12339_v21 = vld [vmem:[#allocation58_spill] sm:$0xff] }
 0x548   :  { %v10216_v54 = vpack.c.bf16 %v3306_v44, %v3302_v47  ;;  %v10218_v45 = vpack.c.bf16 %v3314_v41, %v3310_v43  ;;  %v3207_v25 = vmul.f32 %v10181_v20, %v12334_v0  ;;  %v3211_v63 = vmul.f32 %v10181_v20, %v12335_v59 }
 0x549   :  { %v10224_v4 = vpack.c.bf16 %v3307_v7, %v3303_v34  ;;  %v10226_v52 = vpack.c.bf16 %v3315_v32, %v3311_v24  ;;  %v3206_v53 = vmul.f32 %v10169_v37, %v9569_v14  ;;  %v3210_v30 = vmul.f32 %v10169_v37, %v12288_v10 }
 0x54a   :  { %12332 = vst [vmem:[#allocation48_spill] sm:$0xff] %v10216_v54  ;;  %12333 = vst [vmem:[#allocation59_spill] sm:$0xff] %v10218_v45  ;;  %v3271_v23 = vadd.f32 %v10145_v38, %v3207_v25  ;;  %v3275_v27 = vadd.f32 %v10145_v38, %v3211_v63  ;;  %v3215_v55 = vmul.f32 %v10181_v20, %v12338_v56  ;;  %v12341_v63 = vld [vmem:[#allocation67_spill] sm:$0xff] }
 0x54b   :  { %12336 = vst [vmem:[#allocation60_spill] sm:$0xff] %v10224_v4  ;;  %12337 = vst [vmem:[#allocation52_spill] sm:$0xff] %v10226_v52  ;;  %v3219_v28 = vmul.f32 %v10181_v20, %v12339_v21  ;;  %7929 = vmatprep.subr.bf16.mxu1 %v10224_v4  ;;  %v3270_v47 = vadd.f32 %v10133_v39, %v3206_v53  ;;  %v3274_v44 = vadd.f32 %v10133_v39, %v3210_v30 }
 0x54c   :  { %v3214_v14 = vmul.f32 %v10169_v37, %v12283_v50  ;;  %v3218_v10 = vmul.f32 %v10169_v37, %v9679_v5  ;;  %7931 = vmatpush1.bf16.msra.mxu1 %v10216_v54  ;;  %v3319_v43 = vmax.f32 %v3271_v23, 0.0  ;;  %v3323_v41 = vmax.f32 %v3275_v27, 0.0 }
 0x54d   :  { %v3279_v34 = vadd.f32 %v10145_v38, %v3215_v55  ;;  %v3283_v7 = vadd.f32 %v10145_v38, %v3219_v28  ;;  %7933 = vmatprep.subr.bf16.mxu1 %v10226_v52  ;;  %v3318_v24 = vmax.f32 %v3270_v47, 0.0  ;;  %v3322_v32 = vmax.f32 %v3274_v44, 0.0 }
 0x54e   :  { %v3278_v0 = vadd.f32 %v10133_v39, %v3214_v14  ;;  %v3282_v25 = vadd.f32 %v10133_v39, %v3218_v10  ;;  %v10251_v50 = vpack.c.bf16 %v3323_v41, %v3319_v43  ;;  %v3223_v53 = vmul.f32 %v10181_v20, %v12341_v63 }
 0x54f   :  { %v3327_v59 = vmax.f32 %v3279_v34, 0.0  ;;  %v3331_v5 = vmax.f32 %v3283_v7, 0.0  ;;  %v3096_v30 = vpop.f32.mrb[44].mxu0  ;;  %v10255_v23 = vpack.c.bf16 %v3322_v32, %v3318_v24  ;;  %v3227_v55 = vmul.f32 %v10181_v20, %v9776_v60 }
 0x550   :  { %12340 = vst [vmem:[#allocation56_spill] sm:$0xff] %v10251_v50  ;;  %v3326_v27 = vmax.f32 %v3278_v0, 0.0  ;;  %v3330_v56 = vmax.f32 %v3282_v25, 0.0  ;;  %v10260_v21 = vrot.slane %v3096_v30, %v12315_v16  ;;  %v3098_v28 = vpop.f32.mrb[45].mxu0  ;;  %7935 = vmatpush1.bf16.msra.mxu1 %v10218_v45  ;;  %v3287_v44 = vadd.f32 %v10145_v38, %v3223_v53 }
 0x551   :  { %12342 = vst [vmem:[#allocation61_spill] sm:$0xff] %v10255_v23  ;;  %v10263_v47 = vpack.c.bf16 %v3331_v5, %v3327_v59  ;;  %v3222_v14 = vmul.f32 %v10169_v37, %v9725_v48  ;;  %v10269_v10 = vrot.slane %v3098_v28, %v12315_v16  ;;  %7938 = vmatprep.subr.msk.bf16.mxu1 %vm8730_vm3, %v10251_v50 }
 0x552   :  { %v10274_v60 = vpack.c.bf16 %v3330_v56, %v3326_v27  ;;  %v3291_v41 = vadd.f32 %v10145_v38, %v3227_v55  ;;  %v3226_v34 = vmul.f32 %v10169_v37, %v9766_v13  ;;  %v3335_v7 = vmax.f32 %v3287_v44, 0.0  ;;  %v10296_v13 = vld [vmem:[%s12099_s1] sm:$0xff] }
 0x553   :  { %12343 = vst [vmem:[#allocation63_spill] sm:$0xff] %v10263_v47  ;;  %v3252_v24 = vadd.f32 %v10260_v21, %v10109_v35  ;;  %v3256_v48 = vadd.f32 %v10260_v21, %v10112_v15  ;;  %v3286_v32 = vadd.f32 %v10133_v39, %v3222_v14  ;;  %v3253_v0 = vadd.f32 %v10269_v10, %v10121_v18 }
 0x554   :  { %12345 = vst [vmem:[#allocation66_spill] sm:$0xff] %v10274_v60  ;;  %v3257_v25 = vadd.f32 %v10269_v10, %v10124_v11  ;;  %v3339_v59 = vmax.f32 %v3291_v41, 0.0  ;;  %v3261_v5 = vadd.f32 %v10269_v10, %v10127_v36  ;;  %7941 = vmatpush1.bf16.msk.msra.mxu1 %vm8730_vm3, %v10255_v23  ;;  %v3265_v18 = vadd.f32 %v10269_v10, %v10130_v58 }
 0x555   :  { %v3300_v35 = vmax.f32 %v3252_v24, 0.0  ;;  %v3304_v15 = vmax.f32 %v3256_v48, 0.0  ;;  %v3290_v11 = vadd.f32 %v10133_v39, %v3226_v34  ;;  %7957 = vmatprep.subr.bf16.mxu1 %v10263_v47  ;;  %v3301_v63 = vmax.f32 %v3253_v0, 0.0 }
 0x556   :  { %v3305_v36 = vmax.f32 %v3257_v25, 0.0  ;;  %v10302_v53 = vpack.c.bf16 %v3339_v59, %v3335_v7  ;;  %v3309_v30 = vmax.f32 %v3261_v5, 0.0  ;;  %v3313_v56 = vmax.f32 %v3265_v18, 0.0  ;;  %v10323_v7 = vld [vmem:[%s12099_s1 + $0x8] sm:$0xff] }
 0x557   :  { %v10304_v27 = vpack.c.bf16 %v3304_v15, %v3300_v35  ;;  %v3334_v55 = vmax.f32 %v3286_v32, 0.0  ;;  %v3338_v28 = vmax.f32 %v3290_v11, 0.0  ;;  %6747 = vmatmul.mubr.msk.f32.vlgmr.msra.gmra.mrb[54].mxu1 %vm69_vm1, %v10296_v13  ;;  %v3231_v58 = vmul.f32 %v10181_v20, %v9807_v26 }
 0x558   :  { %12346 = vst [vmem:[#allocation43_spill] sm:$0xff] %v10302_v53  ;;  %v10308_v44 = vpack.c.bf16 %v3305_v36, %v3301_v63  ;;  %v3235_v14 = vmul.f32 %v10181_v20, %v9853_v46  ;;  %v3260_v41 = vadd.f32 %v10260_v21, %v10115_v31  ;;  %7959 = vmatpush1.bf16.msra.mxu1 %v10274_v60 }
 0x559   :  { %3611 = vmatprep.mubr.f32.mxu1 %v12310_v62  ;;  %v10318_v34 = vpack.c.bf16 %v3313_v56, %v3309_v30  ;;  %v10325_v24 = vpack.c.bf16 %v3338_v28, %v3334_v55  ;;  %v3264_v26 = vadd.f32 %v10260_v21, %v10118_v2  ;;  %7961 = vmatprep.subr.bf16.mxu1 %v10302_v53 }
 0x55a   :  { %7915 = vmatprep.subr.bf16.mxu0 %v10308_v44  ;;  %v3295_v46 = vadd.f32 %v10145_v38, %v3231_v58  ;;  %v3299_v31 = vadd.f32 %v10145_v38, %v3235_v14  ;;  %v3308_v20 = vmax.f32 %v3260_v41, 0.0  ;;  %v3269_v48 = vadd.f32 %v10269_v10, %v10136_v6 }
 0x55b   :  { %12347 = vst [vmem:[#allocation45_spill] sm:$0xff] %v10318_v34  ;;  %12348 = vst [vmem:[#allocation64_spill] sm:$0xff] %v10325_v24  ;;  %7917 = vmatpush1.bf16.msra.mxu0 %v10304_v27  ;;  %v3312_v32 = vmax.f32 %v3264_v26, 0.0  ;;  %v3273_v0 = vadd.f32 %v10269_v10, %v10139_v19  ;;  %v3230_v2 = vmul.f32 %v10169_v37, %v9796_v61  ;;  %6748 = vmatmul.mubr.msk.f32.gmra.mrb[56].mxu1 %vm69_vm1, %v10323_v7 }
 0x55c   :  { %v3234_v25 = vmul.f32 %v10169_v37, %v9836_v33  ;;  %7919 = vmatprep.subr.bf16.mxu0 %v10318_v34  ;;  %v3343_v38 = vmax.f32 %v3295_v46, 0.0  ;;  %v3347_v59 = vmax.f32 %v3299_v31, 0.0  ;;  %v3317_v6 = vmax.f32 %v3269_v48, 0.0  ;;  %7963 = vmatpush1.bf16.msra.mxu1 %v10325_v24  ;;  %v10354_v33 = vld [vmem:[%s12099_s1 + $0x10] sm:$0xff] }
 0x55d   :  { %v3268_v5 = vadd.f32 %v10260_v21, %v10142_v17  ;;  %v10348_v19 = vpack.c.bf16 %v3312_v32, %v3308_v20  ;;  %3617 = vmatprep.mubr.f32.mxu1 %v12310_v62  ;;  %v3321_v61 = vmax.f32 %v3273_v0, 0.0  ;;  %v3294_v37 = vadd.f32 %v10133_v39, %v3230_v2 }
 0x55e   :  { %v3298_v35 = vadd.f32 %v10133_v39, %v3234_v25  ;;  %v10358_v15 = vpack.c.bf16 %v3347_v59, %v3343_v38  ;;  %v3272_v17 = vadd.f32 %v10260_v21, %v10148_v9  ;;  %v3277_v11 = vadd.f32 %v10269_v10, %v10151_v40  ;;  %v12356_v38 = vld [vmem:[#allocation55_spill] sm:$0xff] }
 0x55f   :  { %12349 = vst [vmem:[#allocation49_spill] sm:$0xff] %v10348_v19  ;;  %v3316_v18 = vmax.f32 %v3268_v5, 0.0  ;;  %7921 = vmatpush1.bf16.msra.mxu0 %v10348_v19  ;;  %v10365_v63 = vpack.c.bf16 %v3321_v61, %v3317_v6  ;;  %v3342_v36 = vmax.f32 %v3294_v37, 0.0  ;;  %v3281_v56 = vadd.f32 %v10269_v10, %v10154_v49  ;;  %6749 = vmatmul.mubr.msk.f32.gmra.mrb[58].mxu1 %vm69_vm1, %v10354_v33  ;;  %v10446_v37 = vld [vmem:[%s12099_s1 + $0x28] sm:$0x1f] }
 0x560   :  { %12350 = vst [vmem:[#allocation41_spill] sm:$0xff] %v10358_v15  ;;  %v3346_v30 = vmax.f32 %v3298_v35, 0.0  ;;  %7966 = vmatprep.subr.msk.bf16.mxu1 %vm8730_vm3, %v10358_v15  ;;  %v3320_v39 = vmax.f32 %v3272_v17, 0.0  ;;  %v3325_v9 = vmax.f32 %v3277_v11, 0.0  ;;  %v3276_v40 = vadd.f32 %v10260_v21, %v10157_v1  ;;  %3623 = vmatprep.mubr.f32.mxu1 %v12310_v62  ;;  %v10393_v1 = vld [vmem:[%s12099_s1 + $0x18] sm:$0xff]  ;;  %v6828_v17 = vld [vmem:[%s12099_s1 + $0x48] sm:$0xff] }
 0x561   :  { %12351 = vst [vmem:[#allocation54_spill] sm:$0xff] %v10365_v63  ;;  %v3280_v55 = vadd.f32 %v10260_v21, %v10160_v29  ;;  %7924 = vmatprep.subr.msk.bf16.mxu0 %vm8730_vm3, %v10365_v63  ;;  %v3329_v28 = vmax.f32 %v3281_v56, 0.0  ;;  %v3285_v58 = vadd.f32 %v10269_v10, %v10163_v3  ;;  %v3289_v14 = vadd.f32 %v10269_v10, %v10166_v22  ;;  %v6801_v11 = vld [vmem:[%s12106_s8 + $0x2c0] sm:$0xff] }
 0x562   :  { %v10381_v49 = vpack.c.bf16 %v3346_v30, %v3342_v36  ;;  %v10388_v41 = vpack.c.bf16 %v3320_v39, %v3316_v18  ;;  %v3324_v29 = vmax.f32 %v3276_v40, 0.0  ;;  %v3284_v46 = vadd.f32 %v10260_v21, %v10172_v57  ;;  %v6829_v18 = vld [vmem:[%s12099_s1 + $0x50] sm:$0xff]  ;;  %v6802_v36 = vld [vmem:[%s12106_s8 + $0x2c8] sm:$0xff]  ;;  %v6830_v30 = vld [vmem:[%s12099_s1 + $0x58] sm:$0x1f] }
 0x563   :  { %v3328_v26 = vmax.f32 %v3280_v55, 0.0  ;;  %v10400_v3 = vpack.c.bf16 %v3329_v28, %v3325_v9  ;;  %v3333_v31 = vmax.f32 %v3285_v58, 0.0  ;;  %v3337_v22 = vmax.f32 %v3289_v14, 0.0  ;;  %6750 = vmatmul.mubr.msk.f32.gmra.mrb[60].mxu1 %vm69_vm1, %v10393_v1  ;;  %v6803_v39 = vld [vmem:[%s12106_s8 + $0x2d0] sm:$0xff]  ;;  %v6804_v9 = vld [vmem:[%s12106_s8 + $0x2d8] sm:$0xff]  ;;  %v6805_v55 = vld [vmem:[%s12106_s8 + $0x2e0] sm:$0xff] }
 0x564   :  { %12352 = vst [vmem:[#allocation7_spill] sm:$0xff] %v10381_v49  ;;  %12353 = vst [vmem:[#allocation37_spill] sm:$0xff] %v10388_v41  ;;  %7969 = vmatpush1.bf16.msk.msra.mxu1 %vm8730_vm3, %v10381_v49  ;;  %v3288_v20 = vadd.f32 %v10260_v21, %v10175_v42  ;;  %7927 = vmatpush1.bf16.msk.msra.mxu0 %vm8730_vm3, %v10388_v41  ;;  %v3332_v57 = vmax.f32 %v3284_v46, 0.0  ;;  %v3293_v32 = vadd.f32 %v10269_v10, %v10178_v8  ;;  %v10427_v8 = vld [vmem:[%s12099_s1 + $0x20] sm:$0xff]  ;;  %v12360_v35 = vmov 0.0|0.0   ;;  %v6806_v28 = vld [vmem:[%s12106_s8 + $0x2e8] sm:$0xff] }
 0x565   :  { %7985 = vmatprep.subr.bf16.mxu1 %v10224_v4  ;;  %v10408_v48 = vpack.c.bf16 %v3328_v26, %v3324_v29  ;;  %v3297_v0 = vadd.f32 %v10269_v10, %v10184_v12  ;;  %7943 = vmatprep.subr.bf16.mxu0 %v10400_v3  ;;  %v10417_v42 = vpack.c.bf16 %v3337_v22, %v3333_v31  ;;  %v6807_v14 = vld [vmem:[%s12106_s8 + $0x2f0] sm:$0xff]  ;;  %v6809_v26 = vld [vmem:[%s12106_s8 + $0x300] sm:$0xff]  ;;  %v6810_v46 = vld [vmem:[%s12106_s8 + $0x308] sm:$0xff] }
 0x566   :  { %v3336_v2 = vmax.f32 %v3288_v20, 0.0  ;;  %v3292_v25 = vadd.f32 %v10260_v21, %v10187_v51  ;;  %v3296_v59 = vadd.f32 %v10260_v21, %v12356_v38  ;;  %3629 = vmatprep.mubr.f32.mxu1 %v12310_v62  ;;  %v3341_v12 = vmax.f32 %v3293_v32, 0.0  ;;  %v6811_v22 = vld [vmem:[%s12106_s8 + $0x310] sm:$0xff]  ;;  %v6812_v20 = vld [vmem:[%s12106_s8 + $0x318] sm:$0xff]  ;;  %v6813_v32 = vld [vmem:[%s12106_s8 + $0x320] sm:$0xff] }
 0x567   :  { %12354 = vst [vmem:[#allocation3_spill] sm:$0xff] %v10408_v48  ;;  %12355 = vst [vmem:[#allocation9_spill] sm:$0xff] %v10417_v42  ;;  %v3345_v10 = vmax.f32 %v3297_v0, 0.0  ;;  %6739 = vmatmul.mubr.msk.f32.vlgmr.msra.gmra.mrb[46].mxu0 %vm69_vm1, %v10296_v13  ;;  %6751 = vmatmul.mubr.msk.f32.gmra.mrb[62].mxu1 %vm69_vm1, %v10427_v8  ;;  %v10597_v56 = vpack.c.bf16 %v6802_v36, %v6801_v11  ;;  %v10615_v40 = vpack.c.bf16 %v6804_v9, %v6803_v39  ;;  %v6814_v0 = vld [vmem:[%s12106_s8 + $0x328] sm:$0xff]  ;;  %v6816_v38 = vld [vmem:[%s12106_s8 + $0x338] sm:$0xff] }
 0x568   :  { %v10431_v6 = vpack.c.bf16 %v3336_v2, %v3332_v57  ;;  %v3340_v5 = vmax.f32 %v3292_v25, 0.0  ;;  %v3344_v61 = vmax.f32 %v3296_v59, 0.0  ;;  %7945 = vmatpush1.bf16.msra.mxu0 %v10408_v48  ;;  %3510 = vmatprep.mubr.f32.mxu0 %v12310_v62  ;;  %v10630_v58 = vpack.c.bf16 %v6806_v28, %v6805_v55  ;;  %v6815_v25 = vld [vmem:[%s12106_s8 + $0x330] sm:$0xff]  ;;  %v6785_v59 = vld [vmem:[%s12106_s8 + $0x240] sm:$0xff]  ;;  %v6772_v36 = vld [vmem:[%s12106_s8 + $0x1d8] sm:$0xff] }
 0x569   :  { %v10435_v51 = vpack.c.bf16 %v3345_v10, %v3341_v12  ;;  %7947 = vmatprep.subr.bf16.mxu0 %v10417_v42  ;;  %3635 = vmatprep.mubr.f32.mxu1 %v12310_v62  ;;  %v10676_v31 = vpack.c.bf16 %v6810_v46, %v6809_v26  ;;  %v10687_v57 = vpack.c.bf16 %v6812_v20, %v6811_v22  ;;  %v6786_v12 = vld [vmem:[%s12106_s8 + $0x248] sm:$0xff]  ;;  %v6769_v10 = vld [vmem:[%s12106_s8 + $0x1c0] sm:$0xff]  ;;  %v6771_v11 = vld [vmem:[%s12106_s8 + $0x1d0] sm:$0xff] }
 0x56a   :  { %12357 = vst [vmem:[#allocation47_spill] sm:$0xff] %v10431_v6  ;;  %v10440_v21 = vpack.c.bf16 %v3344_v61, %v3340_v5  ;;  %v10697_v2 = vpack.c.bf16 %v6814_v0, %v6813_v32  ;;  %v6770_v5 = vld [vmem:[%s12106_s8 + $0x1c8] sm:$0xff]  ;;  %v10721_v61 = vpack.c.bf16 %v6786_v12, %v6785_v59  ;;  %v10751_v39 = vpack.c.bf16 %v6772_v36, %v6771_v11  ;;  %v6819_v9 = vld [vmem:[%s12106_s8 + $0x350] sm:$0xff]  ;;  %v6820_v55 = vld [vmem:[%s12106_s8 + $0x358] sm:$0xff] }
 0x56b   :  { %12358 = vst [vmem:[#allocation10_spill] sm:$0xff] %v10435_v51  ;;  %6740 = vmatmul.mubr.msk.f32.gmra.mrb[48].mxu0 %vm69_vm1, %v10323_v7  ;;  %6752 = vmatmul.mubr.msk.f32.gmra.mrb[64].mxu1 %vm69_vm1, %v10446_v37  ;;  %v6789_v28 = vld [vmem:[%s12106_s8 + $0x260] sm:$0xff]  ;;  %v6774_v46 = vld [vmem:[%s12106_s8 + $0x1e8] sm:$0xff]  ;;  %v6792_v59 = vld [vmem:[%s12106_s8 + $0x278] sm:$0xff] }
 0x56c   :  { %12359 = vst [vmem:[#allocation4_spill] sm:$0xff] %v10440_v21  ;;  %7949 = vmatpush1.bf16.msra.mxu0 %v10431_v6  ;;  %3516 = vmatprep.mubr.f32.mxu0 %v12310_v62  ;;  %v6773_v26 = vld [vmem:[%s12106_s8 + $0x1e0] sm:$0xff]  ;;  %v6822_v0 = vld [vmem:[%s12106_s8 + $0x368] sm:$0xff]  ;;  %v6775_v12 = vld [vmem:[%s12106_s8 + $0x1f0] sm:$0xff] }
 0x56d   :  { %7952 = vmatprep.subr.msk.bf16.mxu0 %vm8730_vm3, %v10435_v51  ;;  %3819 = vmatprep.mubr.f32.mxu1 %v12310_v62  ;;  %v10779_v20 = vpack.c.bf16 %v6774_v46, %v6773_v26  ;;  %v6821_v32 = vld [vmem:[%s12106_s8 + $0x360] sm:$0xff]  ;;  %v6794_v36 = vld [vmem:[%s12106_s8 + $0x288] sm:$0xff]  ;;  %v6795_v26 = vld [vmem:[%s12106_s8 + $0x290] sm:$0xff] }
 0x56e   :  { %v6793_v11 = vld [vmem:[%s12106_s8 + $0x280] sm:$0xff]  ;;  %v6796_v46 = vld [vmem:[%s12106_s8 + $0x298] sm:$0xff] }
 0x56f   :  { %6741 = vmatmul.mubr.msk.f32.gmra.mrb[50].mxu0 %vm69_vm1, %v10354_v33  ;;  %6763 = vmatmul.mubr.msk.f32.vlgmr.msra.gmra.mrb[66].mxu1 %vm69_vm1, %v10296_v13 }
 0x570   :  { %7955 = vmatpush1.bf16.msk.msra.mxu0 %vm8730_vm3, %v10440_v21  ;;  %3522 = vmatprep.mubr.f32.mxu0 %v12310_v62 }
 0x571   :  { %7971 = vmatprep.subr.bf16.mxu0 %v10308_v44  ;;  %7987 = vmatpush1.bf16.msra.mxu1 %v10216_v54 }
 0x572   :  { %3825 = vmatprep.mubr.f32.mxu1 %v12310_v62  ;;  %7989 = vmatprep.subr.bf16.mxu1 %v10226_v52 }
 0x573   :  { %6742 = vmatmul.mubr.msk.f32.gmra.mrb[52].mxu0 %vm69_vm1, %v10393_v1  ;;  %6764 = vmatmul.mubr.msk.f32.gmra.mrb[68].mxu1 %vm69_vm1, %v10323_v7 }
 0x574   :  { %3528 = vmatprep.mubr.f32.mxu0 %v12310_v62  ;;  %3831 = vmatprep.mubr.f32.mxu1 %v12310_v62 }
 0x575   :  { %7991 = vmatpush1.bf16.msra.mxu1 %v10218_v45 }
 0x576   :  { %7994 = vmatprep.subr.msk.bf16.mxu1 %vm8730_vm3, %v10251_v50 }
 0x577   :  { %6743 = vmatmul.mubr.msk.f32.gmra.mrb[54].mxu0 %vm69_vm1, %v10427_v8  ;;  %6765 = vmatmul.mubr.msk.f32.gmra.mrb[70].mxu1 %vm69_vm1, %v10354_v33 }
 0x578   :  { %3534 = vmatprep.mubr.f32.mxu0 %v12310_v62  ;;  %3837 = vmatprep.mubr.f32.mxu1 %v12310_v62 }
 0x579   :  { %7997 = vmatpush1.bf16.msk.msra.mxu1 %vm8730_vm3, %v10255_v23 }
 0x57a   :  { %8013 = vmatprep.subr.bf16.mxu1 %v10263_v47 }
 0x57b   :  { %6744 = vmatmul.mubr.msk.f32.gmra.mrb[56].mxu0 %vm69_vm1, %v10446_v37  ;;  %6766 = vmatmul.mubr.msk.f32.gmra.mrb[72].mxu1 %vm69_vm1, %v10393_v1 }
 0x57c   :  { %3718 = vmatprep.mubr.f32.mxu0 %v12310_v62  ;;  %3843 = vmatprep.mubr.f32.mxu1 %v12310_v62 }
 0x57f   :  { %6755 = vmatmul.mubr.msk.f32.vlgmr.msra.gmra.mrb[58].mxu0 %vm69_vm1, %v10296_v13  ;;  %6767 = vmatmul.mubr.msk.f32.gmra.mrb[74].mxu1 %vm69_vm1, %v10427_v8  ;;  %v10517_v13 = vld [vmem:[%s12099_s1 + $0x30] sm:$0xff] }
 0x580   :  { %7973 = vmatpush1.bf16.msra.mxu0 %v10304_v27  ;;  %3724 = vmatprep.mubr.f32.mxu0 %v12310_v62 }
 0x581   :  { %7975 = vmatprep.subr.bf16.mxu0 %v10318_v34  ;;  %3849 = vmatprep.mubr.f32.mxu1 %v12310_v62 }
 0x583   :  { %6756 = vmatmul.mubr.msk.f32.gmra.mrb[60].mxu0 %vm69_vm1, %v10323_v7  ;;  %6768 = vmatmul.mubr.msk.f32.gmra.mrb[76].mxu1 %vm69_vm1, %v10446_v37  ;;  %v10537_v7 = vld [vmem:[%s12099_s1 + $0x38] sm:$0xff] }
 0x584   :  { %7977 = vmatpush1.bf16.msra.mxu0 %v10348_v19  ;;  %3730 = vmatprep.mubr.f32.mxu0 %v12310_v62 }
 0x585   :  { %7980 = vmatprep.subr.msk.bf16.mxu0 %vm8730_vm3, %v10365_v63  ;;  %4102 = vmatprep.mubr.f32.mxu1 %v12310_v62 }
 0x587   :  { %6757 = vmatmul.mubr.msk.f32.gmra.mrb[62].mxu0 %vm69_vm1, %v10354_v33  ;;  %6841 = vmatmul.mubr.msk.f32.vlgmr.msra.gmra.mrb[78].mxu1 %vm69_vm1, %v10517_v13  ;;  %v10552_v33 = vld [vmem:[%s12099_s1 + $0x40] sm:$0xff] }
 0x588   :  { %7983 = vmatpush1.bf16.msk.msra.mxu0 %vm8730_vm3, %v10388_v41  ;;  %3736 = vmatprep.mubr.f32.mxu0 %v12310_v62 }
 0x589   :  { %7999 = vmatprep.subr.bf16.mxu0 %v10400_v3  ;;  %8015 = vmatpush1.bf16.msra.mxu1 %v10274_v60 }
 0x58a   :  { %4108 = vmatprep.mubr.f32.mxu1 %v12310_v62  ;;  %8017 = vmatprep.subr.bf16.mxu1 %v10302_v53 }
 0x58b   :  { %6758 = vmatmul.mubr.msk.f32.gmra.mrb[64].mxu0 %vm69_vm1, %v10393_v1  ;;  %6842 = vmatmul.mubr.msk.f32.gmra.mrb[80].mxu1 %vm69_vm1, %v10537_v7  ;;  %v6808_v1 = vld [vmem:[%s12106_s8 + $0x2f8] sm:$0xff] }
 0x58c   :  { %3742 = vmatprep.mubr.f32.mxu0 %v12310_v62  ;;  %4114 = vmatprep.mubr.f32.mxu1 %v12310_v62  ;;  %v10664_v29 = vpack.c.bf16 %v6808_v1, %v6807_v14  ;;  %v10766_v14 = vpack.c.bf16 %v6820_v55, %v6819_v9  ;;  %v6790_v1 = vld [vmem:[%s12106_s8 + $0x268] sm:$0xff]  ;;  %v10827_v9 = vpack.c.bf16 %v6794_v36, %v6793_v11  ;;  %v6777_v55 = vld [vmem:[%s12106_s8 + $0x200] sm:$0xff] }
 0x58d   :  { %8019 = vmatpush1.bf16.msra.mxu1 %v10325_v24  ;;  %v10777_v22 = vpack.c.bf16 %v6790_v1, %v6789_v28  ;;  %v6778_v28 = vld [vmem:[%s12106_s8 + $0x208] sm:$0xff] }
 0x58e   :  { %8022 = vmatprep.subr.msk.bf16.mxu1 %vm8730_vm3, %v10358_v15  ;;  %v10836_v1 = vpack.c.bf16 %v6778_v28, %v6777_v55  ;;  %v6782_v11 = vld [vmem:[%s12106_s8 + $0x228] sm:$0xff]  ;;  %v6799_v55 = vld [vmem:[%s12106_s8 + $0x2b0] sm:$0xff]  ;;  %v6800_v28 = vld [vmem:[%s12106_s8 + $0x2b8] sm:$0xff] }
 0x58f   :  { %6759 = vmatmul.mubr.msk.f32.gmra.mrb[66].mxu0 %vm69_vm1, %v10427_v8  ;;  %6843 = vmatmul.mubr.msk.f32.gmra.mrb[82].mxu1 %vm69_vm1, %v10552_v33  ;;  %v10710_v8 = vpack.c.bf16 %v6816_v38, %v6815_v25  ;;  %v6791_v25 = vld [vmem:[%s12106_s8 + $0x270] sm:$0xff]  ;;  %v10794_v38 = vpack.c.bf16 %v6822_v0, %v6821_v32  ;;  %v10850_v0 = vpack.c.bf16 %v6796_v46, %v6795_v26 }
 0x590   :  { %3748 = vmatprep.mubr.f32.mxu0 %v12310_v62  ;;  %4120 = vmatprep.mubr.f32.mxu1 %v12310_v62  ;;  %v6779_v32 = vld [vmem:[%s12106_s8 + $0x210] sm:$0xff]  ;;  %v10886_v46 = vpack.c.bf16 %v6800_v28, %v6799_v55 }
 0x591   :  { %8025 = vmatpush1.bf16.msk.msra.mxu1 %vm8730_vm3, %v10381_v49  ;;  %v6783_v26 = vld [vmem:[%s12106_s8 + $0x230] sm:$0xff] }
 0x592   :  { %8058 = vmatprep.subr.bf16.mxu1 %v12360_v35 }
 0x593   :  { %6760 = vmatmul.mubr.msk.f32.gmra.mrb[68].mxu0 %vm69_vm1, %v10446_v37  ;;  %6844 = vmatmul.mubr.msk.f32.gmra.mrb[84].mxu1 %vm69_vm1, %v6828_v17  ;;  %v10723_v37 = vpack.c.bf16 %v6770_v5, %v6769_v10  ;;  %v6776_v10 = vld [vmem:[%s12106_s8 + $0x1f8] sm:$0xff]  ;;  %v10805_v5 = vpack.c.bf16 %v6792_v59, %v6791_v25 }
 0x594   :  { %4001 = vmatprep.mubr.f32.mxu0 %v12310_v62  ;;  %4126 = vmatprep.mubr.f32.mxu1 %v12310_v62  ;;  %v6780_v25 = vld [vmem:[%s12106_s8 + $0x218] sm:$0xff] }
 0x595   :  { %v10855_v59 = vpack.c.bf16 %v6780_v25, %v6779_v32  ;;  %v6784_v32 = vld [vmem:[%s12106_s8 + $0x238] sm:$0xff] }
 0x596   :  { %v10891_v25 = vpack.c.bf16 %v6784_v32, %v6783_v26 }
 0x597   :  { %6833 = vmatmul.mubr.msk.f32.vlgmr.msra.gmra.mrb[70].mxu0 %vm69_vm1, %v10517_v13  ;;  %6845 = vmatmul.mubr.msk.f32.gmra.mrb[86].mxu1 %vm69_vm1, %v6829_v18 }
 0x598   :  { %8001 = vmatpush1.bf16.msra.mxu0 %v10408_v48  ;;  %4007 = vmatprep.mubr.f32.mxu0 %v12310_v62 }
 0x599   :  { %8003 = vmatprep.subr.bf16.mxu0 %v10417_v42  ;;  %4132 = vmatprep.mubr.f32.mxu1 %v12310_v62 }
 0x59b   :  { %6834 = vmatmul.mubr.msk.f32.gmra.mrb[72].mxu0 %vm69_vm1, %v10537_v7  ;;  %6846 = vmatmul.mubr.msk.f32.gmra.mrb[88].mxu1 %vm69_vm1, %v6830_v30 }
 0x59c   :  { %8005 = vmatpush1.bf16.msra.mxu0 %v10431_v6  ;;  %4013 = vmatprep.mubr.f32.mxu0 %v12310_v62 }
 0x59d   :  { %8008 = vmatprep.subr.msk.bf16.mxu0 %vm8730_vm3, %v10435_v51  ;;  %4304 = vmatprep.mubr.f32.mxu1 %v12310_v62 }
 0x59f   :  { %6835 = vmatmul.mubr.msk.f32.gmra.mrb[74].mxu0 %vm69_vm1, %v10552_v33  ;;  %6857 = vmatmul.mubr.msk.f32.vlgmr.msra.gmra.mrb[90].mxu1 %vm69_vm1, %v10517_v13 }
 0x5a0   :  { %8011 = vmatpush1.bf16.msk.msra.mxu0 %vm8730_vm3, %v10440_v21  ;;  %4019 = vmatprep.mubr.f32.mxu0 %v12310_v62 }
 0x5a1   :  { %4310 = vmatprep.mubr.f32.mxu1 %v12310_v62  ;;  %8060 = vmatpush1.bf16.msra.mxu1 %v10597_v56 }
 0x5a2   :  { %8061 = vmatprep.subr.bf16.mxu1 %v12360_v35  ;;  %8027 = vmatprep.subr.bf16.mxu0 %v10721_v61 }
 0x5a3   :  { %6836 = vmatmul.mubr.msk.f32.gmra.mrb[76].mxu0 %vm69_vm1, %v6828_v17  ;;  %6858 = vmatmul.mubr.msk.f32.gmra.mrb[92].mxu1 %vm69_vm1, %v10537_v7 }
 0x5a4   :  { %4025 = vmatprep.mubr.f32.mxu0 %v12310_v62  ;;  %4316 = vmatprep.mubr.f32.mxu1 %v12310_v62 }
 0x5a5   :  { %8063 = vmatpush1.bf16.msra.mxu1 %v10615_v40 }
 0x5a6   :  { %8064 = vmatprep.subr.bf16.mxu1 %v12360_v35 }
 0x5a7   :  { %6837 = vmatmul.mubr.msk.f32.gmra.mrb[78].mxu0 %vm69_vm1, %v6829_v18  ;;  %6859 = vmatmul.mubr.msk.f32.gmra.mrb[94].mxu1 %vm69_vm1, %v10552_v33 }
 0x5a8   :  { %4031 = vmatprep.mubr.f32.mxu0 %v12310_v62  ;;  %4322 = vmatprep.mubr.f32.mxu1 %v12310_v62 }
 0x5a9   :  { %8066 = vmatpush1.bf16.msra.mxu1 %v10630_v58 }
 0x5aa   :  { %8067 = vmatprep.subr.bf16.mxu1 %v12360_v35 }
 0x5ab   :  { %6838 = vmatmul.mubr.msk.f32.gmra.mrb[80].mxu0 %vm69_vm1, %v6830_v30  ;;  %6860 = vmatmul.mubr.msk.f32.gmra.mrb[96].mxu1 %vm69_vm1, %v6828_v17 }
 0x5ac   :  { %4203 = vmatprep.mubr.f32.mxu0 %v12310_v62  ;;  %4328 = vmatprep.mubr.f32.mxu1 %v12310_v62 }
 0x5ad   :  { %8069 = vmatpush1.bf16.msra.mxu1 %v10664_v29 }
 0x5ae   :  { %8070 = vmatprep.subr.bf16.mxu1 %v12360_v35 }
 0x5af   :  { %6849 = vmatmul.mubr.msk.f32.vlgmr.msra.gmra.mrb[82].mxu0 %vm69_vm1, %v10517_v13  ;;  %6861 = vmatmul.mubr.msk.f32.gmra.mrb[98].mxu1 %vm69_vm1, %v6829_v18  ;;  %v6817_v13 = vld [vmem:[%s12106_s8 + $0x340] sm:$0xff] }
 0x5b0   :  { %4209 = vmatprep.mubr.f32.mxu0 %v12310_v62  ;;  %4334 = vmatprep.mubr.f32.mxu1 %v12310_v62 }
 0x5b1   :  { %8072 = vmatpush1.bf16.msra.mxu1 %v10676_v31  ;;  %8029 = vmatpush3.bf16.msra.mxu0 %v10723_v37 }
 0x5b2   :  { %8073 = vmatprep.subr.bf16.mxu1 %v12360_v35 }
 0x5b3   :  { %6850 = vmatmul.mubr.msk.f32.gmra.mrb[84].mxu0 %vm69_vm1, %v10537_v7  ;;  %6862 = vmatmul.mubr.msk.f32.gmra.mrb[100].mxu1 %vm69_vm1, %v6830_v30  ;;  %v6818_v7 = vld [vmem:[%s12106_s8 + $0x348] sm:$0xff] }
 0x5b4   :  { %4215 = vmatprep.mubr.f32.mxu0 %v12310_v62 }
 0x5b5   :  { %8075 = vmatpush1.bf16.msra.mxu1 %v10687_v57 }
 0x5b6   :  { %8076 = vmatprep.subr.bf16.mxu1 %v12360_v35 }
 0x5b7   :  { %6851 = vmatmul.mubr.msk.f32.gmra.mrb[86].mxu0 %vm69_vm1, %v10552_v33  ;;  %v6787_v33 = vld [vmem:[%s12106_s8 + $0x250] sm:$0xff] }
 0x5b8   :  { %4221 = vmatprep.mubr.f32.mxu0 %v12310_v62 }
 0x5b9   :  { %8078 = vmatpush1.bf16.msra.mxu1 %v10697_v2 }
 0x5ba   :  { %8079 = vmatprep.subr.bf16.mxu1 %v12360_v35 }
 0x5bb   :  { %6852 = vmatmul.mubr.msk.f32.gmra.mrb[88].mxu0 %vm69_vm1, %v6828_v17  ;;  %v10738_v17 = vpack.c.bf16 %v6818_v7, %v6817_v13  ;;  %v10807_v13 = vpack.c.bf16 %v6776_v10, %v6775_v12  ;;  %v6823_v7 = vld [vmem:[%s12106_s8 + $0x370] sm:$0xff]  ;;  %v6797_v12 = vld [vmem:[%s12106_s8 + $0x2a0] sm:$0xff]  ;;  %v6798_v10 = vld [vmem:[%s12106_s8 + $0x2a8] sm:$0xff] }
 0x5bc   :  { %4227 = vmatprep.mubr.f32.mxu0 %v12310_v62 }
 0x5bd   :  { %8081 = vmatpush1.bf16.msra.mxu1 %v10710_v8 }
 0x5be   :  { %8082 = vmatprep.subr.bf16.mxu1 %v12360_v35 }
 0x5bf   :  { %6853 = vmatmul.mubr.msk.f32.gmra.mrb[90].mxu0 %vm69_vm1, %v6829_v18  ;;  %v6788_v18 = vld [vmem:[%s12106_s8 + $0x258] sm:$0xff] }
 0x5c0   :  { %4233 = vmatprep.mubr.f32.mxu0 %v12310_v62 }
 0x5c1   :  { %8084 = vmatpush1.bf16.msra.mxu1 %v10738_v17 }
 0x5c2   :  { %8085 = vmatprep.subr.bf16.mxu1 %v12360_v35 }
 0x5c3   :  { %6854 = vmatmul.mubr.msk.f32.gmra.mrb[92].mxu0 %vm69_vm1, %v6830_v30  ;;  %v10749_v30 = vpack.c.bf16 %v6788_v18, %v6787_v33  ;;  %v6824_v33 = vld [vmem:[%s12106_s8 + $0x378] sm:$0xff] }
 0x5c4   :  { %v10819_v18 = vpack.c.bf16 %v6824_v33, %v6823_v7  ;;  %v6781_v7 = vld [vmem:[%s12106_s8 + $0x220] sm:$0xff]  ;;  %v10868_v33 = vpack.c.bf16 %v6798_v10, %v6797_v12 }
 0x5c5   :  { %8031 = vmatprep.subr.bf16.mxu0 %v10749_v30  ;;  %8087 = vmatpush1.bf16.msra.mxu1 %v10766_v14  ;;  %v10873_v36 = vpack.c.bf16 %v6782_v11, %v6781_v7 }
 0x5c6   :  { %8033 = vmatpush3.bf16.msra.mxu0 %v10751_v39  ;;  %8088 = vmatprep.subr.bf16.mxu1 %v12360_v35 }
 0x5c7   :  { %8035 = vmatprep.subr.bf16.mxu0 %v10777_v22 }
 0x5c9   :  { %8090 = vmatpush1.bf16.msra.mxu1 %v10794_v38 }
 0x5ca   :  { %8037 = vmatpush3.bf16.msra.mxu0 %v10779_v20  ;;  %8091 = vmatprep.subr.bf16.mxu1 %v12360_v35 }
 0x5cb   :  { %8039 = vmatprep.subr.bf16.mxu0 %v10805_v5 }
 0x5cd   :  { %8093 = vmatpush1.bf16.msra.mxu1 %v10819_v18 }
 0x5ce   :  { %8041 = vmatpush3.bf16.msra.mxu0 %v10807_v13  ;;  %8126 = vmatprep.subr.bf16.mxu1 %v12360_v35 }
 0x5cf   :  { %8043 = vmatprep.subr.bf16.mxu0 %v10827_v9 }
 0x5d2   :  { %8045 = vmatpush3.bf16.msra.mxu0 %v10836_v1 }
 0x5d3   :  { %8047 = vmatprep.subr.bf16.mxu0 %v10850_v0 }
 0x5d6   :  { %8049 = vmatpush3.bf16.msra.mxu0 %v10855_v59 }
 0x5d7   :  { %8051 = vmatprep.subr.bf16.mxu0 %v10868_v33 }
 0x5da   :  { %8053 = vmatpush3.bf16.msra.mxu0 %v10873_v36 }
 0x5db   :  { %8055 = vmatprep.subr.bf16.mxu0 %v10886_v46 }
 0x5de   :  { %8057 = vmatpush3.bf16.msra.mxu0 %v10891_v25 }
 0x5df   :  { %8095 = vmatprep.subr.bf16.mxu0 %v10721_v61 }
 0x62a   :  { %v10896_v12 = vpop.f32.mrb[54].mxu1 }
 0x62b   :  { %v10898_v10 = vpop.f32.mrb[55].mxu1 }
 0x62e   :  { %v10900_v7 = vpop.f32.mrb[56].mxu1 }
 0x62f   :  { %12361 = vst [vmem:[#allocation12_spill] sm:$0xff] %v10900_v7  ;;  %v10902_v11 = vpop.f32.mrb[57].mxu1 }
 0x632   :  { %v10904_v55 = vpop.f32.mrb[58].mxu1 }
 0x633   :  { %12362 = vst [vmem:[#allocation13_spill] sm:$0xff] %v10904_v55  ;;  %v10906_v28 = vpop.f32.mrb[59].mxu1 }
 0x634   :  { %12363 = vst [vmem:[#allocation5_spill] sm:$0xff] %v10906_v28 }
 0x636   :  { %v10908_v26 = vpop.f32.mrb[60].mxu1 }
 0x637   :  { %12364 = vst [vmem:[#allocation15_spill] sm:$0xff] %v10908_v26  ;;  %v10910_v32 = vpop.f32.mrb[61].mxu1 }
 0x638   :  { %12365 = vst [vmem:[#allocation16_spill] sm:$0xff] %v10910_v32 }
 0x63a   :  { %v10912_v16 = vpop.f32.mrb[46].mxu0  ;;  %v10916_v61 = vpop.f32.mrb[62].mxu1 }
 0x63b   :  { %v10914_v49 = vpop.f32.mrb[47].mxu0  ;;  %12366 = vst [vmem:[#allocation6_spill] sm:$0xff] %v10916_v61  ;;  %v10918_v15 = vpop.f32.mrb[63].mxu1 }
 0x63c   :  { %12367 = vst [vmem:[#allocation18_spill] sm:$0xff] %v10918_v15 }
 0x63e   :  { %v10920_v24 = vpop.f32.mrb[48].mxu0  ;;  %v10924_v60 = vpop.f32.mrb[64].mxu1 }
 0x63f   :  { %v10922_v53 = vpop.f32.mrb[49].mxu0  ;;  %12368 = vst [vmem:[#allocation19_spill] sm:$0xff] %v10924_v60  ;;  %v10926_v47 = vpop.f32.mrb[65].mxu1 }
 0x640   :  { %12369 = vst [vmem:[#allocation8_spill] sm:$0xff] %v10926_v47 }
 0x642   :  { %v10928_v23 = vpop.f32.mrb[50].mxu0  ;;  %v10932_v45 = vpop.f32.mrb[66].mxu1 }
 0x643   :  { %v10930_v50 = vpop.f32.mrb[51].mxu0  ;;  %12370 = vst [vmem:[#allocation21_spill] sm:$0xff] %v10932_v45  ;;  %v10934_v52 = vpop.f32.mrb[67].mxu1 }
 0x646   :  { %v10936_v54 = vpop.f32.mrb[52].mxu0  ;;  %v10940_v61 = vpop.f32.mrb[68].mxu1 }
 0x647   :  { %v10938_v62 = vpop.f32.mrb[53].mxu0  ;;  %12371 = vst [vmem:[#allocation22_spill] sm:$0xff] %v10940_v61  ;;  %v10942_v15 = vpop.f32.mrb[69].mxu1 }
 0x648   :  { %12372 = vst [vmem:[#allocation11_spill] sm:$0xff] %v10942_v15 }
 0x64a   :  { %v10944_v26 = vpop.f32.mrb[54].mxu0  ;;  %v10948_v47 = vpop.f32.mrb[70].mxu1 }
 0x64b   :  { %v10946_v60 = vpop.f32.mrb[55].mxu0  ;;  %12373 = vst [vmem:[#allocation24_spill] sm:$0xff] %v10948_v47  ;;  %v10950_v21 = vpop.f32.mrb[71].mxu1 }
 0x64c   :  { %12374 = vst [vmem:[#allocation25_spill] sm:$0xff] %v10950_v21 }
 0x64e   :  { %v10952_v4 = vpop.f32.mrb[56].mxu0  ;;  %v10956_v32 = vpop.f32.mrb[72].mxu1 }
 0x64f   :  { %v10954_v41 = vpop.f32.mrb[57].mxu0  ;;  %12375 = vst [vmem:[#allocation14_spill] sm:$0xff] %v10956_v32  ;;  %v10958_v51 = vpop.f32.mrb[73].mxu1 }
 0x650   :  { %12376 = vst [vmem:[#allocation27_spill] sm:$0xff] %v10958_v51 }
 0x652   :  { %v10960_v55 = vpop.f32.mrb[58].mxu0  ;;  %v10964_v43 = vpop.f32.mrb[74].mxu1 }
 0x653   :  { %v10962_v6 = vpop.f32.mrb[59].mxu0  ;;  %12377 = vst [vmem:[#allocation28_spill] sm:$0xff] %v10964_v43  ;;  %v10966_v63 = vpop.f32.mrb[75].mxu1 }
 0x654   :  { %12378 = vst [vmem:[#allocation17_spill] sm:$0xff] %v10966_v63 }
 0x656   :  { %v10968_v61 = vpop.f32.mrb[60].mxu0  ;;  %v10972_v21 = vpop.f32.mrb[76].mxu1 }
 0x657   :  { %v10970_v47 = vpop.f32.mrb[61].mxu0  ;;  %12379 = vst [vmem:[#allocation20_spill] sm:$0xff] %v10972_v21  ;;  %v10974_v19 = vpop.f32.mrb[77].mxu1 }
 0x658   :  { %12380 = vst [vmem:[#allocation23_spill] sm:$0xff] %v10974_v19 }
 0x65a   :  { %v10976_v28 = vpop.f32.mrb[62].mxu0  ;;  %v4104_v51 = vpop.f32.mrb[78].mxu1 }
 0x65b   :  { %v10978_v32 = vpop.f32.mrb[63].mxu0  ;;  %v4106_v42 = vpop.f32.mrb[79].mxu1 }
 0x65c   :  { %6863 = vmatprep.mubr.msk.f32.mxu1 %vm2204_vm6, %v4106_v42 }
 0x65d   :  { %4519 = vmatmul.mubr.f32.vlgmr.msra.gmra.mrb[102].mxu1 %v4104_v51 }
 0x65e   :  { %v10980_v7 = vpop.f32.mrb[64].mxu0  ;;  %8128 = vmatpush1.bf16.msra.mxu1 %v10597_v56  ;;  %v4110_v63 = vpop.f32.mrb[80].mxu1 }
 0x65f   :  { %v10983_v43 = vpop.f32.mrb[65].mxu0  ;;  %8129 = vmatprep.subr.bf16.mxu1 %v12360_v35  ;;  %v4112_v21 = vpop.f32.mrb[81].mxu1 }
 0x660   :  { %6864 = vmatprep.mubr.msk.f32.mxu1 %vm2204_vm6, %v4112_v21 }
 0x661   :  { %4524 = vmatmul.mubr.f32.gmra.mrb[104].mxu1 %v4110_v63 }
 0x662   :  { %v10987_v19 = vpop.f32.mrb[66].mxu0  ;;  %8131 = vmatpush1.bf16.msra.mxu1 %v10615_v40  ;;  %v4116_v15 = vpop.f32.mrb[82].mxu1 }
 0x663   :  { %v10990_v48 = vpop.f32.mrb[67].mxu0  ;;  %8132 = vmatprep.subr.bf16.mxu1 %v12360_v35  ;;  %v4118_v42 = vpop.f32.mrb[83].mxu1 }
 0x664   :  { %6865 = vmatprep.mubr.msk.f32.mxu1 %vm2204_vm6, %v4118_v42 }
 0x665   :  { %4529 = vmatmul.mubr.f32.gmra.mrb[106].mxu1 %v4116_v15 }
 0x666   :  { %v10994_v51 = vpop.f32.mrb[68].mxu0  ;;  %8134 = vmatpush1.bf16.msra.mxu1 %v10630_v58  ;;  %v4122_v34 = vpop.f32.mrb[84].mxu1 }
 0x667   :  { %v10997_v56 = vpop.f32.mrb[69].mxu0  ;;  %8135 = vmatprep.subr.bf16.mxu1 %v12360_v35  ;;  %v4124_v21 = vpop.f32.mrb[85].mxu1 }
 0x668   :  { %6866 = vmatprep.mubr.msk.f32.mxu1 %vm2204_vm6, %v4124_v21 }
 0x669   :  { %4534 = vmatmul.mubr.f32.gmra.mrb[108].mxu1 %v4122_v34 }
 0x66a   :  { %v4003_v63 = vpop.f32.mrb[70].mxu0  ;;  %8137 = vmatpush1.bf16.msra.mxu1 %v10664_v29  ;;  %v4128_v45 = vpop.f32.mrb[86].mxu1 }
 0x66b   :  { %v4005_v40 = vpop.f32.mrb[71].mxu0  ;;  %8138 = vmatprep.subr.bf16.mxu1 %v12360_v35  ;;  %v4130_v42 = vpop.f32.mrb[87].mxu1 }
 0x66c   :  { %4423 = vmatprep.mubr.f32.mxu0 %v4005_v40  ;;  %6867 = vmatprep.mubr.msk.f32.mxu1 %vm2204_vm6, %v4130_v42 }
 0x66d   :  { %4424 = vmatmul.mubr.f32.vlgmr.msra.gmra.mrb[94].mxu0 %v4003_v63  ;;  %4539 = vmatmul.mubr.f32.gmra.mrb[110].mxu1 %v4128_v45 }
 0x66e   :  { %8097 = vmatpush3.bf16.msra.mxu0 %v10723_v37  ;;  %v4009_v15 = vpop.f32.mrb[72].mxu0  ;;  %8140 = vmatpush1.bf16.msra.mxu1 %v10676_v31  ;;  %v4134_v34 = vpop.f32.mrb[88].mxu1 }
 0x66f   :  { %8099 = vmatprep.subr.bf16.mxu0 %v10749_v30  ;;  %v4011_v58 = vpop.f32.mrb[73].mxu0  ;;  %8141 = vmatprep.subr.bf16.mxu1 %v12360_v35  ;;  %v4136_v29 = vpop.f32.mrb[89].mxu1 }
 0x670   :  { %4428 = vmatprep.mubr.f32.mxu0 %v4011_v58  ;;  %6868 = vmatprep.mubr.msk.f32.mxu1 %vm2204_vm6, %v4136_v29  ;;  %v3348_v58 = vld [vmem:[%s12106_s8] sm:$0xff] }
 0x671   :  { %4429 = vmatmul.mubr.f32.gmra.mrb[96].mxu0 %v4009_v15  ;;  %4544 = vmatmul.mubr.f32.gmra.mrb[112].mxu1 %v4134_v34  ;;  %v3349_v34 = vld [vmem:[%s12106_s8 + $0x8] sm:$0xff] }
 0x672   :  { %8101 = vmatpush3.bf16.msra.mxu0 %v10751_v39  ;;  %v4015_v21 = vpop.f32.mrb[74].mxu0  ;;  %8143 = vmatpush1.bf16.msra.mxu1 %v10687_v57  ;;  %v11013_v45 = vpop.f32.mrb[90].mxu1 }
 0x673   :  { %8103 = vmatprep.subr.bf16.mxu0 %v10777_v22  ;;  %v4017_v37 = vpop.f32.mrb[75].mxu0  ;;  %8144 = vmatprep.subr.bf16.mxu1 %v12360_v35  ;;  %v4308_v31 = vpop.f32.mrb[91].mxu1 }
 0x674   :  { %4433 = vmatprep.mubr.f32.mxu0 %v4017_v37  ;;  %6869 = vmatprep.mubr.msk.f32.mxu1 %vm2204_vm6, %v4308_v31  ;;  %v8164_v31 = vpack.c.bf16 %v3349_v34, %v3348_v58 }
 0x675   :  { %4434 = vmatmul.mubr.f32.gmra.mrb[98].mxu0 %v4015_v21  ;;  %v3366_v21 = vld [vmem:[%s12106_s8 + $0x90] sm:$0xff] }
 0x676   :  { %8105 = vmatpush3.bf16.msra.mxu0 %v10779_v20  ;;  %v4021_v30 = vpop.f32.mrb[76].mxu0  ;;  %8146 = vmatpush1.bf16.msra.mxu1 %v10697_v2  ;;  %v11020_v22 = vpop.f32.mrb[92].mxu1 }
 0x677   :  { %8107 = vmatprep.subr.bf16.mxu0 %v10805_v5  ;;  %v4023_v39 = vpop.f32.mrb[77].mxu0  ;;  %8147 = vmatprep.subr.bf16.mxu1 %v12360_v35  ;;  %v11023_v57 = vpop.f32.mrb[93].mxu1 }
 0x678   :  { %4438 = vmatprep.mubr.f32.mxu0 %v4023_v39  ;;  %v3350_v39 = vld [vmem:[%s12106_s8 + $0x10] sm:$0xff] }
 0x679   :  { %4439 = vmatmul.mubr.f32.gmra.mrb[100].mxu0 %v4021_v30 }
 0x67a   :  { %8109 = vmatpush3.bf16.msra.mxu0 %v10807_v13  ;;  %v4027_v63 = vpop.f32.mrb[78].mxu0  ;;  %8149 = vmatpush1.bf16.msra.mxu1 %v10710_v8  ;;  %v11028_v5 = vpop.f32.mrb[94].mxu1 }
 0x67b   :  { %8111 = vmatprep.subr.bf16.mxu0 %v10827_v9  ;;  %v4029_v20 = vpop.f32.mrb[79].mxu0  ;;  %8150 = vmatprep.subr.bf16.mxu1 %v12360_v35  ;;  %v11031_v2 = vpop.f32.mrb[95].mxu1 }
 0x67c   :  { %4443 = vmatprep.mubr.f32.mxu0 %v4029_v20 }
 0x67d   :  { %4444 = vmatmul.mubr.f32.gmra.mrb[102].mxu0 %v4027_v63  ;;  %v3351_v63 = vld [vmem:[%s12106_s8 + $0x18] sm:$0xff] }
 0x67e   :  { %8113 = vmatpush3.bf16.msra.mxu0 %v10836_v1  ;;  %v4033_v40 = vpop.f32.mrb[80].mxu0  ;;  %8152 = vmatpush1.bf16.msra.mxu1 %v10738_v17  ;;  %v11036_v9 = vpop.f32.mrb[96].mxu1  ;;  %v3364_v17 = vld [vmem:[%s12106_s8 + $0x80] sm:$0xff] }
 0x67f   :  { %8115 = vmatprep.subr.bf16.mxu0 %v10850_v0  ;;  %v4035_v13 = vpop.f32.mrb[81].mxu0  ;;  %8153 = vmatprep.subr.bf16.mxu1 %v12360_v35  ;;  %v11039_v8 = vpop.f32.mrb[97].mxu1  ;;  %v3365_v0 = vld [vmem:[%s12106_s8 + $0x88] sm:$0xff] }
 0x680   :  { %4448 = vmatprep.mubr.f32.mxu0 %v4035_v13  ;;  %v8168_v13 = vpack.c.bf16 %v3351_v63, %v3350_v39  ;;  %v3357_v63 = vld [vmem:[%s12106_s8 + $0x48] sm:$0xff] }
 0x681   :  { %4449 = vmatmul.mubr.f32.gmra.mrb[104].mxu0 %v4033_v40  ;;  %v3368_v40 = vld [vmem:[%s12106_s8 + $0xa0] sm:$0xff] }
 0x682   :  { %8117 = vmatpush3.bf16.msra.mxu0 %v10855_v59  ;;  %v4205_v42 = vpop.f32.mrb[82].mxu0  ;;  %8155 = vmatpush1.bf16.msra.mxu1 %v10766_v14  ;;  %v11050_v15 = vpop.f32.mrb[98].mxu1  ;;  %v8162_v14 = vpack.c.bf16 %v3365_v0, %v3364_v17  ;;  %v3353_v0 = vld [vmem:[%s12106_s8 + $0x28] sm:$0xff] }
 0x683   :  { %8119 = vmatprep.subr.bf16.mxu0 %v10868_v33  ;;  %v4207_v1 = vpop.f32.mrb[83].mxu0  ;;  %8156 = vmatprep.subr.bf16.mxu1 %v12360_v35  ;;  %v11053_v59 = vpop.f32.mrb[99].mxu1 }
 0x684   :  { %4631 = vmatprep.mubr.f32.mxu0 %v4207_v1 }
 0x686   :  { %8121 = vmatpush3.bf16.msra.mxu0 %v10873_v36  ;;  %v4211_v33 = vpop.f32.mrb[84].mxu0  ;;  %8158 = vmatpush1.bf16.msra.mxu1 %v10794_v38  ;;  %v3367_v36 = vld [vmem:[%s12106_s8 + $0x98] sm:$0xff] }
 0x687   :  { %8123 = vmatprep.subr.bf16.mxu0 %v10886_v46  ;;  %v4213_v29 = vpop.f32.mrb[85].mxu0  ;;  %v11070_v46 = vpop.f32.mrb[100].mxu1  ;;  %8159 = vmatprep.subr.bf16.mxu1 %v12360_v35  ;;  %v8166_v38 = vpack.c.bf16 %v3367_v36, %v3366_v21  ;;  %v3355_v21 = vld [vmem:[%s12106_s8 + $0x38] sm:$0xff] }
 0x688   :  { %v11073_v37 = vpop.f32.mrb[101].mxu1 }
 0x68a   :  { %8125 = vmatpush3.bf16.msra.mxu0 %v10891_v25  ;;  %v4217_v30 = vpop.f32.mrb[86].mxu0  ;;  %8161 = vmatpush1.bf16.msra.mxu1 %v10819_v18  ;;  %v3369_v25 = vld [vmem:[%s12106_s8 + $0xa8] sm:$0xff]  ;;  %v3352_v18 = vld [vmem:[%s12106_s8 + $0x20] sm:$0xff] }
 0x68b   :  { %8163 = vmatprep.subr.bf16.mxu0 %v8162_v14  ;;  %v4219_v20 = vpop.f32.mrb[87].mxu0  ;;  %8231 = vmatprep.subr.bf16.mxu1 %v8162_v14  ;;  %v8170_v17 = vpack.c.bf16 %v3369_v25, %v3368_v40  ;;  %v8172_v14 = vpack.c.bf16 %v3353_v0, %v3352_v18  ;;  %v3361_v0 = vld [vmem:[%s12106_s8 + $0x68] sm:$0xff] }
 0x68d   :  { %4632 = vmatmul.mubr.f32.vlgmr.msra.gmra.mrb[106].mxu0 %v4205_v42  ;;  %4727 = vmatmul.mubr.f32.vlgmr.msra.gmra.mrb[114].mxu1 %v11013_v45  ;;  %v3370_v42 = vld [vmem:[%s12106_s8 + $0xb0] sm:$0xff]  ;;  %v3371_v45 = vld [vmem:[%s12106_s8 + $0xb8] sm:$0xff] }
 0x68e   :  { %8165 = vmatpush3.bf16.msra.mxu0 %v8164_v31  ;;  %4636 = vmatprep.mubr.f32.mxu0 %v4213_v29  ;;  %v4223_v1 = vpop.f32.mrb[88].mxu0  ;;  %v8174_v29 = vpack.c.bf16 %v3371_v45, %v3370_v42 }
 0x68f   :  { %8167 = vmatprep.subr.bf16.mxu0 %v8166_v38  ;;  %v4225_v58 = vpop.f32.mrb[89].mxu0  ;;  %8233 = vmatpush3.bf16.msra.mxu1 %v8164_v31 }
 0x690   :  { %6870 = vmatprep.mubr.msk.f32.mxu1 %vm2204_vm6, %v11023_v57  ;;  %8235 = vmatprep.subr.bf16.mxu1 %v8166_v38  ;;  %v3354_v57 = vld [vmem:[%s12106_s8 + $0x30] sm:$0xff] }
 0x691   :  { %4637 = vmatmul.mubr.f32.gmra.mrb[108].mxu0 %v4211_v33  ;;  %4732 = vmatmul.mubr.f32.gmra.mrb[116].mxu1 %v11020_v22  ;;  %v3372_v33 = vld [vmem:[%s12106_s8 + $0xc0] sm:$0xff]  ;;  %v3373_v22 = vld [vmem:[%s12106_s8 + $0xc8] sm:$0xff]  ;;  %v8176_v31 = vpack.c.bf16 %v3355_v21, %v3354_v57  ;;  %v3383_v57 = vld [vmem:[%s12106_s8 + $0x118] sm:$0xff] }
 0x692   :  { %8169 = vmatpush3.bf16.msra.mxu0 %v8168_v13  ;;  %4641 = vmatprep.mubr.f32.mxu0 %v4219_v20  ;;  %v4229_v34 = vpop.f32.mrb[90].mxu0  ;;  %v8178_v39 = vpack.c.bf16 %v3373_v22, %v3372_v33  ;;  %v3385_v33 = vld [vmem:[%s12106_s8 + $0x128] sm:$0xff] }
 0x693   :  { %8171 = vmatprep.subr.bf16.mxu0 %v8170_v17  ;;  %v4231_v36 = vpop.f32.mrb[91].mxu0  ;;  %8237 = vmatpush3.bf16.msra.mxu1 %v8168_v13  ;;  %v3359_v13 = vld [vmem:[%s12106_s8 + $0x58] sm:$0xff] }
 0x694   :  { %6871 = vmatprep.mubr.msk.f32.mxu1 %vm2204_vm6, %v11031_v2  ;;  %8239 = vmatprep.subr.bf16.mxu1 %v8170_v17  ;;  %v3356_v2 = vld [vmem:[%s12106_s8 + $0x40] sm:$0xff] }
 0x695   :  { %4642 = vmatmul.mubr.f32.gmra.mrb[110].mxu0 %v4217_v30  ;;  %4737 = vmatmul.mubr.f32.gmra.mrb[118].mxu1 %v11028_v5  ;;  %v3374_v30 = vld [vmem:[%s12106_s8 + $0xd0] sm:$0xff]  ;;  %v3375_v5 = vld [vmem:[%s12106_s8 + $0xd8] sm:$0xff]  ;;  %v8180_v40 = vpack.c.bf16 %v3357_v63, %v3356_v2 }
 0x696   :  { %8173 = vmatpush3.bf16.msra.mxu0 %v8172_v14  ;;  %4646 = vmatprep.mubr.f32.mxu0 %v4225_v58  ;;  %v4235_v38 = vpop.f32.mrb[92].mxu0  ;;  %v8182_v25 = vpack.c.bf16 %v3375_v5, %v3374_v30  ;;  %v3378_v58 = vld [vmem:[%s12106_s8 + $0xf0] sm:$0xff]  ;;  %v12381_v2 = vld [vmem:[#allocation21_spill] sm:$0xff]  ;;  %v12384_v30 = vld [vmem:[#allocation3_spill] sm:$0xff] }
 0x697   :  { %8175 = vmatprep.subr.bf16.mxu0 %v8174_v29  ;;  %v4237_v20 = vpop.f32.mrb[93].mxu0  ;;  %8241 = vmatpush3.bf16.msra.mxu1 %v8172_v14  ;;  %v3363_v14 = vld [vmem:[%s12106_s8 + $0x78] sm:$0xff] }
 0x698   :  { %6872 = vmatprep.mubr.msk.f32.mxu1 %vm2204_vm6, %v11039_v8  ;;  %8243 = vmatprep.subr.bf16.mxu1 %v8174_v29  ;;  %v3358_v8 = vld [vmem:[%s12106_s8 + $0x50] sm:$0xff]  ;;  %v12382_v63 = vld [vmem:[#allocation45_spill] sm:$0xff] }
 0x699   :  { %4647 = vmatmul.mubr.f32.gmra.mrb[112].mxu0 %v4223_v1  ;;  %4742 = vmatmul.mubr.f32.gmra.mrb[120].mxu1 %v11036_v9  ;;  %v3376_v1 = vld [vmem:[%s12106_s8 + $0xe0] sm:$0xff]  ;;  %v3377_v9 = vld [vmem:[%s12106_s8 + $0xe8] sm:$0xff]  ;;  %v8184_v17 = vpack.c.bf16 %v3359_v13, %v3358_v8  ;;  %v12386_v5 = vld [vmem:[#allocation9_spill] sm:$0xff] }
 0x69a   :  { %8177 = vmatpush3.bf16.msra.mxu0 %v8176_v31  ;;  %4651 = vmatprep.mubr.f32.mxu0 %v4231_v36  ;;  %v8186_v18 = vpack.c.bf16 %v3377_v9, %v3376_v1  ;;  %v3384_v36 = vld [vmem:[%s12106_s8 + $0x120] sm:$0xff]  ;;  %v12393_v8 = vld [vmem:[#allocation47_spill] sm:$0xff]  ;;  %v12394_v13 = vld [vmem:[#allocation13_spill] sm:$0xff] }
 0x69b   :  { %8179 = vmatprep.subr.bf16.mxu0 %v8178_v39  ;;  %8245 = vmatpush3.bf16.msra.mxu1 %v8176_v31  ;;  %v3402_v31 = vld [vmem:[%s12106_s8 + $0x1b0] sm:$0xff]  ;;  %v12395_v1 = vld [vmem:[#allocation10_spill] sm:$0xff] }
 0x69c   :  { %6873 = vmatprep.mubr.msk.f32.mxu1 %vm2204_vm6, %v11053_v59  ;;  %8247 = vmatprep.subr.bf16.mxu1 %v8178_v39  ;;  %v3360_v59 = vld [vmem:[%s12106_s8 + $0x60] sm:$0xff]  ;;  %v12396_v9 = vld [vmem:[#allocation16_spill] sm:$0xff] }
 0x69d   :  { %4652 = vmatmul.mubr.f32.gmra.mrb[114].mxu0 %v4229_v34  ;;  %4747 = vmatmul.mubr.f32.gmra.mrb[122].mxu1 %v11050_v15  ;;  %v3379_v15 = vld [vmem:[%s12106_s8 + $0xf8] sm:$0xff]  ;;  %v8188_v42 = vpack.c.bf16 %v3361_v0, %v3360_v59  ;;  %v12399_v59 = vld [vmem:[#allocation60_spill] sm:$0xff]  ;;  %v12400_v0 = vld [vmem:[#allocation27_spill] sm:$0xff] }
 0x69e   :  { %8181 = vmatpush3.bf16.msra.mxu0 %v8180_v40  ;;  %4656 = vmatprep.mubr.f32.mxu0 %v4237_v20  ;;  %v8190_v45 = vpack.c.bf16 %v3379_v15, %v3378_v58  ;;  %v12383_v20 = vld [vmem:[#allocation11_spill] sm:$0xff]  ;;  %v12401_v58 = vld [vmem:[#allocation4_spill] sm:$0xff] }
 0x69f   :  { %8183 = vmatprep.subr.bf16.mxu0 %v8182_v25  ;;  %8249 = vmatpush3.bf16.msra.mxu1 %v8180_v40  ;;  %v12402_v15 = vld [vmem:[#allocation15_spill] sm:$0xff] }
 0x6a0   :  { %6874 = vmatprep.mubr.msk.f32.mxu1 %vm2204_vm6, %v11073_v37  ;;  %8251 = vmatprep.subr.bf16.mxu1 %v8182_v25  ;;  %v3362_v37 = vld [vmem:[%s12106_s8 + $0x70] sm:$0xff]  ;;  %v12392_v25 = vld [vmem:[#allocation25_spill] sm:$0xff] }
 0x6a1   :  { %4657 = vmatmul.mubr.f32.gmra.mrb[116].mxu0 %v4235_v38  ;;  %4752 = vmatmul.mubr.f32.gmra.mrb[124].mxu1 %v11070_v46  ;;  %v8192_v34 = vpack.c.bf16 %v3363_v14, %v3362_v37  ;;  %v3381_v46 = vld [vmem:[%s12106_s8 + $0x108] sm:$0xff]  ;;  %v3403_v38 = vld [vmem:[%s12106_s8 + $0x1b8] sm:$0xff]  ;;  %v12406_v14 = vld [vmem:[#allocation6_spill] sm:$0xff] }
 0x6a2   :  { %8185 = vmatpush3.bf16.msra.mxu0 %v8184_v17  ;;  %4839 = vmatprep.mubr.f32.mxu0 %v10914_v49  ;;  %v3380_v49 = vld [vmem:[%s12106_s8 + $0x100] sm:$0xff]  ;;  %v8228_v39 = vpack.c.bf16 %v3403_v38, %v3402_v31  ;;  %v12405_v37 = vld [vmem:[#allocation17_spill] sm:$0xff] }
 0x6a3   :  { %8187 = vmatprep.subr.bf16.mxu0 %v8186_v18  ;;  %8253 = vmatpush3.bf16.msra.mxu1 %v8184_v17  ;;  %v8195_v29 = vpack.c.bf16 %v3381_v46, %v3380_v49  ;;  %v12397_v17 = vld [vmem:[#allocation37_spill] sm:$0xff]  ;;  %v12408_v49 = vld [vmem:[#allocation28_spill] sm:$0xff]  ;;  %v12409_v46 = vld [vmem:[#allocation23_spill] sm:$0xff] }
 0x6a4   :  { %5047 = vmatprep.mubr.f32.mxu1 %v10962_v6  ;;  %8255 = vmatprep.subr.bf16.mxu1 %v8186_v18  ;;  %v3382_v6 = vld [vmem:[%s12106_s8 + $0x110] sm:$0xff] }
 0x6a5   :  { %v8198_v21 = vpack.c.bf16 %v3383_v57, %v3382_v6  ;;  %v12398_v18 = vld [vmem:[#allocation24_spill] sm:$0xff]  ;;  %v12411_v6 = vmov 0.0   ;;  %v11351_v57 = vld [vmem:[%s12099_s1 + $0x60] sm:$0xff] }
 0x6a6   :  { %8189 = vmatpush3.bf16.msra.mxu0 %v8188_v42 }
 0x6a7   :  { %8191 = vmatprep.subr.bf16.mxu0 %v8190_v45  ;;  %8257 = vmatpush3.bf16.msra.mxu1 %v8188_v42  ;;  %v12403_v42 = vld [vmem:[#allocation18_spill] sm:$0xff] }
 0x6a8   :  { %8259 = vmatprep.subr.bf16.mxu1 %v8190_v45  ;;  %v12404_v45 = vld [vmem:[#allocation14_spill] sm:$0xff] }
 0x6aa   :  { %8193 = vmatpush3.bf16.msra.mxu0 %v8192_v34 }
 0x6ab   :  { %8194 = vmatprep.subr.bf16.mxu0 %v12360_v35  ;;  %8261 = vmatpush3.bf16.msra.mxu1 %v8192_v34  ;;  %v12407_v34 = vld [vmem:[#allocation8_spill] sm:$0xff] }
 0x6ac   :  { %8262 = vmatprep.subr.bf16.mxu1 %v12360_v35 }
 0x6ad   :  { %4840 = vmatmul.mubr.f32.vlgmr.msra.gmra.mrb[118].mxu0 %v10912_v16  ;;  %v8201_v16 = vpack.c.bf16 %v3385_v33, %v3384_v36  ;;  %v12413_v36 = vld [vmem:[#allocation48_spill] sm:$0xff]  ;;  %v11362_v33 = vld [vmem:[%s12099_s1 + $0x68] sm:$0xff] }
 0x6ae   :  { %4844 = vmatprep.mubr.f32.mxu0 %v10922_v53  ;;  %8196 = vmatpush1.bf16.msra.mxu0 %v8195_v29  ;;  %v3386_v53 = vld [vmem:[%s12106_s8 + $0x130] sm:$0xff] }
 0x6af   :  { %5048 = vmatmul.mubr.f32.vlgmr.msra.gmra.mrb[126].mxu1 %v10960_v55  ;;  %8197 = vmatprep.subr.bf16.mxu0 %v12360_v35  ;;  %v3389_v55 = vld [vmem:[%s12106_s8 + $0x148] sm:$0xff] }
 0x6b0   :  { %5052 = vmatprep.mubr.f32.mxu1 %v10970_v47  ;;  %8264 = vmatpush1.bf16.msra.mxu1 %v8195_v29  ;;  %v3387_v47 = vld [vmem:[%s12106_s8 + $0x138] sm:$0xff]  ;;  %v12410_v29 = vld [vmem:[#allocation19_spill] sm:$0xff] }
 0x6b1   :  { %4845 = vmatmul.mubr.f32.gmra.mrb[120].mxu0 %v10920_v24  ;;  %8265 = vmatprep.subr.bf16.mxu1 %v12360_v35  ;;  %v3388_v24 = vld [vmem:[%s12106_s8 + $0x140] sm:$0xff] }
 0x6b2   :  { %4849 = vmatprep.mubr.f32.mxu0 %v10930_v50  ;;  %8199 = vmatpush1.bf16.msra.mxu0 %v8198_v21  ;;  %v8204_v50 = vpack.c.bf16 %v3387_v47, %v3386_v53  ;;  %v12415_v53 = vld [vmem:[#allocation59_spill] sm:$0xff]  ;;  %v6945_v47 = vld [vmem:[%s12099_s1 + $0x70] sm:$0xff] }
 0x6b3   :  { %5053 = vmatmul.mubr.f32.gmra.mrb[128].mxu1 %v10968_v61  ;;  %8200 = vmatprep.subr.bf16.mxu0 %v12360_v35 }
 0x6b4   :  { %5057 = vmatprep.mubr.f32.mxu1 %v10978_v32  ;;  %8267 = vmatpush1.bf16.msra.mxu1 %v8198_v21  ;;  %v3399_v32 = vld [vmem:[%s12106_s8 + $0x198] sm:$0xff]  ;;  %v12412_v21 = vld [vmem:[#allocation20_spill] sm:$0xff] }
 0x6b5   :  { %4850 = vmatmul.mubr.f32.gmra.mrb[122].mxu0 %v10928_v23  ;;  %8268 = vmatprep.subr.bf16.mxu1 %v12360_v35  ;;  %v3390_v23 = vld [vmem:[%s12106_s8 + $0x150] sm:$0xff] }
 0x6b6   :  { %4854 = vmatprep.mubr.f32.mxu0 %v10938_v62  ;;  %8202 = vmatpush1.bf16.msra.mxu0 %v8201_v16  ;;  %v8207_v62 = vpack.c.bf16 %v3389_v55, %v3388_v24  ;;  %v12417_v24 = vld [vmem:[#allocation61_spill] sm:$0xff] }
 0x6b7   :  { %5058 = vmatmul.mubr.f32.gmra.mrb[130].mxu1 %v10976_v28  ;;  %8203 = vmatprep.subr.bf16.mxu0 %v12360_v35  ;;  %v3397_v28 = vld [vmem:[%s12106_s8 + $0x188] sm:$0xff]  ;;  %v6946_v55 = vld [vmem:[%s12099_s1 + $0x78] sm:$0xff] }
 0x6b8   :  { %5062 = vmatprep.mubr.f32.mxu1 %v10983_v43  ;;  %8270 = vmatpush1.bf16.msra.mxu1 %v8201_v16  ;;  %v3391_v43 = vld [vmem:[%s12106_s8 + $0x158] sm:$0xff]  ;;  %v12414_v16 = vld [vmem:[#allocation52_spill] sm:$0xff] }
 0x6b9   :  { %4855 = vmatmul.mubr.f32.gmra.mrb[124].mxu0 %v10936_v54  ;;  %8271 = vmatprep.subr.bf16.mxu1 %v12360_v35  ;;  %v8210_v54 = vpack.c.bf16 %v3391_v43, %v3390_v23  ;;  %v6947_v23 = vld [vmem:[%s12099_s1 + $0x80] sm:$0xff]  ;;  %v11404_v43 = vld [vmem:[%s12099_s1 + $0x88] sm:$0x1f] }
 0x6ba   :  { %4859 = vmatprep.mubr.f32.mxu0 %v10946_v60  ;;  %8205 = vmatpush1.bf16.msra.mxu0 %v8204_v50  ;;  %v3392_v60 = vld [vmem:[%s12106_s8 + $0x160] sm:$0xff] }
 0x6bb   :  { %5063 = vmatmul.mubr.f32.gmra.mrb[132].mxu1 %v10980_v7  ;;  %8206 = vmatprep.subr.bf16.mxu0 %v12360_v35  ;;  %v3395_v7 = vld [vmem:[%s12106_s8 + $0x178] sm:$0xff] }
 0x6bc   :  { %5067 = vmatprep.mubr.f32.mxu1 %v10990_v48  ;;  %8273 = vmatpush1.bf16.msra.mxu1 %v8204_v50  ;;  %v3393_v48 = vld [vmem:[%s12106_s8 + $0x168] sm:$0xff]  ;;  %v12416_v50 = vld [vmem:[#allocation56_spill] sm:$0xff] }
 0x6bd   :  { %4860 = vmatmul.mubr.f32.gmra.mrb[126].mxu0 %v10944_v26  ;;  %8274 = vmatprep.subr.bf16.mxu1 %v12360_v35 }
 0x6be   :  { %4864 = vmatprep.mubr.f32.mxu0 %v10954_v41  ;;  %8208 = vmatpush1.bf16.msra.mxu0 %v8207_v62  ;;  %v3394_v41 = vld [vmem:[%s12106_s8 + $0x170] sm:$0xff] }
 0x6bf   :  { %5068 = vmatmul.mubr.f32.gmra.mrb[134].mxu1 %v10987_v19  ;;  %8209 = vmatprep.subr.bf16.mxu0 %v12360_v35  ;;  %v8213_v19 = vpack.c.bf16 %v3393_v48, %v3392_v60  ;;  %v12420_v60 = vld [vmem:[#allocation43_spill] sm:$0xff]  ;;  %v12421_v48 = vld [vmem:[#allocation64_spill] sm:$0xff] }
 0x6c0   :  { %5072 = vmatprep.mubr.f32.mxu1 %v10997_v56  ;;  %8276 = vmatpush1.bf16.msra.mxu1 %v8207_v62  ;;  %v3401_v56 = vld [vmem:[%s12106_s8 + $0x1a8] sm:$0xff] }
 0x6c1   :  { %4865 = vmatmul.mubr.f32.gmra.mrb[128].mxu0 %v10952_v4  ;;  %8277 = vmatprep.subr.bf16.mxu1 %v12360_v35  ;;  %v8216_v4 = vpack.c.bf16 %v3395_v7, %v3394_v41  ;;  %v12418_v62 = vld [vmem:[#allocation63_spill] sm:$0xff]  ;;  %v6903_v7 = vld [vmem:[%s12106_s8 + $0x400] sm:$0xff] }
 0x6c2   :  { %8211 = vmatpush1.bf16.msra.mxu0 %v8210_v54  ;;  %6875 = vmatprep.mubr.msk.f32.mxu0 %vm2204_vm6, %v10898_v10  ;;  %v3396_v10 = vld [vmem:[%s12106_s8 + $0x180] sm:$0xff]  ;;  %v12423_v41 = vld [vmem:[#allocation7_spill] sm:$0xff] }
 0x6c3   :  { %5073 = vmatmul.mubr.f32.gmra.mrb[136].mxu1 %v10994_v51  ;;  %8212 = vmatprep.subr.bf16.mxu0 %v12360_v35  ;;  %v8219_v26 = vpack.c.bf16 %v3397_v28, %v3396_v10  ;;  %v3400_v51 = vld [vmem:[%s12106_s8 + $0x1a0] sm:$0xff] }
 0x6c4   :  { %8279 = vmatpush1.bf16.msra.mxu1 %v8210_v54  ;;  %6881 = vmatprep.mubr.msk.f32.mxu1 %vm2204_vm6, %v10934_v52  ;;  %v3398_v52 = vld [vmem:[%s12106_s8 + $0x190] sm:$0xff]  ;;  %v8225_v22 = vpack.c.bf16 %v3401_v56, %v3400_v51  ;;  %v12419_v54 = vld [vmem:[#allocation66_spill] sm:$0xff] }
 0x6c5   :  { %8280 = vmatprep.subr.bf16.mxu1 %v12360_v35  ;;  %v8222_v61 = vpack.c.bf16 %v3399_v32, %v3398_v52  ;;  %v6887_v10 = vld [vmem:[%s12106_s8 + $0x380] sm:$0xff]  ;;  %v6905_v52 = vld [vmem:[%s12106_s8 + $0x410] sm:$0xff]  ;;  %v6906_v32 = vld [vmem:[%s12106_s8 + $0x418] sm:$0xff] }
 0x6c6   :  { %8214 = vmatpush1.bf16.msra.mxu0 %v8213_v19  ;;  %v11455_v51 = vpack.c.bf16 %v6906_v32, %v6905_v52  ;;  %v6889_v56 = vld [vmem:[%s12106_s8 + $0x390] sm:$0xff]  ;;  %v6928_v32 = vld [vmem:[%s12106_s8 + $0x4c8] sm:$0xff] }
 0x6c7   :  { %8215 = vmatprep.subr.bf16.mxu0 %v12360_v35 }
 0x6c8   :  { %8282 = vmatpush1.bf16.msra.mxu1 %v8213_v19  ;;  %v12422_v19 = vld [vmem:[#allocation41_spill] sm:$0xff] }
 0x6c9   :  { %8283 = vmatprep.subr.bf16.mxu1 %v12360_v35 }
 0x6ca   :  { %8217 = vmatpush1.bf16.msra.mxu0 %v8216_v4 }
 0x6cb   :  { %8218 = vmatprep.subr.bf16.mxu0 %v12360_v35 }
 0x6cc   :  { %8285 = vmatpush1.bf16.msra.mxu1 %v8216_v4  ;;  %v6904_v4 = vld [vmem:[%s12106_s8 + $0x408] sm:$0xff] }
 0x6cd   :  { %8286 = vmatprep.subr.bf16.mxu1 %v12360_v35  ;;  %v11441_v28 = vpack.c.bf16 %v6904_v4, %v6903_v7  ;;  %v6916_v7 = vld [vmem:[%s12106_s8 + $0x468] sm:$0xff]  ;;  %v6927_v4 = vld [vmem:[%s12106_s8 + $0x4c0] sm:$0xff] }
 0x6ce   :  { %8220 = vmatpush1.bf16.msra.mxu0 %v8219_v26 }
 0x6cf   :  { %8221 = vmatprep.subr.bf16.mxu0 %v12360_v35 }
 0x6d0   :  { %8288 = vmatpush1.bf16.msra.mxu1 %v8219_v26  ;;  %v6888_v26 = vld [vmem:[%s12106_s8 + $0x388] sm:$0xff] }
 0x6d1   :  { %8289 = vmatprep.subr.bf16.mxu1 %v12360_v35 }
 0x6d2   :  { %8223 = vmatpush1.bf16.msra.mxu0 %v8222_v61 }
 0x6d3   :  { %8224 = vmatprep.subr.bf16.mxu0 %v12360_v35 }
 0x6d4   :  { %8291 = vmatpush1.bf16.msra.mxu1 %v8222_v61  ;;  %v11453_v61 = vpack.c.bf16 %v6888_v26, %v6887_v10 }
 0x6d5   :  { %8292 = vmatprep.subr.bf16.mxu1 %v12360_v35 }
 0x6d6   :  { %8226 = vmatpush1.bf16.msra.mxu0 %v8225_v22 }
 0x6d7   :  { %8227 = vmatprep.subr.bf16.mxu0 %v12360_v35 }
 0x6d8   :  { %8294 = vmatpush1.bf16.msra.mxu1 %v8225_v22  ;;  %v6890_v22 = vld [vmem:[%s12106_s8 + $0x398] sm:$0xff] }
 0x6d9   :  { %8295 = vmatprep.subr.bf16.mxu1 %v12360_v35  ;;  %v11483_v38 = vpack.c.bf16 %v6890_v22, %v6889_v56  ;;  %v11627_v22 = vpack.c.bf16 %v6928_v32, %v6927_v4  ;;  %v6938_v32 = vld [vmem:[%s12106_s8 + $0x518] sm:$0xff] }
 0x6da   :  { %8229 = vmatpush1.bf16.msra.mxu0 %v8228_v39 }
 0x6db   :  { %8299 = vmatprep.subr.bf16.mxu0 %v10308_v44  ;;  %v12385_v44 = vld [vmem:[#allocation12_spill] sm:$0xff] }
 0x6dc   :  { %8297 = vmatpush1.bf16.msra.mxu1 %v8228_v39 }
 0x6dd   :  { %4935 = vmatmul.mubr.f32.vlgmr.msra.gmra.mrb[130].mxu0 %v10896_v12  ;;  %8327 = vmatprep.subr.bf16.mxu1 %v10400_v3  ;;  %v12387_v12 = vld [vmem:[#allocation5_spill] sm:$0xff] }
 0x6de   :  { %6876 = vmatprep.mubr.msk.f32.mxu0 %vm2204_vm6, %v10902_v11  ;;  %8301 = vmatpush1.bf16.msra.mxu0 %v10304_v27  ;;  %v12388_v3 = vld [vmem:[#allocation49_spill] sm:$0xff]  ;;  %v12389_v11 = vld [vmem:[#allocation22_spill] sm:$0xff] }
 0x6df   :  { %5143 = vmatmul.mubr.f32.vlgmr.msra.gmra.mrb[138].mxu1 %v12381_v2  ;;  %8303 = vmatprep.subr.bf16.mxu0 %v12382_v63  ;;  %v12390_v27 = vld [vmem:[#allocation54_spill] sm:$0xff]  ;;  %v6908_v63 = vld [vmem:[%s12106_s8 + $0x428] sm:$0xff] }
 0x6e0   :  { %6882 = vmatprep.mubr.msk.f32.mxu1 %vm2204_vm6, %v12383_v20  ;;  %8329 = vmatpush1.bf16.msra.mxu1 %v12384_v30  ;;  %v6907_v2 = vld [vmem:[%s12106_s8 + $0x420] sm:$0xff] }
 0x6e1   :  { %4940 = vmatmul.mubr.f32.gmra.mrb[132].mxu0 %v12385_v44  ;;  %8331 = vmatprep.subr.bf16.mxu1 %v12386_v5  ;;  %v6919_v20 = vld [vmem:[%s12106_s8 + $0x480] sm:$0xff]  ;;  %v11495_v30 = vpack.c.bf16 %v6908_v63, %v6907_v2  ;;  %v6920_v44 = vld [vmem:[%s12106_s8 + $0x488] sm:$0xff] }
 0x6e2   :  { %6877 = vmatprep.mubr.msk.f32.mxu0 %vm2204_vm6, %v12387_v12  ;;  %8305 = vmatpush1.bf16.msra.mxu0 %v12388_v3  ;;  %v11501_v5 = vpack.c.bf16 %v6920_v44, %v6919_v20  ;;  %v6891_v12 = vld [vmem:[%s12106_s8 + $0x3a0] sm:$0xff]  ;;  %v6892_v3 = vld [vmem:[%s12106_s8 + $0x3a8] sm:$0xff] }
 0x6e3   :  { %5148 = vmatmul.mubr.f32.gmra.mrb[140].mxu1 %v12389_v11  ;;  %8308 = vmatprep.subr.msk.bf16.mxu0 %vm8730_vm3, %v12390_v27  ;;  %v11513_v27 = vpack.c.bf16 %v6892_v3, %v6891_v12  ;;  %v6917_v12 = vld [vmem:[%s12106_s8 + $0x470] sm:$0xff]  ;;  %v6918_v3 = vld [vmem:[%s12106_s8 + $0x478] sm:$0xff] }
 0x6e4   :  { %6883 = vmatprep.mubr.msk.f32.mxu1 %vm2204_vm6, %v12392_v25  ;;  %8333 = vmatpush1.bf16.msra.mxu1 %v12393_v8  ;;  %v6909_v25 = vld [vmem:[%s12106_s8 + $0x430] sm:$0xff]  ;;  %v6910_v8 = vld [vmem:[%s12106_s8 + $0x438] sm:$0xff] }
 0x6e5   :  { %4945 = vmatmul.mubr.f32.gmra.mrb[134].mxu0 %v12394_v13  ;;  %8336 = vmatprep.subr.msk.bf16.mxu1 %vm8730_vm3, %v12395_v1  ;;  %v6921_v13 = vld [vmem:[%s12106_s8 + $0x490] sm:$0xff]  ;;  %v11527_v1 = vpack.c.bf16 %v6910_v8, %v6909_v25 }
 0x6e6   :  { %6878 = vmatprep.mubr.msk.f32.mxu0 %vm2204_vm6, %v12396_v9  ;;  %8311 = vmatpush1.bf16.msk.msra.mxu0 %vm8730_vm3, %v12397_v17  ;;  %v6922_v9 = vld [vmem:[%s12106_s8 + $0x498] sm:$0xff] }
 0x6e7   :  { %5153 = vmatmul.mubr.f32.gmra.mrb[142].mxu1 %v12398_v18  ;;  %8313 = vmatprep.subr.bf16.mxu0 %v12399_v59  ;;  %v11534_v17 = vpack.c.bf16 %v6922_v9, %v6921_v13  ;;  %v6893_v18 = vld [vmem:[%s12106_s8 + $0x3b0] sm:$0xff]  ;;  %v6894_v59 = vld [vmem:[%s12106_s8 + $0x3b8] sm:$0xff]  ;;  %v11653_v13 = vpack.c.bf16 %v6918_v3, %v6917_v12 }
 0x6e8   :  { %6884 = vmatprep.mubr.msk.f32.mxu1 %vm2204_vm6, %v12400_v0  ;;  %8339 = vmatpush1.bf16.msk.msra.mxu1 %vm8730_vm3, %v12401_v58  ;;  %v11545_v58 = vpack.c.bf16 %v6894_v59, %v6893_v18  ;;  %v6930_v9 = vld [vmem:[%s12106_s8 + $0x4d8] sm:$0xff]  ;;  %v6901_v18 = vld [vmem:[%s12106_s8 + $0x3f0] sm:$0xff] }
 0x6e9   :  { %4950 = vmatmul.mubr.f32.gmra.mrb[136].mxu0 %v12402_v15  ;;  %8355 = vmatprep.subr.bf16.mxu1 %v11441_v28 }
 0x6ea   :  { %6879 = vmatprep.mubr.msk.f32.mxu0 %vm2204_vm6, %v12403_v42  ;;  %v6911_v42 = vld [vmem:[%s12106_s8 + $0x440] sm:$0xff] }
 0x6eb   :  { %5158 = vmatmul.mubr.f32.gmra.mrb[144].mxu1 %v12404_v45  ;;  %v6912_v45 = vld [vmem:[%s12106_s8 + $0x448] sm:$0xff] }
 0x6ec   :  { %6885 = vmatprep.mubr.msk.f32.mxu1 %vm2204_vm6, %v12405_v37  ;;  %v6923_v37 = vld [vmem:[%s12106_s8 + $0x4a0] sm:$0xff] }
 0x6ed   :  { %4955 = vmatmul.mubr.f32.gmra.mrb[138].mxu0 %v12406_v14  ;;  %v11559_v14 = vpack.c.bf16 %v6912_v45, %v6911_v42 }
 0x6ee   :  { %6880 = vmatprep.mubr.msk.f32.mxu0 %vm2204_vm6, %v12407_v34  ;;  %v6924_v34 = vld [vmem:[%s12106_s8 + $0x4a8] sm:$0xff] }
 0x6ef   :  { %5163 = vmatmul.mubr.f32.gmra.mrb[146].mxu1 %v12408_v49  ;;  %v11564_v49 = vpack.c.bf16 %v6924_v34, %v6923_v37  ;;  %v6931_v37 = vld [vmem:[%s12106_s8 + $0x4e0] sm:$0xff]  ;;  %v6932_v34 = vld [vmem:[%s12106_s8 + $0x4e8] sm:$0xff] }
 0x6f0   :  { %6886 = vmatprep.mubr.msk.f32.mxu1 %vm2204_vm6, %v12409_v46  ;;  %v6895_v46 = vld [vmem:[%s12106_s8 + $0x3c0] sm:$0xff] }
 0x6f1   :  { %4960 = vmatmul.mubr.f32.gmra.mrb[140].mxu0 %v12410_v29  ;;  %v6896_v29 = vld [vmem:[%s12106_s8 + $0x3c8] sm:$0xff] }
 0x6f2   :  { %5318 = vmatprep.mubr.f32.mxu0 %v12411_v6 }
 0x6f3   :  { %5168 = vmatmul.mubr.f32.gmra.mrb[148].mxu1 %v12412_v21  ;;  %v11575_v21 = vpack.c.bf16 %v6896_v29, %v6895_v46 }
 0x6f4   :  { %5520 = vmatprep.mubr.f32.mxu1 %v12411_v6 }
 0x6f5   :  { %6951 = vmatmul.mubr.msk.f32.vlgmr.msra.gmra.mrb[142].mxu0 %vm69_vm1, %v11351_v57 }
 0x6f6   :  { %8315 = vmatpush1.bf16.msra.mxu0 %v12413_v36  ;;  %5324 = vmatprep.mubr.f32.mxu0 %v12411_v6 }
 0x6f7   :  { %8317 = vmatprep.subr.bf16.mxu0 %v12414_v16  ;;  %6967 = vmatmul.mubr.msk.f32.vlgmr.msra.gmra.mrb[150].mxu1 %vm69_vm1, %v11351_v57  ;;  %v6914_v16 = vld [vmem:[%s12106_s8 + $0x458] sm:$0xff] }
 0x6f8   :  { %5526 = vmatprep.mubr.f32.mxu1 %v12411_v6  ;;  %8357 = vmatpush3.bf16.msra.mxu1 %v11453_v61 }
 0x6f9   :  { %6952 = vmatmul.mubr.msk.f32.gmra.mrb[144].mxu0 %vm69_vm1, %v11362_v33  ;;  %8359 = vmatprep.subr.bf16.mxu1 %v11455_v51 }
 0x6fa   :  { %8319 = vmatpush1.bf16.msra.mxu0 %v12415_v53  ;;  %5330 = vmatprep.mubr.f32.mxu0 %v12411_v6  ;;  %v6925_v53 = vld [vmem:[%s12106_s8 + $0x4b0] sm:$0xff] }
 0x6fb   :  { %8322 = vmatprep.subr.msk.bf16.mxu0 %vm8730_vm3, %v12416_v50  ;;  %6968 = vmatmul.mubr.msk.f32.gmra.mrb[152].mxu1 %vm69_vm1, %v11362_v33 }
 0x6fc   :  { %5532 = vmatprep.mubr.f32.mxu1 %v12411_v6  ;;  %8361 = vmatpush3.bf16.msra.mxu1 %v11483_v38 }
 0x6fd   :  { %6953 = vmatmul.mubr.msk.f32.gmra.mrb[146].mxu0 %vm69_vm1, %v6945_v47  ;;  %8363 = vmatprep.subr.bf16.mxu1 %v11495_v30 }
 0x6fe   :  { %8325 = vmatpush1.bf16.msk.msra.mxu0 %vm8730_vm3, %v12417_v24  ;;  %5336 = vmatprep.mubr.f32.mxu0 %v12411_v6  ;;  %v6926_v24 = vld [vmem:[%s12106_s8 + $0x4b8] sm:$0xff] }
 0x6ff   :  { %8341 = vmatprep.subr.bf16.mxu0 %v12418_v62  ;;  %6969 = vmatmul.mubr.msk.f32.gmra.mrb[154].mxu1 %vm69_vm1, %v6945_v47  ;;  %v11594_v62 = vpack.c.bf16 %v6926_v24, %v6925_v53  ;;  %v6933_v53 = vld [vmem:[%s12106_s8 + $0x4f0] sm:$0xff] }
 0x700   :  { %5538 = vmatprep.mubr.f32.mxu1 %v12411_v6  ;;  %8365 = vmatpush3.bf16.msra.mxu1 %v11513_v27 }
 0x701   :  { %6954 = vmatmul.mubr.msk.f32.gmra.mrb[148].mxu0 %vm69_vm1, %v6946_v55  ;;  %8367 = vmatprep.subr.bf16.mxu1 %v11527_v1 }
 0x702   :  { %5342 = vmatprep.mubr.f32.mxu0 %v12411_v6 }
 0x703   :  { %6970 = vmatmul.mubr.msk.f32.gmra.mrb[156].mxu1 %vm69_vm1, %v6946_v55 }
 0x704   :  { %5544 = vmatprep.mubr.f32.mxu1 %v12411_v6  ;;  %8369 = vmatpush3.bf16.msra.mxu1 %v11545_v58 }
 0x705   :  { %6955 = vmatmul.mubr.msk.f32.gmra.mrb[150].mxu0 %vm69_vm1, %v6947_v23  ;;  %8371 = vmatprep.subr.bf16.mxu1 %v11559_v14 }
 0x706   :  { %5348 = vmatprep.mubr.f32.mxu0 %v12411_v6 }
 0x707   :  { %6971 = vmatmul.mubr.msk.f32.gmra.mrb[158].mxu1 %vm69_vm1, %v6947_v23 }
 0x708   :  { %5550 = vmatprep.mubr.f32.mxu1 %v12411_v6  ;;  %8373 = vmatpush3.bf16.msra.mxu1 %v11575_v21 }
 0x709   :  { %6956 = vmatmul.mubr.msk.f32.gmra.mrb[152].mxu0 %vm69_vm1, %v11404_v43 }
 0x70a   :  { %5419 = vmatprep.mubr.f32.mxu0 %v12411_v6 }
 0x70b   :  { %6972 = vmatmul.mubr.msk.f32.gmra.mrb[160].mxu1 %vm69_vm1, %v11404_v43 }
 0x70d   :  { %6959 = vmatmul.mubr.msk.f32.vlgmr.msra.gmra.mrb[154].mxu0 %vm69_vm1, %v11351_v57 }
 0x70e   :  { %8343 = vmatpush1.bf16.msra.mxu0 %v12419_v54  ;;  %5425 = vmatprep.mubr.f32.mxu0 %v12411_v6 }
 0x70f   :  { %8345 = vmatprep.subr.bf16.mxu0 %v12420_v60 }
 0x711   :  { %6960 = vmatmul.mubr.msk.f32.gmra.mrb[156].mxu0 %vm69_vm1, %v11362_v33 }
 0x712   :  { %8347 = vmatpush1.bf16.msra.mxu0 %v12421_v48  ;;  %5431 = vmatprep.mubr.f32.mxu0 %v12411_v6 }
 0x713   :  { %8350 = vmatprep.subr.msk.bf16.mxu0 %vm8730_vm3, %v12422_v19 }
 0x715   :  { %6961 = vmatmul.mubr.msk.f32.gmra.mrb[158].mxu0 %vm69_vm1, %v6945_v47 }
 0x716   :  { %8353 = vmatpush1.bf16.msk.msra.mxu0 %vm8730_vm3, %v12423_v41  ;;  %5437 = vmatprep.mubr.f32.mxu0 %v12411_v6  ;;  %v6915_v41 = vld [vmem:[%s12106_s8 + $0x460] sm:$0xff] }
 0x717   :  { %8386 = vmatprep.subr.bf16.mxu0 %v12360_v35  ;;  %v11622_v52 = vpack.c.bf16 %v6916_v7, %v6915_v41 }
 0x719   :  { %6962 = vmatmul.mubr.msk.f32.gmra.mrb[160].mxu0 %vm69_vm1, %v6946_v55 }
 0x71a   :  { %5443 = vmatprep.mubr.f32.mxu0 %v12411_v6 }
 0x71d   :  { %6963 = vmatmul.mubr.msk.f32.gmra.mrb[162].mxu0 %vm69_vm1, %v6947_v23 }
 0x71e   :  { %5449 = vmatprep.mubr.f32.mxu0 %v12411_v6 }
 0x721   :  { %6964 = vmatmul.mubr.msk.f32.gmra.mrb[164].mxu0 %vm69_vm1, %v11404_v43 }
 0x722   :  { %5621 = vmatprep.mubr.f32.mxu0 %v12411_v6 }
 0x725   :  { %6975 = vmatmul.mubr.msk.f32.vlgmr.msra.gmra.mrb[166].mxu0 %vm69_vm1, %v11351_v57 }
 0x726   :  { %5627 = vmatprep.mubr.f32.mxu0 %v12411_v6  ;;  %8388 = vmatpush1.bf16.msra.mxu0 %v11501_v5 }
 0x727   :  { %8389 = vmatprep.subr.bf16.mxu0 %v12360_v35 }
 0x729   :  { %6976 = vmatmul.mubr.msk.f32.gmra.mrb[168].mxu0 %vm69_vm1, %v11362_v33  ;;  %v6913_v33 = vld [vmem:[%s12106_s8 + $0x450] sm:$0xff] }
 0x72a   :  { %5633 = vmatprep.mubr.f32.mxu0 %v12411_v6  ;;  %8391 = vmatpush1.bf16.msra.mxu0 %v11534_v17  ;;  %v11589_v50 = vpack.c.bf16 %v6914_v16, %v6913_v33 }
 0x72b   :  { %8392 = vmatprep.subr.bf16.mxu0 %v12360_v35 }
 0x72c   :  { %8375 = vmatprep.subr.bf16.mxu1 %v11589_v50 }
 0x72d   :  { %6977 = vmatmul.mubr.msk.f32.gmra.mrb[170].mxu0 %vm69_vm1, %v6945_v47 }
 0x72e   :  { %5639 = vmatprep.mubr.f32.mxu0 %v12411_v6  ;;  %8394 = vmatpush1.bf16.msra.mxu0 %v11564_v49 }
 0x72f   :  { %8395 = vmatprep.subr.bf16.mxu0 %v12360_v35 }
 0x730   :  { %v11480_v31 = vpop.f32.mrb[102].mxu1 }
 0x731   :  { %6978 = vmatmul.mubr.msk.f32.gmra.mrb[172].mxu0 %vm69_vm1, %v6946_v55  ;;  %v4522_v39 = vpop.f32.mrb[103].mxu1 }
 0x732   :  { %5645 = vmatprep.mubr.f32.mxu0 %v12411_v6  ;;  %8397 = vmatpush1.bf16.msra.mxu0 %v11594_v62  ;;  %v6899_v39 = vld [vmem:[%s12106_s8 + $0x3e0] sm:$0xff] }
 0x733   :  { %8398 = vmatprep.subr.bf16.mxu0 %v12360_v35 }
 0x734   :  { %v11509_v11 = vpop.f32.mrb[104].mxu1 }
 0x735   :  { %6979 = vmatmul.mubr.msk.f32.gmra.mrb[174].mxu0 %vm69_vm1, %v6947_v23  ;;  %v4527_v40 = vpop.f32.mrb[105].mxu1  ;;  %v6897_v23 = vld [vmem:[%s12106_s8 + $0x3d0] sm:$0xff] }
 0x736   :  { %5651 = vmatprep.mubr.f32.mxu0 %v12411_v6  ;;  %8400 = vmatpush1.bf16.msra.mxu0 %v11627_v22  ;;  %v6929_v40 = vld [vmem:[%s12106_s8 + $0x4d0] sm:$0xff] }
 0x737   :  { %8401 = vmatprep.subr.bf16.mxu0 %v12360_v35 }
 0x738   :  { %v11542_v0 = vpop.f32.mrb[106].mxu1 }
 0x739   :  { %6980 = vmatmul.mubr.msk.f32.gmra.mrb[176].mxu0 %vm69_vm1, %v11404_v43  ;;  %v4532_v15 = vpop.f32.mrb[107].mxu1  ;;  %v6898_v43 = vld [vmem:[%s12106_s8 + $0x3d8] sm:$0xff] }
 0x73a   :  { %v11605_v48 = vpack.c.bf16 %v6898_v43, %v6897_v23  ;;  %v11664_v15 = vpack.c.bf16 %v6930_v9, %v6929_v40  ;;  %v6935_v43 = vld [vmem:[%s12106_s8 + $0x500] sm:$0xff] }
 0x73c   :  { %v11572_v57 = vpop.f32.mrb[108].mxu1  ;;  %8377 = vmatpush3.bf16.msra.mxu1 %v11605_v48  ;;  %8403 = vmatpush1.bf16.msra.mxu0 %v11664_v15 }
 0x73d   :  { %v4537_v36 = vpop.f32.mrb[109].mxu1  ;;  %8379 = vmatprep.subr.bf16.mxu1 %v11622_v52  ;;  %8404 = vmatprep.subr.bf16.mxu0 %v12360_v35 }
 0x73e   :  { %v11681_v36 = vpack.c.bf16 %v6932_v34, %v6931_v37 }
 0x740   :  { %v7172_v47 = vpop.f32.mrb[94].mxu0  ;;  %v11602_v60 = vpop.f32.mrb[110].mxu1  ;;  %8406 = vmatpush1.bf16.msra.mxu0 %v11681_v36 }
 0x741   :  { %v7173_v55 = vpop.f32.mrb[95].mxu0  ;;  %v4542_v19 = vpop.f32.mrb[111].mxu1  ;;  %8407 = vmatprep.subr.bf16.mxu0 %v12360_v35 }
 0x742   :  { %v7174_v54 = vadd.f32 %v7173_v55, %v7172_v47 }
 0x744   :  { %v11618_v10 = vadd.f32 %v7174_v54, %v11480_v31  ;;  %v7175_v26 = vpop.f32.mrb[96].mxu0  ;;  %v6900_v31 = vld [vmem:[%s12106_s8 + $0x3e8] sm:$0xff]  ;;  %v4545_v63 = vpop.f32.mrb[112].mxu1 }
 0x745   :  { %v7176_v56 = vpop.f32.mrb[97].mxu0  ;;  %v11636_v20 = vpack.c.bf16 %v6900_v31, %v6899_v39  ;;  %v4547_v44 = vpop.f32.mrb[113].mxu1  ;;  %v6936_v54 = vld [vmem:[%s12106_s8 + $0x508] sm:$0xff]  ;;  %v6939_v39 = vld [vmem:[%s12106_s8 + $0x520] sm:$0xff] }
 0x746   :  { %v7177_v2 = vadd.f32 %v7176_v56, %v7175_v26  ;;  %v11708_v41 = vpack.c.bf16 %v6936_v54, %v6935_v43  ;;  %v6937_v26 = vld [vmem:[%s12106_s8 + $0x510] sm:$0xff]  ;;  %v6940_v31 = vld [vmem:[%s12106_s8 + $0x528] sm:$0xff]  ;;  %v6942_v44 = vld [vmem:[%s12106_s8 + $0x538] sm:$0xff] }
 0x747   :  { %8381 = vmatpush3.bf16.msra.mxu1 %v11636_v20 }
 0x748   :  { %v11649_v25 = vadd.f32 %v7177_v2, %v11509_v11  ;;  %v7178_v8 = vpop.f32.mrb[98].mxu0  ;;  %v6902_v11 = vld [vmem:[%s12106_s8 + $0x3f8] sm:$0xff]  ;;  %8383 = vmatprep.subr.bf16.mxu1 %v11653_v13  ;;  %v11730_v2 = vpack.c.bf16 %v6940_v31, %v6939_v39 }
 0x749   :  { %v7179_v59 = vpop.f32.mrb[99].mxu0  ;;  %v11666_v42 = vpack.c.bf16 %v6902_v11, %v6901_v18 }
 0x74a   :  { %v7180_v45 = vadd.f32 %v7179_v59, %v7178_v8 }
 0x74b   :  { %8385 = vmatpush3.bf16.msra.mxu1 %v11666_v42 }
 0x74c   :  { %v11677_v46 = vadd.f32 %v7180_v45, %v11542_v0  ;;  %v7181_v29 = vpop.f32.mrb[100].mxu0  ;;  %8423 = vmatprep.subr.bf16.mxu1 %v11441_v28  ;;  %v6934_v0 = vld [vmem:[%s12106_s8 + $0x4f8] sm:$0xff] }
 0x74d   :  { %v7182_v33 = vpop.f32.mrb[101].mxu0  ;;  %v11695_v55 = vpack.c.bf16 %v6934_v0, %v6933_v53 }
 0x74e   :  { %v7183_v16 = vadd.f32 %v7182_v33, %v7181_v29 }
 0x74f   :  { %8409 = vmatpush1.bf16.msra.mxu0 %v11695_v55 }
 0x750   :  { %v11692_v47 = vadd.f32 %v7183_v16, %v11572_v57  ;;  %v7184_v24 = vpop.f32.mrb[102].mxu0  ;;  %8410 = vmatprep.subr.bf16.mxu0 %v12360_v35 }
 0x751   :  { %v7185_v28 = vpop.f32.mrb[103].mxu0 }
 0x752   :  { %v7186_v23 = vadd.f32 %v7185_v28, %v7184_v24 }
 0x753   :  { %8412 = vmatpush1.bf16.msra.mxu0 %v11708_v41 }
 0x754   :  { %v11705_v57 = vadd.f32 %v7186_v23, %v11602_v60  ;;  %v7187_v19 = vpop.f32.mrb[104].mxu0  ;;  %8413 = vmatprep.subr.bf16.mxu0 %v12360_v35  ;;  %v11720_v60 = vpack.c.bf16 %v6938_v32, %v6937_v26 }
 0x755   :  { %v7188_v7 = vpop.f32.mrb[105].mxu0 }
 0x756   :  { %v7189_v4 = vadd.f32 %v7188_v7, %v7187_v19 }
 0x757   :  { %8415 = vmatpush1.bf16.msra.mxu0 %v11720_v60 }
 0x758   :  { %v11717_v56 = vadd.f32 %v7189_v4, %v4545_v63  ;;  %8416 = vmatprep.subr.bf16.mxu0 %v12360_v35  ;;  %v6941_v63 = vld [vmem:[%s12106_s8 + $0x530] sm:$0xff] }
 0x759   :  { %v11740_v3 = vpack.c.bf16 %v6942_v44, %v6941_v63 }
 0x75b   :  { %8418 = vmatpush1.bf16.msra.mxu0 %v11730_v2 }
 0x75c   :  { %8419 = vmatprep.subr.bf16.mxu0 %v12360_v35 }
 0x75f   :  { %8421 = vmatpush1.bf16.msra.mxu0 %v11740_v3 }
 0x760   :  { %v7222_v12 = vpop.f32.mrb[106].mxu0  ;;  %v4728_v9 = vpop.f32.mrb[114].mxu1  ;;  %8454 = vmatprep.subr.bf16.mxu0 %v12360_v35 }
 0x761   :  { %v7223_v40 = vpop.f32.mrb[107].mxu0  ;;  %v4730_v18 = vpop.f32.mrb[115].mxu1 }
 0x762   :  { %v7224_v8 = vadd.f32 %v7223_v40, %v7222_v12 }
 0x764   :  { %v4729_v11 = vadd.f32 %v7224_v8, %v4728_v9  ;;  %v7225_v59 = vpop.f32.mrb[108].mxu0  ;;  %v4733_v34 = vpop.f32.mrb[116].mxu1 }
 0x765   :  { %v7226_v45 = vpop.f32.mrb[109].mxu0  ;;  %v4735_v29 = vpop.f32.mrb[117].mxu1 }
 0x766   :  { %v7227_v37 = vadd.f32 %v7226_v45, %v7225_v59 }
 0x768   :  { %v4734_v33 = vadd.f32 %v7227_v37, %v4733_v34  ;;  %v7228_v16 = vpop.f32.mrb[110].mxu0  ;;  %v4738_v24 = vpop.f32.mrb[118].mxu1 }
 0x769   :  { %v7229_v53 = vpop.f32.mrb[111].mxu0  ;;  %v4740_v28 = vpop.f32.mrb[119].mxu1 }
 0x76a   :  { %v7230_v0 = vadd.f32 %v7229_v53, %v7228_v16 }
 0x76c   :  { %v4739_v23 = vadd.f32 %v7230_v0, %v4738_v24  ;;  %v7231_v43 = vpop.f32.mrb[112].mxu0  ;;  %v4743_v7 = vpop.f32.mrb[120].mxu1 }
 0x76d   :  { %v7232_v54 = vpop.f32.mrb[113].mxu0  ;;  %v4745_v4 = vpop.f32.mrb[121].mxu1 }
 0x76e   :  { %v7233_v19 = vadd.f32 %v7232_v54, %v7231_v43 }
 0x770   :  { %v4744_v26 = vadd.f32 %v7233_v19, %v4743_v7  ;;  %v7234_v32 = vpop.f32.mrb[114].mxu0  ;;  %v4748_v63 = vpop.f32.mrb[122].mxu1 }
 0x771   :  { %v7235_v39 = vpop.f32.mrb[115].mxu0  ;;  %v4750_v44 = vpop.f32.mrb[123].mxu1 }
 0x772   :  { %v7236_v31 = vadd.f32 %v7235_v39, %v7234_v32 }
 0x774   :  { %v4749_v12 = vadd.f32 %v7236_v31, %v4748_v63  ;;  %v7237_v40 = vpop.f32.mrb[116].mxu0  ;;  %v4753_v18 = vpop.f32.mrb[124].mxu1 }
 0x775   :  { %v7238_v8 = vpop.f32.mrb[117].mxu0  ;;  %v4755_v59 = vpop.f32.mrb[125].mxu1 }
 0x776   :  { %v7239_v9 = vadd.f32 %v7238_v8, %v7237_v40 }
 0x778   :  { %v4754_v45 = vadd.f32 %v7239_v9, %v4753_v18 }
 0x780   :  { %v7272_v37 = vpop.f32.mrb[118].mxu0 }
 0x781   :  { %v7273_v34 = vpop.f32.mrb[119].mxu0 }
 0x782   :  { %v7274_v29 = vadd.f32 %v7273_v34, %v7272_v37  ;;  %v7322_v16 = vpop.f32.mrb[126].mxu1 }
 0x783   :  { %v7323_v53 = vpop.f32.mrb[127].mxu1 }
 0x784   :  { %v7324_v0 = vadd.f32 %v7323_v53, %v7322_v16  ;;  %v7275_v24 = vpop.f32.mrb[120].mxu0  ;;  %v4842_v28 = vadd.f32 %v7274_v29, %v11618_v10 }
 0x785   :  { %v7276_v43 = vpop.f32.mrb[121].mxu0 }
 0x786   :  { %v7277_v54 = vadd.f32 %v7276_v43, %v7275_v24  ;;  %v7325_v19 = vpop.f32.mrb[128].mxu1  ;;  %v5050_v7 = vadd.f32 %v7324_v0, %v4729_v11 }
 0x787   :  { %v7326_v4 = vpop.f32.mrb[129].mxu1 }
 0x788   :  { %v7327_v32 = vadd.f32 %v7326_v4, %v7325_v19  ;;  %v7278_v39 = vpop.f32.mrb[122].mxu0  ;;  %v4847_v31 = vadd.f32 %v7277_v54, %v11649_v25 }
 0x789   :  { %v7279_v63 = vpop.f32.mrb[123].mxu0 }
 0x78a   :  { %v7280_v44 = vadd.f32 %v7279_v63, %v7278_v39  ;;  %v7328_v40 = vpop.f32.mrb[130].mxu1  ;;  %v5055_v8 = vadd.f32 %v7327_v32, %v4734_v33 }
 0x78b   :  { %v7329_v9 = vpop.f32.mrb[131].mxu1 }
 0x78c   :  { %v7330_v18 = vadd.f32 %v7329_v9, %v7328_v40  ;;  %v7281_v59 = vpop.f32.mrb[124].mxu0  ;;  %v4852_v37 = vadd.f32 %v7280_v44, %v11677_v46 }
 0x78d   :  { %v7282_v34 = vpop.f32.mrb[125].mxu0 }
 0x78e   :  { %v7283_v10 = vadd.f32 %v7282_v34, %v7281_v59  ;;  %v7331_v29 = vpop.f32.mrb[132].mxu1  ;;  %v5060_v16 = vadd.f32 %v7330_v18, %v4739_v23 }
 0x78f   :  { %v7332_v53 = vpop.f32.mrb[133].mxu1 }
 0x790   :  { %v7333_v11 = vadd.f32 %v7332_v53, %v7331_v29  ;;  %v7284_v0 = vpop.f32.mrb[126].mxu0  ;;  %v4857_v24 = vadd.f32 %v7283_v10, %v11692_v47 }
 0x791   :  { %v7285_v43 = vpop.f32.mrb[127].mxu0 }
 0x792   :  { %v7286_v25 = vadd.f32 %v7285_v43, %v7284_v0  ;;  %v7334_v54 = vpop.f32.mrb[134].mxu1  ;;  %v5065_v19 = vadd.f32 %v7333_v11, %v4744_v26 }
 0x793   :  { %v7335_v4 = vpop.f32.mrb[135].mxu1 }
 0x794   :  { %v7336_v33 = vadd.f32 %v7335_v4, %v7334_v54  ;;  %v7287_v32 = vpop.f32.mrb[128].mxu0  ;;  %v4862_v39 = vadd.f32 %v7286_v25, %v11705_v57 }
 0x795   :  { %v7288_v63 = vpop.f32.mrb[129].mxu0 }
 0x796   :  { %v7289_v46 = vadd.f32 %v7288_v63, %v7287_v32  ;;  %v7337_v44 = vpop.f32.mrb[136].mxu1  ;;  %v5070_v40 = vadd.f32 %v7336_v33, %v4749_v12 }
 0x797   :  { %v7338_v9 = vpop.f32.mrb[137].mxu1 }
 0x798   :  { %v7339_v23 = vadd.f32 %v7338_v9, %v7337_v44  ;;  %v4867_v18 = vadd.f32 %v7289_v46, %v11717_v56 }
 0x79a   :  { %v5075_v59 = vadd.f32 %v7339_v23, %v4754_v45 }
 0x7b0   :  { %v4936_v34 = vpop.f32.mrb[130].mxu0 }
 0x7b1   :  { %v11750_v47 = vadd.f32 %v4936_v34, %v4842_v28  ;;  %v4938_v10 = vpop.f32.mrb[131].mxu0 }
 0x7b2   :  { %v5144_v29 = vpop.f32.mrb[138].mxu1 }
 0x7b3   :  { %v11752_v26 = vadd.f32 %v5144_v29, %v5050_v7  ;;  %v5146_v53 = vpop.f32.mrb[139].mxu1 }
 0x7b4   :  { %v4941_v11 = vpop.f32.mrb[132].mxu0 }
 0x7b5   :  { %v11754_v0 = vadd.f32 %v4941_v11, %v4847_v31  ;;  %v4943_v57 = vpop.f32.mrb[133].mxu0 }
 0x7b6   :  { %v5149_v43 = vpop.f32.mrb[140].mxu1 }
 0x7b7   :  { %v11756_v25 = vadd.f32 %v5149_v43, %v5055_v8  ;;  %v5151_v12 = vpop.f32.mrb[141].mxu1 }
 0x7b8   :  { %v4946_v54 = vpop.f32.mrb[134].mxu0 }
 0x7b9   :  { %v11758_v4 = vadd.f32 %v4946_v54, %v4852_v37  ;;  %v4948_v56 = vpop.f32.mrb[135].mxu0 }
 0x7ba   :  { %v5154_v45 = vpop.f32.mrb[142].mxu1 }
 0x7bb   :  { %v11760_v28 = vadd.f32 %v5154_v45, %v5060_v16  ;;  %v5156_v33 = vpop.f32.mrb[143].mxu1 }
 0x7bc   :  { %v4951_v32 = vpop.f32.mrb[136].mxu0 }
 0x7bd   :  { %v11762_v7 = vadd.f32 %v4951_v32, %v4857_v24  ;;  %v4953_v63 = vpop.f32.mrb[137].mxu0 }
 0x7be   :  { %v5159_v46 = vpop.f32.mrb[144].mxu1 }
 0x7bf   :  { %v11764_v31 = vadd.f32 %v5159_v46, %v5065_v19  ;;  %v5161_v44 = vpop.f32.mrb[145].mxu1 }
 0x7c0   :  { %v4956_v9 = vpop.f32.mrb[138].mxu0 }
 0x7c1   :  { %v11766_v8 = vadd.f32 %v4956_v9, %v4862_v39  ;;  %v4958_v23 = vpop.f32.mrb[139].mxu0 }
 0x7c2   :  { %v5164_v34 = vpop.f32.mrb[146].mxu1 }
 0x7c3   :  { %v11768_v37 = vadd.f32 %v5164_v34, %v5070_v40  ;;  %v5166_v10 = vpop.f32.mrb[147].mxu1 }
 0x7c4   :  { %v4961_v29 = vpop.f32.mrb[140].mxu0 }
 0x7c5   :  { %v11770_v16 = vadd.f32 %v4961_v29, %v4867_v18  ;;  %v4963_v53 = vpop.f32.mrb[141].mxu0 }
 0x7c6   :  { %v5169_v11 = vpop.f32.mrb[148].mxu1 }
 0x7c7   :  { %v11772_v24 = vadd.f32 %v5169_v11, %v5075_v59  ;;  %v5171_v57 = vpop.f32.mrb[149].mxu1 }
 0x7c8   :  { %v5320_v43 = vpop.f32.mrb[142].mxu0 }
 0x7c9   :  { %v5322_v19 = vpop.f32.mrb[143].mxu0 }
 0x7ca   :  { %5740 = vmatprep.mubr.f32.mxu1 %v5322_v19  ;;  %v11774_v12 = vpop.f32.mrb[150].mxu1 }
 0x7cb   :  { %5741 = vmatmul.mubr.f32.vlgmr.msra.gmra.mrb[162].mxu1 %v5320_v43  ;;  %v5524_v39 = vpop.f32.mrb[151].mxu1 }
 0x7cc   :  { %v5326_v54 = vpop.f32.mrb[144].mxu0  ;;  %8425 = vmatpush3.bf16.msra.mxu1 %v11453_v61 }
 0x7cd   :  { %v5328_v40 = vpop.f32.mrb[145].mxu0  ;;  %8427 = vmatprep.subr.bf16.mxu1 %v11455_v51 }
 0x7ce   :  { %5745 = vmatprep.mubr.f32.mxu1 %v5328_v40  ;;  %v11778_v18 = vpop.f32.mrb[152].mxu1  ;;  %v6208_v40 = vld [vmem:[%s12107_s12 + $0x28] sm:$0xff] }
 0x7cf   :  { %5746 = vmatmul.mubr.f32.gmra.mrb[164].mxu1 %v5326_v54  ;;  %v5530_v59 = vpop.f32.mrb[153].mxu1  ;;  %v6207_v54 = vld [vmem:[%s12107_s12 + $0x20] sm:$0xff] }
 0x7d0   :  { %v5332_v56 = vpop.f32.mrb[146].mxu0  ;;  %8429 = vmatpush3.bf16.msra.mxu1 %v11483_v38 }
 0x7d1   :  { %v5334_v45 = vpop.f32.mrb[147].mxu0  ;;  %8431 = vmatprep.subr.bf16.mxu1 %v11495_v30 }
 0x7d2   :  { %5750 = vmatprep.mubr.f32.mxu1 %v5334_v45  ;;  %v11782_v33 = vpop.f32.mrb[154].mxu1 }
 0x7d3   :  { %5751 = vmatmul.mubr.f32.gmra.mrb[166].mxu1 %v5332_v56  ;;  %v5536_v32 = vpop.f32.mrb[155].mxu1  ;;  %v11875_v56 = vld [vmem:[%s12107_s12 + $0x30] sm:$0xff] }
 0x7d4   :  { %v5338_v61 = vpop.f32.mrb[148].mxu0  ;;  %8433 = vmatpush3.bf16.msra.mxu1 %v11513_v27 }
 0x7d5   :  { %v5340_v51 = vpop.f32.mrb[149].mxu0  ;;  %8435 = vmatprep.subr.bf16.mxu1 %v11527_v1 }
 0x7d6   :  { %5755 = vmatprep.mubr.f32.mxu1 %v5340_v51  ;;  %v11786_v63 = vpop.f32.mrb[156].mxu1 }
 0x7d7   :  { %5756 = vmatmul.mubr.f32.gmra.mrb[168].mxu1 %v5338_v61  ;;  %v5542_v46 = vpop.f32.mrb[157].mxu1 }
 0x7d8   :  { %v5344_v38 = vpop.f32.mrb[150].mxu0  ;;  %8437 = vmatpush3.bf16.msra.mxu1 %v11545_v58 }
 0x7d9   :  { %v5346_v30 = vpop.f32.mrb[151].mxu0  ;;  %8439 = vmatprep.subr.bf16.mxu1 %v11559_v14 }
 0x7da   :  { %5760 = vmatprep.mubr.f32.mxu1 %v5346_v30  ;;  %v11790_v44 = vpop.f32.mrb[158].mxu1 }
 0x7db   :  { %5761 = vmatmul.mubr.f32.gmra.mrb[170].mxu1 %v5344_v38  ;;  %v5548_v9 = vpop.f32.mrb[159].mxu1 }
 0x7dc   :  { %v5350_v27 = vpop.f32.mrb[152].mxu0  ;;  %8441 = vmatpush3.bf16.msra.mxu1 %v11575_v21 }
 0x7dd   :  { %v5352_v1 = vpop.f32.mrb[153].mxu0  ;;  %8443 = vmatprep.subr.bf16.mxu1 %v11589_v50 }
 0x7de   :  { %5765 = vmatprep.mubr.f32.mxu1 %v5352_v1  ;;  %v5552_v23 = vpop.f32.mrb[160].mxu1 }
 0x7df   :  { %5766 = vmatmul.mubr.f32.gmra.mrb[172].mxu1 %v5350_v27  ;;  %v5554_v34 = vpop.f32.mrb[161].mxu1 }
 0x7e0   :  { %v5421_v10 = vpop.f32.mrb[154].mxu0  ;;  %8445 = vmatpush3.bf16.msra.mxu1 %v11605_v48  ;;  %5948 = vmatprep.mubr.f32.mxu1 %v5524_v39 }
 0x7e1   :  { %v5423_v58 = vpop.f32.mrb[155].mxu0  ;;  %8447 = vmatprep.subr.bf16.mxu1 %v11622_v52 }
 0x7e2   :  { %6981 = vmatprep.mubr.msk.f32.mxu0 %vm2204_vm6, %v5423_v58 }
 0x7e3   :  { %5836 = vmatmul.mubr.f32.vlgmr.msra.gmra.mrb[178].mxu0 %v5421_v10 }
 0x7e4   :  { %8456 = vmatpush1.bf16.msra.mxu0 %v11501_v5  ;;  %v5427_v14 = vpop.f32.mrb[156].mxu0  ;;  %8449 = vmatpush3.bf16.msra.mxu1 %v11636_v20 }
 0x7e5   :  { %v5429_v21 = vpop.f32.mrb[157].mxu0  ;;  %8457 = vmatprep.subr.bf16.mxu0 %v12360_v35  ;;  %8451 = vmatprep.subr.bf16.mxu1 %v11653_v13 }
 0x7e6   :  { %6982 = vmatprep.mubr.msk.f32.mxu0 %vm2204_vm6, %v5429_v21 }
 0x7e7   :  { %5841 = vmatmul.mubr.f32.gmra.mrb[180].mxu0 %v5427_v14 }
 0x7e8   :  { %8459 = vmatpush1.bf16.msra.mxu0 %v11534_v17  ;;  %v5433_v50 = vpop.f32.mrb[158].mxu0  ;;  %8453 = vmatpush3.bf16.msra.mxu1 %v11666_v42 }
 0x7e9   :  { %v5435_v48 = vpop.f32.mrb[159].mxu0  ;;  %8460 = vmatprep.subr.bf16.mxu0 %v12360_v35  ;;  %8490 = vmatprep.subr.bf16.mxu1 %v12360_v35 }
 0x7ea   :  { %6983 = vmatprep.mubr.msk.f32.mxu0 %vm2204_vm6, %v5435_v48 }
 0x7eb   :  { %5846 = vmatmul.mubr.f32.gmra.mrb[182].mxu0 %v5433_v50  ;;  %5949 = vmatmul.mubr.f32.vlgmr.msra.gmra.mrb[174].mxu1 %v11774_v12  ;;  %v6206_v12 = vld [vmem:[%s12107_s12 + $0x18] sm:$0xff] }
 0x7ec   :  { %8462 = vmatpush1.bf16.msra.mxu0 %v11564_v49  ;;  %v5439_v5 = vpop.f32.mrb[160].mxu0  ;;  %5953 = vmatprep.mubr.f32.mxu1 %v5530_v59 }
 0x7ed   :  { %v5441_v52 = vpop.f32.mrb[161].mxu0  ;;  %8463 = vmatprep.subr.bf16.mxu0 %v12360_v35 }
 0x7ee   :  { %6984 = vmatprep.mubr.msk.f32.mxu0 %vm2204_vm6, %v5441_v52 }
 0x7ef   :  { %5851 = vmatmul.mubr.f32.gmra.mrb[184].mxu0 %v5439_v5  ;;  %5954 = vmatmul.mubr.f32.gmra.mrb[176].mxu1 %v11778_v18  ;;  %v11867_v18 = vpack.c.bf16 %v6208_v40, %v6207_v54 }
 0x7f0   :  { %8465 = vmatpush1.bf16.msra.mxu0 %v11594_v62  ;;  %v5445_v17 = vpop.f32.mrb[162].mxu0  ;;  %5958 = vmatprep.mubr.f32.mxu1 %v5536_v32 }
 0x7f1   :  { %v5447_v20 = vpop.f32.mrb[163].mxu0  ;;  %8466 = vmatprep.subr.bf16.mxu0 %v12360_v35 }
 0x7f2   :  { %6985 = vmatprep.mubr.msk.f32.mxu0 %vm2204_vm6, %v5447_v20 }
 0x7f3   :  { %5856 = vmatmul.mubr.f32.gmra.mrb[186].mxu0 %v5445_v17  ;;  %5959 = vmatmul.mubr.f32.gmra.mrb[178].mxu1 %v11782_v33 }
 0x7f4   :  { %8468 = vmatpush1.bf16.msra.mxu0 %v11627_v22  ;;  %v5451_v49 = vpop.f32.mrb[164].mxu0  ;;  %5963 = vmatprep.mubr.f32.mxu1 %v5542_v46 }
 0x7f5   :  { %v5453_v13 = vpop.f32.mrb[165].mxu0  ;;  %8469 = vmatprep.subr.bf16.mxu0 %v12360_v35 }
 0x7f6   :  { %6986 = vmatprep.mubr.msk.f32.mxu0 %vm2204_vm6, %v5453_v13 }
 0x7f7   :  { %5861 = vmatmul.mubr.f32.gmra.mrb[188].mxu0 %v5451_v49  ;;  %5964 = vmatmul.mubr.f32.gmra.mrb[180].mxu1 %v11786_v63 }
 0x7f8   :  { %8471 = vmatpush1.bf16.msra.mxu0 %v11664_v15  ;;  %v5623_v62 = vpop.f32.mrb[166].mxu0  ;;  %5968 = vmatprep.mubr.f32.mxu1 %v5548_v9 }
 0x7f9   :  { %8472 = vmatprep.subr.bf16.mxu0 %v12360_v35  ;;  %v5625_v42 = vpop.f32.mrb[167].mxu0 }
 0x7fa   :  { %6987 = vmatprep.mubr.msk.f32.mxu0 %vm2204_vm6, %v5625_v42 }
 0x7fb   :  { %5969 = vmatmul.mubr.f32.gmra.mrb[182].mxu1 %v11790_v44 }
 0x7fc   :  { %8474 = vmatpush1.bf16.msra.mxu0 %v11681_v36  ;;  %v5629_v22 = vpop.f32.mrb[168].mxu0  ;;  %5973 = vmatprep.mubr.f32.mxu1 %v5554_v34 }
 0x7fd   :  { %8475 = vmatprep.subr.bf16.mxu0 %v12360_v35  ;;  %v5631_v29 = vpop.f32.mrb[169].mxu0 }
 0x7ff   :  { %5974 = vmatmul.mubr.f32.gmra.mrb[184].mxu1 %v5552_v23 }
 0x800   :  { %8477 = vmatpush1.bf16.msra.mxu0 %v11695_v55  ;;  %v5635_v15 = vpop.f32.mrb[170].mxu0  ;;  %7600 = vmatprep.mubr.msk.f32.mxu1 %vm8615_vm8, %v12411_v6 }
 0x801   :  { %8478 = vmatprep.subr.bf16.mxu0 %v12360_v35  ;;  %v5637_v53 = vpop.f32.mrb[171].mxu0 }
 0x804   :  { %8480 = vmatpush1.bf16.msra.mxu0 %v11708_v41  ;;  %v5641_v11 = vpop.f32.mrb[172].mxu0  ;;  %v6203_v41 = vld [vmem:[%s12107_s12] sm:$0xff] }
 0x805   :  { %8481 = vmatprep.subr.bf16.mxu0 %v12360_v35  ;;  %v5643_v57 = vpop.f32.mrb[173].mxu0 }
 0x808   :  { %8483 = vmatpush1.bf16.msra.mxu0 %v11720_v60  ;;  %v5647_v36 = vpop.f32.mrb[174].mxu0  ;;  %v6204_v60 = vld [vmem:[%s12107_s12 + $0x8] sm:$0xff] }
 0x809   :  { %8484 = vmatprep.subr.bf16.mxu0 %v12360_v35  ;;  %v5649_v43 = vpop.f32.mrb[175].mxu0 }
 0x80c   :  { %8486 = vmatpush1.bf16.msra.mxu0 %v11730_v2  ;;  %v5653_v19 = vpop.f32.mrb[176].mxu0  ;;  %v6205_v2 = vld [vmem:[%s12107_s12 + $0x10] sm:$0xff] }
 0x80d   :  { %8487 = vmatprep.subr.bf16.mxu0 %v12360_v35  ;;  %v5655_v55 = vpop.f32.mrb[177].mxu0  ;;  %v11857_v39 = vpack.c.bf16 %v6206_v12, %v6205_v2 }
 0x810   :  { %8489 = vmatpush1.bf16.msra.mxu0 %v11740_v3  ;;  %v11851_v3 = vpack.c.bf16 %v6204_v60, %v6203_v41 }
 0x812   :  { %8492 = vmatpush3.bf16.msra.mxu1 %v11851_v3 }
 0x813   :  { %6044 = vmatmul.mubr.f32.vlgmr.msra.gmra.mrb[190].mxu0 %v5623_v62  ;;  %8493 = vmatprep.subr.bf16.mxu1 %v12360_v35 }
 0x814   :  { %6988 = vmatprep.mubr.msk.f32.mxu0 %vm2204_vm6, %v5631_v29 }
 0x816   :  { %8495 = vmatpush3.bf16.msra.mxu1 %v11857_v39 }
 0x817   :  { %6049 = vmatmul.mubr.f32.gmra.mrb[192].mxu0 %v5629_v22  ;;  %8496 = vmatprep.subr.bf16.mxu1 %v12360_v35 }
 0x818   :  { %6989 = vmatprep.mubr.msk.f32.mxu0 %vm2204_vm6, %v5637_v53 }
 0x81a   :  { %8498 = vmatpush3.bf16.msra.mxu1 %v11867_v18 }
 0x81b   :  { %6054 = vmatmul.mubr.f32.gmra.mrb[194].mxu0 %v5635_v15  ;;  %7598 = vmatprep.subr.mxu1 %v12411_v6 }
 0x81c   :  { %6990 = vmatprep.mubr.msk.f32.mxu0 %vm2204_vm6, %v5643_v57 }
 0x81e   :  { %7599 = vmatpush3.msra.mxu1 %v11875_v56 }
 0x81f   :  { %6059 = vmatmul.mubr.f32.gmra.mrb[196].mxu0 %v5641_v11  ;;  %8499 = vmatprep.subr.bf16.mxu1 %v12360_v35 }
 0x820   :  { %6991 = vmatprep.mubr.msk.f32.mxu0 %vm2204_vm6, %v5649_v43 }
 0x823   :  { %6064 = vmatmul.mubr.f32.gmra.mrb[198].mxu0 %v5647_v36 }
 0x824   :  { %6992 = vmatprep.mubr.msk.f32.mxu0 %vm2204_vm6, %v5655_v55 }
 0x827   :  { %6069 = vmatmul.mubr.f32.gmra.mrb[200].mxu0 %v5653_v19 }
 0x89e   :  { %v7372_v59 = vpop.f32.mrb[162].mxu1 }
 0x89f   :  { %v7373_v45 = vpop.f32.mrb[163].mxu1 }
 0x8a0   :  { %v7374_v33 = vadd.f32 %v7373_v45, %v7372_v59 }
 0x8a2   :  { %v7375_v32 = vpop.f32.mrb[164].mxu1 }
 0x8a3   :  { %v7376_v61 = vpop.f32.mrb[165].mxu1 }
 0x8a4   :  { %v7377_v51 = vadd.f32 %v7376_v61, %v7375_v32 }
 0x8a6   :  { %v7378_v63 = vpop.f32.mrb[166].mxu1 }
 0x8a7   :  { %v7379_v46 = vpop.f32.mrb[167].mxu1 }
 0x8a8   :  { %v7380_v38 = vadd.f32 %v7379_v46, %v7378_v63 }
 0x8aa   :  { %v7381_v30 = vpop.f32.mrb[168].mxu1 }
 0x8ab   :  { %v7382_v44 = vpop.f32.mrb[169].mxu1 }
 0x8ac   :  { %v7383_v9 = vadd.f32 %v7382_v44, %v7381_v30 }
 0x8ae   :  { %v7384_v27 = vpop.f32.mrb[170].mxu1 }
 0x8af   :  { %v7385_v1 = vpop.f32.mrb[171].mxu1 }
 0x8b0   :  { %v7386_v23 = vadd.f32 %v7385_v1, %v7384_v27 }
 0x8b2   :  { %v7387_v34 = vpop.f32.mrb[172].mxu1 }
 0x8b3   :  { %v7388_v10 = vpop.f32.mrb[173].mxu1 }
 0x8b4   :  { %v7389_v58 = vadd.f32 %v7388_v10, %v7387_v34 }
 0x8b6   :  { %v5837_v14 = vpop.f32.mrb[178].mxu0 }
 0x8b7   :  { %v5838_v21 = vadd.f32 %v7374_v33, %v5837_v14  ;;  %v5839_v50 = vpop.f32.mrb[179].mxu0 }
 0x8b9   :  { %v6074_v48 = vadd.f32 %v5838_v21, %v11750_v47 }
 0x8ba   :  { %v5842_v5 = vpop.f32.mrb[180].mxu0 }
 0x8bb   :  { %v5843_v52 = vadd.f32 %v7377_v51, %v5842_v5  ;;  %v5844_v17 = vpop.f32.mrb[181].mxu0 }
 0x8bd   :  { %v6075_v20 = vadd.f32 %v5843_v52, %v11754_v0 }
 0x8be   :  { %v5847_v49 = vpop.f32.mrb[182].mxu0  ;;  %v7422_v13 = vpop.f32.mrb[174].mxu1 }
 0x8bf   :  { %v5848_v62 = vadd.f32 %v7380_v38, %v5847_v49  ;;  %v5849_v42 = vpop.f32.mrb[183].mxu0  ;;  %v7423_v22 = vpop.f32.mrb[175].mxu1 }
 0x8c0   :  { %v7424_v29 = vadd.f32 %v7423_v22, %v7422_v13 }
 0x8c1   :  { %v6076_v15 = vadd.f32 %v5848_v62, %v11758_v4 }
 0x8c2   :  { %v5852_v53 = vpop.f32.mrb[184].mxu0  ;;  %v7425_v11 = vpop.f32.mrb[176].mxu1 }
 0x8c3   :  { %v5853_v57 = vadd.f32 %v7383_v9, %v5852_v53  ;;  %v5854_v36 = vpop.f32.mrb[185].mxu0  ;;  %v7426_v43 = vpop.f32.mrb[177].mxu1 }
 0x8c4   :  { %v7427_v19 = vadd.f32 %v7426_v43, %v7425_v11 }
 0x8c5   :  { %v6077_v47 = vadd.f32 %v5853_v57, %v11762_v7 }
 0x8c6   :  { %v5857_v55 = vpop.f32.mrb[186].mxu0  ;;  %v7428_v41 = vpop.f32.mrb[178].mxu1 }
 0x8c7   :  { %v5858_v60 = vadd.f32 %v7386_v23, %v5857_v55  ;;  %v5859_v0 = vpop.f32.mrb[187].mxu0  ;;  %v7429_v2 = vpop.f32.mrb[179].mxu1 }
 0x8c8   :  { %v7430_v12 = vadd.f32 %v7429_v2, %v7428_v41 }
 0x8c9   :  { %v6078_v54 = vadd.f32 %v5858_v60, %v11766_v8  ;;  %v11892_v8 = vld [vmem:[%s12108_s9] ss:$0 sm:$0xff] }
 0x8ca   :  { %v5862_v40 = vpop.f32.mrb[188].mxu0  ;;  %v7431_v59 = vpop.f32.mrb[180].mxu1  ;;  %v11895_v1 = vadd.f32 %v11892_v8, %v6074_v48  ;;  %v11902_v34 = vadd.f32 %v11892_v8, %v6076_v15  ;;  %v11915_v52 = vadd.f32 %v11892_v8, %v6077_v47 }
 0x8cb   :  { %v5863_v45 = vadd.f32 %v7389_v58, %v5862_v40  ;;  %v5864_v4 = vpop.f32.mrb[189].mxu0  ;;  %v7432_v33 = vpop.f32.mrb[181].mxu1  ;;  %v11926_v22 = vadd.f32 %v11892_v8, %v6078_v54 }
 0x8cc   :  { %v7433_v32 = vadd.f32 %v7432_v33, %v7431_v59  ;;  %v6149_v21 = vmul.f32 %v11895_v1, %v11895_v1  ;;  %v6112_v36 = vsel %vm6105_vm9, %v11902_v34, 0.0  ;;  %v6115_v41 = vsel %vm6105_vm9, %v11915_v52, 0.0 }
 0x8cd   :  { %v6079_v61 = vadd.f32 %v5863_v45, %v11770_v16  ;;  %v11898_v16 = vadd.f32 %v11892_v8, %v6075_v20  ;;  %v6106_v20 = vsel %vm6105_vm9, %v11895_v1, 0.0 }
 0x8ce   :  { %v7434_v51 = vpop.f32.mrb[182].mxu1  ;;  %v6161_v42 = vsel %vm6105_vm9, %v6149_v21, 0.0 }
 0x8cf   :  { %v7435_v63 = vpop.f32.mrb[183].mxu1  ;;  %v6150_v48 = vmul.f32 %v11898_v16, %v11898_v16  ;;  %v11952_v54 = vadd.f32 %v11892_v8, %v6079_v61 }
 0x8d0   :  { %v11885_v46 = vadd.f32 %v7435_v63, %v7434_v51  ;;  %v6118_v63 = vsel %vm6105_vm9, %v11926_v22, 0.0 }
 0x8d1   :  { %v6164_v15 = vsel %vm6105_vm9, %v6150_v48, 0.0 }
 0x8d2   :  { %v7437_v7 = vpop.f32.mrb[184].mxu1 }
 0x8d3   :  { %v7438_v38 = vpop.f32.mrb[185].mxu1 }
 0x8d4   :  { %v11887_v30 = vadd.f32 %v7438_v38, %v7437_v7 }
 0x8e6   :  { %v6045_v44 = vpop.f32.mrb[190].mxu0 }
 0x8e7   :  { %v6046_v9 = vadd.f32 %v7424_v29, %v6045_v44  ;;  %v6047_v27 = vpop.f32.mrb[191].mxu0 }
 0x8e9   :  { %v6080_v23 = vadd.f32 %v6046_v9, %v11752_v26  ;;  %v6151_v26 = vmul.f32 %v11902_v34, %v11902_v34 }
 0x8ea   :  { %v6050_v10 = vpop.f32.mrb[192].mxu0 }
 0x8eb   :  { %v6051_v58 = vadd.f32 %v7427_v19, %v6050_v10  ;;  %v6052_v14 = vpop.f32.mrb[193].mxu0  ;;  %v11907_v50 = vadd.f32 %v11892_v8, %v6080_v23  ;;  %v6167_v43 = vsel %vm6105_vm9, %v6151_v26, 0.0  ;;  %v6152_v19 = vmul.f32 %v11915_v52, %v11915_v52 }
 0x8ed   :  { %v6081_v5 = vadd.f32 %v6051_v58, %v11756_v25  ;;  %v6109_v25 = vsel %vm6105_vm9, %v11898_v16, 0.0  ;;  %v6155_v29 = vmul.f32 %v11907_v50, %v11907_v50  ;;  %v6107_v47 = vsel %vm6105_vm9, %v11907_v50, 0.0 }
 0x8ee   :  { %v6055_v17 = vpop.f32.mrb[194].mxu0  ;;  %v6108_v45 = vadd.f32 %v6107_v47, %v6106_v20 }
 0x8ef   :  { %v11920_v49 = vadd.f32 %v11892_v8, %v6081_v5  ;;  %v6056_v13 = vadd.f32 %v7430_v12, %v6055_v17  ;;  %v6057_v62 = vpop.f32.mrb[195].mxu0  ;;  %v6153_v12 = vmul.f32 %v11926_v22, %v11926_v22  ;;  %v6162_v40 = vsel %vm6105_vm9, %v6155_v29, 0.0 }
 0x8f0   :  { %v6163_v44 = vadd.f32 %v6162_v40, %v6161_v42  ;;  %v6125_v48 = vmul.f32 0.5, %v6108_v45 }
 0x8f1   :  { %v6110_v53 = vsel %vm6105_vm9, %v11920_v49, 0.0  ;;  %v6156_v11 = vmul.f32 %v11920_v49, %v11920_v49  ;;  %v6082_v57 = vadd.f32 %v6056_v13, %v11760_v28  ;;  %v6173_v58 = vsel %vm6105_vm9, %v6153_v12, 0.0 }
 0x8f2   :  { %v6060_v55 = vpop.f32.mrb[196].mxu0  ;;  %v6111_v59 = vadd.f32 %v6110_v53, %v6109_v25  ;;  %v6179_v25 = vmul.f32 0.5, %v6163_v44 }
 0x8f3   :  { %v6165_v60 = vsel %vm6105_vm9, %v6156_v11, 0.0  ;;  %v11947_v0 = vadd.f32 %v11892_v8, %v6082_v57  ;;  %v6061_v28 = vadd.f32 %v7433_v32, %v6060_v55  ;;  %v6062_v2 = vpop.f32.mrb[197].mxu0  ;;  %v6170_v32 = vsel %vm6105_vm9, %v6152_v19, 0.0 }
 0x8f4   :  { %v6166_v7 = vadd.f32 %v6165_v60, %v6164_v15  ;;  %v6126_v14 = vmul.f32 0.5, %v6111_v59  ;;  %v6131_v19 = vsel %vm6105_vm9, %v6125_v48, 0.0  ;;  %v6185_v12 = vsel %vm6105_vm9, %v6179_v25, 0.0 }
 0x8f5   :  { %v6113_v4 = vsel %vm6105_vm9, %v11947_v0, 0.0  ;;  %v6157_v33 = vmul.f32 %v11947_v0, %v11947_v0  ;;  %v6083_v51 = vadd.f32 %v6061_v28, %v11764_v31  ;;  %v6122_v31 = vsel %vm6121_vm10, %v11952_v54, 0.0 }
 0x8f6   :  { %v6114_v61 = vadd.f32 %v6113_v4, %v6112_v36  ;;  %v6065_v38 = vpop.f32.mrb[198].mxu0  ;;  %v6180_v20 = vmul.f32 0.5, %v6166_v7  ;;  %v6132_v57 = vsel %vm6105_vm9, %v6126_v14, 0.0 }
 0x8f7   :  { %v6168_v9 = vsel %vm6105_vm9, %v6157_v33, 0.0  ;;  %v11965_v27 = vadd.f32 %v11892_v8, %v6083_v51  ;;  %v6066_v23 = vadd.f32 %v11885_v46, %v6065_v38  ;;  %v6067_v10 = vpop.f32.mrb[199].mxu0  ;;  %v6154_v46 = vmul.f32 %v11952_v54, %v11952_v54 }
 0x8f8   :  { %v6169_v21 = vadd.f32 %v6168_v9, %v6167_v43  ;;  %v6127_v13 = vmul.f32 0.5, %v6114_v61  ;;  %v6186_v60 = vsel %vm6105_vm9, %v6180_v20, 0.0  ;;  %v6133_v40 = vadd.f32 %v6132_v57, %v6131_v19 }
 0x8f9   :  { %v6116_v5 = vsel %vm6105_vm9, %v11965_v27, 0.0  ;;  %v6158_v26 = vmul.f32 %v11965_v27, %v11965_v27  ;;  %v6084_v17 = vadd.f32 %v6066_v23, %v11768_v37  ;;  %v6176_v23 = vsel %vm6121_vm10, %v6154_v46, 0.0 }
 0x8fa   :  { %v6117_v62 = vadd.f32 %v6116_v5, %v6115_v41  ;;  %v6070_v42 = vpop.f32.mrb[200].mxu0  ;;  %v6181_v36 = vmul.f32 0.5, %v6169_v21 }
 0x8fb   :  { %v6171_v29 = vsel %vm6105_vm9, %v6158_v26, 0.0  ;;  %v11980_v15 = vadd.f32 %v11892_v8, %v6084_v17  ;;  %v6071_v53 = vadd.f32 %v11887_v30, %v6070_v42  ;;  %v6072_v11 = vpop.f32.mrb[201].mxu0  ;;  %v6134_v30 = vsel %vm6105_vm9, %v6127_v13, 0.0 }
 0x8fc   :  { %v6128_v37 = vmul.f32 0.5, %v6117_v62  ;;  %v6172_v43 = vadd.f32 %v6171_v29, %v6170_v32  ;;  %v6188_v4 = vsel %vm6105_vm9, %v6181_v36, 0.0  ;;  %v6187_v32 = vadd.f32 %v6186_v60, %v6185_v12 }
 0x8fd   :  { %v6119_v47 = vsel %vm6105_vm9, %v11980_v15, 0.0  ;;  %v6159_v55 = vmul.f32 %v11980_v15, %v11980_v15  ;;  %v6085_v41 = vadd.f32 %v6071_v53, %v11772_v24  ;;  %v6135_v7 = vadd.f32 %v6134_v30, %v6133_v40  ;;  %v6358_v40 = vld [vmem:[%s12110_s10] sm:$0x1] }
 0x8fe   :  { %v6182_v28 = vmul.f32 0.5, %v6172_v43  ;;  %v6120_v2 = vadd.f32 %v6119_v47, %v6118_v63  ;;  %v6136_v33 = vsel %vm6105_vm9, %v6128_v37, 0.0  ;;  %v6189_v10 = vadd.f32 %v6188_v4, %v6187_v32 }
 0x8ff   :  { %v6174_v59 = vsel %vm6105_vm9, %v6159_v55, 0.0  ;;  %v11995_v45 = vadd.f32 %v11892_v8, %v6085_v41  ;;  %v6137_v14 = vadd.f32 %v6136_v33, %v6135_v7  ;;  %v6362_v33 = vld [vmem:[%s12111_s11] sm:$0x1] }
 0x900   :  { %v6129_v51 = vmul.f32 0.5, %v6120_v2  ;;  %v6175_v24 = vadd.f32 %v6174_v59, %v6173_v58  ;;  %v6190_v38 = vsel %vm6105_vm9, %v6182_v28, 0.0  ;;  %v12424_v7 = vld [vmem:[#allocation30_spill] sm:$0xff] }
 0x901   :  { %v6123_v61 = vsel %vm6121_vm10, %v11995_v45, 0.0  ;;  %v6160_v63 = vmul.f32 %v11995_v45, %v11995_v45  ;;  %v6191_v26 = vadd.f32 %v6190_v38, %v6189_v10 }
 0x902   :  { %v6138_v44 = vsel %vm6105_vm9, %v6129_v51, 0.0  ;;  %v6183_v8 = vmul.f32 0.5, %v6175_v24  ;;  %v6124_v9 = vadd.f32 %v6123_v61, %v6122_v31 }
 0x903   :  { %v6177_v58 = vsel %vm6121_vm10, %v6160_v63, 0.0  ;;  %v6139_v17 = vadd.f32 %v6138_v44, %v6137_v14 }
 0x904   :  { %v6192_v21 = vsel %vm6105_vm9, %v6183_v8, 0.0  ;;  %v6130_v48 = vmul.f32 0.5, %v6124_v9  ;;  %v6178_v5 = vadd.f32 %v6177_v58, %v6176_v23 }
 0x905   :  { %v6193_v62 = vadd.f32 %v6192_v21, %v6191_v26 }
 0x906   :  { %v6140_v20 = vsel %vm6121_vm10, %v6130_v48, 0.0  ;;  %v6184_v13 = vmul.f32 0.5, %v6178_v5 }
 0x907   :  { %v6141_v42 = vadd.f32 %v6140_v20, %v6139_v17 }
 0x908   :  { %v6194_v25 = vsel %vm6121_vm10, %v6184_v13, 0.0 }
 0x909   :  { %v6142_v31 = vrot.slane %v6141_v42, 4  ;;  %v6195_v29 = vadd.f32 %v6194_v25, %v6193_v62 }
 0x90b   :  { %v6143_v46 = vadd.f32 %v6142_v31, %v6141_v42  ;;  %v6196_v53 = vrot.slane %v6195_v29, 4 }
 0x90d   :  { %v6144_v11 = vrot.slane %v6143_v46, 2  ;;  %v6197_v36 = vadd.f32 %v6196_v53, %v6195_v29 }
 0x90f   :  { %v6145_v57 = vadd.f32 %v6144_v11, %v6143_v46  ;;  %v6198_v19 = vrot.slane %v6197_v36, 2 }
 0x911   :  { %v6146_v37 = vrot.slane %v6145_v57, 1  ;;  %v6199_v55 = vadd.f32 %v6198_v19, %v6197_v36 }
 0x913   :  { %v6147_v43 = vadd.f32 %v6146_v37, %v6145_v57  ;;  %v6200_v41 = vrot.slane %v6199_v55, 1 }
 0x915   :  { %v6148_v47 = vmul.f32 0.022222223, %v6147_v43  ;;  %v6201_v60 = vadd.f32 %v6200_v41, %v6199_v55 }
 0x917   :  { %7601 = vmatmul.mubr.msk.f32.vlgmr.msra.gmra.mrb[186].mxu1 %vm6105_vm9, %v6148_v47  ;;  %v6202_v30 = vmul.f32 0.022222223, %v6201_v60 }
 0x918   :  { %8501 = vmatpush3.bf16.msra.mxu1 %v11851_v3  ;;  %7617 = vmatprep.mubr.msk.f32.mxu1 %vm8615_vm8, %v12411_v6  ;;  %v6365_v3 = vld [vmem:[%s12109_s13] sm:$0xff] }
 0x919   :  { %8502 = vmatprep.subr.bf16.mxu1 %v12360_v35 }
 0x91c   :  { %8504 = vmatpush3.bf16.msra.mxu1 %v11857_v39 }
 0x91d   :  { %8505 = vmatprep.subr.bf16.mxu1 %v12360_v35 }
 0x920   :  { %8507 = vmatpush3.bf16.msra.mxu1 %v11867_v18 }
 0x921   :  { %7615 = vmatprep.subr.mxu1 %v12411_v6 }
 0x924   :  { %7616 = vmatpush3.msra.mxu1 %v11875_v56 }
 0x925   :  { %7618 = vmatmul.mubr.msk.f32.vlgmr.msra.gmra.mrb[188].mxu1 %vm6105_vm9, %v6202_v30  ;;  %7620 = vmatprep.subr.mxu1 %v12411_v6 }
 0x926   :  { %7622 = vmatprep.mubr.msk.f32.mxu1 %vm8615_vm8, %v12411_v6  ;;  %7621 = vmatpush3.msra.mxu1 %v6365_v3 }
 0x927   :  { %7625 = vmatprep.subr.mxu1 %v12411_v6 }
 0x9ea   :  { %v6279_v35 = vpop.f32.mrb[186].mxu1 }
 0x9eb   :  { %v7602_v39 = vpop.f32.mrb[187].mxu1  ;;  %v6356_v18 = vmul.f32 %v6279_v35, %v6279_v35 }
 0x9f8   :  { %v6352_v28 = vpop.f32.mrb[188].mxu1 }
 0x9f9   :  { %v6357_v2 = vsub.f32 %v6352_v28, %v6356_v18  ;;  %v7619_v56 = vpop.f32.mrb[189].mxu1 }
 0x9fb   :  { %v6359_v12 = vadd.f32 1e-05, %v6357_v2 }
 0x9fd   :  { %8610 = vrsqrt.f32 %v6359_v12 }
 0xa07   :  { %v8611_v59 = vpop.eup %8610 }
 0xa08   :  { %v6361_v4 = vmul.f32 %v8611_v59, %v6358_v40 }
 0xa0a   :  { %7623 = vmatmul.mubr.msk.f32.vlgmr.msra.gmra.mrb[190].mxu1 %vm6366_vm11, %v6361_v4  ;;  %v6363_v51 = vmul.f32 %v6361_v4, %v6279_v35 }
 0xa0b   :  { %7626 = vmatpush3.msra.mxu1 %v6365_v3  ;;  %7627 = vmatprep.mubr.msk.f32.mxu1 %vm8615_vm8, %v12411_v6 }
 0xa0c   :  { %v6364_v24 = vsub.f32 %v6362_v33, %v6363_v51 }
 0xa0e   :  { %7628 = vmatmul.mubr.msk.f32.vlgmr.msra.gmra.mrb[192].mxu1 %vm6366_vm11, %v6364_v24 }
 0xadd   :  { %v6436_v32 = vpop.f32.mrb[190].mxu1 }
 0xade   :  { %v6516_v61 = vrot.slane %v6436_v32, %v12424_v7  ;;  %v7624_v63 = vpop.f32.mrb[191].mxu1 }
 0xae0   :  { %v6517_v38 = vmul.f32 %v6516_v61, %v11895_v1  ;;  %v6518_v8 = vmul.f32 %v6516_v61, %v11898_v16  ;;  %v6519_v9 = vmul.f32 %v6516_v61, %v11902_v34  ;;  %v6520_v23 = vmul.f32 %v6516_v61, %v11915_v52 }
 0xae1   :  { %v6509_v44 = vpop.f32.mrb[192].mxu1  ;;  %v6521_v10 = vmul.f32 %v6516_v61, %v11926_v22  ;;  %v6522_v6 = vmul.f32 %v6516_v61, %v11952_v54  ;;  %v6523_v58 = vmul.f32 %v6516_v61, %v11907_v50  ;;  %v6524_v21 = vmul.f32 %v6516_v61, %v11920_v49 }
 0xae2   :  { %v7629_v14 = vpop.f32.mrb[193].mxu1  ;;  %v6532_v48 = vrot.slane %v6509_v44, %v12424_v7  ;;  %v6525_v1 = vmul.f32 %v6516_v61, %v11947_v0  ;;  %v6526_v5 = vmul.f32 %v6516_v61, %v11965_v27  ;;  %v6527_v16 = vmul.f32 %v6516_v61, %v11980_v15 }
 0xae3   :  { %v6528_v34 = vmul.f32 %v6516_v61, %v11995_v45 }
 0xae4   :  { %v6533_v52 = vadd.f32 %v6532_v48, %v6517_v38  ;;  %v6534_v26 = vadd.f32 %v6532_v48, %v6518_v8  ;;  %v6535_v22 = vadd.f32 %v6532_v48, %v6519_v9  ;;  %v6536_v17 = vadd.f32 %v6532_v48, %v6520_v23 }
 0xae5   :  { %v6537_v20 = vadd.f32 %v6532_v48, %v6521_v10  ;;  %v6538_v54 = vadd.f32 %v6532_v48, %v6522_v6  ;;  %v6539_v13 = vadd.f32 %v6532_v48, %v6523_v58  ;;  %v6540_v50 = vadd.f32 %v6532_v48, %v6524_v21 }
 0xae6   :  { %v6541_v62 = vadd.f32 %v6532_v48, %v6525_v1  ;;  %v6542_v49 = vadd.f32 %v6532_v48, %v6526_v5  ;;  %v6543_v42 = vadd.f32 %v6532_v48, %v6527_v16  ;;  %v6544_v25 = vadd.f32 %v6532_v48, %v6528_v34 }
 0xae7   :  { %v6545_v31 = vmax.f32 %v6533_v52, 0.0  ;;  %v6546_v0 = vmax.f32 %v6534_v26, 0.0  ;;  %v6547_v29 = vmax.f32 %v6535_v22, 0.0  ;;  %v6548_v27 = vmax.f32 %v6536_v17, 0.0 }
 0xae8   :  { %v6549_v46 = vmax.f32 %v6537_v20, 0.0  ;;  %v6550_v15 = vmax.f32 %v6538_v54, 0.0  ;;  %v6551_v53 = vmax.f32 %v6539_v13, 0.0  ;;  %v6552_v45 = vmax.f32 %v6540_v50, 0.0 }
 0xae9   :  { %v6553_v11 = vmax.f32 %v6541_v62, 0.0  ;;  %v6554_v57 = vmax.f32 %v6542_v49, 0.0  ;;  %v6555_v36 = vmax.f32 %v6543_v42, 0.0  ;;  %v6556_v37 = vmax.f32 %v6544_v25, 0.0  ;;  %6557 = vst.msk [vmem:[%s12112_s14] sm:$0xff] %vm6105_vm9, %v6545_v31  ;;  %6558 = vst.msk [vmem:[%s12112_s14 + $0x8] sm:$0xff] %vm6105_vm9, %v6546_v0 }
 0xaea   :  { %6559 = vst.msk [vmem:[%s12112_s14 + $0x10] sm:$0xff] %vm6105_vm9, %v6547_v29  ;;  %6560 = vst.msk [vmem:[%s12112_s14 + $0x18] sm:$0xff] %vm6105_vm9, %v6548_v27 }
 0xaeb   :  { %6561 = vst.msk [vmem:[%s12112_s14 + $0x20] sm:$0xff] %vm6105_vm9, %v6549_v46  ;;  %6563 = vst.msk [vmem:[%s12112_s14 + $0x30] sm:$0xff] %vm6105_vm9, %v6551_v53 }
 0xaec   :  { %6562 = vst.msk [vmem:[%s12112_s14 + $0x28] sm:$0x1f] %vm6121_vm10, %v6550_v15  ;;  %6568 = vst.msk [vmem:[%s12112_s14 + $0x58] sm:$0x1f] %vm6121_vm10, %v6556_v37 }
 0xaed   :  { %6564 = vst.msk [vmem:[%s12112_s14 + $0x38] sm:$0xff] %vm6105_vm9, %v6552_v45  ;;  %6565 = vst.msk [vmem:[%s12112_s14 + $0x40] sm:$0xff] %vm6105_vm9, %v6553_v11 }
 0xaee   :  { %6566 = vst.msk [vmem:[%s12112_s14 + $0x48] sm:$0xff] %vm6105_vm9, %v6554_v57  ;;  %6567 = vst.msk [vmem:[%s12112_s14 + $0x50] sm:$0xff] %vm6105_vm9, %v6555_v36 }

</bundles_post_ra>
